<compile_context>
chip_gen: v7x
topology: tpu7x:2x2x1
jax: 0.10.0
libtpu: 0.0.40
codegen_flags: <defaults>
</compile_context>

<pallas_src>
import functools

import jax
import jax.numpy as jnp
from jax import lax
from jax.experimental import pallas as pl
from jax.experimental.pallas import tpu as pltpu


LN_EPS = 1e-5
NEG_INF = -1e9


def _layernorm(h, g, b, eps=LN_EPS):
    mu = jnp.mean(h, axis=-1, keepdims=True)
    var = jnp.mean((h - mu) ** 2, axis=-1, keepdims=True)
    return (h - mu) * lax.rsqrt(var + eps) * g + b


# ----------------------------- fused Pallas kernel -----------------------------

def _fused_forward_kernel(
    seq_ref,                                            # scalar prefetch: (B,) int32 in SMEM
    x_ref,                                              # (1, T, input_dim)
    wt_ref, bt_ref, g1_ref, b1_ref, pe_ref, g2_ref, b2_ref,
    wq_ref, wk_ref, wv_ref, bq_ref, bk_ref, bv_ref,     # (NB, H, D, dk) / (NB, H, 1, dk) ...
    wo_ref, bo_ref, lag_ref, lab_ref,
    w1_ref, bf1_ref, w2_ref, bf2_ref, lfg_ref, lfb_ref,
    wout_ref, bout_ref,                                 # (D, n_pad) / (1, n_pad)
    o_ref,                                              # (1, T, n_pad)
    *, n_blocks, n_heads, scale):
    b = pl.program_id(0)
    T = x_ref.shape[1]
    D = wt_ref.shape[1]

    # ---- prologue: transform Linear -> LN1 -> +PE -> LN2 ----
    x = x_ref[0].astype(jnp.bfloat16)
    h = jnp.dot(x, wt_ref[...], preferred_element_type=jnp.float32) + bt_ref[...]
    h = _layernorm(h, g1_ref[...], b1_ref[...])
    h = _layernorm(h + pe_ref[...], g2_ref[...], b2_ref[...])

    # ---- additive key-padding mask built in-kernel from seq_len ----
    # (0.0 for valid key frames, -1e9 for padded key frames; queries are not masked.)
    valid_len = seq_ref[b]
    key_pos = lax.broadcasted_iota(jnp.int32, (T, T), 1)
    mask = jnp.where(key_pos < valid_len, 0.0, NEG_INF).astype(jnp.float32)

    # ---- encoder blocks (static unroll over blocks and heads) ----
    for i in range(n_blocks):
        h_bf = h.astype(jnp.bfloat16)
        attn = jnp.zeros((T, D), jnp.float32)
        for hh in range(n_heads):
            # Per-head weight slabs live at distinct VMEM offsets -> no lane-offset
            # slicing of a fused QKV output and no concatenate of head contexts.
            qh = jnp.dot(h_bf, wq_ref[i, hh], preferred_element_type=jnp.float32) + bq_ref[i, hh]
            kh = jnp.dot(h_bf, wk_ref[i, hh], preferred_element_type=jnp.float32) + bk_ref[i, hh]
            vh = jnp.dot(h_bf, wv_ref[i, hh], preferred_element_type=jnp.float32) + bv_ref[i, hh]
            # q @ k^T via dot_general contracting d_k of both operands (no explicit .T)
            s = lax.dot_general(qh.astype(jnp.bfloat16), kh.astype(jnp.bfloat16),
                                (((1,), (1,)), ((), ())),
                                preferred_element_type=jnp.float32) * scale + mask
            s = s - jnp.max(s, axis=-1, keepdims=True)
            p = jnp.exp(s)
            p = p * pl.reciprocal(jnp.sum(p, axis=-1, keepdims=True), approx=True)
            ctx = jnp.dot(p.astype(jnp.bfloat16), vh.astype(jnp.bfloat16),
                          preferred_element_type=jnp.float32)            # (T, d_v)
            # Fold Wo per head straight into the f32 accumulator.
            attn = attn + jnp.dot(ctx.astype(jnp.bfloat16), wo_ref[i, hh],
                                  preferred_element_type=jnp.float32)
        attn = attn + bo_ref[i]
        h = _layernorm(h + attn, lag_ref[i], lab_ref[i])

        # Position-wise FFN: Linear -> ReLU -> Linear, residual + LayerNorm.
        h_bf = h.astype(jnp.bfloat16)
        ff = jnp.dot(h_bf, w1_ref[i], preferred_element_type=jnp.float32) + bf1_ref[i]
        ff = jnp.maximum(ff, 0.0)
        ff = jnp.dot(ff.astype(jnp.bfloat16), w2_ref[i],
                     preferred_element_type=jnp.float32) + bf2_ref[i]
        h = _layernorm(h + ff, lfg_ref[i], lfb_ref[i])

    # ---- output Linear (lane-padded to 128 cols) + EXACT sigmoid ----
    y = jnp.dot(h.astype(jnp.bfloat16), wout_ref[...],
                preferred_element_type=jnp.float32) + bout_ref[...]
    o_ref[0] = 1.0 / (1.0 + jnp.exp(-y))


# ----------------------------- pallas_call wrapper -----------------------------

def _pinned(a):
    """Full-array block, constant index_map -> stays VMEM-resident across the grid."""
    nd = a.ndim
    return pl.BlockSpec(a.shape, lambda b, seq, nd=nd: (0,) * nd)


def sinusoid_pe(T, D):
    pos = jnp.arange(T, dtype=jnp.float32)[:, None]
    i = jnp.arange(D)[None, :]
    angle = pos / jnp.power(10000.0, (2.0 * (i // 2)) / D)
    return jnp.where(i % 2 == 0, jnp.sin(angle), jnp.cos(angle)).astype(jnp.float32)


@functools.partial(jax.jit, static_argnames=("n_heads", "d_k", "d_v", "n_lang"))
def transformer_e2e_lid(params, x, seq_len, atten_mask, *, n_heads, d_k, d_v, n_lang):
    # TODO(synk): atten_mask is assumed to be the standard key-padding mask derived
    # from seq_len; the fused kernel rebuilds it in-kernel from seq_len (SMEM scalar
    # prefetch) instead of streaming a (B, T, T) f32 mask from HBM.
    del atten_mask
    B, T, In = x.shape
    D = params["transform"]["w"].shape[1]
    NB = params["wq"].shape[0]
    n_pad = params["out_w_pad"].shape[1]
    scale = 1.0 / float(d_k) ** 0.5

    # TODO(synk): reference PositionalEncoding hardcodes features_dim=256; here PE
    # uses feat_dim, and seq_len only influences the attention mask (padded frames
    # are normalized/encoded but cannot be attended to).
    pe = sinusoid_pe(T, D)

    operands = (
        x,
        params["transform"]["w"], params["transform"]["b"],
        params["ln1"]["g"], params["ln1"]["b"],
        pe,
        params["ln2"]["g"], params["ln2"]["b"],
        params["wq"], params["wk"], params["wv"],
        params["bq"], params["bk"], params["bv"],
        params["wo"], params["bo"],
        params["ln_a_g"], params["ln_a_b"],
        params["w1"], params["b1"], params["w2"], params["b2"],
        params["ln_f_g"], params["ln_f_b"],
        params["out_w_pad"], params["out_b_pad"],
    )

    in_specs = [pl.BlockSpec((1, T, In), lambda b, seq: (b, 0, 0))]
    in_specs += [_pinned(a) for a in operands[1:]]
    out_spec = pl.BlockSpec((1, T, n_pad), lambda b, seq: (b, 0, 0))

    # Explicit VMEM budget: pinned weights + per-step activation blocks, x2 for the
    # default double-buffering, plus headroom (well under v7x's 64 MiB physical VMEM).
    weight_bytes = sum(int(a.size) * a.dtype.itemsize for a in operands[1:])
    block_bytes = T * In * x.dtype.itemsize + T * n_pad * 4
    vmem_budget = min(2 * (weight_bytes + block_bytes) + (4 << 20), 100 * 1024 * 1024)

    out = pl.pallas_call(
        functools.partial(_fused_forward_kernel,
                          n_blocks=NB, n_heads=n_heads, scale=scale),
        out_shape=jax.ShapeDtypeStruct((B, T, n_pad), jnp.float32),
        grid_spec=pltpu.PrefetchScalarGridSpec(
            num_scalar_prefetch=1,
            grid=(B,),
            in_specs=in_specs,
            out_specs=out_spec,
        ),
        compiler_params=pltpu.CompilerParams(
            dimension_semantics=("parallel",),
            vmem_limit_bytes=int(vmem_budget),
        ),
    )(seq_len.astype(jnp.int32), *operands)

    return out[:, :, :n_lang]                     # drop lane padding


# ------------------------------ parameter init -------------------------------

def init_params(key, input_dim, feat_dim, d_k, d_v, d_ff, n_heads, n_lang, n_blocks=4):
    keys = iter(jax.random.split(key, 128))

    def w(shape, scale=0.1, dtype=jnp.bfloat16):
        return (scale * jax.random.normal(next(keys), shape, jnp.float32)).astype(dtype)

    def small_b(shape):
        return 0.01 * jax.random.normal(next(keys), shape, jnp.float32)

    def zeros(shape):
        return jnp.zeros(shape, jnp.float32)

    def ones(shape):
        return jnp.ones(shape, jnp.float32)

    n_pad = max(128, -(-n_lang // 128) * 128)     # lane-dense output width
    w_out = 0.1 * jax.random.normal(next(keys), (feat_dim, n_lang), jnp.float32)

    params = {
        "transform": {"w": w((input_dim, feat_dim)), "b": small_b((1, feat_dim))},
        "ln1": {"g": ones((1, feat_dim)), "b": zeros((1, feat_dim))},
        "ln2": {"g": ones((1, feat_dim)), "b": zeros((1, feat_dim))},
        # Attention weights stacked per block (leading axis) and per head (2nd axis).
        "wq": w((n_blocks, n_heads, feat_dim, d_k)),
        "wk": w((n_blocks, n_heads, feat_dim, d_k)),
        "wv": w((n_blocks, n_heads, feat_dim, d_v)),
        "bq": small_b((n_blocks, n_heads, 1, d_k)),
        "bk": small_b((n_blocks, n_heads, 1, d_k)),
        "bv": small_b((n_blocks, n_heads, 1, d_v)),
        "wo": w((n_blocks, n_heads, d_v, feat_dim)),
        "bo": small_b((n_blocks, 1, feat_dim)),
        "ln_a_g": ones((n_blocks, 1, feat_dim)),
        "ln_a_b": zeros((n_blocks, 1, feat_dim)),
        "w1": w((n_blocks, feat_dim, d_ff)),
        "b1": small_b((n_blocks, 1, d_ff)),
        "w2": w((n_blocks, d_ff, feat_dim)),
        "b2": small_b((n_blocks, 1, feat_dim)),
        "ln_f_g": ones((n_blocks, 1, feat_dim)),
        "ln_f_b": zeros((n_blocks, 1, feat_dim)),
        "out_w_pad": jnp.zeros((feat_dim, n_pad), jnp.float32)
                        .at[:, :n_lang].set(w_out).astype(jnp.bfloat16),
        "out_b_pad": zeros((1, n_pad)),
    }
    return params


if __name__ == "__main__":
    B, T = 2, 8
    input_dim, feat_dim = 32, 32
    d_k = d_v = 8
    d_ff = 64
    n_heads = 4
    n_lang = 3

    key = jax.random.PRNGKey(0)
    kx, kp = jax.random.split(key)
    x = jax.random.normal(kx, (B, T, input_dim), jnp.float32)
    seq_len = jnp.array([T, 5], jnp.int32)

    # Additive attention mask kept for API parity with the PyTorch module
    # (the fused kernel rebuilds the identical key-padding mask from seq_len).
    valid = (jnp.arange(T)[None, :] < seq_len[:, None]).astype(jnp.float32)     # (B, T)
    atten_mask = jnp.broadcast_to((1.0 - valid)[:, None, :] * (-1e9), (B, T, T))

    params = init_params(kp, input_dim, feat_dim, d_k, d_v, d_ff, n_heads, n_lang)

    out = transformer_e2e_lid(params, x, seq_len, atten_mask,
                              n_heads=n_heads, d_k=d_k, d_v=d_v, n_lang=n_lang)
    jax.block_until_ready(out)
    assert out.shape == (B, T, n_lang)
    print("KERNEL_OK")
</pallas_src>

<mosaic_0001>
module attributes {stable_mosaic.version = 11 : i64} {
  func.func @_fused_forward_kernel(%arg0: i32, %arg1: memref<2xi32, #tpu.memory_space<smem>>, %arg2: memref<1x8x32xf32, #tpu.memory_space<vmem>>, %arg3: memref<32x32xbf16, #tpu.memory_space<vmem>>, %arg4: memref<1x32xf32, #tpu.memory_space<vmem>>, %arg5: memref<1x32xf32, #tpu.memory_space<vmem>>, %arg6: memref<1x32xf32, #tpu.memory_space<vmem>>, %arg7: memref<8x32xf32, #tpu.memory_space<vmem>>, %arg8: memref<1x32xf32, #tpu.memory_space<vmem>>, %arg9: memref<1x32xf32, #tpu.memory_space<vmem>>, %arg10: memref<4x4x32x8xbf16, #tpu.memory_space<vmem>>, %arg11: memref<4x4x32x8xbf16, #tpu.memory_space<vmem>>, %arg12: memref<4x4x32x8xbf16, #tpu.memory_space<vmem>>, %arg13: memref<4x4x1x8xf32, #tpu.memory_space<vmem>>, %arg14: memref<4x4x1x8xf32, #tpu.memory_space<vmem>>, %arg15: memref<4x4x1x8xf32, #tpu.memory_space<vmem>>, %arg16: memref<4x4x8x32xbf16, #tpu.memory_space<vmem>>, %arg17: memref<4x1x32xf32, #tpu.memory_space<vmem>>, %arg18: memref<4x1x32xf32, #tpu.memory_space<vmem>>, %arg19: memref<4x1x32xf32, #tpu.memory_space<vmem>>, %arg20: memref<4x32x64xbf16, #tpu.memory_space<vmem>>, %arg21: memref<4x1x64xf32, #tpu.memory_space<vmem>>, %arg22: memref<4x64x32xbf16, #tpu.memory_space<vmem>>, %arg23: memref<4x1x32xf32, #tpu.memory_space<vmem>>, %arg24: memref<4x1x32xf32, #tpu.memory_space<vmem>>, %arg25: memref<4x1x32xf32, #tpu.memory_space<vmem>>, %arg26: memref<32x128xbf16, #tpu.memory_space<vmem>>, %arg27: memref<1x128xf32, #tpu.memory_space<vmem>>, %arg28: memref<1x8x128xf32, #tpu.memory_space<vmem>>) attributes {dimension_semantics = [#tpu.dimension_semantics<parallel>], iteration_bounds = array<i64: 2>, scalar_prefetch = 1 : i64, scratch_operands = 0 : i64, tpu.core_type = #tpu.core_type<tc>, window_params = [{transform_indices = @transform_0, window_bounds = array<i64: 1, 8, 32>}, {pipeline_mode = #tpu.pipeline_mode<synchronous>, transform_indices = @transform_1, window_bounds = array<i64: 32, 32>}, {pipeline_mode = #tpu.pipeline_mode<synchronous>, transform_indices = @transform_2, window_bounds = array<i64: 1, 32>}, {pipeline_mode = #tpu.pipeline_mode<synchronous>, transform_indices = @transform_3, window_bounds = array<i64: 1, 32>}, {pipeline_mode = #tpu.pipeline_mode<synchronous>, transform_indices = @transform_4, window_bounds = array<i64: 1, 32>}, {pipeline_mode = #tpu.pipeline_mode<synchronous>, transform_indices = @transform_5, window_bounds = array<i64: 8, 32>}, {pipeline_mode = #tpu.pipeline_mode<synchronous>, transform_indices = @transform_6, window_bounds = array<i64: 1, 32>}, {pipeline_mode = #tpu.pipeline_mode<synchronous>, transform_indices = @transform_7, window_bounds = array<i64: 1, 32>}, {pipeline_mode = #tpu.pipeline_mode<synchronous>, transform_indices = @transform_8, window_bounds = array<i64: 4, 4, 32, 8>}, {pipeline_mode = #tpu.pipeline_mode<synchronous>, transform_indices = @transform_9, window_bounds = array<i64: 4, 4, 32, 8>}, {pipeline_mode = #tpu.pipeline_mode<synchronous>, transform_indices = @transform_10, window_bounds = array<i64: 4, 4, 32, 8>}, {pipeline_mode = #tpu.pipeline_mode<synchronous>, transform_indices = @transform_11, window_bounds = array<i64: 4, 4, 1, 8>}, {pipeline_mode = #tpu.pipeline_mode<synchronous>, transform_indices = @transform_12, window_bounds = array<i64: 4, 4, 1, 8>}, {pipeline_mode = #tpu.pipeline_mode<synchronous>, transform_indices = @transform_13, window_bounds = array<i64: 4, 4, 1, 8>}, {pipeline_mode = #tpu.pipeline_mode<synchronous>, transform_indices = @transform_14, window_bounds = array<i64: 4, 4, 8, 32>}, {pipeline_mode = #tpu.pipeline_mode<synchronous>, transform_indices = @transform_15, window_bounds = array<i64: 4, 1, 32>}, {pipeline_mode = #tpu.pipeline_mode<synchronous>, transform_indices = @transform_16, window_bounds = array<i64: 4, 1, 32>}, {pipeline_mode = #tpu.pipeline_mode<synchronous>, transform_indices = @transform_17, window_bounds = array<i64: 4, 1, 32>}, {pipeline_mode = #tpu.pipeline_mode<synchronous>, transform_indices = @transform_18, window_bounds = array<i64: 4, 32, 64>}, {pipeline_mode = #tpu.pipeline_mode<synchronous>, transform_indices = @transform_19, window_bounds = array<i64: 4, 1, 64>}, {pipeline_mode = #tpu.pipeline_mode<synchronous>, transform_indices = @transform_20, window_bounds = array<i64: 4, 64, 32>}, {pipeline_mode = #tpu.pipeline_mode<synchronous>, transform_indices = @transform_21, window_bounds = array<i64: 4, 1, 32>}, {pipeline_mode = #tpu.pipeline_mode<synchronous>, transform_indices = @transform_22, window_bounds = array<i64: 4, 1, 32>}, {pipeline_mode = #tpu.pipeline_mode<synchronous>, transform_indices = @transform_23, window_bounds = array<i64: 4, 1, 32>}, {pipeline_mode = #tpu.pipeline_mode<synchronous>, transform_indices = @transform_24, window_bounds = array<i64: 32, 128>}, {pipeline_mode = #tpu.pipeline_mode<synchronous>, transform_indices = @transform_25, window_bounds = array<i64: 1, 128>}, {transform_indices = @transform_26, window_bounds = array<i64: 1, 8, 128>}]} {
    %c0 = arith.constant 0 : index
    %c0_0 = arith.constant 0 : index
    %c0_1 = arith.constant 0 : index
    %0 = vector.load %arg2[%c0, %c0_0, %c0_1] : memref<1x8x32xf32, #tpu.memory_space<vmem>>, vector<1x8x32xf32>
    %1 = vector.shape_cast %0 : vector<1x8x32xf32> to vector<8x32xf32>
    %2 = arith.truncf %1 : vector<8x32xf32> to vector<8x32xbf16>
    %c0_2 = arith.constant 0 : index
    %c0_3 = arith.constant 0 : index
    %3 = vector.load %arg3[%c0_2, %c0_3] : memref<32x32xbf16, #tpu.memory_space<vmem>>, vector<32x32xbf16>
    %cst = arith.constant dense<0.000000e+00> : vector<8x32xf32>
    %4 = tpu.matmul %2, %3, %cst {dimension_numbers = #tpu.dot_dimension_numbers<[1], [0], [0], [1], [0, 0, 1, 1], [], []>} : vector<8x32xbf16>, vector<32x32xbf16>, vector<8x32xf32> -> vector<8x32xf32>
    %c0_4 = arith.constant 0 : index
    %c0_5 = arith.constant 0 : index
    %5 = vector.load %arg4[%c0_4, %c0_5] : memref<1x32xf32, #tpu.memory_space<vmem>>, vector<1x32xf32>
    %6 = vector.broadcast %5 : vector<1x32xf32> to vector<8x32xf32>
    %7 = arith.addf %4, %6 : vector<8x32xf32>
    %c0_6 = arith.constant 0 : index
    %c0_7 = arith.constant 0 : index
    %8 = vector.load %arg5[%c0_6, %c0_7] : memref<1x32xf32, #tpu.memory_space<vmem>>, vector<1x32xf32>
    %c0_8 = arith.constant 0 : index
    %c0_9 = arith.constant 0 : index
    %9 = vector.load %arg6[%c0_8, %c0_9] : memref<1x32xf32, #tpu.memory_space<vmem>>, vector<1x32xf32>
    %cst_10 = arith.constant dense<0.000000e+00> : vector<8xf32>
    %10 = vector.multi_reduction <add>, %7, %cst_10 [1] : vector<8x32xf32> to vector<8xf32>
    %11 = vector.shape_cast %10 : vector<8xf32> to vector<8x1xf32>
    %cst_11 = arith.constant 3.200000e+01 : f32
    %12 = vector.broadcast %cst_11 : f32 to vector<8x1xf32>
    %13 = arith.divf %11, %12 : vector<8x1xf32>
    %14 = vector.broadcast %13 : vector<8x1xf32> to vector<8x32xf32>
    %15 = arith.subf %7, %14 : vector<8x32xf32>
    %16 = arith.mulf %15, %15 : vector<8x32xf32>
    %cst_12 = arith.constant dense<0.000000e+00> : vector<8xf32>
    %17 = vector.multi_reduction <add>, %16, %cst_12 [1] : vector<8x32xf32> to vector<8xf32>
    %18 = vector.shape_cast %17 : vector<8xf32> to vector<8x1xf32>
    %cst_13 = arith.constant 3.200000e+01 : f32
    %19 = vector.broadcast %cst_13 : f32 to vector<8x1xf32>
    %20 = arith.divf %18, %19 : vector<8x1xf32>
    %21 = vector.broadcast %13 : vector<8x1xf32> to vector<8x32xf32>
    %22 = arith.subf %7, %21 : vector<8x32xf32>
    %cst_14 = arith.constant 9.99999974E-6 : f32
    %23 = vector.broadcast %cst_14 : f32 to vector<8x1xf32>
    %24 = arith.addf %20, %23 : vector<8x1xf32>
    %25 = math.rsqrt %24 : vector<8x1xf32>
    %26 = vector.broadcast %25 : vector<8x1xf32> to vector<8x32xf32>
    %27 = arith.mulf %22, %26 : vector<8x32xf32>
    %28 = vector.broadcast %8 : vector<1x32xf32> to vector<8x32xf32>
    %29 = arith.mulf %27, %28 : vector<8x32xf32>
    %30 = vector.broadcast %9 : vector<1x32xf32> to vector<8x32xf32>
    %31 = arith.addf %29, %30 : vector<8x32xf32>
    %c0_15 = arith.constant 0 : index
    %c0_16 = arith.constant 0 : index
    %32 = vector.load %arg7[%c0_15, %c0_16] : memref<8x32xf32, #tpu.memory_space<vmem>>, vector<8x32xf32>
    %33 = arith.addf %31, %32 : vector<8x32xf32>
    %c0_17 = arith.constant 0 : index
    %c0_18 = arith.constant 0 : index
    %34 = vector.load %arg8[%c0_17, %c0_18] : memref<1x32xf32, #tpu.memory_space<vmem>>, vector<1x32xf32>
    %c0_19 = arith.constant 0 : index
    %c0_20 = arith.constant 0 : index
    %35 = vector.load %arg9[%c0_19, %c0_20] : memref<1x32xf32, #tpu.memory_space<vmem>>, vector<1x32xf32>
    %cst_21 = arith.constant dense<0.000000e+00> : vector<8xf32>
    %36 = vector.multi_reduction <add>, %33, %cst_21 [1] : vector<8x32xf32> to vector<8xf32>
    %37 = vector.shape_cast %36 : vector<8xf32> to vector<8x1xf32>
    %cst_22 = arith.constant 3.200000e+01 : f32
    %38 = vector.broadcast %cst_22 : f32 to vector<8x1xf32>
    %39 = arith.divf %37, %38 : vector<8x1xf32>
    %40 = vector.broadcast %39 : vector<8x1xf32> to vector<8x32xf32>
    %41 = arith.subf %33, %40 : vector<8x32xf32>
    %42 = arith.mulf %41, %41 : vector<8x32xf32>
    %cst_23 = arith.constant dense<0.000000e+00> : vector<8xf32>
    %43 = vector.multi_reduction <add>, %42, %cst_23 [1] : vector<8x32xf32> to vector<8xf32>
    %44 = vector.shape_cast %43 : vector<8xf32> to vector<8x1xf32>
    %cst_24 = arith.constant 3.200000e+01 : f32
    %45 = vector.broadcast %cst_24 : f32 to vector<8x1xf32>
    %46 = arith.divf %44, %45 : vector<8x1xf32>
    %47 = vector.broadcast %39 : vector<8x1xf32> to vector<8x32xf32>
    %48 = arith.subf %33, %47 : vector<8x32xf32>
    %cst_25 = arith.constant 9.99999974E-6 : f32
    %49 = vector.broadcast %cst_25 : f32 to vector<8x1xf32>
    %50 = arith.addf %46, %49 : vector<8x1xf32>
    %51 = math.rsqrt %50 : vector<8x1xf32>
    %52 = vector.broadcast %51 : vector<8x1xf32> to vector<8x32xf32>
    %53 = arith.mulf %48, %52 : vector<8x32xf32>
    %54 = vector.broadcast %34 : vector<1x32xf32> to vector<8x32xf32>
    %55 = arith.mulf %53, %54 : vector<8x32xf32>
    %56 = vector.broadcast %35 : vector<1x32xf32> to vector<8x32xf32>
    %57 = arith.addf %55, %56 : vector<8x32xf32>
    %58 = arith.index_cast %arg0 : i32 to index
    %59 = memref.load %arg1[%58] : memref<2xi32, #tpu.memory_space<smem>>
    %60 = tpu.iota {dimensions = array<i32: 1>} : vector<8x8xi32>
    %61 = vector.broadcast %59 : i32 to vector<8x8xi32>
    %62 = arith.cmpi slt, %60, %61 : vector<8x8xi32>
    %cst_26 = arith.constant 0.000000e+00 : f32
    %cst_27 = arith.constant -1.000000e+09 : f32
    %63 = vector.broadcast %cst_26 : f32 to vector<8x8xf32>
    %64 = vector.broadcast %cst_27 : f32 to vector<8x8xf32>
    %65 = arith.select %62, %63, %64 : vector<8x8xi1>, vector<8x8xf32>
    %66 = arith.truncf %57 : vector<8x32xf32> to vector<8x32xbf16>
    %cst_28 = arith.constant 0.000000e+00 : f32
    %67 = vector.broadcast %cst_28 : f32 to vector<8x32xf32>
    %c0_29 = arith.constant 0 : index
    %c0_30 = arith.constant 0 : index
    %c0_31 = arith.constant 0 : index
    %c0_32 = arith.constant 0 : index
    %68 = vector.load %arg10[%c0_29, %c0_30, %c0_31, %c0_32] : memref<4x4x32x8xbf16, #tpu.memory_space<vmem>>, vector<1x1x32x8xbf16>
    %69 = vector.shape_cast %68 : vector<1x1x32x8xbf16> to vector<32x8xbf16>
    %cst_33 = arith.constant dense<0.000000e+00> : vector<8x8xf32>
    %70 = tpu.matmul %66, %69, %cst_33 {dimension_numbers = #tpu.dot_dimension_numbers<[1], [0], [0], [1], [0, 0, 1, 1], [], []>} : vector<8x32xbf16>, vector<32x8xbf16>, vector<8x8xf32> -> vector<8x8xf32>
    %c0_34 = arith.constant 0 : index
    %c0_35 = arith.constant 0 : index
    %c0_36 = arith.constant 0 : index
    %c0_37 = arith.constant 0 : index
    %71 = vector.load %arg13[%c0_34, %c0_35, %c0_36, %c0_37] : memref<4x4x1x8xf32, #tpu.memory_space<vmem>>, vector<1x1x1x8xf32>
    %72 = vector.shape_cast %71 : vector<1x1x1x8xf32> to vector<1x8xf32>
    %73 = vector.broadcast %72 : vector<1x8xf32> to vector<8x8xf32>
    %74 = arith.addf %70, %73 : vector<8x8xf32>
    %c0_38 = arith.constant 0 : index
    %c0_39 = arith.constant 0 : index
    %c0_40 = arith.constant 0 : index
    %c0_41 = arith.constant 0 : index
    %75 = vector.load %arg11[%c0_38, %c0_39, %c0_40, %c0_41] : memref<4x4x32x8xbf16, #tpu.memory_space<vmem>>, vector<1x1x32x8xbf16>
    %76 = vector.shape_cast %75 : vector<1x1x32x8xbf16> to vector<32x8xbf16>
    %cst_42 = arith.constant dense<0.000000e+00> : vector<8x8xf32>
    %77 = tpu.matmul %66, %76, %cst_42 {dimension_numbers = #tpu.dot_dimension_numbers<[1], [0], [0], [1], [0, 0, 1, 1], [], []>} : vector<8x32xbf16>, vector<32x8xbf16>, vector<8x8xf32> -> vector<8x8xf32>
    %c0_43 = arith.constant 0 : index
    %c0_44 = arith.constant 0 : index
    %c0_45 = arith.constant 0 : index
    %c0_46 = arith.constant 0 : index
    %78 = vector.load %arg14[%c0_43, %c0_44, %c0_45, %c0_46] : memref<4x4x1x8xf32, #tpu.memory_space<vmem>>, vector<1x1x1x8xf32>
    %79 = vector.shape_cast %78 : vector<1x1x1x8xf32> to vector<1x8xf32>
    %80 = vector.broadcast %79 : vector<1x8xf32> to vector<8x8xf32>
    %81 = arith.addf %77, %80 : vector<8x8xf32>
    %c0_47 = arith.constant 0 : index
    %c0_48 = arith.constant 0 : index
    %c0_49 = arith.constant 0 : index
    %c0_50 = arith.constant 0 : index
    %82 = vector.load %arg12[%c0_47, %c0_48, %c0_49, %c0_50] : memref<4x4x32x8xbf16, #tpu.memory_space<vmem>>, vector<1x1x32x8xbf16>
    %83 = vector.shape_cast %82 : vector<1x1x32x8xbf16> to vector<32x8xbf16>
    %cst_51 = arith.constant dense<0.000000e+00> : vector<8x8xf32>
    %84 = tpu.matmul %66, %83, %cst_51 {dimension_numbers = #tpu.dot_dimension_numbers<[1], [0], [0], [1], [0, 0, 1, 1], [], []>} : vector<8x32xbf16>, vector<32x8xbf16>, vector<8x8xf32> -> vector<8x8xf32>
    %c0_52 = arith.constant 0 : index
    %c0_53 = arith.constant 0 : index
    %c0_54 = arith.constant 0 : index
    %c0_55 = arith.constant 0 : index
    %85 = vector.load %arg15[%c0_52, %c0_53, %c0_54, %c0_55] : memref<4x4x1x8xf32, #tpu.memory_space<vmem>>, vector<1x1x1x8xf32>
    %86 = vector.shape_cast %85 : vector<1x1x1x8xf32> to vector<1x8xf32>
    %87 = vector.broadcast %86 : vector<1x8xf32> to vector<8x8xf32>
    %88 = arith.addf %84, %87 : vector<8x8xf32>
    %89 = arith.truncf %74 : vector<8x8xf32> to vector<8x8xbf16>
    %90 = arith.truncf %81 : vector<8x8xf32> to vector<8x8xbf16>
    %cst_56 = arith.constant dense<0.000000e+00> : vector<8x8xf32>
    %91 = tpu.matmul %89, %90, %cst_56 {dimension_numbers = #tpu.dot_dimension_numbers<[1], [1], [0], [0], [0, 0, 1, 0], [], []>} : vector<8x8xbf16>, vector<8x8xbf16>, vector<8x8xf32> -> vector<8x8xf32>
    %cst_57 = arith.constant 0.353553385 : f32
    %92 = vector.broadcast %cst_57 : f32 to vector<8x8xf32>
    %93 = arith.mulf %91, %92 : vector<8x8xf32>
    %94 = arith.addf %93, %65 : vector<8x8xf32>
    %cst_58 = arith.constant dense<0xFF800000> : vector<8xf32>
    %95 = vector.multi_reduction <maximumf>, %94, %cst_58 [1] : vector<8x8xf32> to vector<8xf32>
    %96 = vector.shape_cast %95 : vector<8xf32> to vector<8x1xf32>
    %97 = vector.broadcast %96 : vector<8x1xf32> to vector<8x8xf32>
    %98 = arith.subf %94, %97 : vector<8x8xf32>
    %99 = math.exp %98 : vector<8x8xf32>
    %cst_59 = arith.constant dense<0.000000e+00> : vector<8xf32>
    %100 = vector.multi_reduction <add>, %99, %cst_59 [1] : vector<8x8xf32> to vector<8xf32>
    %101 = vector.shape_cast %100 : vector<8xf32> to vector<8x1xf32>
    %102 = tpu.reciprocal %101 {approx = true} : vector<8x1xf32> -> vector<8x1xf32>
    %103 = vector.broadcast %102 : vector<8x1xf32> to vector<8x8xf32>
    %104 = arith.mulf %99, %103 : vector<8x8xf32>
    %105 = arith.truncf %104 : vector<8x8xf32> to vector<8x8xbf16>
    %106 = arith.truncf %88 : vector<8x8xf32> to vector<8x8xbf16>
    %cst_60 = arith.constant dense<0.000000e+00> : vector<8x8xf32>
    %107 = tpu.matmul %105, %106, %cst_60 {dimension_numbers = #tpu.dot_dimension_numbers<[1], [0], [0], [1], [0, 0, 1, 1], [], []>} : vector<8x8xbf16>, vector<8x8xbf16>, vector<8x8xf32> -> vector<8x8xf32>
    %108 = arith.truncf %107 : vector<8x8xf32> to vector<8x8xbf16>
    %c0_61 = arith.constant 0 : index
    %c0_62 = arith.constant 0 : index
    %c0_63 = arith.constant 0 : index
    %c0_64 = arith.constant 0 : index
    %109 = vector.load %arg16[%c0_61, %c0_62, %c0_63, %c0_64] : memref<4x4x8x32xbf16, #tpu.memory_space<vmem>>, vector<1x1x8x32xbf16>
    %110 = vector.shape_cast %109 : vector<1x1x8x32xbf16> to vector<8x32xbf16>
    %cst_65 = arith.constant dense<0.000000e+00> : vector<8x32xf32>
    %111 = tpu.matmul %108, %110, %cst_65 {dimension_numbers = #tpu.dot_dimension_numbers<[1], [0], [0], [1], [0, 0, 1, 1], [], []>} : vector<8x8xbf16>, vector<8x32xbf16>, vector<8x32xf32> -> vector<8x32xf32>
    %112 = arith.addf %67, %111 : vector<8x32xf32>
    %c0_66 = arith.constant 0 : index
    %c1 = arith.constant 1 : index
    %c0_67 = arith.constant 0 : index
    %c0_68 = arith.constant 0 : index
    %113 = vector.load %arg10[%c0_66, %c1, %c0_67, %c0_68] : memref<4x4x32x8xbf16, #tpu.memory_space<vmem>>, vector<1x1x32x8xbf16>
    %114 = vector.shape_cast %113 : vector<1x1x32x8xbf16> to vector<32x8xbf16>
    %cst_69 = arith.constant dense<0.000000e+00> : vector<8x8xf32>
    %115 = tpu.matmul %66, %114, %cst_69 {dimension_numbers = #tpu.dot_dimension_numbers<[1], [0], [0], [1], [0, 0, 1, 1], [], []>} : vector<8x32xbf16>, vector<32x8xbf16>, vector<8x8xf32> -> vector<8x8xf32>
    %c0_70 = arith.constant 0 : index
    %c1_71 = arith.constant 1 : index
    %c0_72 = arith.constant 0 : index
    %c0_73 = arith.constant 0 : index
    %116 = vector.load %arg13[%c0_70, %c1_71, %c0_72, %c0_73] : memref<4x4x1x8xf32, #tpu.memory_space<vmem>>, vector<1x1x1x8xf32>
    %117 = vector.shape_cast %116 : vector<1x1x1x8xf32> to vector<1x8xf32>
    %118 = vector.broadcast %117 : vector<1x8xf32> to vector<8x8xf32>
    %119 = arith.addf %115, %118 : vector<8x8xf32>
    %c0_74 = arith.constant 0 : index
    %c1_75 = arith.constant 1 : index
    %c0_76 = arith.constant 0 : index
    %c0_77 = arith.constant 0 : index
    %120 = vector.load %arg11[%c0_74, %c1_75, %c0_76, %c0_77] : memref<4x4x32x8xbf16, #tpu.memory_space<vmem>>, vector<1x1x32x8xbf16>
    %121 = vector.shape_cast %120 : vector<1x1x32x8xbf16> to vector<32x8xbf16>
    %cst_78 = arith.constant dense<0.000000e+00> : vector<8x8xf32>
    %122 = tpu.matmul %66, %121, %cst_78 {dimension_numbers = #tpu.dot_dimension_numbers<[1], [0], [0], [1], [0, 0, 1, 1], [], []>} : vector<8x32xbf16>, vector<32x8xbf16>, vector<8x8xf32> -> vector<8x8xf32>
    %c0_79 = arith.constant 0 : index
    %c1_80 = arith.constant 1 : index
    %c0_81 = arith.constant 0 : index
    %c0_82 = arith.constant 0 : index
    %123 = vector.load %arg14[%c0_79, %c1_80, %c0_81, %c0_82] : memref<4x4x1x8xf32, #tpu.memory_space<vmem>>, vector<1x1x1x8xf32>
    %124 = vector.shape_cast %123 : vector<1x1x1x8xf32> to vector<1x8xf32>
    %125 = vector.broadcast %124 : vector<1x8xf32> to vector<8x8xf32>
    %126 = arith.addf %122, %125 : vector<8x8xf32>
    %c0_83 = arith.constant 0 : index
    %c1_84 = arith.constant 1 : index
    %c0_85 = arith.constant 0 : index
    %c0_86 = arith.constant 0 : index
    %127 = vector.load %arg12[%c0_83, %c1_84, %c0_85, %c0_86] : memref<4x4x32x8xbf16, #tpu.memory_space<vmem>>, vector<1x1x32x8xbf16>
    %128 = vector.shape_cast %127 : vector<1x1x32x8xbf16> to vector<32x8xbf16>
    %cst_87 = arith.constant dense<0.000000e+00> : vector<8x8xf32>
    %129 = tpu.matmul %66, %128, %cst_87 {dimension_numbers = #tpu.dot_dimension_numbers<[1], [0], [0], [1], [0, 0, 1, 1], [], []>} : vector<8x32xbf16>, vector<32x8xbf16>, vector<8x8xf32> -> vector<8x8xf32>
    %c0_88 = arith.constant 0 : index
    %c1_89 = arith.constant 1 : index
    %c0_90 = arith.constant 0 : index
    %c0_91 = arith.constant 0 : index
    %130 = vector.load %arg15[%c0_88, %c1_89, %c0_90, %c0_91] : memref<4x4x1x8xf32, #tpu.memory_space<vmem>>, vector<1x1x1x8xf32>
    %131 = vector.shape_cast %130 : vector<1x1x1x8xf32> to vector<1x8xf32>
    %132 = vector.broadcast %131 : vector<1x8xf32> to vector<8x8xf32>
    %133 = arith.addf %129, %132 : vector<8x8xf32>
    %134 = arith.truncf %119 : vector<8x8xf32> to vector<8x8xbf16>
    %135 = arith.truncf %126 : vector<8x8xf32> to vector<8x8xbf16>
    %cst_92 = arith.constant dense<0.000000e+00> : vector<8x8xf32>
    %136 = tpu.matmul %134, %135, %cst_92 {dimension_numbers = #tpu.dot_dimension_numbers<[1], [1], [0], [0], [0, 0, 1, 0], [], []>} : vector<8x8xbf16>, vector<8x8xbf16>, vector<8x8xf32> -> vector<8x8xf32>
    %cst_93 = arith.constant 0.353553385 : f32
    %137 = vector.broadcast %cst_93 : f32 to vector<8x8xf32>
    %138 = arith.mulf %136, %137 : vector<8x8xf32>
    %139 = arith.addf %138, %65 : vector<8x8xf32>
    %cst_94 = arith.constant dense<0xFF800000> : vector<8xf32>
    %140 = vector.multi_reduction <maximumf>, %139, %cst_94 [1] : vector<8x8xf32> to vector<8xf32>
    %141 = vector.shape_cast %140 : vector<8xf32> to vector<8x1xf32>
    %142 = vector.broadcast %141 : vector<8x1xf32> to vector<8x8xf32>
    %143 = arith.subf %139, %142 : vector<8x8xf32>
    %144 = math.exp %143 : vector<8x8xf32>
    %cst_95 = arith.constant dense<0.000000e+00> : vector<8xf32>
    %145 = vector.multi_reduction <add>, %144, %cst_95 [1] : vector<8x8xf32> to vector<8xf32>
    %146 = vector.shape_cast %145 : vector<8xf32> to vector<8x1xf32>
    %147 = tpu.reciprocal %146 {approx = true} : vector<8x1xf32> -> vector<8x1xf32>
    %148 = vector.broadcast %147 : vector<8x1xf32> to vector<8x8xf32>
    %149 = arith.mulf %144, %148 : vector<8x8xf32>
    %150 = arith.truncf %149 : vector<8x8xf32> to vector<8x8xbf16>
    %151 = arith.truncf %133 : vector<8x8xf32> to vector<8x8xbf16>
    %cst_96 = arith.constant dense<0.000000e+00> : vector<8x8xf32>
    %152 = tpu.matmul %150, %151, %cst_96 {dimension_numbers = #tpu.dot_dimension_numbers<[1], [0], [0], [1], [0, 0, 1, 1], [], []>} : vector<8x8xbf16>, vector<8x8xbf16>, vector<8x8xf32> -> vector<8x8xf32>
    %153 = arith.truncf %152 : vector<8x8xf32> to vector<8x8xbf16>
    %c0_97 = arith.constant 0 : index
    %c1_98 = arith.constant 1 : index
    %c0_99 = arith.constant 0 : index
    %c0_100 = arith.constant 0 : index
    %154 = vector.load %arg16[%c0_97, %c1_98, %c0_99, %c0_100] : memref<4x4x8x32xbf16, #tpu.memory_space<vmem>>, vector<1x1x8x32xbf16>
    %155 = vector.shape_cast %154 : vector<1x1x8x32xbf16> to vector<8x32xbf16>
    %cst_101 = arith.constant dense<0.000000e+00> : vector<8x32xf32>
    %156 = tpu.matmul %153, %155, %cst_101 {dimension_numbers = #tpu.dot_dimension_numbers<[1], [0], [0], [1], [0, 0, 1, 1], [], []>} : vector<8x8xbf16>, vector<8x32xbf16>, vector<8x32xf32> -> vector<8x32xf32>
    %157 = arith.addf %112, %156 : vector<8x32xf32>
    %c0_102 = arith.constant 0 : index
    %c2 = arith.constant 2 : index
    %c0_103 = arith.constant 0 : index
    %c0_104 = arith.constant 0 : index
    %158 = vector.load %arg10[%c0_102, %c2, %c0_103, %c0_104] : memref<4x4x32x8xbf16, #tpu.memory_space<vmem>>, vector<1x1x32x8xbf16>
    %159 = vector.shape_cast %158 : vector<1x1x32x8xbf16> to vector<32x8xbf16>
    %cst_105 = arith.constant dense<0.000000e+00> : vector<8x8xf32>
    %160 = tpu.matmul %66, %159, %cst_105 {dimension_numbers = #tpu.dot_dimension_numbers<[1], [0], [0], [1], [0, 0, 1, 1], [], []>} : vector<8x32xbf16>, vector<32x8xbf16>, vector<8x8xf32> -> vector<8x8xf32>
    %c0_106 = arith.constant 0 : index
    %c2_107 = arith.constant 2 : index
    %c0_108 = arith.constant 0 : index
    %c0_109 = arith.constant 0 : index
    %161 = vector.load %arg13[%c0_106, %c2_107, %c0_108, %c0_109] : memref<4x4x1x8xf32, #tpu.memory_space<vmem>>, vector<1x1x1x8xf32>
    %162 = vector.shape_cast %161 : vector<1x1x1x8xf32> to vector<1x8xf32>
    %163 = vector.broadcast %162 : vector<1x8xf32> to vector<8x8xf32>
    %164 = arith.addf %160, %163 : vector<8x8xf32>
    %c0_110 = arith.constant 0 : index
    %c2_111 = arith.constant 2 : index
    %c0_112 = arith.constant 0 : index
    %c0_113 = arith.constant 0 : index
    %165 = vector.load %arg11[%c0_110, %c2_111, %c0_112, %c0_113] : memref<4x4x32x8xbf16, #tpu.memory_space<vmem>>, vector<1x1x32x8xbf16>
    %166 = vector.shape_cast %165 : vector<1x1x32x8xbf16> to vector<32x8xbf16>
    %cst_114 = arith.constant dense<0.000000e+00> : vector<8x8xf32>
    %167 = tpu.matmul %66, %166, %cst_114 {dimension_numbers = #tpu.dot_dimension_numbers<[1], [0], [0], [1], [0, 0, 1, 1], [], []>} : vector<8x32xbf16>, vector<32x8xbf16>, vector<8x8xf32> -> vector<8x8xf32>
    %c0_115 = arith.constant 0 : index
    %c2_116 = arith.constant 2 : index
    %c0_117 = arith.constant 0 : index
    %c0_118 = arith.constant 0 : index
    %168 = vector.load %arg14[%c0_115, %c2_116, %c0_117, %c0_118] : memref<4x4x1x8xf32, #tpu.memory_space<vmem>>, vector<1x1x1x8xf32>
    %169 = vector.shape_cast %168 : vector<1x1x1x8xf32> to vector<1x8xf32>
    %170 = vector.broadcast %169 : vector<1x8xf32> to vector<8x8xf32>
    %171 = arith.addf %167, %170 : vector<8x8xf32>
    %c0_119 = arith.constant 0 : index
    %c2_120 = arith.constant 2 : index
    %c0_121 = arith.constant 0 : index
    %c0_122 = arith.constant 0 : index
    %172 = vector.load %arg12[%c0_119, %c2_120, %c0_121, %c0_122] : memref<4x4x32x8xbf16, #tpu.memory_space<vmem>>, vector<1x1x32x8xbf16>
    %173 = vector.shape_cast %172 : vector<1x1x32x8xbf16> to vector<32x8xbf16>
    %cst_123 = arith.constant dense<0.000000e+00> : vector<8x8xf32>
    %174 = tpu.matmul %66, %173, %cst_123 {dimension_numbers = #tpu.dot_dimension_numbers<[1], [0], [0], [1], [0, 0, 1, 1], [], []>} : vector<8x32xbf16>, vector<32x8xbf16>, vector<8x8xf32> -> vector<8x8xf32>
    %c0_124 = arith.constant 0 : index
    %c2_125 = arith.constant 2 : index
    %c0_126 = arith.constant 0 : index
    %c0_127 = arith.constant 0 : index
    %175 = vector.load %arg15[%c0_124, %c2_125, %c0_126, %c0_127] : memref<4x4x1x8xf32, #tpu.memory_space<vmem>>, vector<1x1x1x8xf32>
    %176 = vector.shape_cast %175 : vector<1x1x1x8xf32> to vector<1x8xf32>
    %177 = vector.broadcast %176 : vector<1x8xf32> to vector<8x8xf32>
    %178 = arith.addf %174, %177 : vector<8x8xf32>
    %179 = arith.truncf %164 : vector<8x8xf32> to vector<8x8xbf16>
    %180 = arith.truncf %171 : vector<8x8xf32> to vector<8x8xbf16>
    %cst_128 = arith.constant dense<0.000000e+00> : vector<8x8xf32>
    %181 = tpu.matmul %179, %180, %cst_128 {dimension_numbers = #tpu.dot_dimension_numbers<[1], [1], [0], [0], [0, 0, 1, 0], [], []>} : vector<8x8xbf16>, vector<8x8xbf16>, vector<8x8xf32> -> vector<8x8xf32>
    %cst_129 = arith.constant 0.353553385 : f32
    %182 = vector.broadcast %cst_129 : f32 to vector<8x8xf32>
    %183 = arith.mulf %181, %182 : vector<8x8xf32>
    %184 = arith.addf %183, %65 : vector<8x8xf32>
    %cst_130 = arith.constant dense<0xFF800000> : vector<8xf32>
    %185 = vector.multi_reduction <maximumf>, %184, %cst_130 [1] : vector<8x8xf32> to vector<8xf32>
    %186 = vector.shape_cast %185 : vector<8xf32> to vector<8x1xf32>
    %187 = vector.broadcast %186 : vector<8x1xf32> to vector<8x8xf32>
    %188 = arith.subf %184, %187 : vector<8x8xf32>
    %189 = math.exp %188 : vector<8x8xf32>
    %cst_131 = arith.constant dense<0.000000e+00> : vector<8xf32>
    %190 = vector.multi_reduction <add>, %189, %cst_131 [1] : vector<8x8xf32> to vector<8xf32>
    %191 = vector.shape_cast %190 : vector<8xf32> to vector<8x1xf32>
    %192 = tpu.reciprocal %191 {approx = true} : vector<8x1xf32> -> vector<8x1xf32>
    %193 = vector.broadcast %192 : vector<8x1xf32> to vector<8x8xf32>
    %194 = arith.mulf %189, %193 : vector<8x8xf32>
    %195 = arith.truncf %194 : vector<8x8xf32> to vector<8x8xbf16>
    %196 = arith.truncf %178 : vector<8x8xf32> to vector<8x8xbf16>
    %cst_132 = arith.constant dense<0.000000e+00> : vector<8x8xf32>
    %197 = tpu.matmul %195, %196, %cst_132 {dimension_numbers = #tpu.dot_dimension_numbers<[1], [0], [0], [1], [0, 0, 1, 1], [], []>} : vector<8x8xbf16>, vector<8x8xbf16>, vector<8x8xf32> -> vector<8x8xf32>
    %198 = arith.truncf %197 : vector<8x8xf32> to vector<8x8xbf16>
    %c0_133 = arith.constant 0 : index
    %c2_134 = arith.constant 2 : index
    %c0_135 = arith.constant 0 : index
    %c0_136 = arith.constant 0 : index
    %199 = vector.load %arg16[%c0_133, %c2_134, %c0_135, %c0_136] : memref<4x4x8x32xbf16, #tpu.memory_space<vmem>>, vector<1x1x8x32xbf16>
    %200 = vector.shape_cast %199 : vector<1x1x8x32xbf16> to vector<8x32xbf16>
    %cst_137 = arith.constant dense<0.000000e+00> : vector<8x32xf32>
    %201 = tpu.matmul %198, %200, %cst_137 {dimension_numbers = #tpu.dot_dimension_numbers<[1], [0], [0], [1], [0, 0, 1, 1], [], []>} : vector<8x8xbf16>, vector<8x32xbf16>, vector<8x32xf32> -> vector<8x32xf32>
    %202 = arith.addf %157, %201 : vector<8x32xf32>
    %c0_138 = arith.constant 0 : index
    %c3 = arith.constant 3 : index
    %c0_139 = arith.constant 0 : index
    %c0_140 = arith.constant 0 : index
    %203 = vector.load %arg10[%c0_138, %c3, %c0_139, %c0_140] : memref<4x4x32x8xbf16, #tpu.memory_space<vmem>>, vector<1x1x32x8xbf16>
    %204 = vector.shape_cast %203 : vector<1x1x32x8xbf16> to vector<32x8xbf16>
    %cst_141 = arith.constant dense<0.000000e+00> : vector<8x8xf32>
    %205 = tpu.matmul %66, %204, %cst_141 {dimension_numbers = #tpu.dot_dimension_numbers<[1], [0], [0], [1], [0, 0, 1, 1], [], []>} : vector<8x32xbf16>, vector<32x8xbf16>, vector<8x8xf32> -> vector<8x8xf32>
    %c0_142 = arith.constant 0 : index
    %c3_143 = arith.constant 3 : index
    %c0_144 = arith.constant 0 : index
    %c0_145 = arith.constant 0 : index
    %206 = vector.load %arg13[%c0_142, %c3_143, %c0_144, %c0_145] : memref<4x4x1x8xf32, #tpu.memory_space<vmem>>, vector<1x1x1x8xf32>
    %207 = vector.shape_cast %206 : vector<1x1x1x8xf32> to vector<1x8xf32>
    %208 = vector.broadcast %207 : vector<1x8xf32> to vector<8x8xf32>
    %209 = arith.addf %205, %208 : vector<8x8xf32>
    %c0_146 = arith.constant 0 : index
    %c3_147 = arith.constant 3 : index
    %c0_148 = arith.constant 0 : index
    %c0_149 = arith.constant 0 : index
    %210 = vector.load %arg11[%c0_146, %c3_147, %c0_148, %c0_149] : memref<4x4x32x8xbf16, #tpu.memory_space<vmem>>, vector<1x1x32x8xbf16>
    %211 = vector.shape_cast %210 : vector<1x1x32x8xbf16> to vector<32x8xbf16>
    %cst_150 = arith.constant dense<0.000000e+00> : vector<8x8xf32>
    %212 = tpu.matmul %66, %211, %cst_150 {dimension_numbers = #tpu.dot_dimension_numbers<[1], [0], [0], [1], [0, 0, 1, 1], [], []>} : vector<8x32xbf16>, vector<32x8xbf16>, vector<8x8xf32> -> vector<8x8xf32>
    %c0_151 = arith.constant 0 : index
    %c3_152 = arith.constant 3 : index
    %c0_153 = arith.constant 0 : index
    %c0_154 = arith.constant 0 : index
    %213 = vector.load %arg14[%c0_151, %c3_152, %c0_153, %c0_154] : memref<4x4x1x8xf32, #tpu.memory_space<vmem>>, vector<1x1x1x8xf32>
    %214 = vector.shape_cast %213 : vector<1x1x1x8xf32> to vector<1x8xf32>
    %215 = vector.broadcast %214 : vector<1x8xf32> to vector<8x8xf32>
    %216 = arith.addf %212, %215 : vector<8x8xf32>
    %c0_155 = arith.constant 0 : index
    %c3_156 = arith.constant 3 : index
    %c0_157 = arith.constant 0 : index
    %c0_158 = arith.constant 0 : index
    %217 = vector.load %arg12[%c0_155, %c3_156, %c0_157, %c0_158] : memref<4x4x32x8xbf16, #tpu.memory_space<vmem>>, vector<1x1x32x8xbf16>
    %218 = vector.shape_cast %217 : vector<1x1x32x8xbf16> to vector<32x8xbf16>
    %cst_159 = arith.constant dense<0.000000e+00> : vector<8x8xf32>
    %219 = tpu.matmul %66, %218, %cst_159 {dimension_numbers = #tpu.dot_dimension_numbers<[1], [0], [0], [1], [0, 0, 1, 1], [], []>} : vector<8x32xbf16>, vector<32x8xbf16>, vector<8x8xf32> -> vector<8x8xf32>
    %c0_160 = arith.constant 0 : index
    %c3_161 = arith.constant 3 : index
    %c0_162 = arith.constant 0 : index
    %c0_163 = arith.constant 0 : index
    %220 = vector.load %arg15[%c0_160, %c3_161, %c0_162, %c0_163] : memref<4x4x1x8xf32, #tpu.memory_space<vmem>>, vector<1x1x1x8xf32>
    %221 = vector.shape_cast %220 : vector<1x1x1x8xf32> to vector<1x8xf32>
    %222 = vector.broadcast %221 : vector<1x8xf32> to vector<8x8xf32>
    %223 = arith.addf %219, %222 : vector<8x8xf32>
    %224 = arith.truncf %209 : vector<8x8xf32> to vector<8x8xbf16>
    %225 = arith.truncf %216 : vector<8x8xf32> to vector<8x8xbf16>
    %cst_164 = arith.constant dense<0.000000e+00> : vector<8x8xf32>
    %226 = tpu.matmul %224, %225, %cst_164 {dimension_numbers = #tpu.dot_dimension_numbers<[1], [1], [0], [0], [0, 0, 1, 0], [], []>} : vector<8x8xbf16>, vector<8x8xbf16>, vector<8x8xf32> -> vector<8x8xf32>
    %cst_165 = arith.constant 0.353553385 : f32
    %227 = vector.broadcast %cst_165 : f32 to vector<8x8xf32>
    %228 = arith.mulf %226, %227 : vector<8x8xf32>
    %229 = arith.addf %228, %65 : vector<8x8xf32>
    %cst_166 = arith.constant dense<0xFF800000> : vector<8xf32>
    %230 = vector.multi_reduction <maximumf>, %229, %cst_166 [1] : vector<8x8xf32> to vector<8xf32>
    %231 = vector.shape_cast %230 : vector<8xf32> to vector<8x1xf32>
    %232 = vector.broadcast %231 : vector<8x1xf32> to vector<8x8xf32>
    %233 = arith.subf %229, %232 : vector<8x8xf32>
    %234 = math.exp %233 : vector<8x8xf32>
    %cst_167 = arith.constant dense<0.000000e+00> : vector<8xf32>
    %235 = vector.multi_reduction <add>, %234, %cst_167 [1] : vector<8x8xf32> to vector<8xf32>
    %236 = vector.shape_cast %235 : vector<8xf32> to vector<8x1xf32>
    %237 = tpu.reciprocal %236 {approx = true} : vector<8x1xf32> -> vector<8x1xf32>
    %238 = vector.broadcast %237 : vector<8x1xf32> to vector<8x8xf32>
    %239 = arith.mulf %234, %238 : vector<8x8xf32>
    %240 = arith.truncf %239 : vector<8x8xf32> to vector<8x8xbf16>
    %241 = arith.truncf %223 : vector<8x8xf32> to vector<8x8xbf16>
    %cst_168 = arith.constant dense<0.000000e+00> : vector<8x8xf32>
    %242 = tpu.matmul %240, %241, %cst_168 {dimension_numbers = #tpu.dot_dimension_numbers<[1], [0], [0], [1], [0, 0, 1, 1], [], []>} : vector<8x8xbf16>, vector<8x8xbf16>, vector<8x8xf32> -> vector<8x8xf32>
    %243 = arith.truncf %242 : vector<8x8xf32> to vector<8x8xbf16>
    %c0_169 = arith.constant 0 : index
    %c3_170 = arith.constant 3 : index
    %c0_171 = arith.constant 0 : index
    %c0_172 = arith.constant 0 : index
    %244 = vector.load %arg16[%c0_169, %c3_170, %c0_171, %c0_172] : memref<4x4x8x32xbf16, #tpu.memory_space<vmem>>, vector<1x1x8x32xbf16>
    %245 = vector.shape_cast %244 : vector<1x1x8x32xbf16> to vector<8x32xbf16>
    %cst_173 = arith.constant dense<0.000000e+00> : vector<8x32xf32>
    %246 = tpu.matmul %243, %245, %cst_173 {dimension_numbers = #tpu.dot_dimension_numbers<[1], [0], [0], [1], [0, 0, 1, 1], [], []>} : vector<8x8xbf16>, vector<8x32xbf16>, vector<8x32xf32> -> vector<8x32xf32>
    %247 = arith.addf %202, %246 : vector<8x32xf32>
    %c0_174 = arith.constant 0 : index
    %c0_175 = arith.constant 0 : index
    %c0_176 = arith.constant 0 : index
    %248 = vector.load %arg17[%c0_174, %c0_175, %c0_176] : memref<4x1x32xf32, #tpu.memory_space<vmem>>, vector<1x1x32xf32>
    %249 = vector.shape_cast %248 : vector<1x1x32xf32> to vector<1x32xf32>
    %250 = vector.broadcast %249 : vector<1x32xf32> to vector<8x32xf32>
    %251 = arith.addf %247, %250 : vector<8x32xf32>
    %252 = arith.addf %57, %251 : vector<8x32xf32>
    %c0_177 = arith.constant 0 : index
    %c0_178 = arith.constant 0 : index
    %c0_179 = arith.constant 0 : index
    %253 = vector.load %arg18[%c0_177, %c0_178, %c0_179] : memref<4x1x32xf32, #tpu.memory_space<vmem>>, vector<1x1x32xf32>
    %254 = vector.shape_cast %253 : vector<1x1x32xf32> to vector<1x32xf32>
    %c0_180 = arith.constant 0 : index
    %c0_181 = arith.constant 0 : index
    %c0_182 = arith.constant 0 : index
    %255 = vector.load %arg19[%c0_180, %c0_181, %c0_182] : memref<4x1x32xf32, #tpu.memory_space<vmem>>, vector<1x1x32xf32>
    %256 = vector.shape_cast %255 : vector<1x1x32xf32> to vector<1x32xf32>
    %cst_183 = arith.constant dense<0.000000e+00> : vector<8xf32>
    %257 = vector.multi_reduction <add>, %252, %cst_183 [1] : vector<8x32xf32> to vector<8xf32>
    %258 = vector.shape_cast %257 : vector<8xf32> to vector<8x1xf32>
    %cst_184 = arith.constant 3.200000e+01 : f32
    %259 = vector.broadcast %cst_184 : f32 to vector<8x1xf32>
    %260 = arith.divf %258, %259 : vector<8x1xf32>
    %261 = vector.broadcast %260 : vector<8x1xf32> to vector<8x32xf32>
    %262 = arith.subf %252, %261 : vector<8x32xf32>
    %263 = arith.mulf %262, %262 : vector<8x32xf32>
    %cst_185 = arith.constant dense<0.000000e+00> : vector<8xf32>
    %264 = vector.multi_reduction <add>, %263, %cst_185 [1] : vector<8x32xf32> to vector<8xf32>
    %265 = vector.shape_cast %264 : vector<8xf32> to vector<8x1xf32>
    %cst_186 = arith.constant 3.200000e+01 : f32
    %266 = vector.broadcast %cst_186 : f32 to vector<8x1xf32>
    %267 = arith.divf %265, %266 : vector<8x1xf32>
    %268 = vector.broadcast %260 : vector<8x1xf32> to vector<8x32xf32>
    %269 = arith.subf %252, %268 : vector<8x32xf32>
    %cst_187 = arith.constant 9.99999974E-6 : f32
    %270 = vector.broadcast %cst_187 : f32 to vector<8x1xf32>
    %271 = arith.addf %267, %270 : vector<8x1xf32>
    %272 = math.rsqrt %271 : vector<8x1xf32>
    %273 = vector.broadcast %272 : vector<8x1xf32> to vector<8x32xf32>
    %274 = arith.mulf %269, %273 : vector<8x32xf32>
    %275 = vector.broadcast %254 : vector<1x32xf32> to vector<8x32xf32>
    %276 = arith.mulf %274, %275 : vector<8x32xf32>
    %277 = vector.broadcast %256 : vector<1x32xf32> to vector<8x32xf32>
    %278 = arith.addf %276, %277 : vector<8x32xf32>
    %279 = arith.truncf %278 : vector<8x32xf32> to vector<8x32xbf16>
    %c0_188 = arith.constant 0 : index
    %c0_189 = arith.constant 0 : index
    %c0_190 = arith.constant 0 : index
    %280 = vector.load %arg20[%c0_188, %c0_189, %c0_190] : memref<4x32x64xbf16, #tpu.memory_space<vmem>>, vector<1x32x64xbf16>
    %281 = vector.shape_cast %280 : vector<1x32x64xbf16> to vector<32x64xbf16>
    %cst_191 = arith.constant dense<0.000000e+00> : vector<8x64xf32>
    %282 = tpu.matmul %279, %281, %cst_191 {dimension_numbers = #tpu.dot_dimension_numbers<[1], [0], [0], [1], [0, 0, 1, 1], [], []>} : vector<8x32xbf16>, vector<32x64xbf16>, vector<8x64xf32> -> vector<8x64xf32>
    %c0_192 = arith.constant 0 : index
    %c0_193 = arith.constant 0 : index
    %c0_194 = arith.constant 0 : index
    %283 = vector.load %arg21[%c0_192, %c0_193, %c0_194] : memref<4x1x64xf32, #tpu.memory_space<vmem>>, vector<1x1x64xf32>
    %284 = vector.shape_cast %283 : vector<1x1x64xf32> to vector<1x64xf32>
    %285 = vector.broadcast %284 : vector<1x64xf32> to vector<8x64xf32>
    %286 = arith.addf %282, %285 : vector<8x64xf32>
    %cst_195 = arith.constant 0.000000e+00 : f32
    %287 = vector.broadcast %cst_195 : f32 to vector<8x64xf32>
    %288 = arith.maximumf %286, %287 : vector<8x64xf32>
    %289 = arith.truncf %288 : vector<8x64xf32> to vector<8x64xbf16>
    %c0_196 = arith.constant 0 : index
    %c0_197 = arith.constant 0 : index
    %c0_198 = arith.constant 0 : index
    %290 = vector.load %arg22[%c0_196, %c0_197, %c0_198] : memref<4x64x32xbf16, #tpu.memory_space<vmem>>, vector<1x64x32xbf16>
    %291 = vector.shape_cast %290 : vector<1x64x32xbf16> to vector<64x32xbf16>
    %cst_199 = arith.constant dense<0.000000e+00> : vector<8x32xf32>
    %292 = tpu.matmul %289, %291, %cst_199 {dimension_numbers = #tpu.dot_dimension_numbers<[1], [0], [0], [1], [0, 0, 1, 1], [], []>} : vector<8x64xbf16>, vector<64x32xbf16>, vector<8x32xf32> -> vector<8x32xf32>
    %c0_200 = arith.constant 0 : index
    %c0_201 = arith.constant 0 : index
    %c0_202 = arith.constant 0 : index
    %293 = vector.load %arg23[%c0_200, %c0_201, %c0_202] : memref<4x1x32xf32, #tpu.memory_space<vmem>>, vector<1x1x32xf32>
    %294 = vector.shape_cast %293 : vector<1x1x32xf32> to vector<1x32xf32>
    %295 = vector.broadcast %294 : vector<1x32xf32> to vector<8x32xf32>
    %296 = arith.addf %292, %295 : vector<8x32xf32>
    %297 = arith.addf %278, %296 : vector<8x32xf32>
    %c0_203 = arith.constant 0 : index
    %c0_204 = arith.constant 0 : index
    %c0_205 = arith.constant 0 : index
    %298 = vector.load %arg24[%c0_203, %c0_204, %c0_205] : memref<4x1x32xf32, #tpu.memory_space<vmem>>, vector<1x1x32xf32>
    %299 = vector.shape_cast %298 : vector<1x1x32xf32> to vector<1x32xf32>
    %c0_206 = arith.constant 0 : index
    %c0_207 = arith.constant 0 : index
    %c0_208 = arith.constant 0 : index
    %300 = vector.load %arg25[%c0_206, %c0_207, %c0_208] : memref<4x1x32xf32, #tpu.memory_space<vmem>>, vector<1x1x32xf32>
    %301 = vector.shape_cast %300 : vector<1x1x32xf32> to vector<1x32xf32>
    %cst_209 = arith.constant dense<0.000000e+00> : vector<8xf32>
    %302 = vector.multi_reduction <add>, %297, %cst_209 [1] : vector<8x32xf32> to vector<8xf32>
    %303 = vector.shape_cast %302 : vector<8xf32> to vector<8x1xf32>
    %cst_210 = arith.constant 3.200000e+01 : f32
    %304 = vector.broadcast %cst_210 : f32 to vector<8x1xf32>
    %305 = arith.divf %303, %304 : vector<8x1xf32>
    %306 = vector.broadcast %305 : vector<8x1xf32> to vector<8x32xf32>
    %307 = arith.subf %297, %306 : vector<8x32xf32>
    %308 = arith.mulf %307, %307 : vector<8x32xf32>
    %cst_211 = arith.constant dense<0.000000e+00> : vector<8xf32>
    %309 = vector.multi_reduction <add>, %308, %cst_211 [1] : vector<8x32xf32> to vector<8xf32>
    %310 = vector.shape_cast %309 : vector<8xf32> to vector<8x1xf32>
    %cst_212 = arith.constant 3.200000e+01 : f32
    %311 = vector.broadcast %cst_212 : f32 to vector<8x1xf32>
    %312 = arith.divf %310, %311 : vector<8x1xf32>
    %313 = vector.broadcast %305 : vector<8x1xf32> to vector<8x32xf32>
    %314 = arith.subf %297, %313 : vector<8x32xf32>
    %cst_213 = arith.constant 9.99999974E-6 : f32
    %315 = vector.broadcast %cst_213 : f32 to vector<8x1xf32>
    %316 = arith.addf %312, %315 : vector<8x1xf32>
    %317 = math.rsqrt %316 : vector<8x1xf32>
    %318 = vector.broadcast %317 : vector<8x1xf32> to vector<8x32xf32>
    %319 = arith.mulf %314, %318 : vector<8x32xf32>
    %320 = vector.broadcast %299 : vector<1x32xf32> to vector<8x32xf32>
    %321 = arith.mulf %319, %320 : vector<8x32xf32>
    %322 = vector.broadcast %301 : vector<1x32xf32> to vector<8x32xf32>
    %323 = arith.addf %321, %322 : vector<8x32xf32>
    %324 = arith.truncf %323 : vector<8x32xf32> to vector<8x32xbf16>
    %cst_214 = arith.constant 0.000000e+00 : f32
    %325 = vector.broadcast %cst_214 : f32 to vector<8x32xf32>
    %c1_215 = arith.constant 1 : index
    %c0_216 = arith.constant 0 : index
    %c0_217 = arith.constant 0 : index
    %c0_218 = arith.constant 0 : index
    %326 = vector.load %arg10[%c1_215, %c0_216, %c0_217, %c0_218] : memref<4x4x32x8xbf16, #tpu.memory_space<vmem>>, vector<1x1x32x8xbf16>
    %327 = vector.shape_cast %326 : vector<1x1x32x8xbf16> to vector<32x8xbf16>
    %cst_219 = arith.constant dense<0.000000e+00> : vector<8x8xf32>
    %328 = tpu.matmul %324, %327, %cst_219 {dimension_numbers = #tpu.dot_dimension_numbers<[1], [0], [0], [1], [0, 0, 1, 1], [], []>} : vector<8x32xbf16>, vector<32x8xbf16>, vector<8x8xf32> -> vector<8x8xf32>
    %c1_220 = arith.constant 1 : index
    %c0_221 = arith.constant 0 : index
    %c0_222 = arith.constant 0 : index
    %c0_223 = arith.constant 0 : index
    %329 = vector.load %arg13[%c1_220, %c0_221, %c0_222, %c0_223] : memref<4x4x1x8xf32, #tpu.memory_space<vmem>>, vector<1x1x1x8xf32>
    %330 = vector.shape_cast %329 : vector<1x1x1x8xf32> to vector<1x8xf32>
    %331 = vector.broadcast %330 : vector<1x8xf32> to vector<8x8xf32>
    %332 = arith.addf %328, %331 : vector<8x8xf32>
    %c1_224 = arith.constant 1 : index
    %c0_225 = arith.constant 0 : index
    %c0_226 = arith.constant 0 : index
    %c0_227 = arith.constant 0 : index
    %333 = vector.load %arg11[%c1_224, %c0_225, %c0_226, %c0_227] : memref<4x4x32x8xbf16, #tpu.memory_space<vmem>>, vector<1x1x32x8xbf16>
    %334 = vector.shape_cast %333 : vector<1x1x32x8xbf16> to vector<32x8xbf16>
    %cst_228 = arith.constant dense<0.000000e+00> : vector<8x8xf32>
    %335 = tpu.matmul %324, %334, %cst_228 {dimension_numbers = #tpu.dot_dimension_numbers<[1], [0], [0], [1], [0, 0, 1, 1], [], []>} : vector<8x32xbf16>, vector<32x8xbf16>, vector<8x8xf32> -> vector<8x8xf32>
    %c1_229 = arith.constant 1 : index
    %c0_230 = arith.constant 0 : index
    %c0_231 = arith.constant 0 : index
    %c0_232 = arith.constant 0 : index
    %336 = vector.load %arg14[%c1_229, %c0_230, %c0_231, %c0_232] : memref<4x4x1x8xf32, #tpu.memory_space<vmem>>, vector<1x1x1x8xf32>
    %337 = vector.shape_cast %336 : vector<1x1x1x8xf32> to vector<1x8xf32>
    %338 = vector.broadcast %337 : vector<1x8xf32> to vector<8x8xf32>
    %339 = arith.addf %335, %338 : vector<8x8xf32>
    %c1_233 = arith.constant 1 : index
    %c0_234 = arith.constant 0 : index
    %c0_235 = arith.constant 0 : index
    %c0_236 = arith.constant 0 : index
    %340 = vector.load %arg12[%c1_233, %c0_234, %c0_235, %c0_236] : memref<4x4x32x8xbf16, #tpu.memory_space<vmem>>, vector<1x1x32x8xbf16>
    %341 = vector.shape_cast %340 : vector<1x1x32x8xbf16> to vector<32x8xbf16>
    %cst_237 = arith.constant dense<0.000000e+00> : vector<8x8xf32>
    %342 = tpu.matmul %324, %341, %cst_237 {dimension_numbers = #tpu.dot_dimension_numbers<[1], [0], [0], [1], [0, 0, 1, 1], [], []>} : vector<8x32xbf16>, vector<32x8xbf16>, vector<8x8xf32> -> vector<8x8xf32>
    %c1_238 = arith.constant 1 : index
    %c0_239 = arith.constant 0 : index
    %c0_240 = arith.constant 0 : index
    %c0_241 = arith.constant 0 : index
    %343 = vector.load %arg15[%c1_238, %c0_239, %c0_240, %c0_241] : memref<4x4x1x8xf32, #tpu.memory_space<vmem>>, vector<1x1x1x8xf32>
    %344 = vector.shape_cast %343 : vector<1x1x1x8xf32> to vector<1x8xf32>
    %345 = vector.broadcast %344 : vector<1x8xf32> to vector<8x8xf32>
    %346 = arith.addf %342, %345 : vector<8x8xf32>
    %347 = arith.truncf %332 : vector<8x8xf32> to vector<8x8xbf16>
    %348 = arith.truncf %339 : vector<8x8xf32> to vector<8x8xbf16>
    %cst_242 = arith.constant dense<0.000000e+00> : vector<8x8xf32>
    %349 = tpu.matmul %347, %348, %cst_242 {dimension_numbers = #tpu.dot_dimension_numbers<[1], [1], [0], [0], [0, 0, 1, 0], [], []>} : vector<8x8xbf16>, vector<8x8xbf16>, vector<8x8xf32> -> vector<8x8xf32>
    %cst_243 = arith.constant 0.353553385 : f32
    %350 = vector.broadcast %cst_243 : f32 to vector<8x8xf32>
    %351 = arith.mulf %349, %350 : vector<8x8xf32>
    %352 = arith.addf %351, %65 : vector<8x8xf32>
    %cst_244 = arith.constant dense<0xFF800000> : vector<8xf32>
    %353 = vector.multi_reduction <maximumf>, %352, %cst_244 [1] : vector<8x8xf32> to vector<8xf32>
    %354 = vector.shape_cast %353 : vector<8xf32> to vector<8x1xf32>
    %355 = vector.broadcast %354 : vector<8x1xf32> to vector<8x8xf32>
    %356 = arith.subf %352, %355 : vector<8x8xf32>
    %357 = math.exp %356 : vector<8x8xf32>
    %cst_245 = arith.constant dense<0.000000e+00> : vector<8xf32>
    %358 = vector.multi_reduction <add>, %357, %cst_245 [1] : vector<8x8xf32> to vector<8xf32>
    %359 = vector.shape_cast %358 : vector<8xf32> to vector<8x1xf32>
    %360 = tpu.reciprocal %359 {approx = true} : vector<8x1xf32> -> vector<8x1xf32>
    %361 = vector.broadcast %360 : vector<8x1xf32> to vector<8x8xf32>
    %362 = arith.mulf %357, %361 : vector<8x8xf32>
    %363 = arith.truncf %362 : vector<8x8xf32> to vector<8x8xbf16>
    %364 = arith.truncf %346 : vector<8x8xf32> to vector<8x8xbf16>
    %cst_246 = arith.constant dense<0.000000e+00> : vector<8x8xf32>
    %365 = tpu.matmul %363, %364, %cst_246 {dimension_numbers = #tpu.dot_dimension_numbers<[1], [0], [0], [1], [0, 0, 1, 1], [], []>} : vector<8x8xbf16>, vector<8x8xbf16>, vector<8x8xf32> -> vector<8x8xf32>
    %366 = arith.truncf %365 : vector<8x8xf32> to vector<8x8xbf16>
    %c1_247 = arith.constant 1 : index
    %c0_248 = arith.constant 0 : index
    %c0_249 = arith.constant 0 : index
    %c0_250 = arith.constant 0 : index
    %367 = vector.load %arg16[%c1_247, %c0_248, %c0_249, %c0_250] : memref<4x4x8x32xbf16, #tpu.memory_space<vmem>>, vector<1x1x8x32xbf16>
    %368 = vector.shape_cast %367 : vector<1x1x8x32xbf16> to vector<8x32xbf16>
    %cst_251 = arith.constant dense<0.000000e+00> : vector<8x32xf32>
    %369 = tpu.matmul %366, %368, %cst_251 {dimension_numbers = #tpu.dot_dimension_numbers<[1], [0], [0], [1], [0, 0, 1, 1], [], []>} : vector<8x8xbf16>, vector<8x32xbf16>, vector<8x32xf32> -> vector<8x32xf32>
    %370 = arith.addf %325, %369 : vector<8x32xf32>
    %c1_252 = arith.constant 1 : index
    %c1_253 = arith.constant 1 : index
    %c0_254 = arith.constant 0 : index
    %c0_255 = arith.constant 0 : index
    %371 = vector.load %arg10[%c1_252, %c1_253, %c0_254, %c0_255] : memref<4x4x32x8xbf16, #tpu.memory_space<vmem>>, vector<1x1x32x8xbf16>
    %372 = vector.shape_cast %371 : vector<1x1x32x8xbf16> to vector<32x8xbf16>
    %cst_256 = arith.constant dense<0.000000e+00> : vector<8x8xf32>
    %373 = tpu.matmul %324, %372, %cst_256 {dimension_numbers = #tpu.dot_dimension_numbers<[1], [0], [0], [1], [0, 0, 1, 1], [], []>} : vector<8x32xbf16>, vector<32x8xbf16>, vector<8x8xf32> -> vector<8x8xf32>
    %c1_257 = arith.constant 1 : index
    %c1_258 = arith.constant 1 : index
    %c0_259 = arith.constant 0 : index
    %c0_260 = arith.constant 0 : index
    %374 = vector.load %arg13[%c1_257, %c1_258, %c0_259, %c0_260] : memref<4x4x1x8xf32, #tpu.memory_space<vmem>>, vector<1x1x1x8xf32>
    %375 = vector.shape_cast %374 : vector<1x1x1x8xf32> to vector<1x8xf32>
    %376 = vector.broadcast %375 : vector<1x8xf32> to vector<8x8xf32>
    %377 = arith.addf %373, %376 : vector<8x8xf32>
    %c1_261 = arith.constant 1 : index
    %c1_262 = arith.constant 1 : index
    %c0_263 = arith.constant 0 : index
    %c0_264 = arith.constant 0 : index
    %378 = vector.load %arg11[%c1_261, %c1_262, %c0_263, %c0_264] : memref<4x4x32x8xbf16, #tpu.memory_space<vmem>>, vector<1x1x32x8xbf16>
    %379 = vector.shape_cast %378 : vector<1x1x32x8xbf16> to vector<32x8xbf16>
    %cst_265 = arith.constant dense<0.000000e+00> : vector<8x8xf32>
    %380 = tpu.matmul %324, %379, %cst_265 {dimension_numbers = #tpu.dot_dimension_numbers<[1], [0], [0], [1], [0, 0, 1, 1], [], []>} : vector<8x32xbf16>, vector<32x8xbf16>, vector<8x8xf32> -> vector<8x8xf32>
    %c1_266 = arith.constant 1 : index
    %c1_267 = arith.constant 1 : index
    %c0_268 = arith.constant 0 : index
    %c0_269 = arith.constant 0 : index
    %381 = vector.load %arg14[%c1_266, %c1_267, %c0_268, %c0_269] : memref<4x4x1x8xf32, #tpu.memory_space<vmem>>, vector<1x1x1x8xf32>
    %382 = vector.shape_cast %381 : vector<1x1x1x8xf32> to vector<1x8xf32>
    %383 = vector.broadcast %382 : vector<1x8xf32> to vector<8x8xf32>
    %384 = arith.addf %380, %383 : vector<8x8xf32>
    %c1_270 = arith.constant 1 : index
    %c1_271 = arith.constant 1 : index
    %c0_272 = arith.constant 0 : index
    %c0_273 = arith.constant 0 : index
    %385 = vector.load %arg12[%c1_270, %c1_271, %c0_272, %c0_273] : memref<4x4x32x8xbf16, #tpu.memory_space<vmem>>, vector<1x1x32x8xbf16>
    %386 = vector.shape_cast %385 : vector<1x1x32x8xbf16> to vector<32x8xbf16>
    %cst_274 = arith.constant dense<0.000000e+00> : vector<8x8xf32>
    %387 = tpu.matmul %324, %386, %cst_274 {dimension_numbers = #tpu.dot_dimension_numbers<[1], [0], [0], [1], [0, 0, 1, 1], [], []>} : vector<8x32xbf16>, vector<32x8xbf16>, vector<8x8xf32> -> vector<8x8xf32>
    %c1_275 = arith.constant 1 : index
    %c1_276 = arith.constant 1 : index
    %c0_277 = arith.constant 0 : index
    %c0_278 = arith.constant 0 : index
    %388 = vector.load %arg15[%c1_275, %c1_276, %c0_277, %c0_278] : memref<4x4x1x8xf32, #tpu.memory_space<vmem>>, vector<1x1x1x8xf32>
    %389 = vector.shape_cast %388 : vector<1x1x1x8xf32> to vector<1x8xf32>
    %390 = vector.broadcast %389 : vector<1x8xf32> to vector<8x8xf32>
    %391 = arith.addf %387, %390 : vector<8x8xf32>
    %392 = arith.truncf %377 : vector<8x8xf32> to vector<8x8xbf16>
    %393 = arith.truncf %384 : vector<8x8xf32> to vector<8x8xbf16>
    %cst_279 = arith.constant dense<0.000000e+00> : vector<8x8xf32>
    %394 = tpu.matmul %392, %393, %cst_279 {dimension_numbers = #tpu.dot_dimension_numbers<[1], [1], [0], [0], [0, 0, 1, 0], [], []>} : vector<8x8xbf16>, vector<8x8xbf16>, vector<8x8xf32> -> vector<8x8xf32>
    %cst_280 = arith.constant 0.353553385 : f32
    %395 = vector.broadcast %cst_280 : f32 to vector<8x8xf32>
    %396 = arith.mulf %394, %395 : vector<8x8xf32>
    %397 = arith.addf %396, %65 : vector<8x8xf32>
    %cst_281 = arith.constant dense<0xFF800000> : vector<8xf32>
    %398 = vector.multi_reduction <maximumf>, %397, %cst_281 [1] : vector<8x8xf32> to vector<8xf32>
    %399 = vector.shape_cast %398 : vector<8xf32> to vector<8x1xf32>
    %400 = vector.broadcast %399 : vector<8x1xf32> to vector<8x8xf32>
    %401 = arith.subf %397, %400 : vector<8x8xf32>
    %402 = math.exp %401 : vector<8x8xf32>
    %cst_282 = arith.constant dense<0.000000e+00> : vector<8xf32>
    %403 = vector.multi_reduction <add>, %402, %cst_282 [1] : vector<8x8xf32> to vector<8xf32>
    %404 = vector.shape_cast %403 : vector<8xf32> to vector<8x1xf32>
    %405 = tpu.reciprocal %404 {approx = true} : vector<8x1xf32> -> vector<8x1xf32>
    %406 = vector.broadcast %405 : vector<8x1xf32> to vector<8x8xf32>
    %407 = arith.mulf %402, %406 : vector<8x8xf32>
    %408 = arith.truncf %407 : vector<8x8xf32> to vector<8x8xbf16>
    %409 = arith.truncf %391 : vector<8x8xf32> to vector<8x8xbf16>
    %cst_283 = arith.constant dense<0.000000e+00> : vector<8x8xf32>
    %410 = tpu.matmul %408, %409, %cst_283 {dimension_numbers = #tpu.dot_dimension_numbers<[1], [0], [0], [1], [0, 0, 1, 1], [], []>} : vector<8x8xbf16>, vector<8x8xbf16>, vector<8x8xf32> -> vector<8x8xf32>
    %411 = arith.truncf %410 : vector<8x8xf32> to vector<8x8xbf16>
    %c1_284 = arith.constant 1 : index
    %c1_285 = arith.constant 1 : index
    %c0_286 = arith.constant 0 : index
    %c0_287 = arith.constant 0 : index
    %412 = vector.load %arg16[%c1_284, %c1_285, %c0_286, %c0_287] : memref<4x4x8x32xbf16, #tpu.memory_space<vmem>>, vector<1x1x8x32xbf16>
    %413 = vector.shape_cast %412 : vector<1x1x8x32xbf16> to vector<8x32xbf16>
    %cst_288 = arith.constant dense<0.000000e+00> : vector<8x32xf32>
    %414 = tpu.matmul %411, %413, %cst_288 {dimension_numbers = #tpu.dot_dimension_numbers<[1], [0], [0], [1], [0, 0, 1, 1], [], []>} : vector<8x8xbf16>, vector<8x32xbf16>, vector<8x32xf32> -> vector<8x32xf32>
    %415 = arith.addf %370, %414 : vector<8x32xf32>
    %c1_289 = arith.constant 1 : index
    %c2_290 = arith.constant 2 : index
    %c0_291 = arith.constant 0 : index
    %c0_292 = arith.constant 0 : index
    %416 = vector.load %arg10[%c1_289, %c2_290, %c0_291, %c0_292] : memref<4x4x32x8xbf16, #tpu.memory_space<vmem>>, vector<1x1x32x8xbf16>
    %417 = vector.shape_cast %416 : vector<1x1x32x8xbf16> to vector<32x8xbf16>
    %cst_293 = arith.constant dense<0.000000e+00> : vector<8x8xf32>
    %418 = tpu.matmul %324, %417, %cst_293 {dimension_numbers = #tpu.dot_dimension_numbers<[1], [0], [0], [1], [0, 0, 1, 1], [], []>} : vector<8x32xbf16>, vector<32x8xbf16>, vector<8x8xf32> -> vector<8x8xf32>
    %c1_294 = arith.constant 1 : index
    %c2_295 = arith.constant 2 : index
    %c0_296 = arith.constant 0 : index
    %c0_297 = arith.constant 0 : index
    %419 = vector.load %arg13[%c1_294, %c2_295, %c0_296, %c0_297] : memref<4x4x1x8xf32, #tpu.memory_space<vmem>>, vector<1x1x1x8xf32>
    %420 = vector.shape_cast %419 : vector<1x1x1x8xf32> to vector<1x8xf32>
    %421 = vector.broadcast %420 : vector<1x8xf32> to vector<8x8xf32>
    %422 = arith.addf %418, %421 : vector<8x8xf32>
    %c1_298 = arith.constant 1 : index
    %c2_299 = arith.constant 2 : index
    %c0_300 = arith.constant 0 : index
    %c0_301 = arith.constant 0 : index
    %423 = vector.load %arg11[%c1_298, %c2_299, %c0_300, %c0_301] : memref<4x4x32x8xbf16, #tpu.memory_space<vmem>>, vector<1x1x32x8xbf16>
    %424 = vector.shape_cast %423 : vector<1x1x32x8xbf16> to vector<32x8xbf16>
    %cst_302 = arith.constant dense<0.000000e+00> : vector<8x8xf32>
    %425 = tpu.matmul %324, %424, %cst_302 {dimension_numbers = #tpu.dot_dimension_numbers<[1], [0], [0], [1], [0, 0, 1, 1], [], []>} : vector<8x32xbf16>, vector<32x8xbf16>, vector<8x8xf32> -> vector<8x8xf32>
    %c1_303 = arith.constant 1 : index
    %c2_304 = arith.constant 2 : index
    %c0_305 = arith.constant 0 : index
    %c0_306 = arith.constant 0 : index
    %426 = vector.load %arg14[%c1_303, %c2_304, %c0_305, %c0_306] : memref<4x4x1x8xf32, #tpu.memory_space<vmem>>, vector<1x1x1x8xf32>
    %427 = vector.shape_cast %426 : vector<1x1x1x8xf32> to vector<1x8xf32>
    %428 = vector.broadcast %427 : vector<1x8xf32> to vector<8x8xf32>
    %429 = arith.addf %425, %428 : vector<8x8xf32>
    %c1_307 = arith.constant 1 : index
    %c2_308 = arith.constant 2 : index
    %c0_309 = arith.constant 0 : index
    %c0_310 = arith.constant 0 : index
    %430 = vector.load %arg12[%c1_307, %c2_308, %c0_309, %c0_310] : memref<4x4x32x8xbf16, #tpu.memory_space<vmem>>, vector<1x1x32x8xbf16>
    %431 = vector.shape_cast %430 : vector<1x1x32x8xbf16> to vector<32x8xbf16>
    %cst_311 = arith.constant dense<0.000000e+00> : vector<8x8xf32>
    %432 = tpu.matmul %324, %431, %cst_311 {dimension_numbers = #tpu.dot_dimension_numbers<[1], [0], [0], [1], [0, 0, 1, 1], [], []>} : vector<8x32xbf16>, vector<32x8xbf16>, vector<8x8xf32> -> vector<8x8xf32>
    %c1_312 = arith.constant 1 : index
    %c2_313 = arith.constant 2 : index
    %c0_314 = arith.constant 0 : index
    %c0_315 = arith.constant 0 : index
    %433 = vector.load %arg15[%c1_312, %c2_313, %c0_314, %c0_315] : memref<4x4x1x8xf32, #tpu.memory_space<vmem>>, vector<1x1x1x8xf32>
    %434 = vector.shape_cast %433 : vector<1x1x1x8xf32> to vector<1x8xf32>
    %435 = vector.broadcast %434 : vector<1x8xf32> to vector<8x8xf32>
    %436 = arith.addf %432, %435 : vector<8x8xf32>
    %437 = arith.truncf %422 : vector<8x8xf32> to vector<8x8xbf16>
    %438 = arith.truncf %429 : vector<8x8xf32> to vector<8x8xbf16>
    %cst_316 = arith.constant dense<0.000000e+00> : vector<8x8xf32>
    %439 = tpu.matmul %437, %438, %cst_316 {dimension_numbers = #tpu.dot_dimension_numbers<[1], [1], [0], [0], [0, 0, 1, 0], [], []>} : vector<8x8xbf16>, vector<8x8xbf16>, vector<8x8xf32> -> vector<8x8xf32>
    %cst_317 = arith.constant 0.353553385 : f32
    %440 = vector.broadcast %cst_317 : f32 to vector<8x8xf32>
    %441 = arith.mulf %439, %440 : vector<8x8xf32>
    %442 = arith.addf %441, %65 : vector<8x8xf32>
    %cst_318 = arith.constant dense<0xFF800000> : vector<8xf32>
    %443 = vector.multi_reduction <maximumf>, %442, %cst_318 [1] : vector<8x8xf32> to vector<8xf32>
    %444 = vector.shape_cast %443 : vector<8xf32> to vector<8x1xf32>
    %445 = vector.broadcast %444 : vector<8x1xf32> to vector<8x8xf32>
    %446 = arith.subf %442, %445 : vector<8x8xf32>
    %447 = math.exp %446 : vector<8x8xf32>
    %cst_319 = arith.constant dense<0.000000e+00> : vector<8xf32>
    %448 = vector.multi_reduction <add>, %447, %cst_319 [1] : vector<8x8xf32> to vector<8xf32>
    %449 = vector.shape_cast %448 : vector<8xf32> to vector<8x1xf32>
    %450 = tpu.reciprocal %449 {approx = true} : vector<8x1xf32> -> vector<8x1xf32>
    %451 = vector.broadcast %450 : vector<8x1xf32> to vector<8x8xf32>
    %452 = arith.mulf %447, %451 : vector<8x8xf32>
    %453 = arith.truncf %452 : vector<8x8xf32> to vector<8x8xbf16>
    %454 = arith.truncf %436 : vector<8x8xf32> to vector<8x8xbf16>
    %cst_320 = arith.constant dense<0.000000e+00> : vector<8x8xf32>
    %455 = tpu.matmul %453, %454, %cst_320 {dimension_numbers = #tpu.dot_dimension_numbers<[1], [0], [0], [1], [0, 0, 1, 1], [], []>} : vector<8x8xbf16>, vector<8x8xbf16>, vector<8x8xf32> -> vector<8x8xf32>
    %456 = arith.truncf %455 : vector<8x8xf32> to vector<8x8xbf16>
    %c1_321 = arith.constant 1 : index
    %c2_322 = arith.constant 2 : index
    %c0_323 = arith.constant 0 : index
    %c0_324 = arith.constant 0 : index
    %457 = vector.load %arg16[%c1_321, %c2_322, %c0_323, %c0_324] : memref<4x4x8x32xbf16, #tpu.memory_space<vmem>>, vector<1x1x8x32xbf16>
    %458 = vector.shape_cast %457 : vector<1x1x8x32xbf16> to vector<8x32xbf16>
    %cst_325 = arith.constant dense<0.000000e+00> : vector<8x32xf32>
    %459 = tpu.matmul %456, %458, %cst_325 {dimension_numbers = #tpu.dot_dimension_numbers<[1], [0], [0], [1], [0, 0, 1, 1], [], []>} : vector<8x8xbf16>, vector<8x32xbf16>, vector<8x32xf32> -> vector<8x32xf32>
    %460 = arith.addf %415, %459 : vector<8x32xf32>
    %c1_326 = arith.constant 1 : index
    %c3_327 = arith.constant 3 : index
    %c0_328 = arith.constant 0 : index
    %c0_329 = arith.constant 0 : index
    %461 = vector.load %arg10[%c1_326, %c3_327, %c0_328, %c0_329] : memref<4x4x32x8xbf16, #tpu.memory_space<vmem>>, vector<1x1x32x8xbf16>
    %462 = vector.shape_cast %461 : vector<1x1x32x8xbf16> to vector<32x8xbf16>
    %cst_330 = arith.constant dense<0.000000e+00> : vector<8x8xf32>
    %463 = tpu.matmul %324, %462, %cst_330 {dimension_numbers = #tpu.dot_dimension_numbers<[1], [0], [0], [1], [0, 0, 1, 1], [], []>} : vector<8x32xbf16>, vector<32x8xbf16>, vector<8x8xf32> -> vector<8x8xf32>
    %c1_331 = arith.constant 1 : index
    %c3_332 = arith.constant 3 : index
    %c0_333 = arith.constant 0 : index
    %c0_334 = arith.constant 0 : index
    %464 = vector.load %arg13[%c1_331, %c3_332, %c0_333, %c0_334] : memref<4x4x1x8xf32, #tpu.memory_space<vmem>>, vector<1x1x1x8xf32>
    %465 = vector.shape_cast %464 : vector<1x1x1x8xf32> to vector<1x8xf32>
    %466 = vector.broadcast %465 : vector<1x8xf32> to vector<8x8xf32>
    %467 = arith.addf %463, %466 : vector<8x8xf32>
    %c1_335 = arith.constant 1 : index
    %c3_336 = arith.constant 3 : index
    %c0_337 = arith.constant 0 : index
    %c0_338 = arith.constant 0 : index
    %468 = vector.load %arg11[%c1_335, %c3_336, %c0_337, %c0_338] : memref<4x4x32x8xbf16, #tpu.memory_space<vmem>>, vector<1x1x32x8xbf16>
    %469 = vector.shape_cast %468 : vector<1x1x32x8xbf16> to vector<32x8xbf16>
    %cst_339 = arith.constant dense<0.000000e+00> : vector<8x8xf32>
    %470 = tpu.matmul %324, %469, %cst_339 {dimension_numbers = #tpu.dot_dimension_numbers<[1], [0], [0], [1], [0, 0, 1, 1], [], []>} : vector<8x32xbf16>, vector<32x8xbf16>, vector<8x8xf32> -> vector<8x8xf32>
    %c1_340 = arith.constant 1 : index
    %c3_341 = arith.constant 3 : index
    %c0_342 = arith.constant 0 : index
    %c0_343 = arith.constant 0 : index
    %471 = vector.load %arg14[%c1_340, %c3_341, %c0_342, %c0_343] : memref<4x4x1x8xf32, #tpu.memory_space<vmem>>, vector<1x1x1x8xf32>
    %472 = vector.shape_cast %471 : vector<1x1x1x8xf32> to vector<1x8xf32>
    %473 = vector.broadcast %472 : vector<1x8xf32> to vector<8x8xf32>
    %474 = arith.addf %470, %473 : vector<8x8xf32>
    %c1_344 = arith.constant 1 : index
    %c3_345 = arith.constant 3 : index
    %c0_346 = arith.constant 0 : index
    %c0_347 = arith.constant 0 : index
    %475 = vector.load %arg12[%c1_344, %c3_345, %c0_346, %c0_347] : memref<4x4x32x8xbf16, #tpu.memory_space<vmem>>, vector<1x1x32x8xbf16>
    %476 = vector.shape_cast %475 : vector<1x1x32x8xbf16> to vector<32x8xbf16>
    %cst_348 = arith.constant dense<0.000000e+00> : vector<8x8xf32>
    %477 = tpu.matmul %324, %476, %cst_348 {dimension_numbers = #tpu.dot_dimension_numbers<[1], [0], [0], [1], [0, 0, 1, 1], [], []>} : vector<8x32xbf16>, vector<32x8xbf16>, vector<8x8xf32> -> vector<8x8xf32>
    %c1_349 = arith.constant 1 : index
    %c3_350 = arith.constant 3 : index
    %c0_351 = arith.constant 0 : index
    %c0_352 = arith.constant 0 : index
    %478 = vector.load %arg15[%c1_349, %c3_350, %c0_351, %c0_352] : memref<4x4x1x8xf32, #tpu.memory_space<vmem>>, vector<1x1x1x8xf32>
    %479 = vector.shape_cast %478 : vector<1x1x1x8xf32> to vector<1x8xf32>
    %480 = vector.broadcast %479 : vector<1x8xf32> to vector<8x8xf32>
    %481 = arith.addf %477, %480 : vector<8x8xf32>
    %482 = arith.truncf %467 : vector<8x8xf32> to vector<8x8xbf16>
    %483 = arith.truncf %474 : vector<8x8xf32> to vector<8x8xbf16>
    %cst_353 = arith.constant dense<0.000000e+00> : vector<8x8xf32>
    %484 = tpu.matmul %482, %483, %cst_353 {dimension_numbers = #tpu.dot_dimension_numbers<[1], [1], [0], [0], [0, 0, 1, 0], [], []>} : vector<8x8xbf16>, vector<8x8xbf16>, vector<8x8xf32> -> vector<8x8xf32>
    %cst_354 = arith.constant 0.353553385 : f32
    %485 = vector.broadcast %cst_354 : f32 to vector<8x8xf32>
    %486 = arith.mulf %484, %485 : vector<8x8xf32>
    %487 = arith.addf %486, %65 : vector<8x8xf32>
    %cst_355 = arith.constant dense<0xFF800000> : vector<8xf32>
    %488 = vector.multi_reduction <maximumf>, %487, %cst_355 [1] : vector<8x8xf32> to vector<8xf32>
    %489 = vector.shape_cast %488 : vector<8xf32> to vector<8x1xf32>
    %490 = vector.broadcast %489 : vector<8x1xf32> to vector<8x8xf32>
    %491 = arith.subf %487, %490 : vector<8x8xf32>
    %492 = math.exp %491 : vector<8x8xf32>
    %cst_356 = arith.constant dense<0.000000e+00> : vector<8xf32>
    %493 = vector.multi_reduction <add>, %492, %cst_356 [1] : vector<8x8xf32> to vector<8xf32>
    %494 = vector.shape_cast %493 : vector<8xf32> to vector<8x1xf32>
    %495 = tpu.reciprocal %494 {approx = true} : vector<8x1xf32> -> vector<8x1xf32>
    %496 = vector.broadcast %495 : vector<8x1xf32> to vector<8x8xf32>
    %497 = arith.mulf %492, %496 : vector<8x8xf32>
    %498 = arith.truncf %497 : vector<8x8xf32> to vector<8x8xbf16>
    %499 = arith.truncf %481 : vector<8x8xf32> to vector<8x8xbf16>
    %cst_357 = arith.constant dense<0.000000e+00> : vector<8x8xf32>
    %500 = tpu.matmul %498, %499, %cst_357 {dimension_numbers = #tpu.dot_dimension_numbers<[1], [0], [0], [1], [0, 0, 1, 1], [], []>} : vector<8x8xbf16>, vector<8x8xbf16>, vector<8x8xf32> -> vector<8x8xf32>
    %501 = arith.truncf %500 : vector<8x8xf32> to vector<8x8xbf16>
    %c1_358 = arith.constant 1 : index
    %c3_359 = arith.constant 3 : index
    %c0_360 = arith.constant 0 : index
    %c0_361 = arith.constant 0 : index
    %502 = vector.load %arg16[%c1_358, %c3_359, %c0_360, %c0_361] : memref<4x4x8x32xbf16, #tpu.memory_space<vmem>>, vector<1x1x8x32xbf16>
    %503 = vector.shape_cast %502 : vector<1x1x8x32xbf16> to vector<8x32xbf16>
    %cst_362 = arith.constant dense<0.000000e+00> : vector<8x32xf32>
    %504 = tpu.matmul %501, %503, %cst_362 {dimension_numbers = #tpu.dot_dimension_numbers<[1], [0], [0], [1], [0, 0, 1, 1], [], []>} : vector<8x8xbf16>, vector<8x32xbf16>, vector<8x32xf32> -> vector<8x32xf32>
    %505 = arith.addf %460, %504 : vector<8x32xf32>
    %c1_363 = arith.constant 1 : index
    %c0_364 = arith.constant 0 : index
    %c0_365 = arith.constant 0 : index
    %506 = vector.load %arg17[%c1_363, %c0_364, %c0_365] : memref<4x1x32xf32, #tpu.memory_space<vmem>>, vector<1x1x32xf32>
    %507 = vector.shape_cast %506 : vector<1x1x32xf32> to vector<1x32xf32>
    %508 = vector.broadcast %507 : vector<1x32xf32> to vector<8x32xf32>
    %509 = arith.addf %505, %508 : vector<8x32xf32>
    %510 = arith.addf %323, %509 : vector<8x32xf32>
    %c1_366 = arith.constant 1 : index
    %c0_367 = arith.constant 0 : index
    %c0_368 = arith.constant 0 : index
    %511 = vector.load %arg18[%c1_366, %c0_367, %c0_368] : memref<4x1x32xf32, #tpu.memory_space<vmem>>, vector<1x1x32xf32>
    %512 = vector.shape_cast %511 : vector<1x1x32xf32> to vector<1x32xf32>
    %c1_369 = arith.constant 1 : index
    %c0_370 = arith.constant 0 : index
    %c0_371 = arith.constant 0 : index
    %513 = vector.load %arg19[%c1_369, %c0_370, %c0_371] : memref<4x1x32xf32, #tpu.memory_space<vmem>>, vector<1x1x32xf32>
    %514 = vector.shape_cast %513 : vector<1x1x32xf32> to vector<1x32xf32>
    %cst_372 = arith.constant dense<0.000000e+00> : vector<8xf32>
    %515 = vector.multi_reduction <add>, %510, %cst_372 [1] : vector<8x32xf32> to vector<8xf32>
    %516 = vector.shape_cast %515 : vector<8xf32> to vector<8x1xf32>
    %cst_373 = arith.constant 3.200000e+01 : f32
    %517 = vector.broadcast %cst_373 : f32 to vector<8x1xf32>
    %518 = arith.divf %516, %517 : vector<8x1xf32>
    %519 = vector.broadcast %518 : vector<8x1xf32> to vector<8x32xf32>
    %520 = arith.subf %510, %519 : vector<8x32xf32>
    %521 = arith.mulf %520, %520 : vector<8x32xf32>
    %cst_374 = arith.constant dense<0.000000e+00> : vector<8xf32>
    %522 = vector.multi_reduction <add>, %521, %cst_374 [1] : vector<8x32xf32> to vector<8xf32>
    %523 = vector.shape_cast %522 : vector<8xf32> to vector<8x1xf32>
    %cst_375 = arith.constant 3.200000e+01 : f32
    %524 = vector.broadcast %cst_375 : f32 to vector<8x1xf32>
    %525 = arith.divf %523, %524 : vector<8x1xf32>
    %526 = vector.broadcast %518 : vector<8x1xf32> to vector<8x32xf32>
    %527 = arith.subf %510, %526 : vector<8x32xf32>
    %cst_376 = arith.constant 9.99999974E-6 : f32
    %528 = vector.broadcast %cst_376 : f32 to vector<8x1xf32>
    %529 = arith.addf %525, %528 : vector<8x1xf32>
    %530 = math.rsqrt %529 : vector<8x1xf32>
    %531 = vector.broadcast %530 : vector<8x1xf32> to vector<8x32xf32>
    %532 = arith.mulf %527, %531 : vector<8x32xf32>
    %533 = vector.broadcast %512 : vector<1x32xf32> to vector<8x32xf32>
    %534 = arith.mulf %532, %533 : vector<8x32xf32>
    %535 = vector.broadcast %514 : vector<1x32xf32> to vector<8x32xf32>
    %536 = arith.addf %534, %535 : vector<8x32xf32>
    %537 = arith.truncf %536 : vector<8x32xf32> to vector<8x32xbf16>
    %c1_377 = arith.constant 1 : index
    %c0_378 = arith.constant 0 : index
    %c0_379 = arith.constant 0 : index
    %538 = vector.load %arg20[%c1_377, %c0_378, %c0_379] : memref<4x32x64xbf16, #tpu.memory_space<vmem>>, vector<1x32x64xbf16>
    %539 = vector.shape_cast %538 : vector<1x32x64xbf16> to vector<32x64xbf16>
    %cst_380 = arith.constant dense<0.000000e+00> : vector<8x64xf32>
    %540 = tpu.matmul %537, %539, %cst_380 {dimension_numbers = #tpu.dot_dimension_numbers<[1], [0], [0], [1], [0, 0, 1, 1], [], []>} : vector<8x32xbf16>, vector<32x64xbf16>, vector<8x64xf32> -> vector<8x64xf32>
    %c1_381 = arith.constant 1 : index
    %c0_382 = arith.constant 0 : index
    %c0_383 = arith.constant 0 : index
    %541 = vector.load %arg21[%c1_381, %c0_382, %c0_383] : memref<4x1x64xf32, #tpu.memory_space<vmem>>, vector<1x1x64xf32>
    %542 = vector.shape_cast %541 : vector<1x1x64xf32> to vector<1x64xf32>
    %543 = vector.broadcast %542 : vector<1x64xf32> to vector<8x64xf32>
    %544 = arith.addf %540, %543 : vector<8x64xf32>
    %cst_384 = arith.constant 0.000000e+00 : f32
    %545 = vector.broadcast %cst_384 : f32 to vector<8x64xf32>
    %546 = arith.maximumf %544, %545 : vector<8x64xf32>
    %547 = arith.truncf %546 : vector<8x64xf32> to vector<8x64xbf16>
    %c1_385 = arith.constant 1 : index
    %c0_386 = arith.constant 0 : index
    %c0_387 = arith.constant 0 : index
    %548 = vector.load %arg22[%c1_385, %c0_386, %c0_387] : memref<4x64x32xbf16, #tpu.memory_space<vmem>>, vector<1x64x32xbf16>
    %549 = vector.shape_cast %548 : vector<1x64x32xbf16> to vector<64x32xbf16>
    %cst_388 = arith.constant dense<0.000000e+00> : vector<8x32xf32>
    %550 = tpu.matmul %547, %549, %cst_388 {dimension_numbers = #tpu.dot_dimension_numbers<[1], [0], [0], [1], [0, 0, 1, 1], [], []>} : vector<8x64xbf16>, vector<64x32xbf16>, vector<8x32xf32> -> vector<8x32xf32>
    %c1_389 = arith.constant 1 : index
    %c0_390 = arith.constant 0 : index
    %c0_391 = arith.constant 0 : index
    %551 = vector.load %arg23[%c1_389, %c0_390, %c0_391] : memref<4x1x32xf32, #tpu.memory_space<vmem>>, vector<1x1x32xf32>
    %552 = vector.shape_cast %551 : vector<1x1x32xf32> to vector<1x32xf32>
    %553 = vector.broadcast %552 : vector<1x32xf32> to vector<8x32xf32>
    %554 = arith.addf %550, %553 : vector<8x32xf32>
    %555 = arith.addf %536, %554 : vector<8x32xf32>
    %c1_392 = arith.constant 1 : index
    %c0_393 = arith.constant 0 : index
    %c0_394 = arith.constant 0 : index
    %556 = vector.load %arg24[%c1_392, %c0_393, %c0_394] : memref<4x1x32xf32, #tpu.memory_space<vmem>>, vector<1x1x32xf32>
    %557 = vector.shape_cast %556 : vector<1x1x32xf32> to vector<1x32xf32>
    %c1_395 = arith.constant 1 : index
    %c0_396 = arith.constant 0 : index
    %c0_397 = arith.constant 0 : index
    %558 = vector.load %arg25[%c1_395, %c0_396, %c0_397] : memref<4x1x32xf32, #tpu.memory_space<vmem>>, vector<1x1x32xf32>
    %559 = vector.shape_cast %558 : vector<1x1x32xf32> to vector<1x32xf32>
    %cst_398 = arith.constant dense<0.000000e+00> : vector<8xf32>
    %560 = vector.multi_reduction <add>, %555, %cst_398 [1] : vector<8x32xf32> to vector<8xf32>
    %561 = vector.shape_cast %560 : vector<8xf32> to vector<8x1xf32>
    %cst_399 = arith.constant 3.200000e+01 : f32
    %562 = vector.broadcast %cst_399 : f32 to vector<8x1xf32>
    %563 = arith.divf %561, %562 : vector<8x1xf32>
    %564 = vector.broadcast %563 : vector<8x1xf32> to vector<8x32xf32>
    %565 = arith.subf %555, %564 : vector<8x32xf32>
    %566 = arith.mulf %565, %565 : vector<8x32xf32>
    %cst_400 = arith.constant dense<0.000000e+00> : vector<8xf32>
    %567 = vector.multi_reduction <add>, %566, %cst_400 [1] : vector<8x32xf32> to vector<8xf32>
    %568 = vector.shape_cast %567 : vector<8xf32> to vector<8x1xf32>
    %cst_401 = arith.constant 3.200000e+01 : f32
    %569 = vector.broadcast %cst_401 : f32 to vector<8x1xf32>
    %570 = arith.divf %568, %569 : vector<8x1xf32>
    %571 = vector.broadcast %563 : vector<8x1xf32> to vector<8x32xf32>
    %572 = arith.subf %555, %571 : vector<8x32xf32>
    %cst_402 = arith.constant 9.99999974E-6 : f32
    %573 = vector.broadcast %cst_402 : f32 to vector<8x1xf32>
    %574 = arith.addf %570, %573 : vector<8x1xf32>
    %575 = math.rsqrt %574 : vector<8x1xf32>
    %576 = vector.broadcast %575 : vector<8x1xf32> to vector<8x32xf32>
    %577 = arith.mulf %572, %576 : vector<8x32xf32>
    %578 = vector.broadcast %557 : vector<1x32xf32> to vector<8x32xf32>
    %579 = arith.mulf %577, %578 : vector<8x32xf32>
    %580 = vector.broadcast %559 : vector<1x32xf32> to vector<8x32xf32>
    %581 = arith.addf %579, %580 : vector<8x32xf32>
    %582 = arith.truncf %581 : vector<8x32xf32> to vector<8x32xbf16>
    %cst_403 = arith.constant 0.000000e+00 : f32
    %583 = vector.broadcast %cst_403 : f32 to vector<8x32xf32>
    %c2_404 = arith.constant 2 : index
    %c0_405 = arith.constant 0 : index
    %c0_406 = arith.constant 0 : index
    %c0_407 = arith.constant 0 : index
    %584 = vector.load %arg10[%c2_404, %c0_405, %c0_406, %c0_407] : memref<4x4x32x8xbf16, #tpu.memory_space<vmem>>, vector<1x1x32x8xbf16>
    %585 = vector.shape_cast %584 : vector<1x1x32x8xbf16> to vector<32x8xbf16>
    %cst_408 = arith.constant dense<0.000000e+00> : vector<8x8xf32>
    %586 = tpu.matmul %582, %585, %cst_408 {dimension_numbers = #tpu.dot_dimension_numbers<[1], [0], [0], [1], [0, 0, 1, 1], [], []>} : vector<8x32xbf16>, vector<32x8xbf16>, vector<8x8xf32> -> vector<8x8xf32>
    %c2_409 = arith.constant 2 : index
    %c0_410 = arith.constant 0 : index
    %c0_411 = arith.constant 0 : index
    %c0_412 = arith.constant 0 : index
    %587 = vector.load %arg13[%c2_409, %c0_410, %c0_411, %c0_412] : memref<4x4x1x8xf32, #tpu.memory_space<vmem>>, vector<1x1x1x8xf32>
    %588 = vector.shape_cast %587 : vector<1x1x1x8xf32> to vector<1x8xf32>
    %589 = vector.broadcast %588 : vector<1x8xf32> to vector<8x8xf32>
    %590 = arith.addf %586, %589 : vector<8x8xf32>
    %c2_413 = arith.constant 2 : index
    %c0_414 = arith.constant 0 : index
    %c0_415 = arith.constant 0 : index
    %c0_416 = arith.constant 0 : index
    %591 = vector.load %arg11[%c2_413, %c0_414, %c0_415, %c0_416] : memref<4x4x32x8xbf16, #tpu.memory_space<vmem>>, vector<1x1x32x8xbf16>
    %592 = vector.shape_cast %591 : vector<1x1x32x8xbf16> to vector<32x8xbf16>
    %cst_417 = arith.constant dense<0.000000e+00> : vector<8x8xf32>
    %593 = tpu.matmul %582, %592, %cst_417 {dimension_numbers = #tpu.dot_dimension_numbers<[1], [0], [0], [1], [0, 0, 1, 1], [], []>} : vector<8x32xbf16>, vector<32x8xbf16>, vector<8x8xf32> -> vector<8x8xf32>
    %c2_418 = arith.constant 2 : index
    %c0_419 = arith.constant 0 : index
    %c0_420 = arith.constant 0 : index
    %c0_421 = arith.constant 0 : index
    %594 = vector.load %arg14[%c2_418, %c0_419, %c0_420, %c0_421] : memref<4x4x1x8xf32, #tpu.memory_space<vmem>>, vector<1x1x1x8xf32>
    %595 = vector.shape_cast %594 : vector<1x1x1x8xf32> to vector<1x8xf32>
    %596 = vector.broadcast %595 : vector<1x8xf32> to vector<8x8xf32>
    %597 = arith.addf %593, %596 : vector<8x8xf32>
    %c2_422 = arith.constant 2 : index
    %c0_423 = arith.constant 0 : index
    %c0_424 = arith.constant 0 : index
    %c0_425 = arith.constant 0 : index
    %598 = vector.load %arg12[%c2_422, %c0_423, %c0_424, %c0_425] : memref<4x4x32x8xbf16, #tpu.memory_space<vmem>>, vector<1x1x32x8xbf16>
    %599 = vector.shape_cast %598 : vector<1x1x32x8xbf16> to vector<32x8xbf16>
    %cst_426 = arith.constant dense<0.000000e+00> : vector<8x8xf32>
    %600 = tpu.matmul %582, %599, %cst_426 {dimension_numbers = #tpu.dot_dimension_numbers<[1], [0], [0], [1], [0, 0, 1, 1], [], []>} : vector<8x32xbf16>, vector<32x8xbf16>, vector<8x8xf32> -> vector<8x8xf32>
    %c2_427 = arith.constant 2 : index
    %c0_428 = arith.constant 0 : index
    %c0_429 = arith.constant 0 : index
    %c0_430 = arith.constant 0 : index
    %601 = vector.load %arg15[%c2_427, %c0_428, %c0_429, %c0_430] : memref<4x4x1x8xf32, #tpu.memory_space<vmem>>, vector<1x1x1x8xf32>
    %602 = vector.shape_cast %601 : vector<1x1x1x8xf32> to vector<1x8xf32>
    %603 = vector.broadcast %602 : vector<1x8xf32> to vector<8x8xf32>
    %604 = arith.addf %600, %603 : vector<8x8xf32>
    %605 = arith.truncf %590 : vector<8x8xf32> to vector<8x8xbf16>
    %606 = arith.truncf %597 : vector<8x8xf32> to vector<8x8xbf16>
    %cst_431 = arith.constant dense<0.000000e+00> : vector<8x8xf32>
    %607 = tpu.matmul %605, %606, %cst_431 {dimension_numbers = #tpu.dot_dimension_numbers<[1], [1], [0], [0], [0, 0, 1, 0], [], []>} : vector<8x8xbf16>, vector<8x8xbf16>, vector<8x8xf32> -> vector<8x8xf32>
    %cst_432 = arith.constant 0.353553385 : f32
    %608 = vector.broadcast %cst_432 : f32 to vector<8x8xf32>
    %609 = arith.mulf %607, %608 : vector<8x8xf32>
    %610 = arith.addf %609, %65 : vector<8x8xf32>
    %cst_433 = arith.constant dense<0xFF800000> : vector<8xf32>
    %611 = vector.multi_reduction <maximumf>, %610, %cst_433 [1] : vector<8x8xf32> to vector<8xf32>
    %612 = vector.shape_cast %611 : vector<8xf32> to vector<8x1xf32>
    %613 = vector.broadcast %612 : vector<8x1xf32> to vector<8x8xf32>
    %614 = arith.subf %610, %613 : vector<8x8xf32>
    %615 = math.exp %614 : vector<8x8xf32>
    %cst_434 = arith.constant dense<0.000000e+00> : vector<8xf32>
    %616 = vector.multi_reduction <add>, %615, %cst_434 [1] : vector<8x8xf32> to vector<8xf32>
    %617 = vector.shape_cast %616 : vector<8xf32> to vector<8x1xf32>
    %618 = tpu.reciprocal %617 {approx = true} : vector<8x1xf32> -> vector<8x1xf32>
    %619 = vector.broadcast %618 : vector<8x1xf32> to vector<8x8xf32>
    %620 = arith.mulf %615, %619 : vector<8x8xf32>
    %621 = arith.truncf %620 : vector<8x8xf32> to vector<8x8xbf16>
    %622 = arith.truncf %604 : vector<8x8xf32> to vector<8x8xbf16>
    %cst_435 = arith.constant dense<0.000000e+00> : vector<8x8xf32>
    %623 = tpu.matmul %621, %622, %cst_435 {dimension_numbers = #tpu.dot_dimension_numbers<[1], [0], [0], [1], [0, 0, 1, 1], [], []>} : vector<8x8xbf16>, vector<8x8xbf16>, vector<8x8xf32> -> vector<8x8xf32>
    %624 = arith.truncf %623 : vector<8x8xf32> to vector<8x8xbf16>
    %c2_436 = arith.constant 2 : index
    %c0_437 = arith.constant 0 : index
    %c0_438 = arith.constant 0 : index
    %c0_439 = arith.constant 0 : index
    %625 = vector.load %arg16[%c2_436, %c0_437, %c0_438, %c0_439] : memref<4x4x8x32xbf16, #tpu.memory_space<vmem>>, vector<1x1x8x32xbf16>
    %626 = vector.shape_cast %625 : vector<1x1x8x32xbf16> to vector<8x32xbf16>
    %cst_440 = arith.constant dense<0.000000e+00> : vector<8x32xf32>
    %627 = tpu.matmul %624, %626, %cst_440 {dimension_numbers = #tpu.dot_dimension_numbers<[1], [0], [0], [1], [0, 0, 1, 1], [], []>} : vector<8x8xbf16>, vector<8x32xbf16>, vector<8x32xf32> -> vector<8x32xf32>
    %628 = arith.addf %583, %627 : vector<8x32xf32>
    %c2_441 = arith.constant 2 : index
    %c1_442 = arith.constant 1 : index
    %c0_443 = arith.constant 0 : index
    %c0_444 = arith.constant 0 : index
    %629 = vector.load %arg10[%c2_441, %c1_442, %c0_443, %c0_444] : memref<4x4x32x8xbf16, #tpu.memory_space<vmem>>, vector<1x1x32x8xbf16>
    %630 = vector.shape_cast %629 : vector<1x1x32x8xbf16> to vector<32x8xbf16>
    %cst_445 = arith.constant dense<0.000000e+00> : vector<8x8xf32>
    %631 = tpu.matmul %582, %630, %cst_445 {dimension_numbers = #tpu.dot_dimension_numbers<[1], [0], [0], [1], [0, 0, 1, 1], [], []>} : vector<8x32xbf16>, vector<32x8xbf16>, vector<8x8xf32> -> vector<8x8xf32>
    %c2_446 = arith.constant 2 : index
    %c1_447 = arith.constant 1 : index
    %c0_448 = arith.constant 0 : index
    %c0_449 = arith.constant 0 : index
    %632 = vector.load %arg13[%c2_446, %c1_447, %c0_448, %c0_449] : memref<4x4x1x8xf32, #tpu.memory_space<vmem>>, vector<1x1x1x8xf32>
    %633 = vector.shape_cast %632 : vector<1x1x1x8xf32> to vector<1x8xf32>
    %634 = vector.broadcast %633 : vector<1x8xf32> to vector<8x8xf32>
    %635 = arith.addf %631, %634 : vector<8x8xf32>
    %c2_450 = arith.constant 2 : index
    %c1_451 = arith.constant 1 : index
    %c0_452 = arith.constant 0 : index
    %c0_453 = arith.constant 0 : index
    %636 = vector.load %arg11[%c2_450, %c1_451, %c0_452, %c0_453] : memref<4x4x32x8xbf16, #tpu.memory_space<vmem>>, vector<1x1x32x8xbf16>
    %637 = vector.shape_cast %636 : vector<1x1x32x8xbf16> to vector<32x8xbf16>
    %cst_454 = arith.constant dense<0.000000e+00> : vector<8x8xf32>
    %638 = tpu.matmul %582, %637, %cst_454 {dimension_numbers = #tpu.dot_dimension_numbers<[1], [0], [0], [1], [0, 0, 1, 1], [], []>} : vector<8x32xbf16>, vector<32x8xbf16>, vector<8x8xf32> -> vector<8x8xf32>
    %c2_455 = arith.constant 2 : index
    %c1_456 = arith.constant 1 : index
    %c0_457 = arith.constant 0 : index
    %c0_458 = arith.constant 0 : index
    %639 = vector.load %arg14[%c2_455, %c1_456, %c0_457, %c0_458] : memref<4x4x1x8xf32, #tpu.memory_space<vmem>>, vector<1x1x1x8xf32>
    %640 = vector.shape_cast %639 : vector<1x1x1x8xf32> to vector<1x8xf32>
    %641 = vector.broadcast %640 : vector<1x8xf32> to vector<8x8xf32>
    %642 = arith.addf %638, %641 : vector<8x8xf32>
    %c2_459 = arith.constant 2 : index
    %c1_460 = arith.constant 1 : index
    %c0_461 = arith.constant 0 : index
    %c0_462 = arith.constant 0 : index
    %643 = vector.load %arg12[%c2_459, %c1_460, %c0_461, %c0_462] : memref<4x4x32x8xbf16, #tpu.memory_space<vmem>>, vector<1x1x32x8xbf16>
    %644 = vector.shape_cast %643 : vector<1x1x32x8xbf16> to vector<32x8xbf16>
    %cst_463 = arith.constant dense<0.000000e+00> : vector<8x8xf32>
    %645 = tpu.matmul %582, %644, %cst_463 {dimension_numbers = #tpu.dot_dimension_numbers<[1], [0], [0], [1], [0, 0, 1, 1], [], []>} : vector<8x32xbf16>, vector<32x8xbf16>, vector<8x8xf32> -> vector<8x8xf32>
    %c2_464 = arith.constant 2 : index
    %c1_465 = arith.constant 1 : index
    %c0_466 = arith.constant 0 : index
    %c0_467 = arith.constant 0 : index
    %646 = vector.load %arg15[%c2_464, %c1_465, %c0_466, %c0_467] : memref<4x4x1x8xf32, #tpu.memory_space<vmem>>, vector<1x1x1x8xf32>
    %647 = vector.shape_cast %646 : vector<1x1x1x8xf32> to vector<1x8xf32>
    %648 = vector.broadcast %647 : vector<1x8xf32> to vector<8x8xf32>
    %649 = arith.addf %645, %648 : vector<8x8xf32>
    %650 = arith.truncf %635 : vector<8x8xf32> to vector<8x8xbf16>
    %651 = arith.truncf %642 : vector<8x8xf32> to vector<8x8xbf16>
    %cst_468 = arith.constant dense<0.000000e+00> : vector<8x8xf32>
    %652 = tpu.matmul %650, %651, %cst_468 {dimension_numbers = #tpu.dot_dimension_numbers<[1], [1], [0], [0], [0, 0, 1, 0], [], []>} : vector<8x8xbf16>, vector<8x8xbf16>, vector<8x8xf32> -> vector<8x8xf32>
    %cst_469 = arith.constant 0.353553385 : f32
    %653 = vector.broadcast %cst_469 : f32 to vector<8x8xf32>
    %654 = arith.mulf %652, %653 : vector<8x8xf32>
    %655 = arith.addf %654, %65 : vector<8x8xf32>
    %cst_470 = arith.constant dense<0xFF800000> : vector<8xf32>
    %656 = vector.multi_reduction <maximumf>, %655, %cst_470 [1] : vector<8x8xf32> to vector<8xf32>
    %657 = vector.shape_cast %656 : vector<8xf32> to vector<8x1xf32>
    %658 = vector.broadcast %657 : vector<8x1xf32> to vector<8x8xf32>
    %659 = arith.subf %655, %658 : vector<8x8xf32>
    %660 = math.exp %659 : vector<8x8xf32>
    %cst_471 = arith.constant dense<0.000000e+00> : vector<8xf32>
    %661 = vector.multi_reduction <add>, %660, %cst_471 [1] : vector<8x8xf32> to vector<8xf32>
    %662 = vector.shape_cast %661 : vector<8xf32> to vector<8x1xf32>
    %663 = tpu.reciprocal %662 {approx = true} : vector<8x1xf32> -> vector<8x1xf32>
    %664 = vector.broadcast %663 : vector<8x1xf32> to vector<8x8xf32>
    %665 = arith.mulf %660, %664 : vector<8x8xf32>
    %666 = arith.truncf %665 : vector<8x8xf32> to vector<8x8xbf16>
    %667 = arith.truncf %649 : vector<8x8xf32> to vector<8x8xbf16>
    %cst_472 = arith.constant dense<0.000000e+00> : vector<8x8xf32>
    %668 = tpu.matmul %666, %667, %cst_472 {dimension_numbers = #tpu.dot_dimension_numbers<[1], [0], [0], [1], [0, 0, 1, 1], [], []>} : vector<8x8xbf16>, vector<8x8xbf16>, vector<8x8xf32> -> vector<8x8xf32>
    %669 = arith.truncf %668 : vector<8x8xf32> to vector<8x8xbf16>
    %c2_473 = arith.constant 2 : index
    %c1_474 = arith.constant 1 : index
    %c0_475 = arith.constant 0 : index
    %c0_476 = arith.constant 0 : index
    %670 = vector.load %arg16[%c2_473, %c1_474, %c0_475, %c0_476] : memref<4x4x8x32xbf16, #tpu.memory_space<vmem>>, vector<1x1x8x32xbf16>
    %671 = vector.shape_cast %670 : vector<1x1x8x32xbf16> to vector<8x32xbf16>
    %cst_477 = arith.constant dense<0.000000e+00> : vector<8x32xf32>
    %672 = tpu.matmul %669, %671, %cst_477 {dimension_numbers = #tpu.dot_dimension_numbers<[1], [0], [0], [1], [0, 0, 1, 1], [], []>} : vector<8x8xbf16>, vector<8x32xbf16>, vector<8x32xf32> -> vector<8x32xf32>
    %673 = arith.addf %628, %672 : vector<8x32xf32>
    %c2_478 = arith.constant 2 : index
    %c2_479 = arith.constant 2 : index
    %c0_480 = arith.constant 0 : index
    %c0_481 = arith.constant 0 : index
    %674 = vector.load %arg10[%c2_478, %c2_479, %c0_480, %c0_481] : memref<4x4x32x8xbf16, #tpu.memory_space<vmem>>, vector<1x1x32x8xbf16>
    %675 = vector.shape_cast %674 : vector<1x1x32x8xbf16> to vector<32x8xbf16>
    %cst_482 = arith.constant dense<0.000000e+00> : vector<8x8xf32>
    %676 = tpu.matmul %582, %675, %cst_482 {dimension_numbers = #tpu.dot_dimension_numbers<[1], [0], [0], [1], [0, 0, 1, 1], [], []>} : vector<8x32xbf16>, vector<32x8xbf16>, vector<8x8xf32> -> vector<8x8xf32>
    %c2_483 = arith.constant 2 : index
    %c2_484 = arith.constant 2 : index
    %c0_485 = arith.constant 0 : index
    %c0_486 = arith.constant 0 : index
    %677 = vector.load %arg13[%c2_483, %c2_484, %c0_485, %c0_486] : memref<4x4x1x8xf32, #tpu.memory_space<vmem>>, vector<1x1x1x8xf32>
    %678 = vector.shape_cast %677 : vector<1x1x1x8xf32> to vector<1x8xf32>
    %679 = vector.broadcast %678 : vector<1x8xf32> to vector<8x8xf32>
    %680 = arith.addf %676, %679 : vector<8x8xf32>
    %c2_487 = arith.constant 2 : index
    %c2_488 = arith.constant 2 : index
    %c0_489 = arith.constant 0 : index
    %c0_490 = arith.constant 0 : index
    %681 = vector.load %arg11[%c2_487, %c2_488, %c0_489, %c0_490] : memref<4x4x32x8xbf16, #tpu.memory_space<vmem>>, vector<1x1x32x8xbf16>
    %682 = vector.shape_cast %681 : vector<1x1x32x8xbf16> to vector<32x8xbf16>
    %cst_491 = arith.constant dense<0.000000e+00> : vector<8x8xf32>
    %683 = tpu.matmul %582, %682, %cst_491 {dimension_numbers = #tpu.dot_dimension_numbers<[1], [0], [0], [1], [0, 0, 1, 1], [], []>} : vector<8x32xbf16>, vector<32x8xbf16>, vector<8x8xf32> -> vector<8x8xf32>
    %c2_492 = arith.constant 2 : index
    %c2_493 = arith.constant 2 : index
    %c0_494 = arith.constant 0 : index
    %c0_495 = arith.constant 0 : index
    %684 = vector.load %arg14[%c2_492, %c2_493, %c0_494, %c0_495] : memref<4x4x1x8xf32, #tpu.memory_space<vmem>>, vector<1x1x1x8xf32>
    %685 = vector.shape_cast %684 : vector<1x1x1x8xf32> to vector<1x8xf32>
    %686 = vector.broadcast %685 : vector<1x8xf32> to vector<8x8xf32>
    %687 = arith.addf %683, %686 : vector<8x8xf32>
    %c2_496 = arith.constant 2 : index
    %c2_497 = arith.constant 2 : index
    %c0_498 = arith.constant 0 : index
    %c0_499 = arith.constant 0 : index
    %688 = vector.load %arg12[%c2_496, %c2_497, %c0_498, %c0_499] : memref<4x4x32x8xbf16, #tpu.memory_space<vmem>>, vector<1x1x32x8xbf16>
    %689 = vector.shape_cast %688 : vector<1x1x32x8xbf16> to vector<32x8xbf16>
    %cst_500 = arith.constant dense<0.000000e+00> : vector<8x8xf32>
    %690 = tpu.matmul %582, %689, %cst_500 {dimension_numbers = #tpu.dot_dimension_numbers<[1], [0], [0], [1], [0, 0, 1, 1], [], []>} : vector<8x32xbf16>, vector<32x8xbf16>, vector<8x8xf32> -> vector<8x8xf32>
    %c2_501 = arith.constant 2 : index
    %c2_502 = arith.constant 2 : index
    %c0_503 = arith.constant 0 : index
    %c0_504 = arith.constant 0 : index
    %691 = vector.load %arg15[%c2_501, %c2_502, %c0_503, %c0_504] : memref<4x4x1x8xf32, #tpu.memory_space<vmem>>, vector<1x1x1x8xf32>
    %692 = vector.shape_cast %691 : vector<1x1x1x8xf32> to vector<1x8xf32>
    %693 = vector.broadcast %692 : vector<1x8xf32> to vector<8x8xf32>
    %694 = arith.addf %690, %693 : vector<8x8xf32>
    %695 = arith.truncf %680 : vector<8x8xf32> to vector<8x8xbf16>
    %696 = arith.truncf %687 : vector<8x8xf32> to vector<8x8xbf16>
    %cst_505 = arith.constant dense<0.000000e+00> : vector<8x8xf32>
    %697 = tpu.matmul %695, %696, %cst_505 {dimension_numbers = #tpu.dot_dimension_numbers<[1], [1], [0], [0], [0, 0, 1, 0], [], []>} : vector<8x8xbf16>, vector<8x8xbf16>, vector<8x8xf32> -> vector<8x8xf32>
    %cst_506 = arith.constant 0.353553385 : f32
    %698 = vector.broadcast %cst_506 : f32 to vector<8x8xf32>
    %699 = arith.mulf %697, %698 : vector<8x8xf32>
    %700 = arith.addf %699, %65 : vector<8x8xf32>
    %cst_507 = arith.constant dense<0xFF800000> : vector<8xf32>
    %701 = vector.multi_reduction <maximumf>, %700, %cst_507 [1] : vector<8x8xf32> to vector<8xf32>
    %702 = vector.shape_cast %701 : vector<8xf32> to vector<8x1xf32>
    %703 = vector.broadcast %702 : vector<8x1xf32> to vector<8x8xf32>
    %704 = arith.subf %700, %703 : vector<8x8xf32>
    %705 = math.exp %704 : vector<8x8xf32>
    %cst_508 = arith.constant dense<0.000000e+00> : vector<8xf32>
    %706 = vector.multi_reduction <add>, %705, %cst_508 [1] : vector<8x8xf32> to vector<8xf32>
    %707 = vector.shape_cast %706 : vector<8xf32> to vector<8x1xf32>
    %708 = tpu.reciprocal %707 {approx = true} : vector<8x1xf32> -> vector<8x1xf32>
    %709 = vector.broadcast %708 : vector<8x1xf32> to vector<8x8xf32>
    %710 = arith.mulf %705, %709 : vector<8x8xf32>
    %711 = arith.truncf %710 : vector<8x8xf32> to vector<8x8xbf16>
    %712 = arith.truncf %694 : vector<8x8xf32> to vector<8x8xbf16>
    %cst_509 = arith.constant dense<0.000000e+00> : vector<8x8xf32>
    %713 = tpu.matmul %711, %712, %cst_509 {dimension_numbers = #tpu.dot_dimension_numbers<[1], [0], [0], [1], [0, 0, 1, 1], [], []>} : vector<8x8xbf16>, vector<8x8xbf16>, vector<8x8xf32> -> vector<8x8xf32>
    %714 = arith.truncf %713 : vector<8x8xf32> to vector<8x8xbf16>
    %c2_510 = arith.constant 2 : index
    %c2_511 = arith.constant 2 : index
    %c0_512 = arith.constant 0 : index
    %c0_513 = arith.constant 0 : index
    %715 = vector.load %arg16[%c2_510, %c2_511, %c0_512, %c0_513] : memref<4x4x8x32xbf16, #tpu.memory_space<vmem>>, vector<1x1x8x32xbf16>
    %716 = vector.shape_cast %715 : vector<1x1x8x32xbf16> to vector<8x32xbf16>
    %cst_514 = arith.constant dense<0.000000e+00> : vector<8x32xf32>
    %717 = tpu.matmul %714, %716, %cst_514 {dimension_numbers = #tpu.dot_dimension_numbers<[1], [0], [0], [1], [0, 0, 1, 1], [], []>} : vector<8x8xbf16>, vector<8x32xbf16>, vector<8x32xf32> -> vector<8x32xf32>
    %718 = arith.addf %673, %717 : vector<8x32xf32>
    %c2_515 = arith.constant 2 : index
    %c3_516 = arith.constant 3 : index
    %c0_517 = arith.constant 0 : index
    %c0_518 = arith.constant 0 : index
    %719 = vector.load %arg10[%c2_515, %c3_516, %c0_517, %c0_518] : memref<4x4x32x8xbf16, #tpu.memory_space<vmem>>, vector<1x1x32x8xbf16>
    %720 = vector.shape_cast %719 : vector<1x1x32x8xbf16> to vector<32x8xbf16>
    %cst_519 = arith.constant dense<0.000000e+00> : vector<8x8xf32>
    %721 = tpu.matmul %582, %720, %cst_519 {dimension_numbers = #tpu.dot_dimension_numbers<[1], [0], [0], [1], [0, 0, 1, 1], [], []>} : vector<8x32xbf16>, vector<32x8xbf16>, vector<8x8xf32> -> vector<8x8xf32>
    %c2_520 = arith.constant 2 : index
    %c3_521 = arith.constant 3 : index
    %c0_522 = arith.constant 0 : index
    %c0_523 = arith.constant 0 : index
    %722 = vector.load %arg13[%c2_520, %c3_521, %c0_522, %c0_523] : memref<4x4x1x8xf32, #tpu.memory_space<vmem>>, vector<1x1x1x8xf32>
    %723 = vector.shape_cast %722 : vector<1x1x1x8xf32> to vector<1x8xf32>
    %724 = vector.broadcast %723 : vector<1x8xf32> to vector<8x8xf32>
    %725 = arith.addf %721, %724 : vector<8x8xf32>
    %c2_524 = arith.constant 2 : index
    %c3_525 = arith.constant 3 : index
    %c0_526 = arith.constant 0 : index
    %c0_527 = arith.constant 0 : index
    %726 = vector.load %arg11[%c2_524, %c3_525, %c0_526, %c0_527] : memref<4x4x32x8xbf16, #tpu.memory_space<vmem>>, vector<1x1x32x8xbf16>
    %727 = vector.shape_cast %726 : vector<1x1x32x8xbf16> to vector<32x8xbf16>
    %cst_528 = arith.constant dense<0.000000e+00> : vector<8x8xf32>
    %728 = tpu.matmul %582, %727, %cst_528 {dimension_numbers = #tpu.dot_dimension_numbers<[1], [0], [0], [1], [0, 0, 1, 1], [], []>} : vector<8x32xbf16>, vector<32x8xbf16>, vector<8x8xf32> -> vector<8x8xf32>
    %c2_529 = arith.constant 2 : index
    %c3_530 = arith.constant 3 : index
    %c0_531 = arith.constant 0 : index
    %c0_532 = arith.constant 0 : index
    %729 = vector.load %arg14[%c2_529, %c3_530, %c0_531, %c0_532] : memref<4x4x1x8xf32, #tpu.memory_space<vmem>>, vector<1x1x1x8xf32>
    %730 = vector.shape_cast %729 : vector<1x1x1x8xf32> to vector<1x8xf32>
    %731 = vector.broadcast %730 : vector<1x8xf32> to vector<8x8xf32>
    %732 = arith.addf %728, %731 : vector<8x8xf32>
    %c2_533 = arith.constant 2 : index
    %c3_534 = arith.constant 3 : index
    %c0_535 = arith.constant 0 : index
    %c0_536 = arith.constant 0 : index
    %733 = vector.load %arg12[%c2_533, %c3_534, %c0_535, %c0_536] : memref<4x4x32x8xbf16, #tpu.memory_space<vmem>>, vector<1x1x32x8xbf16>
    %734 = vector.shape_cast %733 : vector<1x1x32x8xbf16> to vector<32x8xbf16>
    %cst_537 = arith.constant dense<0.000000e+00> : vector<8x8xf32>
    %735 = tpu.matmul %582, %734, %cst_537 {dimension_numbers = #tpu.dot_dimension_numbers<[1], [0], [0], [1], [0, 0, 1, 1], [], []>} : vector<8x32xbf16>, vector<32x8xbf16>, vector<8x8xf32> -> vector<8x8xf32>
    %c2_538 = arith.constant 2 : index
    %c3_539 = arith.constant 3 : index
    %c0_540 = arith.constant 0 : index
    %c0_541 = arith.constant 0 : index
    %736 = vector.load %arg15[%c2_538, %c3_539, %c0_540, %c0_541] : memref<4x4x1x8xf32, #tpu.memory_space<vmem>>, vector<1x1x1x8xf32>
    %737 = vector.shape_cast %736 : vector<1x1x1x8xf32> to vector<1x8xf32>
    %738 = vector.broadcast %737 : vector<1x8xf32> to vector<8x8xf32>
    %739 = arith.addf %735, %738 : vector<8x8xf32>
    %740 = arith.truncf %725 : vector<8x8xf32> to vector<8x8xbf16>
    %741 = arith.truncf %732 : vector<8x8xf32> to vector<8x8xbf16>
    %cst_542 = arith.constant dense<0.000000e+00> : vector<8x8xf32>
    %742 = tpu.matmul %740, %741, %cst_542 {dimension_numbers = #tpu.dot_dimension_numbers<[1], [1], [0], [0], [0, 0, 1, 0], [], []>} : vector<8x8xbf16>, vector<8x8xbf16>, vector<8x8xf32> -> vector<8x8xf32>
    %cst_543 = arith.constant 0.353553385 : f32
    %743 = vector.broadcast %cst_543 : f32 to vector<8x8xf32>
    %744 = arith.mulf %742, %743 : vector<8x8xf32>
    %745 = arith.addf %744, %65 : vector<8x8xf32>
    %cst_544 = arith.constant dense<0xFF800000> : vector<8xf32>
    %746 = vector.multi_reduction <maximumf>, %745, %cst_544 [1] : vector<8x8xf32> to vector<8xf32>
    %747 = vector.shape_cast %746 : vector<8xf32> to vector<8x1xf32>
    %748 = vector.broadcast %747 : vector<8x1xf32> to vector<8x8xf32>
    %749 = arith.subf %745, %748 : vector<8x8xf32>
    %750 = math.exp %749 : vector<8x8xf32>
    %cst_545 = arith.constant dense<0.000000e+00> : vector<8xf32>
    %751 = vector.multi_reduction <add>, %750, %cst_545 [1] : vector<8x8xf32> to vector<8xf32>
    %752 = vector.shape_cast %751 : vector<8xf32> to vector<8x1xf32>
    %753 = tpu.reciprocal %752 {approx = true} : vector<8x1xf32> -> vector<8x1xf32>
    %754 = vector.broadcast %753 : vector<8x1xf32> to vector<8x8xf32>
    %755 = arith.mulf %750, %754 : vector<8x8xf32>
    %756 = arith.truncf %755 : vector<8x8xf32> to vector<8x8xbf16>
    %757 = arith.truncf %739 : vector<8x8xf32> to vector<8x8xbf16>
    %cst_546 = arith.constant dense<0.000000e+00> : vector<8x8xf32>
    %758 = tpu.matmul %756, %757, %cst_546 {dimension_numbers = #tpu.dot_dimension_numbers<[1], [0], [0], [1], [0, 0, 1, 1], [], []>} : vector<8x8xbf16>, vector<8x8xbf16>, vector<8x8xf32> -> vector<8x8xf32>
    %759 = arith.truncf %758 : vector<8x8xf32> to vector<8x8xbf16>
    %c2_547 = arith.constant 2 : index
    %c3_548 = arith.constant 3 : index
    %c0_549 = arith.constant 0 : index
    %c0_550 = arith.constant 0 : index
    %760 = vector.load %arg16[%c2_547, %c3_548, %c0_549, %c0_550] : memref<4x4x8x32xbf16, #tpu.memory_space<vmem>>, vector<1x1x8x32xbf16>
    %761 = vector.shape_cast %760 : vector<1x1x8x32xbf16> to vector<8x32xbf16>
    %cst_551 = arith.constant dense<0.000000e+00> : vector<8x32xf32>
    %762 = tpu.matmul %759, %761, %cst_551 {dimension_numbers = #tpu.dot_dimension_numbers<[1], [0], [0], [1], [0, 0, 1, 1], [], []>} : vector<8x8xbf16>, vector<8x32xbf16>, vector<8x32xf32> -> vector<8x32xf32>
    %763 = arith.addf %718, %762 : vector<8x32xf32>
    %c2_552 = arith.constant 2 : index
    %c0_553 = arith.constant 0 : index
    %c0_554 = arith.constant 0 : index
    %764 = vector.load %arg17[%c2_552, %c0_553, %c0_554] : memref<4x1x32xf32, #tpu.memory_space<vmem>>, vector<1x1x32xf32>
    %765 = vector.shape_cast %764 : vector<1x1x32xf32> to vector<1x32xf32>
    %766 = vector.broadcast %765 : vector<1x32xf32> to vector<8x32xf32>
    %767 = arith.addf %763, %766 : vector<8x32xf32>
    %768 = arith.addf %581, %767 : vector<8x32xf32>
    %c2_555 = arith.constant 2 : index
    %c0_556 = arith.constant 0 : index
    %c0_557 = arith.constant 0 : index
    %769 = vector.load %arg18[%c2_555, %c0_556, %c0_557] : memref<4x1x32xf32, #tpu.memory_space<vmem>>, vector<1x1x32xf32>
    %770 = vector.shape_cast %769 : vector<1x1x32xf32> to vector<1x32xf32>
    %c2_558 = arith.constant 2 : index
    %c0_559 = arith.constant 0 : index
    %c0_560 = arith.constant 0 : index
    %771 = vector.load %arg19[%c2_558, %c0_559, %c0_560] : memref<4x1x32xf32, #tpu.memory_space<vmem>>, vector<1x1x32xf32>
    %772 = vector.shape_cast %771 : vector<1x1x32xf32> to vector<1x32xf32>
    %cst_561 = arith.constant dense<0.000000e+00> : vector<8xf32>
    %773 = vector.multi_reduction <add>, %768, %cst_561 [1] : vector<8x32xf32> to vector<8xf32>
    %774 = vector.shape_cast %773 : vector<8xf32> to vector<8x1xf32>
    %cst_562 = arith.constant 3.200000e+01 : f32
    %775 = vector.broadcast %cst_562 : f32 to vector<8x1xf32>
    %776 = arith.divf %774, %775 : vector<8x1xf32>
    %777 = vector.broadcast %776 : vector<8x1xf32> to vector<8x32xf32>
    %778 = arith.subf %768, %777 : vector<8x32xf32>
    %779 = arith.mulf %778, %778 : vector<8x32xf32>
    %cst_563 = arith.constant dense<0.000000e+00> : vector<8xf32>
    %780 = vector.multi_reduction <add>, %779, %cst_563 [1] : vector<8x32xf32> to vector<8xf32>
    %781 = vector.shape_cast %780 : vector<8xf32> to vector<8x1xf32>
    %cst_564 = arith.constant 3.200000e+01 : f32
    %782 = vector.broadcast %cst_564 : f32 to vector<8x1xf32>
    %783 = arith.divf %781, %782 : vector<8x1xf32>
    %784 = vector.broadcast %776 : vector<8x1xf32> to vector<8x32xf32>
    %785 = arith.subf %768, %784 : vector<8x32xf32>
    %cst_565 = arith.constant 9.99999974E-6 : f32
    %786 = vector.broadcast %cst_565 : f32 to vector<8x1xf32>
    %787 = arith.addf %783, %786 : vector<8x1xf32>
    %788 = math.rsqrt %787 : vector<8x1xf32>
    %789 = vector.broadcast %788 : vector<8x1xf32> to vector<8x32xf32>
    %790 = arith.mulf %785, %789 : vector<8x32xf32>
    %791 = vector.broadcast %770 : vector<1x32xf32> to vector<8x32xf32>
    %792 = arith.mulf %790, %791 : vector<8x32xf32>
    %793 = vector.broadcast %772 : vector<1x32xf32> to vector<8x32xf32>
    %794 = arith.addf %792, %793 : vector<8x32xf32>
    %795 = arith.truncf %794 : vector<8x32xf32> to vector<8x32xbf16>
    %c2_566 = arith.constant 2 : index
    %c0_567 = arith.constant 0 : index
    %c0_568 = arith.constant 0 : index
    %796 = vector.load %arg20[%c2_566, %c0_567, %c0_568] : memref<4x32x64xbf16, #tpu.memory_space<vmem>>, vector<1x32x64xbf16>
    %797 = vector.shape_cast %796 : vector<1x32x64xbf16> to vector<32x64xbf16>
    %cst_569 = arith.constant dense<0.000000e+00> : vector<8x64xf32>
    %798 = tpu.matmul %795, %797, %cst_569 {dimension_numbers = #tpu.dot_dimension_numbers<[1], [0], [0], [1], [0, 0, 1, 1], [], []>} : vector<8x32xbf16>, vector<32x64xbf16>, vector<8x64xf32> -> vector<8x64xf32>
    %c2_570 = arith.constant 2 : index
    %c0_571 = arith.constant 0 : index
    %c0_572 = arith.constant 0 : index
    %799 = vector.load %arg21[%c2_570, %c0_571, %c0_572] : memref<4x1x64xf32, #tpu.memory_space<vmem>>, vector<1x1x64xf32>
    %800 = vector.shape_cast %799 : vector<1x1x64xf32> to vector<1x64xf32>
    %801 = vector.broadcast %800 : vector<1x64xf32> to vector<8x64xf32>
    %802 = arith.addf %798, %801 : vector<8x64xf32>
    %cst_573 = arith.constant 0.000000e+00 : f32
    %803 = vector.broadcast %cst_573 : f32 to vector<8x64xf32>
    %804 = arith.maximumf %802, %803 : vector<8x64xf32>
    %805 = arith.truncf %804 : vector<8x64xf32> to vector<8x64xbf16>
    %c2_574 = arith.constant 2 : index
    %c0_575 = arith.constant 0 : index
    %c0_576 = arith.constant 0 : index
    %806 = vector.load %arg22[%c2_574, %c0_575, %c0_576] : memref<4x64x32xbf16, #tpu.memory_space<vmem>>, vector<1x64x32xbf16>
    %807 = vector.shape_cast %806 : vector<1x64x32xbf16> to vector<64x32xbf16>
    %cst_577 = arith.constant dense<0.000000e+00> : vector<8x32xf32>
    %808 = tpu.matmul %805, %807, %cst_577 {dimension_numbers = #tpu.dot_dimension_numbers<[1], [0], [0], [1], [0, 0, 1, 1], [], []>} : vector<8x64xbf16>, vector<64x32xbf16>, vector<8x32xf32> -> vector<8x32xf32>
    %c2_578 = arith.constant 2 : index
    %c0_579 = arith.constant 0 : index
    %c0_580 = arith.constant 0 : index
    %809 = vector.load %arg23[%c2_578, %c0_579, %c0_580] : memref<4x1x32xf32, #tpu.memory_space<vmem>>, vector<1x1x32xf32>
    %810 = vector.shape_cast %809 : vector<1x1x32xf32> to vector<1x32xf32>
    %811 = vector.broadcast %810 : vector<1x32xf32> to vector<8x32xf32>
    %812 = arith.addf %808, %811 : vector<8x32xf32>
    %813 = arith.addf %794, %812 : vector<8x32xf32>
    %c2_581 = arith.constant 2 : index
    %c0_582 = arith.constant 0 : index
    %c0_583 = arith.constant 0 : index
    %814 = vector.load %arg24[%c2_581, %c0_582, %c0_583] : memref<4x1x32xf32, #tpu.memory_space<vmem>>, vector<1x1x32xf32>
    %815 = vector.shape_cast %814 : vector<1x1x32xf32> to vector<1x32xf32>
    %c2_584 = arith.constant 2 : index
    %c0_585 = arith.constant 0 : index
    %c0_586 = arith.constant 0 : index
    %816 = vector.load %arg25[%c2_584, %c0_585, %c0_586] : memref<4x1x32xf32, #tpu.memory_space<vmem>>, vector<1x1x32xf32>
    %817 = vector.shape_cast %816 : vector<1x1x32xf32> to vector<1x32xf32>
    %cst_587 = arith.constant dense<0.000000e+00> : vector<8xf32>
    %818 = vector.multi_reduction <add>, %813, %cst_587 [1] : vector<8x32xf32> to vector<8xf32>
    %819 = vector.shape_cast %818 : vector<8xf32> to vector<8x1xf32>
    %cst_588 = arith.constant 3.200000e+01 : f32
    %820 = vector.broadcast %cst_588 : f32 to vector<8x1xf32>
    %821 = arith.divf %819, %820 : vector<8x1xf32>
    %822 = vector.broadcast %821 : vector<8x1xf32> to vector<8x32xf32>
    %823 = arith.subf %813, %822 : vector<8x32xf32>
    %824 = arith.mulf %823, %823 : vector<8x32xf32>
    %cst_589 = arith.constant dense<0.000000e+00> : vector<8xf32>
    %825 = vector.multi_reduction <add>, %824, %cst_589 [1] : vector<8x32xf32> to vector<8xf32>
    %826 = vector.shape_cast %825 : vector<8xf32> to vector<8x1xf32>
    %cst_590 = arith.constant 3.200000e+01 : f32
    %827 = vector.broadcast %cst_590 : f32 to vector<8x1xf32>
    %828 = arith.divf %826, %827 : vector<8x1xf32>
    %829 = vector.broadcast %821 : vector<8x1xf32> to vector<8x32xf32>
    %830 = arith.subf %813, %829 : vector<8x32xf32>
    %cst_591 = arith.constant 9.99999974E-6 : f32
    %831 = vector.broadcast %cst_591 : f32 to vector<8x1xf32>
    %832 = arith.addf %828, %831 : vector<8x1xf32>
    %833 = math.rsqrt %832 : vector<8x1xf32>
    %834 = vector.broadcast %833 : vector<8x1xf32> to vector<8x32xf32>
    %835 = arith.mulf %830, %834 : vector<8x32xf32>
    %836 = vector.broadcast %815 : vector<1x32xf32> to vector<8x32xf32>
    %837 = arith.mulf %835, %836 : vector<8x32xf32>
    %838 = vector.broadcast %817 : vector<1x32xf32> to vector<8x32xf32>
    %839 = arith.addf %837, %838 : vector<8x32xf32>
    %840 = arith.truncf %839 : vector<8x32xf32> to vector<8x32xbf16>
    %cst_592 = arith.constant 0.000000e+00 : f32
    %841 = vector.broadcast %cst_592 : f32 to vector<8x32xf32>
    %c3_593 = arith.constant 3 : index
    %c0_594 = arith.constant 0 : index
    %c0_595 = arith.constant 0 : index
    %c0_596 = arith.constant 0 : index
    %842 = vector.load %arg10[%c3_593, %c0_594, %c0_595, %c0_596] : memref<4x4x32x8xbf16, #tpu.memory_space<vmem>>, vector<1x1x32x8xbf16>
    %843 = vector.shape_cast %842 : vector<1x1x32x8xbf16> to vector<32x8xbf16>
    %cst_597 = arith.constant dense<0.000000e+00> : vector<8x8xf32>
    %844 = tpu.matmul %840, %843, %cst_597 {dimension_numbers = #tpu.dot_dimension_numbers<[1], [0], [0], [1], [0, 0, 1, 1], [], []>} : vector<8x32xbf16>, vector<32x8xbf16>, vector<8x8xf32> -> vector<8x8xf32>
    %c3_598 = arith.constant 3 : index
    %c0_599 = arith.constant 0 : index
    %c0_600 = arith.constant 0 : index
    %c0_601 = arith.constant 0 : index
    %845 = vector.load %arg13[%c3_598, %c0_599, %c0_600, %c0_601] : memref<4x4x1x8xf32, #tpu.memory_space<vmem>>, vector<1x1x1x8xf32>
    %846 = vector.shape_cast %845 : vector<1x1x1x8xf32> to vector<1x8xf32>
    %847 = vector.broadcast %846 : vector<1x8xf32> to vector<8x8xf32>
    %848 = arith.addf %844, %847 : vector<8x8xf32>
    %c3_602 = arith.constant 3 : index
    %c0_603 = arith.constant 0 : index
    %c0_604 = arith.constant 0 : index
    %c0_605 = arith.constant 0 : index
    %849 = vector.load %arg11[%c3_602, %c0_603, %c0_604, %c0_605] : memref<4x4x32x8xbf16, #tpu.memory_space<vmem>>, vector<1x1x32x8xbf16>
    %850 = vector.shape_cast %849 : vector<1x1x32x8xbf16> to vector<32x8xbf16>
    %cst_606 = arith.constant dense<0.000000e+00> : vector<8x8xf32>
    %851 = tpu.matmul %840, %850, %cst_606 {dimension_numbers = #tpu.dot_dimension_numbers<[1], [0], [0], [1], [0, 0, 1, 1], [], []>} : vector<8x32xbf16>, vector<32x8xbf16>, vector<8x8xf32> -> vector<8x8xf32>
    %c3_607 = arith.constant 3 : index
    %c0_608 = arith.constant 0 : index
    %c0_609 = arith.constant 0 : index
    %c0_610 = arith.constant 0 : index
    %852 = vector.load %arg14[%c3_607, %c0_608, %c0_609, %c0_610] : memref<4x4x1x8xf32, #tpu.memory_space<vmem>>, vector<1x1x1x8xf32>
    %853 = vector.shape_cast %852 : vector<1x1x1x8xf32> to vector<1x8xf32>
    %854 = vector.broadcast %853 : vector<1x8xf32> to vector<8x8xf32>
    %855 = arith.addf %851, %854 : vector<8x8xf32>
    %c3_611 = arith.constant 3 : index
    %c0_612 = arith.constant 0 : index
    %c0_613 = arith.constant 0 : index
    %c0_614 = arith.constant 0 : index
    %856 = vector.load %arg12[%c3_611, %c0_612, %c0_613, %c0_614] : memref<4x4x32x8xbf16, #tpu.memory_space<vmem>>, vector<1x1x32x8xbf16>
    %857 = vector.shape_cast %856 : vector<1x1x32x8xbf16> to vector<32x8xbf16>
    %cst_615 = arith.constant dense<0.000000e+00> : vector<8x8xf32>
    %858 = tpu.matmul %840, %857, %cst_615 {dimension_numbers = #tpu.dot_dimension_numbers<[1], [0], [0], [1], [0, 0, 1, 1], [], []>} : vector<8x32xbf16>, vector<32x8xbf16>, vector<8x8xf32> -> vector<8x8xf32>
    %c3_616 = arith.constant 3 : index
    %c0_617 = arith.constant 0 : index
    %c0_618 = arith.constant 0 : index
    %c0_619 = arith.constant 0 : index
    %859 = vector.load %arg15[%c3_616, %c0_617, %c0_618, %c0_619] : memref<4x4x1x8xf32, #tpu.memory_space<vmem>>, vector<1x1x1x8xf32>
    %860 = vector.shape_cast %859 : vector<1x1x1x8xf32> to vector<1x8xf32>
    %861 = vector.broadcast %860 : vector<1x8xf32> to vector<8x8xf32>
    %862 = arith.addf %858, %861 : vector<8x8xf32>
    %863 = arith.truncf %848 : vector<8x8xf32> to vector<8x8xbf16>
    %864 = arith.truncf %855 : vector<8x8xf32> to vector<8x8xbf16>
    %cst_620 = arith.constant dense<0.000000e+00> : vector<8x8xf32>
    %865 = tpu.matmul %863, %864, %cst_620 {dimension_numbers = #tpu.dot_dimension_numbers<[1], [1], [0], [0], [0, 0, 1, 0], [], []>} : vector<8x8xbf16>, vector<8x8xbf16>, vector<8x8xf32> -> vector<8x8xf32>
    %cst_621 = arith.constant 0.353553385 : f32
    %866 = vector.broadcast %cst_621 : f32 to vector<8x8xf32>
    %867 = arith.mulf %865, %866 : vector<8x8xf32>
    %868 = arith.addf %867, %65 : vector<8x8xf32>
    %cst_622 = arith.constant dense<0xFF800000> : vector<8xf32>
    %869 = vector.multi_reduction <maximumf>, %868, %cst_622 [1] : vector<8x8xf32> to vector<8xf32>
    %870 = vector.shape_cast %869 : vector<8xf32> to vector<8x1xf32>
    %871 = vector.broadcast %870 : vector<8x1xf32> to vector<8x8xf32>
    %872 = arith.subf %868, %871 : vector<8x8xf32>
    %873 = math.exp %872 : vector<8x8xf32>
    %cst_623 = arith.constant dense<0.000000e+00> : vector<8xf32>
    %874 = vector.multi_reduction <add>, %873, %cst_623 [1] : vector<8x8xf32> to vector<8xf32>
    %875 = vector.shape_cast %874 : vector<8xf32> to vector<8x1xf32>
    %876 = tpu.reciprocal %875 {approx = true} : vector<8x1xf32> -> vector<8x1xf32>
    %877 = vector.broadcast %876 : vector<8x1xf32> to vector<8x8xf32>
    %878 = arith.mulf %873, %877 : vector<8x8xf32>
    %879 = arith.truncf %878 : vector<8x8xf32> to vector<8x8xbf16>
    %880 = arith.truncf %862 : vector<8x8xf32> to vector<8x8xbf16>
    %cst_624 = arith.constant dense<0.000000e+00> : vector<8x8xf32>
    %881 = tpu.matmul %879, %880, %cst_624 {dimension_numbers = #tpu.dot_dimension_numbers<[1], [0], [0], [1], [0, 0, 1, 1], [], []>} : vector<8x8xbf16>, vector<8x8xbf16>, vector<8x8xf32> -> vector<8x8xf32>
    %882 = arith.truncf %881 : vector<8x8xf32> to vector<8x8xbf16>
    %c3_625 = arith.constant 3 : index
    %c0_626 = arith.constant 0 : index
    %c0_627 = arith.constant 0 : index
    %c0_628 = arith.constant 0 : index
    %883 = vector.load %arg16[%c3_625, %c0_626, %c0_627, %c0_628] : memref<4x4x8x32xbf16, #tpu.memory_space<vmem>>, vector<1x1x8x32xbf16>
    %884 = vector.shape_cast %883 : vector<1x1x8x32xbf16> to vector<8x32xbf16>
    %cst_629 = arith.constant dense<0.000000e+00> : vector<8x32xf32>
    %885 = tpu.matmul %882, %884, %cst_629 {dimension_numbers = #tpu.dot_dimension_numbers<[1], [0], [0], [1], [0, 0, 1, 1], [], []>} : vector<8x8xbf16>, vector<8x32xbf16>, vector<8x32xf32> -> vector<8x32xf32>
    %886 = arith.addf %841, %885 : vector<8x32xf32>
    %c3_630 = arith.constant 3 : index
    %c1_631 = arith.constant 1 : index
    %c0_632 = arith.constant 0 : index
    %c0_633 = arith.constant 0 : index
    %887 = vector.load %arg10[%c3_630, %c1_631, %c0_632, %c0_633] : memref<4x4x32x8xbf16, #tpu.memory_space<vmem>>, vector<1x1x32x8xbf16>
    %888 = vector.shape_cast %887 : vector<1x1x32x8xbf16> to vector<32x8xbf16>
    %cst_634 = arith.constant dense<0.000000e+00> : vector<8x8xf32>
    %889 = tpu.matmul %840, %888, %cst_634 {dimension_numbers = #tpu.dot_dimension_numbers<[1], [0], [0], [1], [0, 0, 1, 1], [], []>} : vector<8x32xbf16>, vector<32x8xbf16>, vector<8x8xf32> -> vector<8x8xf32>
    %c3_635 = arith.constant 3 : index
    %c1_636 = arith.constant 1 : index
    %c0_637 = arith.constant 0 : index
    %c0_638 = arith.constant 0 : index
    %890 = vector.load %arg13[%c3_635, %c1_636, %c0_637, %c0_638] : memref<4x4x1x8xf32, #tpu.memory_space<vmem>>, vector<1x1x1x8xf32>
    %891 = vector.shape_cast %890 : vector<1x1x1x8xf32> to vector<1x8xf32>
    %892 = vector.broadcast %891 : vector<1x8xf32> to vector<8x8xf32>
    %893 = arith.addf %889, %892 : vector<8x8xf32>
    %c3_639 = arith.constant 3 : index
    %c1_640 = arith.constant 1 : index
    %c0_641 = arith.constant 0 : index
    %c0_642 = arith.constant 0 : index
    %894 = vector.load %arg11[%c3_639, %c1_640, %c0_641, %c0_642] : memref<4x4x32x8xbf16, #tpu.memory_space<vmem>>, vector<1x1x32x8xbf16>
    %895 = vector.shape_cast %894 : vector<1x1x32x8xbf16> to vector<32x8xbf16>
    %cst_643 = arith.constant dense<0.000000e+00> : vector<8x8xf32>
    %896 = tpu.matmul %840, %895, %cst_643 {dimension_numbers = #tpu.dot_dimension_numbers<[1], [0], [0], [1], [0, 0, 1, 1], [], []>} : vector<8x32xbf16>, vector<32x8xbf16>, vector<8x8xf32> -> vector<8x8xf32>
    %c3_644 = arith.constant 3 : index
    %c1_645 = arith.constant 1 : index
    %c0_646 = arith.constant 0 : index
    %c0_647 = arith.constant 0 : index
    %897 = vector.load %arg14[%c3_644, %c1_645, %c0_646, %c0_647] : memref<4x4x1x8xf32, #tpu.memory_space<vmem>>, vector<1x1x1x8xf32>
    %898 = vector.shape_cast %897 : vector<1x1x1x8xf32> to vector<1x8xf32>
    %899 = vector.broadcast %898 : vector<1x8xf32> to vector<8x8xf32>
    %900 = arith.addf %896, %899 : vector<8x8xf32>
    %c3_648 = arith.constant 3 : index
    %c1_649 = arith.constant 1 : index
    %c0_650 = arith.constant 0 : index
    %c0_651 = arith.constant 0 : index
    %901 = vector.load %arg12[%c3_648, %c1_649, %c0_650, %c0_651] : memref<4x4x32x8xbf16, #tpu.memory_space<vmem>>, vector<1x1x32x8xbf16>
    %902 = vector.shape_cast %901 : vector<1x1x32x8xbf16> to vector<32x8xbf16>
    %cst_652 = arith.constant dense<0.000000e+00> : vector<8x8xf32>
    %903 = tpu.matmul %840, %902, %cst_652 {dimension_numbers = #tpu.dot_dimension_numbers<[1], [0], [0], [1], [0, 0, 1, 1], [], []>} : vector<8x32xbf16>, vector<32x8xbf16>, vector<8x8xf32> -> vector<8x8xf32>
    %c3_653 = arith.constant 3 : index
    %c1_654 = arith.constant 1 : index
    %c0_655 = arith.constant 0 : index
    %c0_656 = arith.constant 0 : index
    %904 = vector.load %arg15[%c3_653, %c1_654, %c0_655, %c0_656] : memref<4x4x1x8xf32, #tpu.memory_space<vmem>>, vector<1x1x1x8xf32>
    %905 = vector.shape_cast %904 : vector<1x1x1x8xf32> to vector<1x8xf32>
    %906 = vector.broadcast %905 : vector<1x8xf32> to vector<8x8xf32>
    %907 = arith.addf %903, %906 : vector<8x8xf32>
    %908 = arith.truncf %893 : vector<8x8xf32> to vector<8x8xbf16>
    %909 = arith.truncf %900 : vector<8x8xf32> to vector<8x8xbf16>
    %cst_657 = arith.constant dense<0.000000e+00> : vector<8x8xf32>
    %910 = tpu.matmul %908, %909, %cst_657 {dimension_numbers = #tpu.dot_dimension_numbers<[1], [1], [0], [0], [0, 0, 1, 0], [], []>} : vector<8x8xbf16>, vector<8x8xbf16>, vector<8x8xf32> -> vector<8x8xf32>
    %cst_658 = arith.constant 0.353553385 : f32
    %911 = vector.broadcast %cst_658 : f32 to vector<8x8xf32>
    %912 = arith.mulf %910, %911 : vector<8x8xf32>
    %913 = arith.addf %912, %65 : vector<8x8xf32>
    %cst_659 = arith.constant dense<0xFF800000> : vector<8xf32>
    %914 = vector.multi_reduction <maximumf>, %913, %cst_659 [1] : vector<8x8xf32> to vector<8xf32>
    %915 = vector.shape_cast %914 : vector<8xf32> to vector<8x1xf32>
    %916 = vector.broadcast %915 : vector<8x1xf32> to vector<8x8xf32>
    %917 = arith.subf %913, %916 : vector<8x8xf32>
    %918 = math.exp %917 : vector<8x8xf32>
    %cst_660 = arith.constant dense<0.000000e+00> : vector<8xf32>
    %919 = vector.multi_reduction <add>, %918, %cst_660 [1] : vector<8x8xf32> to vector<8xf32>
    %920 = vector.shape_cast %919 : vector<8xf32> to vector<8x1xf32>
    %921 = tpu.reciprocal %920 {approx = true} : vector<8x1xf32> -> vector<8x1xf32>
    %922 = vector.broadcast %921 : vector<8x1xf32> to vector<8x8xf32>
    %923 = arith.mulf %918, %922 : vector<8x8xf32>
    %924 = arith.truncf %923 : vector<8x8xf32> to vector<8x8xbf16>
    %925 = arith.truncf %907 : vector<8x8xf32> to vector<8x8xbf16>
    %cst_661 = arith.constant dense<0.000000e+00> : vector<8x8xf32>
    %926 = tpu.matmul %924, %925, %cst_661 {dimension_numbers = #tpu.dot_dimension_numbers<[1], [0], [0], [1], [0, 0, 1, 1], [], []>} : vector<8x8xbf16>, vector<8x8xbf16>, vector<8x8xf32> -> vector<8x8xf32>
    %927 = arith.truncf %926 : vector<8x8xf32> to vector<8x8xbf16>
    %c3_662 = arith.constant 3 : index
    %c1_663 = arith.constant 1 : index
    %c0_664 = arith.constant 0 : index
    %c0_665 = arith.constant 0 : index
    %928 = vector.load %arg16[%c3_662, %c1_663, %c0_664, %c0_665] : memref<4x4x8x32xbf16, #tpu.memory_space<vmem>>, vector<1x1x8x32xbf16>
    %929 = vector.shape_cast %928 : vector<1x1x8x32xbf16> to vector<8x32xbf16>
    %cst_666 = arith.constant dense<0.000000e+00> : vector<8x32xf32>
    %930 = tpu.matmul %927, %929, %cst_666 {dimension_numbers = #tpu.dot_dimension_numbers<[1], [0], [0], [1], [0, 0, 1, 1], [], []>} : vector<8x8xbf16>, vector<8x32xbf16>, vector<8x32xf32> -> vector<8x32xf32>
    %931 = arith.addf %886, %930 : vector<8x32xf32>
    %c3_667 = arith.constant 3 : index
    %c2_668 = arith.constant 2 : index
    %c0_669 = arith.constant 0 : index
    %c0_670 = arith.constant 0 : index
    %932 = vector.load %arg10[%c3_667, %c2_668, %c0_669, %c0_670] : memref<4x4x32x8xbf16, #tpu.memory_space<vmem>>, vector<1x1x32x8xbf16>
    %933 = vector.shape_cast %932 : vector<1x1x32x8xbf16> to vector<32x8xbf16>
    %cst_671 = arith.constant dense<0.000000e+00> : vector<8x8xf32>
    %934 = tpu.matmul %840, %933, %cst_671 {dimension_numbers = #tpu.dot_dimension_numbers<[1], [0], [0], [1], [0, 0, 1, 1], [], []>} : vector<8x32xbf16>, vector<32x8xbf16>, vector<8x8xf32> -> vector<8x8xf32>
    %c3_672 = arith.constant 3 : index
    %c2_673 = arith.constant 2 : index
    %c0_674 = arith.constant 0 : index
    %c0_675 = arith.constant 0 : index
    %935 = vector.load %arg13[%c3_672, %c2_673, %c0_674, %c0_675] : memref<4x4x1x8xf32, #tpu.memory_space<vmem>>, vector<1x1x1x8xf32>
    %936 = vector.shape_cast %935 : vector<1x1x1x8xf32> to vector<1x8xf32>
    %937 = vector.broadcast %936 : vector<1x8xf32> to vector<8x8xf32>
    %938 = arith.addf %934, %937 : vector<8x8xf32>
    %c3_676 = arith.constant 3 : index
    %c2_677 = arith.constant 2 : index
    %c0_678 = arith.constant 0 : index
    %c0_679 = arith.constant 0 : index
    %939 = vector.load %arg11[%c3_676, %c2_677, %c0_678, %c0_679] : memref<4x4x32x8xbf16, #tpu.memory_space<vmem>>, vector<1x1x32x8xbf16>
    %940 = vector.shape_cast %939 : vector<1x1x32x8xbf16> to vector<32x8xbf16>
    %cst_680 = arith.constant dense<0.000000e+00> : vector<8x8xf32>
    %941 = tpu.matmul %840, %940, %cst_680 {dimension_numbers = #tpu.dot_dimension_numbers<[1], [0], [0], [1], [0, 0, 1, 1], [], []>} : vector<8x32xbf16>, vector<32x8xbf16>, vector<8x8xf32> -> vector<8x8xf32>
    %c3_681 = arith.constant 3 : index
    %c2_682 = arith.constant 2 : index
    %c0_683 = arith.constant 0 : index
    %c0_684 = arith.constant 0 : index
    %942 = vector.load %arg14[%c3_681, %c2_682, %c0_683, %c0_684] : memref<4x4x1x8xf32, #tpu.memory_space<vmem>>, vector<1x1x1x8xf32>
    %943 = vector.shape_cast %942 : vector<1x1x1x8xf32> to vector<1x8xf32>
    %944 = vector.broadcast %943 : vector<1x8xf32> to vector<8x8xf32>
    %945 = arith.addf %941, %944 : vector<8x8xf32>
    %c3_685 = arith.constant 3 : index
    %c2_686 = arith.constant 2 : index
    %c0_687 = arith.constant 0 : index
    %c0_688 = arith.constant 0 : index
    %946 = vector.load %arg12[%c3_685, %c2_686, %c0_687, %c0_688] : memref<4x4x32x8xbf16, #tpu.memory_space<vmem>>, vector<1x1x32x8xbf16>
    %947 = vector.shape_cast %946 : vector<1x1x32x8xbf16> to vector<32x8xbf16>
    %cst_689 = arith.constant dense<0.000000e+00> : vector<8x8xf32>
    %948 = tpu.matmul %840, %947, %cst_689 {dimension_numbers = #tpu.dot_dimension_numbers<[1], [0], [0], [1], [0, 0, 1, 1], [], []>} : vector<8x32xbf16>, vector<32x8xbf16>, vector<8x8xf32> -> vector<8x8xf32>
    %c3_690 = arith.constant 3 : index
    %c2_691 = arith.constant 2 : index
    %c0_692 = arith.constant 0 : index
    %c0_693 = arith.constant 0 : index
    %949 = vector.load %arg15[%c3_690, %c2_691, %c0_692, %c0_693] : memref<4x4x1x8xf32, #tpu.memory_space<vmem>>, vector<1x1x1x8xf32>
    %950 = vector.shape_cast %949 : vector<1x1x1x8xf32> to vector<1x8xf32>
    %951 = vector.broadcast %950 : vector<1x8xf32> to vector<8x8xf32>
    %952 = arith.addf %948, %951 : vector<8x8xf32>
    %953 = arith.truncf %938 : vector<8x8xf32> to vector<8x8xbf16>
    %954 = arith.truncf %945 : vector<8x8xf32> to vector<8x8xbf16>
    %cst_694 = arith.constant dense<0.000000e+00> : vector<8x8xf32>
    %955 = tpu.matmul %953, %954, %cst_694 {dimension_numbers = #tpu.dot_dimension_numbers<[1], [1], [0], [0], [0, 0, 1, 0], [], []>} : vector<8x8xbf16>, vector<8x8xbf16>, vector<8x8xf32> -> vector<8x8xf32>
    %cst_695 = arith.constant 0.353553385 : f32
    %956 = vector.broadcast %cst_695 : f32 to vector<8x8xf32>
    %957 = arith.mulf %955, %956 : vector<8x8xf32>
    %958 = arith.addf %957, %65 : vector<8x8xf32>
    %cst_696 = arith.constant dense<0xFF800000> : vector<8xf32>
    %959 = vector.multi_reduction <maximumf>, %958, %cst_696 [1] : vector<8x8xf32> to vector<8xf32>
    %960 = vector.shape_cast %959 : vector<8xf32> to vector<8x1xf32>
    %961 = vector.broadcast %960 : vector<8x1xf32> to vector<8x8xf32>
    %962 = arith.subf %958, %961 : vector<8x8xf32>
    %963 = math.exp %962 : vector<8x8xf32>
    %cst_697 = arith.constant dense<0.000000e+00> : vector<8xf32>
    %964 = vector.multi_reduction <add>, %963, %cst_697 [1] : vector<8x8xf32> to vector<8xf32>
    %965 = vector.shape_cast %964 : vector<8xf32> to vector<8x1xf32>
    %966 = tpu.reciprocal %965 {approx = true} : vector<8x1xf32> -> vector<8x1xf32>
    %967 = vector.broadcast %966 : vector<8x1xf32> to vector<8x8xf32>
    %968 = arith.mulf %963, %967 : vector<8x8xf32>
    %969 = arith.truncf %968 : vector<8x8xf32> to vector<8x8xbf16>
    %970 = arith.truncf %952 : vector<8x8xf32> to vector<8x8xbf16>
    %cst_698 = arith.constant dense<0.000000e+00> : vector<8x8xf32>
    %971 = tpu.matmul %969, %970, %cst_698 {dimension_numbers = #tpu.dot_dimension_numbers<[1], [0], [0], [1], [0, 0, 1, 1], [], []>} : vector<8x8xbf16>, vector<8x8xbf16>, vector<8x8xf32> -> vector<8x8xf32>
    %972 = arith.truncf %971 : vector<8x8xf32> to vector<8x8xbf16>
    %c3_699 = arith.constant 3 : index
    %c2_700 = arith.constant 2 : index
    %c0_701 = arith.constant 0 : index
    %c0_702 = arith.constant 0 : index
    %973 = vector.load %arg16[%c3_699, %c2_700, %c0_701, %c0_702] : memref<4x4x8x32xbf16, #tpu.memory_space<vmem>>, vector<1x1x8x32xbf16>
    %974 = vector.shape_cast %973 : vector<1x1x8x32xbf16> to vector<8x32xbf16>
    %cst_703 = arith.constant dense<0.000000e+00> : vector<8x32xf32>
    %975 = tpu.matmul %972, %974, %cst_703 {dimension_numbers = #tpu.dot_dimension_numbers<[1], [0], [0], [1], [0, 0, 1, 1], [], []>} : vector<8x8xbf16>, vector<8x32xbf16>, vector<8x32xf32> -> vector<8x32xf32>
    %976 = arith.addf %931, %975 : vector<8x32xf32>
    %c3_704 = arith.constant 3 : index
    %c3_705 = arith.constant 3 : index
    %c0_706 = arith.constant 0 : index
    %c0_707 = arith.constant 0 : index
    %977 = vector.load %arg10[%c3_704, %c3_705, %c0_706, %c0_707] : memref<4x4x32x8xbf16, #tpu.memory_space<vmem>>, vector<1x1x32x8xbf16>
    %978 = vector.shape_cast %977 : vector<1x1x32x8xbf16> to vector<32x8xbf16>
    %cst_708 = arith.constant dense<0.000000e+00> : vector<8x8xf32>
    %979 = tpu.matmul %840, %978, %cst_708 {dimension_numbers = #tpu.dot_dimension_numbers<[1], [0], [0], [1], [0, 0, 1, 1], [], []>} : vector<8x32xbf16>, vector<32x8xbf16>, vector<8x8xf32> -> vector<8x8xf32>
    %c3_709 = arith.constant 3 : index
    %c3_710 = arith.constant 3 : index
    %c0_711 = arith.constant 0 : index
    %c0_712 = arith.constant 0 : index
    %980 = vector.load %arg13[%c3_709, %c3_710, %c0_711, %c0_712] : memref<4x4x1x8xf32, #tpu.memory_space<vmem>>, vector<1x1x1x8xf32>
    %981 = vector.shape_cast %980 : vector<1x1x1x8xf32> to vector<1x8xf32>
    %982 = vector.broadcast %981 : vector<1x8xf32> to vector<8x8xf32>
    %983 = arith.addf %979, %982 : vector<8x8xf32>
    %c3_713 = arith.constant 3 : index
    %c3_714 = arith.constant 3 : index
    %c0_715 = arith.constant 0 : index
    %c0_716 = arith.constant 0 : index
    %984 = vector.load %arg11[%c3_713, %c3_714, %c0_715, %c0_716] : memref<4x4x32x8xbf16, #tpu.memory_space<vmem>>, vector<1x1x32x8xbf16>
    %985 = vector.shape_cast %984 : vector<1x1x32x8xbf16> to vector<32x8xbf16>
    %cst_717 = arith.constant dense<0.000000e+00> : vector<8x8xf32>
    %986 = tpu.matmul %840, %985, %cst_717 {dimension_numbers = #tpu.dot_dimension_numbers<[1], [0], [0], [1], [0, 0, 1, 1], [], []>} : vector<8x32xbf16>, vector<32x8xbf16>, vector<8x8xf32> -> vector<8x8xf32>
    %c3_718 = arith.constant 3 : index
    %c3_719 = arith.constant 3 : index
    %c0_720 = arith.constant 0 : index
    %c0_721 = arith.constant 0 : index
    %987 = vector.load %arg14[%c3_718, %c3_719, %c0_720, %c0_721] : memref<4x4x1x8xf32, #tpu.memory_space<vmem>>, vector<1x1x1x8xf32>
    %988 = vector.shape_cast %987 : vector<1x1x1x8xf32> to vector<1x8xf32>
    %989 = vector.broadcast %988 : vector<1x8xf32> to vector<8x8xf32>
    %990 = arith.addf %986, %989 : vector<8x8xf32>
    %c3_722 = arith.constant 3 : index
    %c3_723 = arith.constant 3 : index
    %c0_724 = arith.constant 0 : index
    %c0_725 = arith.constant 0 : index
    %991 = vector.load %arg12[%c3_722, %c3_723, %c0_724, %c0_725] : memref<4x4x32x8xbf16, #tpu.memory_space<vmem>>, vector<1x1x32x8xbf16>
    %992 = vector.shape_cast %991 : vector<1x1x32x8xbf16> to vector<32x8xbf16>
    %cst_726 = arith.constant dense<0.000000e+00> : vector<8x8xf32>
    %993 = tpu.matmul %840, %992, %cst_726 {dimension_numbers = #tpu.dot_dimension_numbers<[1], [0], [0], [1], [0, 0, 1, 1], [], []>} : vector<8x32xbf16>, vector<32x8xbf16>, vector<8x8xf32> -> vector<8x8xf32>
    %c3_727 = arith.constant 3 : index
    %c3_728 = arith.constant 3 : index
    %c0_729 = arith.constant 0 : index
    %c0_730 = arith.constant 0 : index
    %994 = vector.load %arg15[%c3_727, %c3_728, %c0_729, %c0_730] : memref<4x4x1x8xf32, #tpu.memory_space<vmem>>, vector<1x1x1x8xf32>
    %995 = vector.shape_cast %994 : vector<1x1x1x8xf32> to vector<1x8xf32>
    %996 = vector.broadcast %995 : vector<1x8xf32> to vector<8x8xf32>
    %997 = arith.addf %993, %996 : vector<8x8xf32>
    %998 = arith.truncf %983 : vector<8x8xf32> to vector<8x8xbf16>
    %999 = arith.truncf %990 : vector<8x8xf32> to vector<8x8xbf16>
    %cst_731 = arith.constant dense<0.000000e+00> : vector<8x8xf32>
    %1000 = tpu.matmul %998, %999, %cst_731 {dimension_numbers = #tpu.dot_dimension_numbers<[1], [1], [0], [0], [0, 0, 1, 0], [], []>} : vector<8x8xbf16>, vector<8x8xbf16>, vector<8x8xf32> -> vector<8x8xf32>
    %cst_732 = arith.constant 0.353553385 : f32
    %1001 = vector.broadcast %cst_732 : f32 to vector<8x8xf32>
    %1002 = arith.mulf %1000, %1001 : vector<8x8xf32>
    %1003 = arith.addf %1002, %65 : vector<8x8xf32>
    %cst_733 = arith.constant dense<0xFF800000> : vector<8xf32>
    %1004 = vector.multi_reduction <maximumf>, %1003, %cst_733 [1] : vector<8x8xf32> to vector<8xf32>
    %1005 = vector.shape_cast %1004 : vector<8xf32> to vector<8x1xf32>
    %1006 = vector.broadcast %1005 : vector<8x1xf32> to vector<8x8xf32>
    %1007 = arith.subf %1003, %1006 : vector<8x8xf32>
    %1008 = math.exp %1007 : vector<8x8xf32>
    %cst_734 = arith.constant dense<0.000000e+00> : vector<8xf32>
    %1009 = vector.multi_reduction <add>, %1008, %cst_734 [1] : vector<8x8xf32> to vector<8xf32>
    %1010 = vector.shape_cast %1009 : vector<8xf32> to vector<8x1xf32>
    %1011 = tpu.reciprocal %1010 {approx = true} : vector<8x1xf32> -> vector<8x1xf32>
    %1012 = vector.broadcast %1011 : vector<8x1xf32> to vector<8x8xf32>
    %1013 = arith.mulf %1008, %1012 : vector<8x8xf32>
    %1014 = arith.truncf %1013 : vector<8x8xf32> to vector<8x8xbf16>
    %1015 = arith.truncf %997 : vector<8x8xf32> to vector<8x8xbf16>
    %cst_735 = arith.constant dense<0.000000e+00> : vector<8x8xf32>
    %1016 = tpu.matmul %1014, %1015, %cst_735 {dimension_numbers = #tpu.dot_dimension_numbers<[1], [0], [0], [1], [0, 0, 1, 1], [], []>} : vector<8x8xbf16>, vector<8x8xbf16>, vector<8x8xf32> -> vector<8x8xf32>
    %1017 = arith.truncf %1016 : vector<8x8xf32> to vector<8x8xbf16>
    %c3_736 = arith.constant 3 : index
    %c3_737 = arith.constant 3 : index
    %c0_738 = arith.constant 0 : index
    %c0_739 = arith.constant 0 : index
    %1018 = vector.load %arg16[%c3_736, %c3_737, %c0_738, %c0_739] : memref<4x4x8x32xbf16, #tpu.memory_space<vmem>>, vector<1x1x8x32xbf16>
    %1019 = vector.shape_cast %1018 : vector<1x1x8x32xbf16> to vector<8x32xbf16>
    %cst_740 = arith.constant dense<0.000000e+00> : vector<8x32xf32>
    %1020 = tpu.matmul %1017, %1019, %cst_740 {dimension_numbers = #tpu.dot_dimension_numbers<[1], [0], [0], [1], [0, 0, 1, 1], [], []>} : vector<8x8xbf16>, vector<8x32xbf16>, vector<8x32xf32> -> vector<8x32xf32>
    %1021 = arith.addf %976, %1020 : vector<8x32xf32>
    %c3_741 = arith.constant 3 : index
    %c0_742 = arith.constant 0 : index
    %c0_743 = arith.constant 0 : index
    %1022 = vector.load %arg17[%c3_741, %c0_742, %c0_743] : memref<4x1x32xf32, #tpu.memory_space<vmem>>, vector<1x1x32xf32>
    %1023 = vector.shape_cast %1022 : vector<1x1x32xf32> to vector<1x32xf32>
    %1024 = vector.broadcast %1023 : vector<1x32xf32> to vector<8x32xf32>
    %1025 = arith.addf %1021, %1024 : vector<8x32xf32>
    %1026 = arith.addf %839, %1025 : vector<8x32xf32>
    %c3_744 = arith.constant 3 : index
    %c0_745 = arith.constant 0 : index
    %c0_746 = arith.constant 0 : index
    %1027 = vector.load %arg18[%c3_744, %c0_745, %c0_746] : memref<4x1x32xf32, #tpu.memory_space<vmem>>, vector<1x1x32xf32>
    %1028 = vector.shape_cast %1027 : vector<1x1x32xf32> to vector<1x32xf32>
    %c3_747 = arith.constant 3 : index
    %c0_748 = arith.constant 0 : index
    %c0_749 = arith.constant 0 : index
    %1029 = vector.load %arg19[%c3_747, %c0_748, %c0_749] : memref<4x1x32xf32, #tpu.memory_space<vmem>>, vector<1x1x32xf32>
    %1030 = vector.shape_cast %1029 : vector<1x1x32xf32> to vector<1x32xf32>
    %cst_750 = arith.constant dense<0.000000e+00> : vector<8xf32>
    %1031 = vector.multi_reduction <add>, %1026, %cst_750 [1] : vector<8x32xf32> to vector<8xf32>
    %1032 = vector.shape_cast %1031 : vector<8xf32> to vector<8x1xf32>
    %cst_751 = arith.constant 3.200000e+01 : f32
    %1033 = vector.broadcast %cst_751 : f32 to vector<8x1xf32>
    %1034 = arith.divf %1032, %1033 : vector<8x1xf32>
    %1035 = vector.broadcast %1034 : vector<8x1xf32> to vector<8x32xf32>
    %1036 = arith.subf %1026, %1035 : vector<8x32xf32>
    %1037 = arith.mulf %1036, %1036 : vector<8x32xf32>
    %cst_752 = arith.constant dense<0.000000e+00> : vector<8xf32>
    %1038 = vector.multi_reduction <add>, %1037, %cst_752 [1] : vector<8x32xf32> to vector<8xf32>
    %1039 = vector.shape_cast %1038 : vector<8xf32> to vector<8x1xf32>
    %cst_753 = arith.constant 3.200000e+01 : f32
    %1040 = vector.broadcast %cst_753 : f32 to vector<8x1xf32>
    %1041 = arith.divf %1039, %1040 : vector<8x1xf32>
    %1042 = vector.broadcast %1034 : vector<8x1xf32> to vector<8x32xf32>
    %1043 = arith.subf %1026, %1042 : vector<8x32xf32>
    %cst_754 = arith.constant 9.99999974E-6 : f32
    %1044 = vector.broadcast %cst_754 : f32 to vector<8x1xf32>
    %1045 = arith.addf %1041, %1044 : vector<8x1xf32>
    %1046 = math.rsqrt %1045 : vector<8x1xf32>
    %1047 = vector.broadcast %1046 : vector<8x1xf32> to vector<8x32xf32>
    %1048 = arith.mulf %1043, %1047 : vector<8x32xf32>
    %1049 = vector.broadcast %1028 : vector<1x32xf32> to vector<8x32xf32>
    %1050 = arith.mulf %1048, %1049 : vector<8x32xf32>
    %1051 = vector.broadcast %1030 : vector<1x32xf32> to vector<8x32xf32>
    %1052 = arith.addf %1050, %1051 : vector<8x32xf32>
    %1053 = arith.truncf %1052 : vector<8x32xf32> to vector<8x32xbf16>
    %c3_755 = arith.constant 3 : index
    %c0_756 = arith.constant 0 : index
    %c0_757 = arith.constant 0 : index
    %1054 = vector.load %arg20[%c3_755, %c0_756, %c0_757] : memref<4x32x64xbf16, #tpu.memory_space<vmem>>, vector<1x32x64xbf16>
    %1055 = vector.shape_cast %1054 : vector<1x32x64xbf16> to vector<32x64xbf16>
    %cst_758 = arith.constant dense<0.000000e+00> : vector<8x64xf32>
    %1056 = tpu.matmul %1053, %1055, %cst_758 {dimension_numbers = #tpu.dot_dimension_numbers<[1], [0], [0], [1], [0, 0, 1, 1], [], []>} : vector<8x32xbf16>, vector<32x64xbf16>, vector<8x64xf32> -> vector<8x64xf32>
    %c3_759 = arith.constant 3 : index
    %c0_760 = arith.constant 0 : index
    %c0_761 = arith.constant 0 : index
    %1057 = vector.load %arg21[%c3_759, %c0_760, %c0_761] : memref<4x1x64xf32, #tpu.memory_space<vmem>>, vector<1x1x64xf32>
    %1058 = vector.shape_cast %1057 : vector<1x1x64xf32> to vector<1x64xf32>
    %1059 = vector.broadcast %1058 : vector<1x64xf32> to vector<8x64xf32>
    %1060 = arith.addf %1056, %1059 : vector<8x64xf32>
    %cst_762 = arith.constant 0.000000e+00 : f32
    %1061 = vector.broadcast %cst_762 : f32 to vector<8x64xf32>
    %1062 = arith.maximumf %1060, %1061 : vector<8x64xf32>
    %1063 = arith.truncf %1062 : vector<8x64xf32> to vector<8x64xbf16>
    %c3_763 = arith.constant 3 : index
    %c0_764 = arith.constant 0 : index
    %c0_765 = arith.constant 0 : index
    %1064 = vector.load %arg22[%c3_763, %c0_764, %c0_765] : memref<4x64x32xbf16, #tpu.memory_space<vmem>>, vector<1x64x32xbf16>
    %1065 = vector.shape_cast %1064 : vector<1x64x32xbf16> to vector<64x32xbf16>
    %cst_766 = arith.constant dense<0.000000e+00> : vector<8x32xf32>
    %1066 = tpu.matmul %1063, %1065, %cst_766 {dimension_numbers = #tpu.dot_dimension_numbers<[1], [0], [0], [1], [0, 0, 1, 1], [], []>} : vector<8x64xbf16>, vector<64x32xbf16>, vector<8x32xf32> -> vector<8x32xf32>
    %c3_767 = arith.constant 3 : index
    %c0_768 = arith.constant 0 : index
    %c0_769 = arith.constant 0 : index
    %1067 = vector.load %arg23[%c3_767, %c0_768, %c0_769] : memref<4x1x32xf32, #tpu.memory_space<vmem>>, vector<1x1x32xf32>
    %1068 = vector.shape_cast %1067 : vector<1x1x32xf32> to vector<1x32xf32>
    %1069 = vector.broadcast %1068 : vector<1x32xf32> to vector<8x32xf32>
    %1070 = arith.addf %1066, %1069 : vector<8x32xf32>
    %1071 = arith.addf %1052, %1070 : vector<8x32xf32>
    %c3_770 = arith.constant 3 : index
    %c0_771 = arith.constant 0 : index
    %c0_772 = arith.constant 0 : index
    %1072 = vector.load %arg24[%c3_770, %c0_771, %c0_772] : memref<4x1x32xf32, #tpu.memory_space<vmem>>, vector<1x1x32xf32>
    %1073 = vector.shape_cast %1072 : vector<1x1x32xf32> to vector<1x32xf32>
    %c3_773 = arith.constant 3 : index
    %c0_774 = arith.constant 0 : index
    %c0_775 = arith.constant 0 : index
    %1074 = vector.load %arg25[%c3_773, %c0_774, %c0_775] : memref<4x1x32xf32, #tpu.memory_space<vmem>>, vector<1x1x32xf32>
    %1075 = vector.shape_cast %1074 : vector<1x1x32xf32> to vector<1x32xf32>
    %cst_776 = arith.constant dense<0.000000e+00> : vector<8xf32>
    %1076 = vector.multi_reduction <add>, %1071, %cst_776 [1] : vector<8x32xf32> to vector<8xf32>
    %1077 = vector.shape_cast %1076 : vector<8xf32> to vector<8x1xf32>
    %cst_777 = arith.constant 3.200000e+01 : f32
    %1078 = vector.broadcast %cst_777 : f32 to vector<8x1xf32>
    %1079 = arith.divf %1077, %1078 : vector<8x1xf32>
    %1080 = vector.broadcast %1079 : vector<8x1xf32> to vector<8x32xf32>
    %1081 = arith.subf %1071, %1080 : vector<8x32xf32>
    %1082 = arith.mulf %1081, %1081 : vector<8x32xf32>
    %cst_778 = arith.constant dense<0.000000e+00> : vector<8xf32>
    %1083 = vector.multi_reduction <add>, %1082, %cst_778 [1] : vector<8x32xf32> to vector<8xf32>
    %1084 = vector.shape_cast %1083 : vector<8xf32> to vector<8x1xf32>
    %cst_779 = arith.constant 3.200000e+01 : f32
    %1085 = vector.broadcast %cst_779 : f32 to vector<8x1xf32>
    %1086 = arith.divf %1084, %1085 : vector<8x1xf32>
    %1087 = vector.broadcast %1079 : vector<8x1xf32> to vector<8x32xf32>
    %1088 = arith.subf %1071, %1087 : vector<8x32xf32>
    %cst_780 = arith.constant 9.99999974E-6 : f32
    %1089 = vector.broadcast %cst_780 : f32 to vector<8x1xf32>
    %1090 = arith.addf %1086, %1089 : vector<8x1xf32>
    %1091 = math.rsqrt %1090 : vector<8x1xf32>
    %1092 = vector.broadcast %1091 : vector<8x1xf32> to vector<8x32xf32>
    %1093 = arith.mulf %1088, %1092 : vector<8x32xf32>
    %1094 = vector.broadcast %1073 : vector<1x32xf32> to vector<8x32xf32>
    %1095 = arith.mulf %1093, %1094 : vector<8x32xf32>
    %1096 = vector.broadcast %1075 : vector<1x32xf32> to vector<8x32xf32>
    %1097 = arith.addf %1095, %1096 : vector<8x32xf32>
    %1098 = arith.truncf %1097 : vector<8x32xf32> to vector<8x32xbf16>
    %c0_781 = arith.constant 0 : index
    %c0_782 = arith.constant 0 : index
    %1099 = vector.load %arg26[%c0_781, %c0_782] : memref<32x128xbf16, #tpu.memory_space<vmem>>, vector<32x128xbf16>
    %cst_783 = arith.constant dense<0.000000e+00> : vector<8x128xf32>
    %1100 = tpu.matmul %1098, %1099, %cst_783 {dimension_numbers = #tpu.dot_dimension_numbers<[1], [0], [0], [1], [0, 0, 1, 1], [], []>} : vector<8x32xbf16>, vector<32x128xbf16>, vector<8x128xf32> -> vector<8x128xf32>
    %c0_784 = arith.constant 0 : index
    %c0_785 = arith.constant 0 : index
    %1101 = vector.load %arg27[%c0_784, %c0_785] : memref<1x128xf32, #tpu.memory_space<vmem>>, vector<1x128xf32>
    %1102 = vector.broadcast %1101 : vector<1x128xf32> to vector<8x128xf32>
    %1103 = arith.addf %1100, %1102 : vector<8x128xf32>
    %cst_786 = arith.constant 0.000000e+00 : f32
    %1104 = vector.broadcast %cst_786 : f32 to vector<8x128xf32>
    %1105 = arith.subf %1104, %1103 : vector<8x128xf32>
    %1106 = math.exp %1105 : vector<8x128xf32>
    %cst_787 = arith.constant 1.000000e+00 : f32
    %1107 = vector.broadcast %cst_787 : f32 to vector<8x128xf32>
    %1108 = arith.addf %1107, %1106 : vector<8x128xf32>
    %cst_788 = arith.constant 1.000000e+00 : f32
    %1109 = vector.broadcast %cst_788 : f32 to vector<8x128xf32>
    %1110 = arith.divf %1109, %1108 : vector<8x128xf32>
    %c0_789 = arith.constant 0 : index
    %c0_790 = arith.constant 0 : index
    %c0_791 = arith.constant 0 : index
    %1111 = vector.load %arg28[%c0_789, %c0_790, %c0_791] : memref<1x8x128xf32, #tpu.memory_space<vmem>>, vector<1x8x128xf32>
    %1112 = vector.shape_cast %1111 : vector<1x8x128xf32> to vector<8x128xf32>
    %1113 = vector.shape_cast %1110 : vector<8x128xf32> to vector<1x8x128xf32>
    tpu.vector_store %arg28[%c0_789, %c0_790, %c0_791], %1113 {strides = array<i32>} : memref<1x8x128xf32, #tpu.memory_space<vmem>>, vector<1x8x128xf32>,
    return
  }
  func.func @transform_0(%arg0: i32, %arg1: memref<2xi32, #tpu.memory_space<smem>>) -> (i32, i32, i32) {
    %c0_i32 = arith.constant 0 : i32
    %c0_i32_0 = arith.constant 0 : i32
    %c0_i32_1 = arith.constant 0 : i32
    return %arg0, %c0_i32, %c0_i32_0 : i32, i32, i32
  }
  func.func @transform_1(%arg0: i32, %arg1: memref<2xi32, #tpu.memory_space<smem>>) -> (i32, i32) {
    %c0_i32 = arith.constant 0 : i32
    %c0_i32_0 = arith.constant 0 : i32
    %c0_i32_1 = arith.constant 0 : i32
    return %c0_i32, %c0_i32_0 : i32, i32
  }
  func.func @transform_2(%arg0: i32, %arg1: memref<2xi32, #tpu.memory_space<smem>>) -> (i32, i32) {
    %c0_i32 = arith.constant 0 : i32
    %c0_i32_0 = arith.constant 0 : i32
    %c0_i32_1 = arith.constant 0 : i32
    return %c0_i32, %c0_i32_0 : i32, i32
  }
  func.func @transform_3(%arg0: i32, %arg1: memref<2xi32, #tpu.memory_space<smem>>) -> (i32, i32) {
    %c0_i32 = arith.constant 0 : i32
    %c0_i32_0 = arith.constant 0 : i32
    %c0_i32_1 = arith.constant 0 : i32
    return %c0_i32, %c0_i32_0 : i32, i32
  }
  func.func @transform_4(%arg0: i32, %arg1: memref<2xi32, #tpu.memory_space<smem>>) -> (i32, i32) {
    %c0_i32 = arith.constant 0 : i32
    %c0_i32_0 = arith.constant 0 : i32
    %c0_i32_1 = arith.constant 0 : i32
    return %c0_i32, %c0_i32_0 : i32, i32
  }
  func.func @transform_5(%arg0: i32, %arg1: memref<2xi32, #tpu.memory_space<smem>>) -> (i32, i32) {
    %c0_i32 = arith.constant 0 : i32
    %c0_i32_0 = arith.constant 0 : i32
    %c0_i32_1 = arith.constant 0 : i32
    return %c0_i32, %c0_i32_0 : i32, i32
  }
  func.func @transform_6(%arg0: i32, %arg1: memref<2xi32, #tpu.memory_space<smem>>) -> (i32, i32) {
    %c0_i32 = arith.constant 0 : i32
    %c0_i32_0 = arith.constant 0 : i32
    %c0_i32_1 = arith.constant 0 : i32
    return %c0_i32, %c0_i32_0 : i32, i32
  }
  func.func @transform_7(%arg0: i32, %arg1: memref<2xi32, #tpu.memory_space<smem>>) -> (i32, i32) {
    %c0_i32 = arith.constant 0 : i32
    %c0_i32_0 = arith.constant 0 : i32
    %c0_i32_1 = arith.constant 0 : i32
    return %c0_i32, %c0_i32_0 : i32, i32
  }
  func.func @transform_8(%arg0: i32, %arg1: memref<2xi32, #tpu.memory_space<smem>>) -> (i32, i32, i32, i32) {
    %c0_i32 = arith.constant 0 : i32
    %c0_i32_0 = arith.constant 0 : i32
    %c0_i32_1 = arith.constant 0 : i32
    %c0_i32_2 = arith.constant 0 : i32
    %c0_i32_3 = arith.constant 0 : i32
    return %c0_i32, %c0_i32_0, %c0_i32_1, %c0_i32_2 : i32, i32, i32, i32
  }
  func.func @transform_9(%arg0: i32, %arg1: memref<2xi32, #tpu.memory_space<smem>>) -> (i32, i32, i32, i32) {
    %c0_i32 = arith.constant 0 : i32
    %c0_i32_0 = arith.constant 0 : i32
    %c0_i32_1 = arith.constant 0 : i32
    %c0_i32_2 = arith.constant 0 : i32
    %c0_i32_3 = arith.constant 0 : i32
    return %c0_i32, %c0_i32_0, %c0_i32_1, %c0_i32_2 : i32, i32, i32, i32
  }
  func.func @transform_10(%arg0: i32, %arg1: memref<2xi32, #tpu.memory_space<smem>>) -> (i32, i32, i32, i32) {
    %c0_i32 = arith.constant 0 : i32
    %c0_i32_0 = arith.constant 0 : i32
    %c0_i32_1 = arith.constant 0 : i32
    %c0_i32_2 = arith.constant 0 : i32
    %c0_i32_3 = arith.constant 0 : i32
    return %c0_i32, %c0_i32_0, %c0_i32_1, %c0_i32_2 : i32, i32, i32, i32
  }
  func.func @transform_11(%arg0: i32, %arg1: memref<2xi32, #tpu.memory_space<smem>>) -> (i32, i32, i32, i32) {
    %c0_i32 = arith.constant 0 : i32
    %c0_i32_0 = arith.constant 0 : i32
    %c0_i32_1 = arith.constant 0 : i32
    %c0_i32_2 = arith.constant 0 : i32
    %c0_i32_3 = arith.constant 0 : i32
    return %c0_i32, %c0_i32_0, %c0_i32_1, %c0_i32_2 : i32, i32, i32, i32
  }
  func.func @transform_12(%arg0: i32, %arg1: memref<2xi32, #tpu.memory_space<smem>>) -> (i32, i32, i32, i32) {
    %c0_i32 = arith.constant 0 : i32
    %c0_i32_0 = arith.constant 0 : i32
    %c0_i32_1 = arith.constant 0 : i32
    %c0_i32_2 = arith.constant 0 : i32
    %c0_i32_3 = arith.constant 0 : i32
    return %c0_i32, %c0_i32_0, %c0_i32_1, %c0_i32_2 : i32, i32, i32, i32
  }
  func.func @transform_13(%arg0: i32, %arg1: memref<2xi32, #tpu.memory_space<smem>>) -> (i32, i32, i32, i32) {
    %c0_i32 = arith.constant 0 : i32
    %c0_i32_0 = arith.constant 0 : i32
    %c0_i32_1 = arith.constant 0 : i32
    %c0_i32_2 = arith.constant 0 : i32
    %c0_i32_3 = arith.constant 0 : i32
    return %c0_i32, %c0_i32_0, %c0_i32_1, %c0_i32_2 : i32, i32, i32, i32
  }
  func.func @transform_14(%arg0: i32, %arg1: memref<2xi32, #tpu.memory_space<smem>>) -> (i32, i32, i32, i32) {
    %c0_i32 = arith.constant 0 : i32
    %c0_i32_0 = arith.constant 0 : i32
    %c0_i32_1 = arith.constant 0 : i32
    %c0_i32_2 = arith.constant 0 : i32
    %c0_i32_3 = arith.constant 0 : i32
    return %c0_i32, %c0_i32_0, %c0_i32_1, %c0_i32_2 : i32, i32, i32, i32
  }
  func.func @transform_15(%arg0: i32, %arg1: memref<2xi32, #tpu.memory_space<smem>>) -> (i32, i32, i32) {
    %c0_i32 = arith.constant 0 : i32
    %c0_i32_0 = arith.constant 0 : i32
    %c0_i32_1 = arith.constant 0 : i32
    %c0_i32_2 = arith.constant 0 : i32
    return %c0_i32, %c0_i32_0, %c0_i32_1 : i32, i32, i32
  }
  func.func @transform_16(%arg0: i32, %arg1: memref<2xi32, #tpu.memory_space<smem>>) -> (i32, i32, i32) {
    %c0_i32 = arith.constant 0 : i32
    %c0_i32_0 = arith.constant 0 : i32
    %c0_i32_1 = arith.constant 0 : i32
    %c0_i32_2 = arith.constant 0 : i32
    return %c0_i32, %c0_i32_0, %c0_i32_1 : i32, i32, i32
  }
  func.func @transform_17(%arg0: i32, %arg1: memref<2xi32, #tpu.memory_space<smem>>) -> (i32, i32, i32) {
    %c0_i32 = arith.constant 0 : i32
    %c0_i32_0 = arith.constant 0 : i32
    %c0_i32_1 = arith.constant 0 : i32
    %c0_i32_2 = arith.constant 0 : i32
    return %c0_i32, %c0_i32_0, %c0_i32_1 : i32, i32, i32
  }
  func.func @transform_18(%arg0: i32, %arg1: memref<2xi32, #tpu.memory_space<smem>>) -> (i32, i32, i32) {
    %c0_i32 = arith.constant 0 : i32
    %c0_i32_0 = arith.constant 0 : i32
    %c0_i32_1 = arith.constant 0 : i32
    %c0_i32_2 = arith.constant 0 : i32
    return %c0_i32, %c0_i32_0, %c0_i32_1 : i32, i32, i32
  }
  func.func @transform_19(%arg0: i32, %arg1: memref<2xi32, #tpu.memory_space<smem>>) -> (i32, i32, i32) {
    %c0_i32 = arith.constant 0 : i32
    %c0_i32_0 = arith.constant 0 : i32
    %c0_i32_1 = arith.constant 0 : i32
    %c0_i32_2 = arith.constant 0 : i32
    return %c0_i32, %c0_i32_0, %c0_i32_1 : i32, i32, i32
  }
  func.func @transform_20(%arg0: i32, %arg1: memref<2xi32, #tpu.memory_space<smem>>) -> (i32, i32, i32) {
    %c0_i32 = arith.constant 0 : i32
    %c0_i32_0 = arith.constant 0 : i32
    %c0_i32_1 = arith.constant 0 : i32
    %c0_i32_2 = arith.constant 0 : i32
    return %c0_i32, %c0_i32_0, %c0_i32_1 : i32, i32, i32
  }
  func.func @transform_21(%arg0: i32, %arg1: memref<2xi32, #tpu.memory_space<smem>>) -> (i32, i32, i32) {
    %c0_i32 = arith.constant 0 : i32
    %c0_i32_0 = arith.constant 0 : i32
    %c0_i32_1 = arith.constant 0 : i32
    %c0_i32_2 = arith.constant 0 : i32
    return %c0_i32, %c0_i32_0, %c0_i32_1 : i32, i32, i32
  }
  func.func @transform_22(%arg0: i32, %arg1: memref<2xi32, #tpu.memory_space<smem>>) -> (i32, i32, i32) {
    %c0_i32 = arith.constant 0 : i32
    %c0_i32_0 = arith.constant 0 : i32
    %c0_i32_1 = arith.constant 0 : i32
    %c0_i32_2 = arith.constant 0 : i32
    return %c0_i32, %c0_i32_0, %c0_i32_1 : i32, i32, i32
  }
  func.func @transform_23(%arg0: i32, %arg1: memref<2xi32, #tpu.memory_space<smem>>) -> (i32, i32, i32) {
    %c0_i32 = arith.constant 0 : i32
    %c0_i32_0 = arith.constant 0 : i32
    %c0_i32_1 = arith.constant 0 : i32
    %c0_i32_2 = arith.constant 0 : i32
    return %c0_i32, %c0_i32_0, %c0_i32_1 : i32, i32, i32
  }
  func.func @transform_24(%arg0: i32, %arg1: memref<2xi32, #tpu.memory_space<smem>>) -> (i32, i32) {
    %c0_i32 = arith.constant 0 : i32
    %c0_i32_0 = arith.constant 0 : i32
    %c0_i32_1 = arith.constant 0 : i32
    return %c0_i32, %c0_i32_0 : i32, i32
  }
  func.func @transform_25(%arg0: i32, %arg1: memref<2xi32, #tpu.memory_space<smem>>) -> (i32, i32) {
    %c0_i32 = arith.constant 0 : i32
    %c0_i32_0 = arith.constant 0 : i32
    %c0_i32_1 = arith.constant 0 : i32
    return %c0_i32, %c0_i32_0 : i32, i32
  }
  func.func @transform_26(%arg0: i32, %arg1: memref<2xi32, #tpu.memory_space<smem>>) -> (i32, i32, i32) {
    %c0_i32 = arith.constant 0 : i32
    %c0_i32_0 = arith.constant 0 : i32
    %c0_i32_1 = arith.constant 0 : i32
    return %arg0, %c0_i32, %c0_i32_0 : i32, i32, i32
  }
}

</mosaic_0001>

<bundles_post_ra>
// kernel: transformer_e2e_lid.1
= control target key start
LH: loop header
LB: loop body
LE: loop exit
PB: predicated region body
PF: predicated region fallthrough
CT: control target
= control target key end

     0   :  { %s11080_s0 = inlined_call_operand.vmem [shape: s32[2], index: 0, kind: input, shape index: {}]   ;;  %s11081_s1 = inlined_call_operand.vmem [shape: f32[2,8,32], index: 1, kind: input, shape index: {}]   ;;  %s11082_s2 = inlined_call_operand.vmem [shape: bf16[32,32], index: 2, kind: input, shape index: {}]   ;;  %s11083_s3 = inlined_call_operand.vmem [shape: f32[1,32], index: 3, kind: input, shape index: {}]   ;;  %s11084_s4 = inlined_call_operand.vmem [shape: f32[1,32], index: 4, kind: input, shape index: {}]   ;;  %s11085_s5 = inlined_call_operand.vmem [shape: f32[1,32], index: 5, kind: input, shape index: {}]   ;;  %s11086_s6 = inlined_call_operand.vmem [shape: f32[8,32], index: 6, kind: input, shape index: {}]   ;;  %s11087_s7 = inlined_call_operand.vmem [shape: f32[1,32], index: 7, kind: input, shape index: {}]   ;;  %s11088_s8 = inlined_call_operand.vmem [shape: f32[1,32], index: 8, kind: input, shape index: {}]   ;;  %s11089_s9 = inlined_call_operand.vmem [shape: bf16[4,4,32,8], index: 9, kind: input, shape index: {}]   ;;  %s11090_s10 = inlined_call_operand.vmem [shape: bf16[4,4,32,8], index: 10, kind: input, shape index: {}]   ;;  %s11091_s11 = inlined_call_operand.vmem [shape: bf16[4,4,32,8], index: 11, kind: input, shape index: {}]   ;;  %s11092_s12 = inlined_call_operand.vmem [shape: f32[4,4,1,8], index: 12, kind: input, shape index: {}]   ;;  %s11093_s13 = inlined_call_operand.vmem [shape: f32[4,4,1,8], index: 13, kind: input, shape index: {}]   ;;  %s11094_s14 = inlined_call_operand.vmem [shape: f32[4,4,1,8], index: 14, kind: input, shape index: {}]   ;;  %s11095_s15 = inlined_call_operand.vmem [shape: bf16[4,4,8,32], index: 15, kind: input, shape index: {}]   ;;  %s11096_s16 = inlined_call_operand.vmem [shape: f32[4,1,32], index: 16, kind: input, shape index: {}]   ;;  %s11097_s17 = inlined_call_operand.vmem [shape: f32[4,1,32], index: 17, kind: input, shape index: {}]   ;;  %s11098_s18 = inlined_call_operand.vmem [shape: f32[4,1,32], index: 18, kind: input, shape index: {}]   ;;  %s11099_s19 = inlined_call_operand.vmem [shape: bf16[4,32,64], index: 19, kind: input, shape index: {}]   ;;  %s11100_s20 = inlined_call_operand.vmem [shape: f32[4,1,64], index: 20, kind: input, shape index: {}]   ;;  %s11101_s21 = inlined_call_operand.vmem [shape: bf16[4,64,32], index: 21, kind: input, shape index: {}]   ;;  %s11102_s22 = inlined_call_operand.vmem [shape: f32[4,1,32], index: 22, kind: input, shape index: {}]   ;;  %s11103_s23 = inlined_call_operand.vmem [shape: f32[4,1,32], index: 23, kind: input, shape index: {}]   ;;  %s11104_s24 = inlined_call_operand.vmem [shape: f32[4,1,32], index: 24, kind: input, shape index: {}]   ;;  %s11105_s25 = inlined_call_operand.vmem [shape: bf16[32,128], index: 25, kind: input, shape index: {}]   ;;  %s11106_s26 = inlined_call_operand.vmem [shape: f32[1,128], index: 26, kind: input, shape index: {}]   ;;  %s11107_s27 = inlined_call_operand.vmem [shape: f32[2,8,128], index: 27, kind: output, shape index: {}]  }
   0x1   :  { %11113 = sst [smem:[#allocation5_spill]] %s11080_s0 }
   0x2   :  { %11114 = sst [smem:[#allocation6_spill]] %s11081_s1 }
   0x3   :  { %11115 = sst [smem:[#allocation7_spill]] %s11082_s2 }
   0x4   :  { %11116 = sst [smem:[#allocation8_spill]] %s11083_s3 }
   0x5   :  { %11117 = sst [smem:[#allocation9_spill]] %s11084_s4 }
   0x6   :  { %11118 = sst [smem:[#allocation10_spill]] %s11085_s5 }
   0x7   :  { %11119 = sst [smem:[#allocation11_spill]] %s11086_s6 }
   0x8   :  { %11120 = sst [smem:[#allocation12_spill]] %s11087_s7 }
   0x9   :  { %11121 = sst [smem:[#allocation13_spill]] %s11088_s8 }
   0xa   :  { %11122 = sst [smem:[#allocation14_spill]] %s11089_s9  ;;  %s11126_s8 = sld [smem:[#allocation5_spill]] }
   0xb   :  { %11123 = sst [smem:[#allocation15_spill]] %s11090_s10 }
   0xc   :  { %11124 = sst [smem:[#allocation16_spill]] %s11091_s11 }
   0xd   :  { %11125 = sst [smem:[#allocation17_spill]] %s11100_s20 }
  0x10   :  { %s32_s20 = sshll.u32 %s11126_s8, 4  ;;  %s33_s20 = int_to_ptr.vmem [resolvable:$true] %s32_s20 }
  0x11   :  { %s9517_s30 = scalar_lea.vmem %s33_s20, 16  ;;  %p9522_p1 = scmp.lt.s32.totalorder %s33_s20, %s33_s20 }
  0x12   :  { %p9518_p0 = scmp.ne.s32.totalorder %s33_s20, %s9517_s30  ;;  %p9523_p2 = scmp.lt.s32.totalorder %s9517_s30, %s9517_s30 }
  0x14   :  { %p9524_p3 = por %p9523_p2, %p9522_p1 }
  0x16   :  { %p9525_p4 = pnand %p9524_p3, %p9518_p0 }
  0x18   :  { %9528 = shalt.err (!%p9525_p4)  }
  0x19   :  { %s9539_s9 = smov [#allocation3]  }
  0x1a   :  { %35 = dma.vmem_to_smem %s33_s20, 16, %s9539_s9, [#allocation2] }
  0x1b   :  { %9533 = dma.done.wait [#allocation2], 16 }
  0x1c   :  { %9534 = vsyncadd [#allocation2], 4294967280 }
  0x1d   :  { %37 = sfence }
  0x1e   :  { %s9686_s5 = smov 0  }
  0x1f LB: > { %s9692_s28 = sadd.s32 4294967295, %s9537_s5   ;;  %p7633_p5 = scmp.ge.s32.totalorder %s9537_s5, 1  ;;  %s9537_s5 = sphi %s9686_s5, %s43_s5  }
  0x20   : > { %p718_p6 = scmp.lt.s32.totalorder %s9537_s5, 3 }
  0x22   : > { %p719_p7 = pnand %p7633_p5, %p718_p6 }
  0x23   : > { %s11127_s10 = sld [smem:[#allocation7_spill]] (!%p719_p7)  ;;  %v9540_v1 = vmov (!%p719_p7), 0.0   ;;  %vm9541_vm0 = vmmov (!%p719_p7), 0   ;;  %p786_p8 = scmp.lt.s32.totalorder (!%p719_p7), %s9692_s28, 1  ;;  %vm820_vm1 = vcmask (!%p719_p7), 261120   ;;  %vm1126_vm2 = vcmask (!%p719_p7), 64512  }
  0x24   : > { %722 = sbr.rel (%p719_p7) target bundleno = 21017 (0x5219), region = 124  ;;  %8525 = vmatprep.subr.bf16.mxu0 (!%p719_p7), %v9540_v1  ;;  %8533 = vmatprep.subr.bf16.mxu1 (!%p719_p7), %v9540_v1  ;;  %s11128_s7 = sld [smem:[#allocation6_spill]] (!%p719_p7)  ;;  %v7648_v50 = vld [vmem:[%s11093_s13] ss:$0 sm:$0xff] (!%p719_p7)  ;;  %vm1191_vm3 = vcmask (!%p719_p7), 1043456   ;;  %vm2490_vm5 = vcmask (!%p719_p7), 523264  }
  0x25   : > { %8529 = vmatprep.mubr.msk.bf16.mxu0 (!%p719_p7), %vm9541_vm0, %v9540_v1  ;;  %8537 = vmatprep.mubr.msk.bf16.mxu1 (!%p719_p7), %vm9541_vm0, %v9540_v1  ;;  %s11129_s9 = sld [smem:[#allocation8_spill]] (!%p719_p7)  ;;  %s11130_s29 = sld [smem:[#allocation9_spill]] (!%p719_p7)  ;;  %v7644_v61 = vld [vmem:[%s11092_s12] ss:$0 sm:$0xff] (!%p719_p7) }
  0x26   : > { %s11131_s3 = sld [smem:[#allocation10_spill]] (!%p719_p7)  ;;  %s11132_s8 = sld [smem:[#allocation11_spill]] (!%p719_p7)  ;;  %v7652_v63 = vld [vmem:[%s11094_s14] ss:$0 sm:$0xff] (!%p719_p7) }
  0x27   : > { %s11133_s20 = sld [smem:[#allocation14_spill]] (!%p719_p7)  ;;  %s11134_s1 = sld [smem:[#allocation15_spill]] (!%p719_p7) }
  0x28   : > { %s11136_s2 = sld [smem:[#allocation13_spill]] (!%p719_p7) }
  0x29   : > { %v9305_v0 = vld [vmem:[%s11127_s10] sm:$0xff] (!%p719_p7)   ;;  %v9306_v2 = vld [vmem:[%s11127_s10 + $0x8] sm:$0xff] (!%p719_p7)  }
  0x2a   : > { %8526 = vmatpush3.bf16.msra.mxu0 (!%p719_p7), %v9305_v0 }
  0x2b   : > { %8527 = vmatprep.subr.bf16.mxu0 %v9540_v1  ;;  %s9711_s6 = scalar_select %p786_p8, %s9692_s28, 1  ;;  %v7636_v5 = vld [vmem:[%s11129_s9] ss:$0 sm:$0xff] }
  0x2c   : > { %v7640_v21 = vld [vmem:[%s11130_s29] ss:$0 sm:$0xff]  ;;  %s11135_s9 = sld [smem:[#allocation12_spill]] }
  0x2d   : > { %s7634_s11 = sshll.u32 %s9711_s6, 3  ;;  %v7641_v23 = vld [vmem:[%s11131_s3] ss:$0 sm:$0xff]  ;;  %v9309_v36 = vld [vmem:[%s11133_s20 + $0x8] sm:$0xff]  }
  0x2e   : > { %8528 = vmatpush3.bf16.msra.mxu0 %v9306_v2  ;;  %s789_s4 = scalar_lea.vmem %s11128_s7, %s7634_s11  ;;  %v894_v25 = vld [vmem:[%s11132_s8] sm:$0xff]  ;;  %v9310_v37 = vld [vmem:[%s11134_s1 + $0x8] sm:$0xff]   ;;  %s925_s8 = sld [smem:[#allocation3 + %s9692_s28]] }
  0x2f   : > { %8541 = vmatprep.subr.bf16.mxu0 %v9540_v1  ;;  %v795_v3 = vld [vmem:[%s789_s4] sm:$0xff]  ;;  %s11137_s4 = sld [smem:[#allocation16_spill]]  ;;  %s793_s7 = scalar_lea.vmem %s11107_s27, %s7634_s11 }
  0x30   : > { %v796_v4 = vpack.c.bf16 %v795_v3, %v795_v3  ;;  %v9307_v34 = vld [vmem:[%s11133_s20] sm:$0xff]  }
  0x31   : > { %v9308_v35 = vld [vmem:[%s11134_s1] sm:$0xff]   ;;  %8534 = vmatpush3.bf16.msra.mxu1 %v9307_v34 }
  0x32   : > { %8530 = vmatmul.mubr.msk.bf16.vlgmr.msra.gmra.mrb[0].mxu0 %vm820_vm1, %v796_v4  ;;  %8535 = vmatprep.subr.bf16.mxu1 %v9540_v1  ;;  %v7642_v42 = vld [vmem:[%s11135_s9] ss:$0 sm:$0xff]  ;;  %s11138_s9 = sld [smem:[#allocation17_spill]] }
  0x33   : > { %8545 = vmatprep.mubr.msk.bf16.mxu0 %vm9541_vm0, %v9540_v1  ;;  %8542 = vmatpush3.bf16.msra.mxu0 %v9308_v35  ;;  %v7643_v44 = vld [vmem:[%s11136_s2] ss:$0 sm:$0xff] }
  0x34   : > { %8543 = vmatprep.subr.bf16.mxu0 %v9540_v1 }
  0x35   : > { %8536 = vmatpush3.bf16.msra.mxu1 %v9309_v36  ;;  %v9311_v47 = vld [vmem:[%s11137_s4] sm:$0xff]   ;;  %v9312_v49 = vld [vmem:[%s11137_s4 + $0x8] sm:$0xff]  }
  0x36   : > { %8549 = vmatprep.subr.bf16.mxu1 %v9540_v1 }
  0x37   : > { %8544 = vmatpush3.bf16.msra.mxu0 %v9310_v37 }
  0x38   : > { %8557 = vmatprep.subr.bf16.mxu0 %v9540_v1 }
 0x105   : > { %v858_v6 = vpop.f32.mrb[0].mxu0 }
 0x106   : > { %v859_v7 = vadd.f32 %v7636_v5, %v858_v6  ;;  %v8531_v8 = vpop.f32.mrb[1].mxu0  ;;  %v9313_v6 = vld [vmem:[%s11133_s20 + $0x10] sm:$0xff]  }
 0x107   : > { %v861_v9 = vpop.f32.mrb[2].mxu0 }
 0x108   : > { %v8532_v10 = vpop.f32.mrb[3].mxu0  ;;  %v866_v11 = vsel %vm820_vm1, %v859_v7, 0.0 }
 0x109   : > { %867 = vadd.xlane.f32.xlu0 %v866_v11  ;;  %v9314_v11 = vld [vmem:[%s11133_s20 + $0x18] sm:$0xff]  }
 0x196   : > { %v868_v12 = vpop.xlane.xlu0 %867 }
 0x197   : > { %v870_v13 = vmul.f32 0.03125, %v868_v12  ;;  %v9315_v12 = vld [vmem:[%s11137_s4 + $0x10] sm:$0xff]  }
 0x199   : > { %v871_v14 = vsub.f32 %v859_v7, %v870_v13  ;;  %v9316_v13 = vld [vmem:[%s11137_s4 + $0x18] sm:$0xff]  }
 0x19b   : > { %v872_v15 = vmul.f32 %v871_v14, %v871_v14 }
 0x19d   : > { %v873_v16 = vsel %vm820_vm1, %v872_v15, 0.0 }
 0x19e   : > { %874 = vadd.xlane.f32.xlu0 %v873_v16  ;;  %v928_v16 = vstv %s925_s8 }
 0x22b   : > { %v875_v17 = vpop.xlane.xlu0 %874 }
 0x22c   : > { %v876_v18 = vmul.f32 0.03125, %v875_v17 }
 0x22e   : > { %v877_v19 = vadd.f32 1e-05, %v876_v18  ;;  %v9542_v18 = vmov -1e+09  }
 0x230   : > { %9429 = vrsqrt.f32 %v877_v19 }
 0x23a   : > { %v9430_v20 = vpop.eup %9429 }
 0x23b   : > { %v879_v22 = vmul.f32 %v9430_v20, %v871_v14  ;;  %v926_v14 = vlaneseq }
 0x23d   : > { %v886_v24 = vmul.f32 %v7640_v21, %v879_v22  ;;  %v927_v15 = vand.u32 127, %v926_v14 }
 0x23f   : > { %v893_v26 = vadd.f32 %v7641_v23, %v886_v24  ;;  %vm929_vm4 = vcmp.lt.s32.totalorder %v927_v15, %v928_v16  ;;  %v7687_v15 = vld [vmem:[%s11095_s15 + $0x4] sm:$0xf] }
 0x240   : > { %v9828_v19 = vsel %vm929_vm4, 0.0, %v9542_v18  ;;  %v1548_v16 = vsel %vm1191_vm3, %v7687_v15, 0 }
 0x241   : > { %v895_v27 = vadd.f32 %v894_v25, %v893_v26 }
 0x243   : > { %v898_v28 = vsel %vm820_vm1, %v895_v27, 0.0 }
 0x244   : > { %899 = vadd.xlane.f32.xlu1 %v898_v28 }
 0x2d1   : > { %v900_v29 = vpop.xlane.xlu1 %899 }
 0x2d2   : > { %v901_v30 = vmul.f32 0.03125, %v900_v29 }
 0x2d4   : > { %v902_v31 = vsub.f32 %v895_v27, %v901_v30  ;;  %v7681_v30 = vld [vmem:[%s11094_s14 + $0x1] ss:$0 sm:$0xff] }
 0x2d6   : > { %v903_v32 = vmul.f32 %v902_v31, %v902_v31 }
 0x2d8   : > { %v904_v33 = vsel %vm820_vm1, %v903_v32, 0.0 }
 0x2d9   : > { %905 = vadd.xlane.f32.xlu1 %v904_v33 }
 0x366   : > { %v906_v38 = vpop.xlane.xlu1 %905 }
 0x367   : > { %v907_v39 = vmul.f32 0.03125, %v906_v38 }
 0x369   : > { %v908_v40 = vadd.f32 1e-05, %v907_v39 }
 0x36b   : > { %9431 = vrsqrt.f32 %v908_v40 }
 0x375   : > { %v9432_v41 = vpop.eup %9431 }
 0x376   : > { %v910_v43 = vmul.f32 %v9432_v41, %v902_v31 }
 0x378   : > { %v917_v45 = vmul.f32 %v7642_v42, %v910_v43 }
 0x37a   : > { %v9761_v46 = vadd.f32 %v7643_v44, %v917_v45 }
 0x37c   : > { %v9768_v48 = vpack.c.bf16 %v9761_v46, %v9761_v46 }
 0x37e   : > { %8538 = vmatmul.mubr.msk.bf16.vlgmr.msra.gmra.mrb[0].mxu1 %vm820_vm1, %v9768_v48  ;;  %8546 = vmatmul.mubr.msk.bf16.vlgmr.msra.gmra.mrb[4].mxu0 %vm820_vm1, %v9768_v48 }
 0x37f   : > { %8550 = vmatpush3.bf16.msra.mxu1 %v9311_v47  ;;  %8553 = vmatprep.mubr.msk.bf16.mxu1 %vm9541_vm0, %v9540_v1  ;;  %v9317_v47 = vld [vmem:[%s11134_s1 + $0x10] sm:$0xff]  }
 0x380   : > { %8551 = vmatprep.subr.bf16.mxu1 %v9540_v1  ;;  %8559 = vmatprep.mubr.msk.bf16.mxu0 %vm9541_vm0, %v9540_v1 }
 0x383   : > { %8552 = vmatpush3.bf16.msra.mxu1 %v9312_v49 }
 0x384   : > { %8563 = vmatprep.subr.bf16.mxu1 %v9540_v1 }
 0x386   : > { %8554 = vmatmul.mubr.msk.bf16.vlgmr.msra.gmra.mrb[4].mxu1 %vm820_vm1, %v9768_v48 }
 0x387   : > { %8565 = vmatprep.mubr.msk.bf16.mxu1 %vm9541_vm0, %v9540_v1 }
 0x451   : > { %v992_v51 = vpop.f32.mrb[0].mxu1  ;;  %v1055_v52 = vpop.f32.mrb[4].mxu0 }
 0x452   : > { %v1056_v53 = vadd.f32 %v7648_v50, %v1055_v52  ;;  %v8539_v54 = vpop.f32.mrb[1].mxu1  ;;  %v8547_v55 = vpop.f32.mrb[5].mxu0  ;;  %v993_v0 = vadd.f32 %v7644_v61, %v992_v51  ;;  %v9318_v50 = vld [vmem:[%s11134_s1 + $0x18] sm:$0xff]  }
 0x453   : > { %v995_v56 = vpop.f32.mrb[2].mxu1  ;;  %v1058_v57 = vpop.f32.mrb[6].mxu0  ;;  %v7672_v55 = vld [vmem:[%s11093_s13 + $0x1] ss:$0 sm:$0xff] }
 0x454   : > { %v1125_v58 = vpack.c.bf16 %v1056_v53, %v1056_v53  ;;  %v8540_v59 = vpop.f32.mrb[3].mxu1  ;;  %v8548_v60 = vpop.f32.mrb[7].mxu0  ;;  %v1124_v7 = vpack.c.bf16 %v993_v0, %v993_v0 }
 0x456   : > { %v1131_v62 = vsel %vm1126_vm2, %v1125_v58, 0 }
 0x457   : > { %8558 = vmatpush3.bf16.xpose.msra.mxu0 %v1131_v62  ;;  %v7663_v62 = vld [vmem:[%s11092_s12 + $0x1] ss:$0 sm:$0xff] }
 0x458   : > { %8569 = vmatprep.subr.bf16.mxu0 %v9540_v1 }
 0x459   : > { %v1118_v2 = vpop.f32.mrb[4].mxu1 }
 0x45a   : > { %v1119_v3 = vadd.f32 %v7652_v63, %v1118_v2  ;;  %v8555_v4 = vpop.f32.mrb[5].mxu1 }
 0x45b   : > { %v1121_v5 = vpop.f32.mrb[6].mxu1 }
 0x45c   : > { %v1187_v8 = vpack.c.bf16 %v1119_v3, %v1119_v3  ;;  %v8556_v9 = vpop.f32.mrb[7].mxu1 }
 0x45e   : > { %v1193_v10 = vsel %vm1191_vm3, %v1187_v8, 0  ;;  %8560 = vmatmul.mubr.msk.bf16.vlgmr.msra.gmra.mrb[8].mxu0 %vm1126_vm2, %v1124_v7 }
 0x45f   : > { %8564 = vmatpush3.bf16.msra.mxu1 %v1193_v10  ;;  %8570 = vmatpush3.bf16.msra.mxu0 %v9313_v6 }
 0x460   : > { %8571 = vmatprep.subr.bf16.mxu0 %v9540_v1  ;;  %8573 = vmatprep.mubr.msk.bf16.mxu0 %vm9541_vm0, %v9540_v1 }
 0x461   : > { %8577 = vmatprep.subr.bf16.mxu1 %v9540_v1 }
 0x463   : > { %8572 = vmatpush3.bf16.msra.mxu0 %v9314_v11 }
 0x464   : > { %8585 = vmatprep.subr.bf16.mxu0 %v9540_v1 }
 0x466   : > { %8574 = vmatmul.mubr.msk.bf16.vlgmr.msra.gmra.mrb[12].mxu0 %vm820_vm1, %v9768_v48 }
 0x467   : > { %8586 = vmatpush3.bf16.msra.mxu0 %v9315_v12  ;;  %8589 = vmatprep.mubr.msk.bf16.mxu0 %vm9541_vm0, %v9540_v1 }
 0x468   : > { %8587 = vmatprep.subr.bf16.mxu0 %v9540_v1 }
 0x46b   : > { %8588 = vmatpush3.bf16.msra.mxu0 %v9316_v13 }
 0x46c   : > { %8599 = vmatprep.subr.bf16.mxu0 %v9540_v1 }
 0x46e   : > { %8590 = vmatmul.mubr.msk.bf16.vlgmr.msra.gmra.mrb[16].mxu0 %vm820_vm1, %v9768_v48 }
 0x46f   : > { %8601 = vmatprep.mubr.msk.bf16.mxu0 %vm9541_vm0, %v9540_v1 }
 0x531   : > { %v1167_v17 = vpop.f32.mrb[8].mxu0 }
 0x532   : > { %v1173_v20 = vmul.f32 0.35355338, %v1167_v17  ;;  %v8561_v21 = vpop.f32.mrb[9].mxu0 }
 0x533   : > { %v1170_v22 = vpop.f32.mrb[10].mxu0 }
 0x534   : > { %v8562_v23 = vpop.f32.mrb[11].mxu0  ;;  %v1174_v24 = vadd.f32 %v1173_v20, %v9828_v19  ;;  %v1236_v20 = vld [vmem:[%s11095_s15] sm:$0xf] }
 0x535   : > { %v1594_v23 = vsel %vm1191_vm3, %v1236_v20, 0  ;;  %v7719_v20 = vld [vmem:[%s11095_s15 + $0x8] sm:$0xf] }
 0x536   : > { %v1175_v25 = vsel %vm1126_vm2, %v1174_v24, -inf }
 0x537   : > { %1176 = vmax.xlane.f32.xlu0 %v1175_v25 }
 0x539   : > { %v1296_v26 = vpop.f32.mrb[12].mxu0 }
 0x53a   : > { %v8575_v27 = vpop.f32.mrb[13].mxu0  ;;  %v1297_v0 = vadd.f32 %v7663_v62, %v1296_v26  ;;  %v9320_v26 = vld [vmem:[%s11134_s1 + $0x28] sm:$0xff]   ;;  %v7713_v62 = vld [vmem:[%s11094_s14 + $0x2] ss:$0 sm:$0xff] }
 0x53b   : > { %v1299_v28 = vpop.f32.mrb[14].mxu0 }
 0x53c   : > { %v8576_v29 = vpop.f32.mrb[15].mxu0  ;;  %v1432_v2 = vpack.c.bf16 %v1297_v0, %v1297_v0  ;;  %v9321_v28 = vld [vmem:[%s11133_s20 + $0x20] sm:$0xff]  }
 0x541   : > { %v1426_v31 = vpop.f32.mrb[16].mxu0 }
 0x542   : > { %v1427_v32 = vadd.f32 %v7681_v30, %v1426_v31  ;;  %v8591_v33 = vpop.f32.mrb[17].mxu0 }
 0x543   : > { %v1429_v34 = vpop.f32.mrb[18].mxu0  ;;  %v9322_v33 = vld [vmem:[%s11133_s20 + $0x28] sm:$0xff]  }
 0x544   : > { %v1494_v35 = vpack.c.bf16 %v1427_v32, %v1427_v32  ;;  %v8592_v36 = vpop.f32.mrb[19].mxu0 }
 0x546   : > { %v1499_v37 = vsel %vm1191_vm3, %v1494_v35, 0  ;;  %v9323_v35 = vld [vmem:[%s11137_s4 + $0x20] sm:$0xff]  }
 0x547   : > { %8600 = vmatpush3.bf16.msra.mxu0 %v1499_v37 }
 0x548   : > { %8611 = vmatprep.subr.bf16.mxu0 %v9540_v1 }
 0x5c4   : > { %v1177_v38 = vpop.xlane.xlu0 %1176 }
 0x5c5   : > { %v1178_v39 = vsub.f32 %v1174_v24, %v1177_v38  ;;  %v9319_v24 = vld [vmem:[%s11134_s1 + $0x20] sm:$0xff]  }
 0x5c7   : > { %v1179_v40 = vmul.f32 1.442695, %v1178_v39  ;;  %v9324_v39 = vld [vmem:[%s11137_s4 + $0x28] sm:$0xff]  }
 0x5c9   : > { %9433 = vpow2.f32 %v1179_v40  ;;  %v7704_v40 = vld [vmem:[%s11093_s13 + $0x2] ss:$0 sm:$0xff] }
 0x5d3   : > { %v9434_v41 = vpop.eup %9433 }
 0x5d4   : > { %v1181_v42 = vsel %vm1126_vm2, %v9434_v41, 0.0 }
 0x5d5   : > { %1182 = vadd.xlane.f32.xlu1 %v1181_v42 }
 0x662   : > { %v1183_v43 = vpop.xlane.xlu1 %1182 }
 0x663   : > { %9435 = vrcp.f32 %v1183_v43 }
 0x66d   : > { %v9436_v44 = vpop.eup %9435 }
 0x66e   : > { %v1185_v45 = vmul.f32 %v9436_v44, %v9434_v41 }
 0x670   : > { %v1186_v49 = vpack.c.bf16 %v1185_v45, %v1185_v45 }
 0x672   : > { %8566 = vmatmul.mubr.msk.bf16.vlgmr.msra.gmra.mrb[8].mxu1 %vm1126_vm2, %v1186_v49 }
 0x673   : > { %8578 = vmatpush3.bf16.msra.mxu1 %v9317_v47  ;;  %8581 = vmatprep.mubr.msk.bf16.mxu1 %vm9541_vm0, %v9540_v1 }
 0x674   : > { %8579 = vmatprep.subr.bf16.mxu1 %v9540_v1 }
 0x677   : > { %8580 = vmatpush3.bf16.msra.mxu1 %v9318_v50 }
 0x678   : > { %8593 = vmatprep.subr.bf16.mxu1 %v9540_v1 }
 0x67a   : > { %8582 = vmatmul.mubr.msk.bf16.vlgmr.msra.gmra.mrb[12].mxu1 %vm820_vm1, %v9768_v48 }
 0x67b   : > { %8595 = vmatprep.mubr.msk.bf16.mxu1 %vm9541_vm0, %v9540_v1 }
 0x745   : > { %v1229_v51 = vpop.f32.mrb[8].mxu1 }
 0x746   : > { %v8567_v52 = vpop.f32.mrb[9].mxu1  ;;  %v1235_v25 = vpack.c.bf16 %v1229_v51, %v1229_v51 }
 0x747   : > { %v1232_v53 = vpop.f32.mrb[10].mxu1 }
 0x748   : > { %v8568_v54 = vpop.f32.mrb[11].mxu1 }
 0x74d   : > { %v1361_v56 = vpop.f32.mrb[12].mxu1 }
 0x74e   : > { %v1362_v57 = vadd.f32 %v7672_v55, %v1361_v56  ;;  %v8583_v58 = vpop.f32.mrb[13].mxu1  ;;  %v7695_v55 = vld [vmem:[%s11092_s12 + $0x2] ss:$0 sm:$0xff] }
 0x74f   : > { %v1364_v59 = vpop.f32.mrb[14].mxu1 }
 0x750   : > { %v1433_v60 = vpack.c.bf16 %v1362_v57, %v1362_v57  ;;  %v8584_v61 = vpop.f32.mrb[15].mxu1 }
 0x752   : > { %v1438_v63 = vsel %vm1126_vm2, %v1433_v60, 0 }
 0x753   : > { %8594 = vmatpush3.bf16.xpose.msra.mxu1 %v1438_v63 }
 0x754   : > { %8605 = vmatprep.subr.bf16.mxu1 %v9540_v1 }
 0x75a   : > { %8596 = vmatmul.mubr.msk.bf16.vlgmr.msra.gmra.mrb[16].mxu1 %vm1126_vm2, %v1432_v2 }
 0x75b   : > { %8607 = vmatprep.mubr.msk.bf16.mxu1 %vm9541_vm0, %v9540_v1  ;;  %8606 = vmatpush3.bf16.msra.mxu1 %v1548_v16 }
 0x75c   : > { %8617 = vmatprep.subr.bf16.mxu1 %v9540_v1 }
 0x82d   : > { %v1474_v3 = vpop.f32.mrb[16].mxu1 }
 0x82e   : > { %v1480_v4 = vmul.f32 0.35355338, %v1474_v3  ;;  %v8597_v5 = vpop.f32.mrb[17].mxu1 }
 0x82f   : > { %v1477_v6 = vpop.f32.mrb[18].mxu1 }
 0x830   : > { %v8598_v7 = vpop.f32.mrb[19].mxu1  ;;  %v1481_v8 = vadd.f32 %v1480_v4, %v9828_v19 }
 0x832   : > { %v1482_v9 = vsel %vm1126_vm2, %v1481_v8, -inf }
 0x833   : > { %1483 = vmax.xlane.f32.xlu0 %v1482_v9 }
 0x8c0   : > { %v1484_v10 = vpop.xlane.xlu0 %1483 }
 0x8c1   : > { %v1485_v11 = vsub.f32 %v1481_v8, %v1484_v10 }
 0x8c3   : > { %v1486_v12 = vmul.f32 1.442695, %v1485_v11 }
 0x8c5   : > { %9437 = vpow2.f32 %v1486_v12 }
 0x8cf   : > { %v9438_v13 = vpop.eup %9437 }
 0x8d0   : > { %v1488_v14 = vsel %vm1126_vm2, %v9438_v13, 0.0 }
 0x8d1   : > { %1489 = vadd.xlane.f32.xlu1 %v1488_v14 }
 0x95e   : > { %v1490_v17 = vpop.xlane.xlu1 %1489 }
 0x95f   : > { %9439 = vrcp.f32 %v1490_v17 }
 0x969   : > { %v9440_v18 = vpop.eup %9439 }
 0x96a   : > { %v1492_v21 = vmul.f32 %v9440_v18, %v9438_v13 }
 0x96c   : > { %v1493_v22 = vpack.c.bf16 %v1492_v21, %v1492_v21  ;;  %v1947_v21 = vsel %vm1191_vm3, %v7719_v20, 0 }
 0x96e   : > { %8602 = vmatmul.mubr.msk.bf16.vlgmr.msra.gmra.mrb[20].mxu0 %vm1126_vm2, %v1493_v22 }
 0x96f   : > { %8612 = vmatpush3.bf16.msra.mxu0 %v1594_v23  ;;  %8613 = vmatprep.mubr.msk.bf16.mxu0 %vm9541_vm0, %v9540_v1 }
 0x970   : > { %8625 = vmatprep.subr.bf16.mxu0 %v9540_v1 }
 0x976   : > { %8614 = vmatmul.mubr.msk.bf16.vlgmr.msra.gmra.mrb[24].mxu0 %vm1126_vm2, %v1235_v25  ;;  %v9325_v25 = vld [vmem:[%s11133_s20 + $0x30] sm:$0xff]  }
 0x977   : > { %8626 = vmatpush3.bf16.msra.mxu0 %v9319_v24  ;;  %8629 = vmatprep.mubr.msk.bf16.mxu0 %vm9541_vm0, %v9540_v1 }
 0x978   : > { %8627 = vmatprep.subr.bf16.mxu0 %v9540_v1 }
 0x97b   : > { %8628 = vmatpush3.bf16.msra.mxu0 %v9320_v26 }
 0x97c   : > { %8641 = vmatprep.subr.bf16.mxu0 %v9540_v1 }
 0x97e   : > { %8630 = vmatmul.mubr.msk.bf16.vlgmr.msra.gmra.mrb[28].mxu0 %vm820_vm1, %v9768_v48 }
 0x97f   : > { %8643 = vmatprep.mubr.msk.bf16.mxu0 %vm9541_vm0, %v9540_v1 }
 0xa41   : > { %v1535_v27 = vpop.f32.mrb[20].mxu0 }
 0xa42   : > { %v1541_v29 = vpack.c.bf16 %v1535_v27, %v1535_v27  ;;  %v8603_v30 = vpop.f32.mrb[21].mxu0  ;;  %v9326_v27 = vld [vmem:[%s11133_s20 + $0x38] sm:$0xff]  }
 0xa43   : > { %v1538_v31 = vpop.f32.mrb[22].mxu0 }
 0xa44   : > { %v8604_v32 = vpop.f32.mrb[23].mxu0  ;;  %8608 = vmatmul.mubr.msk.bf16.vlgmr.msra.gmra.mrb[20].mxu1 %vm1126_vm2, %v1541_v29  ;;  %v9328_v29 = vld [vmem:[%s11137_s4 + $0x38] sm:$0xff]   ;;  %v9329_v31 = vld [vmem:[%s11134_s1 + $0x30] sm:$0xff]  }
 0xa45   : > { %8618 = vmatpush3.bf16.msra.mxu1 %v9321_v28  ;;  %8621 = vmatprep.mubr.msk.bf16.mxu1 %vm9541_vm0, %v9540_v1  ;;  %v9327_v28 = vld [vmem:[%s11137_s4 + $0x30] sm:$0xff]  }
 0xa46   : > { %8619 = vmatprep.subr.bf16.mxu1 %v9540_v1 }
 0xa49   : > { %v1630_v34 = vpop.f32.mrb[24].mxu0  ;;  %8620 = vmatpush3.bf16.msra.mxu1 %v9322_v33 }
 0xa4a   : > { %v8615_v36 = vpop.f32.mrb[25].mxu0  ;;  %8633 = vmatprep.subr.bf16.mxu1 %v9540_v1 }
 0xa4b   : > { %v1633_v37 = vpop.f32.mrb[26].mxu0  ;;  %v9330_v36 = vld [vmem:[%s11134_s1 + $0x38] sm:$0xff]  }
 0xa4c   : > { %v8616_v38 = vpop.f32.mrb[27].mxu0  ;;  %8622 = vmatmul.mubr.msk.bf16.vlgmr.msra.gmra.mrb[24].mxu1 %vm820_vm1, %v9768_v48 }
 0xa4d   : > { %8634 = vmatpush3.bf16.msra.mxu1 %v9323_v35  ;;  %8637 = vmatprep.mubr.msk.bf16.mxu1 %vm9541_vm0, %v9540_v1 }
 0xa4e   : > { %8635 = vmatprep.subr.bf16.mxu1 %v9540_v1 }
 0xa51   : > { %v1760_v41 = vpop.f32.mrb[28].mxu0  ;;  %8636 = vmatpush3.bf16.msra.mxu1 %v9324_v39 }
 0xa52   : > { %v1761_v42 = vadd.f32 %v7704_v40, %v1760_v41  ;;  %v8631_v43 = vpop.f32.mrb[29].mxu0  ;;  %8647 = vmatprep.subr.bf16.mxu1 %v9540_v1  ;;  %v7744_v41 = vld [vmem:[%s11094_s14 + $0x3] ss:$0 sm:$0xff] }
 0xa53   : > { %v1763_v44 = vpop.f32.mrb[30].mxu0 }
 0xa54   : > { %v1832_v45 = vpack.c.bf16 %v1761_v42, %v1761_v42  ;;  %v8632_v47 = vpop.f32.mrb[31].mxu0  ;;  %8638 = vmatmul.mubr.msk.bf16.vlgmr.msra.gmra.mrb[28].mxu1 %vm820_vm1, %v9768_v48 }
 0xa55   : > { %8649 = vmatprep.mubr.msk.bf16.mxu1 %vm9541_vm0, %v9540_v1 }
 0xa56   : > { %v1837_v49 = vsel %vm1126_vm2, %v1832_v45, 0 }
 0xa57   : > { %8642 = vmatpush3.bf16.xpose.msra.mxu0 %v1837_v49 }
 0xa58   : > { %8653 = vmatprep.subr.bf16.mxu0 %v9540_v1 }
 0xb17   : > { %v1584_v50 = vpop.f32.mrb[20].mxu1 }
 0xb18   : > { %v9927_v51 = vadd.f32 %v1630_v34, %v1584_v50  ;;  %v8609_v52 = vpop.f32.mrb[21].mxu1 }
 0xb19   : > { %v1587_v53 = vpop.f32.mrb[22].mxu1 }
 0xb1a   : > { %v8610_v54 = vpop.f32.mrb[23].mxu1 }
 0xb1f   : > { %v1695_v56 = vpop.f32.mrb[24].mxu1 }
 0xb20   : > { %v1696_v57 = vadd.f32 %v7695_v55, %v1695_v56  ;;  %v8623_v58 = vpop.f32.mrb[25].mxu1  ;;  %v7735_v56 = vld [vmem:[%s11093_s13 + $0x3] ss:$0 sm:$0xff] }
 0xb21   : > { %v1698_v59 = vpop.f32.mrb[26].mxu1 }
 0xb22   : > { %v1831_v60 = vpack.c.bf16 %v1696_v57, %v1696_v57  ;;  %v8624_v61 = vpop.f32.mrb[27].mxu1 }
 0xb24   : > { %8644 = vmatmul.mubr.msk.bf16.vlgmr.msra.gmra.mrb[32].mxu0 %vm1126_vm2, %v1831_v60 }
 0xb25   : > { %8655 = vmatprep.mubr.msk.bf16.mxu0 %vm9541_vm0, %v9540_v1  ;;  %8654 = vmatpush3.bf16.msra.mxu0 %v1947_v21 }
 0xb26   : > { %8667 = vmatprep.subr.bf16.mxu0 %v9540_v1 }
 0xb27   : > { %v1825_v63 = vpop.f32.mrb[28].mxu1 }
 0xb28   : > { %v1826_v0 = vadd.f32 %v7713_v62, %v1825_v63  ;;  %v8639_v2 = vpop.f32.mrb[29].mxu1  ;;  %v7726_v63 = vld [vmem:[%s11092_s12 + $0x3] ss:$0 sm:$0xff] }
 0xb29   : > { %v1828_v3 = vpop.f32.mrb[30].mxu1 }
 0xb2a   : > { %v1893_v4 = vpack.c.bf16 %v1826_v0, %v1826_v0  ;;  %v8640_v5 = vpop.f32.mrb[31].mxu1 }
 0xb2c   : > { %v1898_v6 = vsel %vm1191_vm3, %v1893_v4, 0 }
 0xb2d   : > { %8648 = vmatpush3.bf16.msra.mxu1 %v1898_v6 }
 0xb2e   : > { %8659 = vmatprep.subr.bf16.mxu1 %v9540_v1 }
 0xbf7   : > { %v1873_v7 = vpop.f32.mrb[32].mxu0 }
 0xbf8   : > { %v1879_v8 = vmul.f32 0.35355338, %v1873_v7  ;;  %v8645_v9 = vpop.f32.mrb[33].mxu0 }
 0xbf9   : > { %v1876_v10 = vpop.f32.mrb[34].mxu0 }
 0xbfa   : > { %v8646_v11 = vpop.f32.mrb[35].mxu0  ;;  %v1880_v12 = vadd.f32 %v1879_v8, %v9828_v19 }
 0xbfc   : > { %v1881_v13 = vsel %vm1126_vm2, %v1880_v12, -inf }
 0xbfd   : > { %1882 = vmax.xlane.f32.xlu0 %v1881_v13 }
 0xc8a   : > { %v1883_v14 = vpop.xlane.xlu0 %1882 }
 0xc8b   : > { %v1884_v15 = vsub.f32 %v1880_v12, %v1883_v14 }
 0xc8d   : > { %v1885_v16 = vmul.f32 1.442695, %v1884_v15  ;;  %v7750_v15 = vld [vmem:[%s11095_s15 + $0xc] sm:$0xf] }
 0xc8f   : > { %9441 = vpow2.f32 %v1885_v16  ;;  %v2301_v16 = vsel %vm1191_vm3, %v7750_v15, 0  ;;  %v9337_v15 = vld [vmem:[%s11133_s20 + $0x40] sm:$0xff]  }
 0xc99   : > { %v9442_v17 = vpop.eup %9441 }
 0xc9a   : > { %v1887_v18 = vsel %vm1126_vm2, %v9442_v17, 0.0 }
 0xc9b   : > { %1888 = vadd.xlane.f32.xlu1 %v1887_v18 }
 0xd28   : > { %v1889_v22 = vpop.xlane.xlu1 %1888 }
 0xd29   : > { %9443 = vrcp.f32 %v1889_v22 }
 0xd33   : > { %v9444_v23 = vpop.eup %9443 }
 0xd34   : > { %v1891_v24 = vmul.f32 %v9444_v23, %v9442_v17 }
 0xd36   : > { %v1892_v26 = vpack.c.bf16 %v1891_v24, %v1891_v24 }
 0xd38   : > { %8650 = vmatmul.mubr.msk.bf16.vlgmr.msra.gmra.mrb[32].mxu1 %vm1126_vm2, %v1892_v26 }
 0xd39   : > { %8660 = vmatpush3.bf16.msra.mxu1 %v9325_v25  ;;  %8663 = vmatprep.mubr.msk.bf16.mxu1 %vm9541_vm0, %v9540_v1 }
 0xd3a   : > { %8661 = vmatprep.subr.bf16.mxu1 %v9540_v1 }
 0xd3d   : > { %8662 = vmatpush3.bf16.msra.mxu1 %v9326_v27 }
 0xd3e   : > { %8675 = vmatprep.subr.bf16.mxu1 %v9540_v1 }
 0xd40   : > { %8664 = vmatmul.mubr.msk.bf16.vlgmr.msra.gmra.mrb[36].mxu1 %vm820_vm1, %v9768_v48 }
 0xd41   : > { %8676 = vmatpush3.bf16.msra.mxu1 %v9327_v28  ;;  %8679 = vmatprep.mubr.msk.bf16.mxu1 %vm9541_vm0, %v9540_v1  ;;  %v7752_v28 = vld [vmem:[%s11096_s16] ss:$0 sm:$0xff] }
 0xd42   : > { %8677 = vmatprep.subr.bf16.mxu1 %v9540_v1 }
 0xd45   : > { %8678 = vmatpush3.bf16.msra.mxu1 %v9328_v29 }
 0xd46   : > { %8689 = vmatprep.subr.bf16.mxu1 %v9540_v1 }
 0xd48   : > { %8680 = vmatmul.mubr.msk.bf16.vlgmr.msra.gmra.mrb[40].mxu1 %vm820_vm1, %v9768_v48 }
 0xd49   : > { %8691 = vmatprep.mubr.msk.bf16.mxu1 %vm9541_vm0, %v9540_v1 }
 0xe0b   : > { %v1934_v30 = vpop.f32.mrb[32].mxu1 }
 0xe0c   : > { %v1940_v32 = vpack.c.bf16 %v1934_v30, %v1934_v30  ;;  %v8651_v33 = vpop.f32.mrb[33].mxu1 }
 0xe0d   : > { %v1937_v34 = vpop.f32.mrb[34].mxu1 }
 0xe0e   : > { %v8652_v35 = vpop.f32.mrb[35].mxu1  ;;  %8656 = vmatmul.mubr.msk.bf16.vlgmr.msra.gmra.mrb[36].mxu0 %vm1126_vm2, %v1940_v32 }
 0xe0f   : > { %8668 = vmatpush3.bf16.msra.mxu0 %v9329_v31  ;;  %8671 = vmatprep.mubr.msk.bf16.mxu0 %vm9541_vm0, %v9540_v1 }
 0xe10   : > { %8669 = vmatprep.subr.bf16.mxu0 %v9540_v1 }
 0xe13   : > { %v2049_v37 = vpop.f32.mrb[36].mxu1  ;;  %8670 = vmatpush3.bf16.msra.mxu0 %v9330_v36 }
 0xe14   : > { %v8665_v38 = vpop.f32.mrb[37].mxu1  ;;  %8683 = vmatprep.subr.bf16.mxu0 %v9540_v1 }
 0xe15   : > { %v2052_v39 = vpop.f32.mrb[38].mxu1 }
 0xe16   : > { %v8666_v40 = vpop.f32.mrb[39].mxu1  ;;  %8672 = vmatmul.mubr.msk.bf16.vlgmr.msra.gmra.mrb[40].mxu0 %vm820_vm1, %v9768_v48 }
 0xe17   : > { %8685 = vmatprep.mubr.msk.bf16.mxu0 %vm9541_vm0, %v9540_v1 }
 0xe1b   : > { %v2179_v42 = vpop.f32.mrb[40].mxu1 }
 0xe1c   : > { %v2180_v43 = vadd.f32 %v7744_v41, %v2179_v42  ;;  %v8681_v44 = vpop.f32.mrb[41].mxu1  ;;  %v9331_v41 = vld [vmem:[%s11099_s19] sm:$0xff]  }
 0xe1d   : > { %v2182_v45 = vpop.f32.mrb[42].mxu1  ;;  %v9333_v42 = vld [vmem:[%s11101_s21] sm:$0xff]  }
 0xe1e   : > { %v2247_v47 = vpack.c.bf16 %v2180_v43, %v2180_v43  ;;  %v8682_v49 = vpop.f32.mrb[43].mxu1  ;;  %v9334_v43 = vld [vmem:[%s11101_s21 + $0x8] sm:$0xff]  }
 0xe20   : > { %v2252_v50 = vsel %vm1191_vm3, %v2247_v47, 0 }
 0xe21   : > { %8690 = vmatpush3.bf16.msra.mxu1 %v2252_v50  ;;  %v7753_v50 = vld [vmem:[%s11097_s17] ss:$0 sm:$0xff] }
 0xe22   : > { %8701 = vmatprep.subr.bf16.mxu1 %v9540_v1 }
 0xee1   : > { %v1983_v52 = vpop.f32.mrb[36].mxu0 }
 0xee2   : > { %v1989_v48 = vadd.f32 %v1983_v52, %v9927_v51  ;;  %v8657_v53 = vpop.f32.mrb[37].mxu0  ;;  %v2050_v51 = vadd.f32 %v7726_v63, %v2049_v37 }
 0xee3   : > { %v1986_v54 = vpop.f32.mrb[38].mxu0 }
 0xee4   : > { %v8658_v55 = vpop.f32.mrb[39].mxu0  ;;  %v2185_v2 = vpack.c.bf16 %v2050_v51, %v2050_v51 }
 0xee9   : > { %v2114_v57 = vpop.f32.mrb[40].mxu0 }
 0xeea   : > { %v2115_v58 = vadd.f32 %v7735_v56, %v2114_v57  ;;  %v8673_v59 = vpop.f32.mrb[41].mxu0  ;;  %v9335_v56 = vld [vmem:[%s11101_s21 + $0x10] sm:$0xff]   ;;  %v9336_v57 = vld [vmem:[%s11101_s21 + $0x18] sm:$0xff]  }
 0xeeb   : > { %v2117_v60 = vpop.f32.mrb[42].mxu0 }
 0xeec   : > { %v2186_v61 = vpack.c.bf16 %v2115_v58, %v2115_v58  ;;  %v8674_v62 = vpop.f32.mrb[43].mxu0  ;;  %v7755_v58 = vld [vmem:[%s11138_s9] ss:$0 sm:$0xff] }
 0xeee   : > { %v2191_v0 = vsel %vm1126_vm2, %v2186_v61, 0 }
 0xeef   : > { %8684 = vmatpush3.bf16.xpose.msra.mxu0 %v2191_v0 }
 0xef0   : > { %8695 = vmatprep.subr.bf16.mxu0 %v9540_v1 }
 0xef6   : > { %8686 = vmatmul.mubr.msk.bf16.vlgmr.msra.gmra.mrb[44].mxu0 %vm1126_vm2, %v2185_v2  ;;  %v7759_v2 = vld [vmem:[%s11102_s22] ss:$0 sm:$0xff] }
 0xef7   : > { %8697 = vmatprep.mubr.msk.bf16.mxu0 %vm9541_vm0, %v9540_v1  ;;  %8696 = vmatpush3.bf16.msra.mxu0 %v2301_v16  ;;  %v9338_v16 = vld [vmem:[%s11137_s4 + $0x40] sm:$0xff]  }
 0xef8   : > { %8709 = vmatprep.subr.bf16.mxu0 %v9540_v1 }
 0xfc9   : > { %v2227_v3 = vpop.f32.mrb[44].mxu0 }
 0xfca   : > { %v2233_v4 = vmul.f32 0.35355338, %v2227_v3  ;;  %v8687_v5 = vpop.f32.mrb[45].mxu0 }
 0xfcb   : > { %v2230_v6 = vpop.f32.mrb[46].mxu0 }
 0xfcc   : > { %v8688_v7 = vpop.f32.mrb[47].mxu0  ;;  %v2234_v8 = vadd.f32 %v2233_v4, %v9828_v19 }
 0xfce   : > { %v2235_v9 = vsel %vm1126_vm2, %v2234_v8, -inf }
 0xfcf   : > { %2236 = vmax.xlane.f32.xlu0 %v2235_v9 }
0x105c   : > { %v2237_v10 = vpop.xlane.xlu0 %2236 }
0x105d   : > { %v2238_v11 = vsub.f32 %v2234_v8, %v2237_v10 }
0x105f   : > { %v2239_v12 = vmul.f32 1.442695, %v2238_v11 }
0x1061   : > { %9445 = vpow2.f32 %v2239_v12 }
0x106b   : > { %v9446_v13 = vpop.eup %9445 }
0x106c   : > { %v2241_v14 = vsel %vm1126_vm2, %v9446_v13, 0.0 }
0x106d   : > { %2242 = vadd.xlane.f32.xlu1 %v2241_v14 }
0x10fa   : > { %v2243_v17 = vpop.xlane.xlu1 %2242 }
0x10fb   : > { %9447 = vrcp.f32 %v2243_v17  ;;  %v9339_v17 = vld [vmem:[%s11133_s20 + $0x48] sm:$0xff]  }
0x1105   : > { %v9448_v18 = vpop.eup %9447 }
0x1106   : > { %v2245_v20 = vmul.f32 %v9448_v18, %v9446_v13  ;;  %v9340_v18 = vld [vmem:[%s11137_s4 + $0x48] sm:$0xff]  }
0x1108   : > { %v2246_v21 = vpack.c.bf16 %v2245_v20, %v2245_v20 }
0x110a   : > { %8692 = vmatmul.mubr.msk.bf16.vlgmr.msra.gmra.mrb[44].mxu1 %vm1126_vm2, %v2246_v21 }
0x110b   : > { %8705 = vmatprep.mubr.msk.bf16.mxu1 %vm9541_vm0, %v9540_v1  ;;  %8702 = vmatpush3.bf16.msra.mxu1 %v9331_v41 }
0x110c   : > { %8703 = vmatprep.subr.bf16.mxu1 %v9540_v1 }
0x11dd   : > { %v2288_v22 = vpop.f32.mrb[44].mxu1 }
0x11de   : > { %v2294_v23 = vpack.c.bf16 %v2288_v22, %v2288_v22  ;;  %v8693_v24 = vpop.f32.mrb[45].mxu1 }
0x11df   : > { %v2291_v25 = vpop.f32.mrb[46].mxu1  ;;  %v7765_v24 = vld [vmem:[%s11103_s23] ss:$0 sm:$0xff] }
0x11e0   : > { %v8694_v26 = vpop.f32.mrb[47].mxu1  ;;  %8698 = vmatmul.mubr.msk.bf16.vlgmr.msra.gmra.mrb[48].mxu0 %vm1126_vm2, %v2294_v23 }
0x11e1   : > { %8717 = vmatprep.mubr.msk.bf16.mxu0 %vm9541_vm0, %v9540_v1  ;;  %8710 = vmatpush3.bf16.msra.mxu0 %v9333_v42  ;;  %v7766_v26 = vld [vmem:[%s11104_s24] ss:$0 sm:$0xff] }
0x11e2   : > { %8711 = vmatprep.subr.bf16.mxu0 %v9540_v1 }
0x11e5   : > { %8712 = vmatpush3.bf16.msra.mxu0 %v9334_v43  ;;  %v7781_v43 = vld [vmem:[%s11093_s13 + $0x4] ss:$0 sm:$0xff] }
0x11e6   : > { %8713 = vmatprep.subr.bf16.mxu0 %v9540_v1 }
0x11e9   : > { %8714 = vmatpush3.bf16.msra.mxu0 %v9335_v56 }
0x11ea   : > { %8715 = vmatprep.subr.bf16.mxu0 %v9540_v1 }
0x11ed   : > { %8716 = vmatpush3.bf16.msra.mxu0 %v9336_v57  ;;  %v9344_v57 = vld [vmem:[%s11133_s20 + $0x58] sm:$0xff]  }
0x11ee   : > { %8737 = vmatprep.subr.bf16.mxu0 %v9540_v1 }
0x12b3   : > { %v2337_v27 = vpop.f32.mrb[48].mxu0 }
0x12b4   : > { %v2343_v29 = vadd.f32 %v2337_v27, %v1989_v48  ;;  %v8699_v30 = vpop.f32.mrb[49].mxu0  ;;  %v7754_v48 = vld [vmem:[%s11098_s18] ss:$0 sm:$0xff] }
0x12b5   : > { %v2340_v31 = vpop.f32.mrb[50].mxu0 }
0x12b6   : > { %v2351_v32 = vadd.f32 %v7752_v28, %v2343_v29  ;;  %v8700_v33 = vpop.f32.mrb[51].mxu0  ;;  %v9341_v29 = vld [vmem:[%s11134_s1 + $0x40] sm:$0xff]   ;;  %v9342_v31 = vld [vmem:[%s11134_s1 + $0x48] sm:$0xff]  }
0x12b8   : > { %v2352_v34 = vadd.f32 %v2351_v32, %v9761_v46  ;;  %v9332_v46 = vld [vmem:[%s11099_s19 + $0x8] sm:$0xff]   ;;  %v7790_v32 = vld [vmem:[%s11094_s14 + $0x4] ss:$0 sm:$0xff] }
0x12b9   : > { %8704 = vmatpush3.bf16.msra.mxu1 %v9332_v46 }
0x12ba   : > { %v2355_v35 = vsel %vm820_vm1, %v2352_v34, 0.0  ;;  %8721 = vmatprep.subr.bf16.mxu1 %v9540_v1 }
0x12bb   : > { %2356 = vadd.xlane.f32.xlu0 %v2355_v35 }
0x1348   : > { %v2357_v36 = vpop.xlane.xlu0 %2356 }
0x1349   : > { %v2358_v37 = vmul.f32 0.03125, %v2357_v36 }
0x134b   : > { %v2359_v38 = vsub.f32 %v2352_v34, %v2358_v37 }
0x134d   : > { %v2360_v39 = vmul.f32 %v2359_v38, %v2359_v38 }
0x134f   : > { %v2361_v40 = vsel %vm820_vm1, %v2360_v39, 0.0 }
0x1350   : > { %2362 = vadd.xlane.f32.xlu1 %v2361_v40 }
0x13dd   : > { %v2363_v44 = vpop.xlane.xlu1 %2362 }
0x13de   : > { %v2364_v45 = vmul.f32 0.03125, %v2363_v44 }
0x13e0   : > { %v2365_v47 = vadd.f32 1e-05, %v2364_v45 }
0x13e2   : > { %9449 = vrsqrt.f32 %v2365_v47 }
0x13ec   : > { %v9450_v49 = vpop.eup %9449 }
0x13ed   : > { %v2367_v52 = vmul.f32 %v9450_v49, %v2359_v38 }
0x13ef   : > { %v2374_v53 = vmul.f32 %v7753_v50, %v2367_v52 }
0x13f1   : > { %v2381_v54 = vadd.f32 %v7754_v48, %v2374_v53  ;;  %v7772_v48 = vld [vmem:[%s11092_s12 + $0x4] ss:$0 sm:$0xff] }
0x13f3   : > { %v2382_v55 = vpack.c.bf16 %v2381_v54, %v2381_v54 }
0x13f5   : > { %8706 = vmatmul.mubr.msk.bf16.vlgmr.msra.gmra.mrb[48].mxu1 %vm820_vm1, %v2382_v55  ;;  %v9343_v55 = vld [vmem:[%s11133_s20 + $0x50] sm:$0xff]  }
0x13f6   : > { %8725 = vmatprep.mubr.msk.bf16.mxu1 %vm9541_vm0, %v9540_v1  ;;  %8722 = vmatpush3.bf16.msra.mxu1 %v9337_v15 }
0x13f7   : > { %8723 = vmatprep.subr.bf16.mxu1 %v9540_v1 }
0x13fa   : > { %8724 = vmatpush3.bf16.msra.mxu1 %v9339_v17 }
0x13fb   : > { %8729 = vmatprep.subr.bf16.mxu1 %v9540_v1 }
0x14c8   : > { %v2443_v59 = vpop.f32.mrb[48].mxu1 }
0x14c9   : > { %v2444_v60 = vadd.f32 %v7755_v58, %v2443_v59  ;;  %v8707_v61 = vpop.f32.mrb[49].mxu1  ;;  %v9345_v58 = vld [vmem:[%s11137_s4 + $0x50] sm:$0xff]   ;;  %v9346_v59 = vld [vmem:[%s11137_s4 + $0x58] sm:$0xff]  }
0x14ca   : > { %v2446_v62 = vpop.f32.mrb[50].mxu1 }
0x14cb   : > { %v2449_v63 = vmax.f32 %v2444_v60, 0.0  ;;  %v8708_v0 = vpop.f32.mrb[51].mxu1 }
0x14cd   : > { %v2450_v51 = vpack.c.bf16 %v2449_v63, %v2449_v63 }
0x14cf   : > { %8718 = vmatmul.mubr.msk.bf16.vlgmr.msra.gmra.mrb[52].mxu0 %vm2490_vm5, %v2450_v51 }
0x14d0   : > { %8741 = vmatprep.mubr.msk.bf16.mxu0 %vm9541_vm0, %v9540_v1  ;;  %8738 = vmatpush3.bf16.msra.mxu0 %v9338_v16 }
0x14d1   : > { %8739 = vmatprep.subr.bf16.mxu0 %v9540_v1 }
0x14d4   : > { %8740 = vmatpush3.bf16.msra.mxu0 %v9340_v18 }
0x14d5   : > { %8751 = vmatprep.subr.bf16.mxu0 %v9540_v1 }
0x15a2   : > { %v2528_v3 = vpop.f32.mrb[52].mxu0 }
0x15a3   : > { %v2529_v4 = vadd.f32 %v7759_v2, %v2528_v3  ;;  %v8719_v5 = vpop.f32.mrb[53].mxu0 }
0x15a4   : > { %v2531_v6 = vpop.f32.mrb[54].mxu0 }
0x15a5   : > { %v8720_v7 = vpop.f32.mrb[55].mxu0  ;;  %v2534_v8 = vadd.f32 %v2529_v4, %v2381_v54 }
0x15a6   : > { %v7820_v7 = vld [vmem:[%s11094_s14 + $0x5] ss:$0 sm:$0xff] }
0x15a7   : > { %v2537_v9 = vsel %vm820_vm1, %v2534_v8, 0.0 }
0x15a8   : > { %2538 = vadd.xlane.f32.xlu0 %v2537_v9 }
0x1635   : > { %v2539_v10 = vpop.xlane.xlu0 %2538 }
0x1636   : > { %v2540_v11 = vmul.f32 0.03125, %v2539_v10 }
0x1638   : > { %v2541_v12 = vsub.f32 %v2534_v8, %v2540_v11 }
0x163a   : > { %v2542_v13 = vmul.f32 %v2541_v12, %v2541_v12 }
0x163c   : > { %v2543_v14 = vsel %vm820_vm1, %v2542_v13, 0.0 }
0x163d   : > { %2544 = vadd.xlane.f32.xlu1 %v2543_v14 }
0x16ca   : > { %v2545_v20 = vpop.xlane.xlu1 %2544 }
0x16cb   : > { %v2546_v21 = vmul.f32 0.03125, %v2545_v20 }
0x16cd   : > { %v2547_v22 = vadd.f32 1e-05, %v2546_v21 }
0x16cf   : > { %9451 = vrsqrt.f32 %v2547_v22 }
0x16d9   : > { %v9452_v23 = vpop.eup %9451 }
0x16da   : > { %v2549_v25 = vmul.f32 %v9452_v23, %v2541_v12 }
0x16dc   : > { %v2556_v27 = vmul.f32 %v7765_v24, %v2549_v25  ;;  %v9347_v24 = vld [vmem:[%s11134_s1 + $0x50] sm:$0xff]  }
0x16de   : > { %v10093_v28 = vadd.f32 %v7766_v26, %v2556_v27  ;;  %v9348_v26 = vld [vmem:[%s11134_s1 + $0x58] sm:$0xff]  }
0x16e0   : > { %v10100_v30 = vpack.c.bf16 %v10093_v28, %v10093_v28 }
0x16e2   : > { %8726 = vmatmul.mubr.msk.bf16.vlgmr.msra.gmra.mrb[52].mxu1 %vm820_vm1, %v10100_v30  ;;  %8742 = vmatmul.mubr.msk.bf16.vlgmr.msra.gmra.mrb[56].mxu0 %vm820_vm1, %v10100_v30 }
0x16e3   : > { %8730 = vmatpush3.bf16.msra.mxu1 %v9341_v29  ;;  %8733 = vmatprep.mubr.msk.bf16.mxu1 %vm9541_vm0, %v9540_v1 }
0x16e4   : > { %8731 = vmatprep.subr.bf16.mxu1 %v9540_v1  ;;  %8753 = vmatprep.mubr.msk.bf16.mxu0 %vm9541_vm0, %v9540_v1 }
0x16e7   : > { %8732 = vmatpush3.bf16.msra.mxu1 %v9342_v31 }
0x16e8   : > { %8745 = vmatprep.subr.bf16.mxu1 %v9540_v1 }
0x16ea   : > { %8734 = vmatmul.mubr.msk.bf16.vlgmr.msra.gmra.mrb[56].mxu1 %vm820_vm1, %v10100_v30 }
0x16eb   : > { %8747 = vmatprep.mubr.msk.bf16.mxu1 %vm9541_vm0, %v9540_v1 }
0x17b5   : > { %v2627_v33 = vpop.f32.mrb[52].mxu1  ;;  %v2757_v34 = vpop.f32.mrb[56].mxu0 }
0x17b6   : > { %v2758_v35 = vadd.f32 %v7790_v32, %v2757_v34  ;;  %v8727_v36 = vpop.f32.mrb[53].mxu1  ;;  %v8743_v37 = vpop.f32.mrb[57].mxu0  ;;  %v2628_v54 = vadd.f32 %v7772_v48, %v2627_v33  ;;  %v7811_v33 = vld [vmem:[%s11093_s13 + $0x5] ss:$0 sm:$0xff] }
0x17b7   : > { %v2630_v38 = vpop.f32.mrb[54].mxu1  ;;  %v2760_v39 = vpop.f32.mrb[58].mxu0 }
0x17b8   : > { %v2825_v40 = vpack.c.bf16 %v2758_v35, %v2758_v35  ;;  %v8728_v41 = vpop.f32.mrb[55].mxu1  ;;  %v8744_v46 = vpop.f32.mrb[59].mxu0  ;;  %v2763_v56 = vpack.c.bf16 %v2628_v54, %v2628_v54 }
0x17ba   : > { %v2830_v42 = vsel %vm1191_vm3, %v2825_v40, 0  ;;  %v7802_v40 = vld [vmem:[%s11092_s12 + $0x5] ss:$0 sm:$0xff] }
0x17bb   : > { %8752 = vmatpush3.bf16.msra.mxu0 %v2830_v42 }
0x17bc   : > { %8765 = vmatprep.subr.bf16.mxu0 %v9540_v1 }
0x17bd   : > { %v2692_v44 = vpop.f32.mrb[56].mxu1 }
0x17be   : > { %v2693_v45 = vadd.f32 %v7781_v43, %v2692_v44  ;;  %v8735_v47 = vpop.f32.mrb[57].mxu1 }
0x17bf   : > { %v2695_v49 = vpop.f32.mrb[58].mxu1 }
0x17c0   : > { %v2764_v50 = vpack.c.bf16 %v2693_v45, %v2693_v45  ;;  %v8736_v52 = vpop.f32.mrb[59].mxu1 }
0x17c2   : > { %v2769_v53 = vsel %vm1126_vm2, %v2764_v50, 0 }
0x17c3   : > { %8746 = vmatpush3.bf16.xpose.msra.mxu1 %v2769_v53 }
0x17c4   : > { %8757 = vmatprep.subr.bf16.mxu1 %v9540_v1 }
0x17ca   : > { %8748 = vmatmul.mubr.msk.bf16.vlgmr.msra.gmra.mrb[60].mxu1 %vm1126_vm2, %v2763_v56 }
0x17cb   : > { %8758 = vmatpush3.bf16.msra.mxu1 %v9343_v55  ;;  %8761 = vmatprep.mubr.msk.bf16.mxu1 %vm9541_vm0, %v9540_v1 }
0x17cc   : > { %8759 = vmatprep.subr.bf16.mxu1 %v9540_v1 }
0x17cf   : > { %8760 = vmatpush3.bf16.msra.mxu1 %v9344_v57  ;;  %v7826_v57 = vld [vmem:[%s11095_s15 + $0x14] sm:$0xf] }
0x17d0   : > { %8773 = vmatprep.subr.bf16.mxu1 %v9540_v1 }
0x17d2   : > { %8762 = vmatmul.mubr.msk.bf16.vlgmr.msra.gmra.mrb[64].mxu1 %vm820_vm1, %v10100_v30 }
0x17d3   : > { %8774 = vmatpush3.bf16.msra.mxu1 %v9345_v58  ;;  %8777 = vmatprep.mubr.msk.bf16.mxu1 %vm9541_vm0, %v9540_v1  ;;  %v3186_v58 = vsel %vm1191_vm3, %v7826_v57, 0 }
0x17d4   : > { %8775 = vmatprep.subr.bf16.mxu1 %v9540_v1 }
0x17d7   : > { %8776 = vmatpush3.bf16.msra.mxu1 %v9346_v59 }
0x17d8   : > { %8787 = vmatprep.subr.bf16.mxu1 %v9540_v1 }
0x17da   : > { %8778 = vmatmul.mubr.msk.bf16.vlgmr.msra.gmra.mrb[68].mxu1 %vm820_vm1, %v10100_v30 }
0x17db   : > { %8789 = vmatprep.mubr.msk.bf16.mxu1 %vm9541_vm0, %v9540_v1 }
0x189d   : > { %v2805_v60 = vpop.f32.mrb[60].mxu1 }
0x189e   : > { %v2811_v61 = vmul.f32 0.35355338, %v2805_v60  ;;  %v8749_v62 = vpop.f32.mrb[61].mxu1 }
0x189f   : > { %v2808_v63 = vpop.f32.mrb[62].mxu1 }
0x18a0   : > { %v8750_v0 = vpop.f32.mrb[63].mxu1  ;;  %v2812_v51 = vadd.f32 %v2811_v61, %v9828_v19  ;;  %v7796_v61 = vld [vmem:[%s11095_s15 + $0x10] sm:$0xf] }
0x18a1   : > { %v3232_v0 = vsel %vm1191_vm3, %v7796_v61, 0  ;;  %v7858_v61 = vld [vmem:[%s11095_s15 + $0x18] sm:$0xf] }
0x18a2   : > { %v2813_v2 = vsel %vm1126_vm2, %v2812_v51, -inf }
0x18a3   : > { %2814 = vmax.xlane.f32.xlu0 %v2813_v2 }
0x18a5   : > { %v2934_v3 = vpop.f32.mrb[64].mxu1 }
0x18a6   : > { %v8763_v4 = vpop.f32.mrb[65].mxu1  ;;  %v2935_v46 = vadd.f32 %v7802_v40, %v2934_v3  ;;  %v9350_v3 = vld [vmem:[%s11134_s1 + $0x68] sm:$0xff]   ;;  %v7852_v40 = vld [vmem:[%s11094_s14 + $0x6] ss:$0 sm:$0xff] }
0x18a7   : > { %v2937_v5 = vpop.f32.mrb[66].mxu1 }
0x18a8   : > { %v8764_v6 = vpop.f32.mrb[67].mxu1  ;;  %v3070_v42 = vpack.c.bf16 %v2935_v46, %v2935_v46  ;;  %v9351_v5 = vld [vmem:[%s11133_s20 + $0x60] sm:$0xff]  }
0x18ad   : > { %v3064_v8 = vpop.f32.mrb[68].mxu1 }
0x18ae   : > { %v3065_v9 = vadd.f32 %v7820_v7, %v3064_v8  ;;  %v8779_v10 = vpop.f32.mrb[69].mxu1 }
0x18af   : > { %v3067_v11 = vpop.f32.mrb[70].mxu1  ;;  %v9352_v10 = vld [vmem:[%s11133_s20 + $0x68] sm:$0xff]  }
0x18b0   : > { %v3132_v12 = vpack.c.bf16 %v3065_v9, %v3065_v9  ;;  %v8780_v13 = vpop.f32.mrb[71].mxu1 }
0x18b2   : > { %v3137_v14 = vsel %vm1191_vm3, %v3132_v12, 0  ;;  %v9353_v12 = vld [vmem:[%s11137_s4 + $0x60] sm:$0xff]  }
0x18b3   : > { %8788 = vmatpush3.bf16.msra.mxu1 %v3137_v14 }
0x18b4   : > { %8799 = vmatprep.subr.bf16.mxu1 %v9540_v1 }
0x1930   : > { %v2815_v15 = vpop.xlane.xlu0 %2814 }
0x1931   : > { %v2816_v16 = vsub.f32 %v2812_v51, %v2815_v15  ;;  %v9349_v51 = vld [vmem:[%s11134_s1 + $0x60] sm:$0xff]  }
0x1933   : > { %v2817_v17 = vmul.f32 1.442695, %v2816_v16  ;;  %v9354_v16 = vld [vmem:[%s11137_s4 + $0x68] sm:$0xff]  }
0x1935   : > { %9453 = vpow2.f32 %v2817_v17  ;;  %v7843_v17 = vld [vmem:[%s11093_s13 + $0x6] ss:$0 sm:$0xff] }
0x193f   : > { %v9454_v18 = vpop.eup %9453 }
0x1940   : > { %v2819_v20 = vsel %vm1126_vm2, %v9454_v18, 0.0 }
0x1941   : > { %2820 = vadd.xlane.f32.xlu1 %v2819_v20 }
0x19ce   : > { %v2821_v21 = vpop.xlane.xlu1 %2820 }
0x19cf   : > { %9455 = vrcp.f32 %v2821_v21 }
0x19d9   : > { %v9456_v22 = vpop.eup %9455 }
0x19da   : > { %v2823_v23 = vmul.f32 %v9456_v22, %v9454_v18 }
0x19dc   : > { %v2824_v25 = vpack.c.bf16 %v2823_v23, %v2823_v23 }
0x19de   : > { %8754 = vmatmul.mubr.msk.bf16.vlgmr.msra.gmra.mrb[60].mxu0 %vm1126_vm2, %v2824_v25 }
0x19df   : > { %8766 = vmatpush3.bf16.msra.mxu0 %v9347_v24  ;;  %8769 = vmatprep.mubr.msk.bf16.mxu0 %vm9541_vm0, %v9540_v1 }
0x19e0   : > { %8767 = vmatprep.subr.bf16.mxu0 %v9540_v1 }
0x19e3   : > { %8768 = vmatpush3.bf16.msra.mxu0 %v9348_v26 }
0x19e4   : > { %8781 = vmatprep.subr.bf16.mxu0 %v9540_v1 }
0x19e6   : > { %8770 = vmatmul.mubr.msk.bf16.vlgmr.msra.gmra.mrb[64].mxu0 %vm820_vm1, %v10100_v30 }
0x19e7   : > { %8783 = vmatprep.mubr.msk.bf16.mxu0 %vm9541_vm0, %v9540_v1 }
0x1ab1   : > { %v2866_v27 = vpop.f32.mrb[60].mxu0 }
0x1ab2   : > { %v8755_v29 = vpop.f32.mrb[61].mxu0  ;;  %v2872_v2 = vpack.c.bf16 %v2866_v27, %v2866_v27 }
0x1ab3   : > { %v2869_v31 = vpop.f32.mrb[62].mxu0 }
0x1ab4   : > { %v8756_v32 = vpop.f32.mrb[63].mxu0 }
0x1ab9   : > { %v2999_v34 = vpop.f32.mrb[64].mxu0 }
0x1aba   : > { %v3000_v35 = vadd.f32 %v7811_v33, %v2999_v34  ;;  %v8771_v36 = vpop.f32.mrb[65].mxu0  ;;  %v7834_v33 = vld [vmem:[%s11092_s12 + $0x6] ss:$0 sm:$0xff] }
0x1abb   : > { %v3002_v37 = vpop.f32.mrb[66].mxu0 }
0x1abc   : > { %v3071_v38 = vpack.c.bf16 %v3000_v35, %v3000_v35  ;;  %v8772_v39 = vpop.f32.mrb[67].mxu0 }
0x1abe   : > { %v3076_v41 = vsel %vm1126_vm2, %v3071_v38, 0 }
0x1abf   : > { %8782 = vmatpush3.bf16.xpose.msra.mxu0 %v3076_v41 }
0x1ac0   : > { %8793 = vmatprep.subr.bf16.mxu0 %v9540_v1 }
0x1ac6   : > { %8784 = vmatmul.mubr.msk.bf16.vlgmr.msra.gmra.mrb[68].mxu0 %vm1126_vm2, %v3070_v42 }
0x1ac7   : > { %8795 = vmatprep.mubr.msk.bf16.mxu0 %vm9541_vm0, %v9540_v1  ;;  %8794 = vmatpush3.bf16.msra.mxu0 %v3186_v58 }
0x1ac8   : > { %8805 = vmatprep.subr.bf16.mxu0 %v9540_v1 }
0x1b99   : > { %v3112_v43 = vpop.f32.mrb[68].mxu0 }
0x1b9a   : > { %v3118_v44 = vmul.f32 0.35355338, %v3112_v43  ;;  %v8785_v45 = vpop.f32.mrb[69].mxu0 }
0x1b9b   : > { %v3115_v47 = vpop.f32.mrb[70].mxu0 }
0x1b9c   : > { %v8786_v49 = vpop.f32.mrb[71].mxu0  ;;  %v3119_v50 = vadd.f32 %v3118_v44, %v9828_v19 }
0x1b9e   : > { %v3120_v52 = vsel %vm1126_vm2, %v3119_v50, -inf }
0x1b9f   : > { %3121 = vmax.xlane.f32.xlu0 %v3120_v52 }
0x1c2c   : > { %v3122_v48 = vpop.xlane.xlu0 %3121 }
0x1c2d   : > { %v3123_v53 = vsub.f32 %v3119_v50, %v3122_v48 }
0x1c2f   : > { %v3124_v54 = vmul.f32 1.442695, %v3123_v53 }
0x1c31   : > { %9457 = vpow2.f32 %v3124_v54 }
0x1c3b   : > { %v9458_v55 = vpop.eup %9457 }
0x1c3c   : > { %v3126_v56 = vsel %vm1126_vm2, %v9458_v55, 0.0 }
0x1c3d   : > { %3127 = vadd.xlane.f32.xlu1 %v3126_v56 }
0x1cca   : > { %v3128_v59 = vpop.xlane.xlu1 %3127 }
0x1ccb   : > { %9459 = vrcp.f32 %v3128_v59 }
0x1cd5   : > { %v9460_v60 = vpop.eup %9459 }
0x1cd6   : > { %v3130_v62 = vmul.f32 %v9460_v60, %v9458_v55 }
0x1cd8   : > { %v3131_v63 = vpack.c.bf16 %v3130_v62, %v3130_v62  ;;  %v3585_v62 = vsel %vm1191_vm3, %v7858_v61, 0 }
0x1cda   : > { %8790 = vmatmul.mubr.msk.bf16.vlgmr.msra.gmra.mrb[72].mxu1 %vm1126_vm2, %v3131_v63 }
0x1cdb   : > { %8800 = vmatpush3.bf16.msra.mxu1 %v3232_v0  ;;  %8801 = vmatprep.mubr.msk.bf16.mxu1 %vm9541_vm0, %v9540_v1 }
0x1cdc   : > { %8813 = vmatprep.subr.bf16.mxu1 %v9540_v1 }
0x1ce2   : > { %8802 = vmatmul.mubr.msk.bf16.vlgmr.msra.gmra.mrb[76].mxu1 %vm1126_vm2, %v2872_v2  ;;  %v9355_v2 = vld [vmem:[%s11133_s20 + $0x70] sm:$0xff]  }
0x1ce3   : > { %8814 = vmatpush3.bf16.msra.mxu1 %v9349_v51  ;;  %8817 = vmatprep.mubr.msk.bf16.mxu1 %vm9541_vm0, %v9540_v1 }
0x1ce4   : > { %8815 = vmatprep.subr.bf16.mxu1 %v9540_v1 }
0x1ce7   : > { %8816 = vmatpush3.bf16.msra.mxu1 %v9350_v3 }
0x1ce8   : > { %8829 = vmatprep.subr.bf16.mxu1 %v9540_v1 }
0x1cea   : > { %8818 = vmatmul.mubr.msk.bf16.vlgmr.msra.gmra.mrb[80].mxu1 %vm820_vm1, %v10100_v30 }
0x1ceb   : > { %8831 = vmatprep.mubr.msk.bf16.mxu1 %vm9541_vm0, %v9540_v1 }
0x1dad   : > { %v3173_v4 = vpop.f32.mrb[72].mxu1 }
0x1dae   : > { %v3179_v6 = vpack.c.bf16 %v3173_v4, %v3173_v4  ;;  %v8791_v7 = vpop.f32.mrb[73].mxu1  ;;  %v9356_v4 = vld [vmem:[%s11133_s20 + $0x78] sm:$0xff]  }
0x1daf   : > { %v3176_v8 = vpop.f32.mrb[74].mxu1 }
0x1db0   : > { %v8792_v9 = vpop.f32.mrb[75].mxu1  ;;  %8796 = vmatmul.mubr.msk.bf16.vlgmr.msra.gmra.mrb[72].mxu0 %vm1126_vm2, %v3179_v6  ;;  %v9358_v6 = vld [vmem:[%s11137_s4 + $0x78] sm:$0xff]   ;;  %v9359_v8 = vld [vmem:[%s11134_s1 + $0x70] sm:$0xff]  }
0x1db1   : > { %8806 = vmatpush3.bf16.msra.mxu0 %v9351_v5  ;;  %8809 = vmatprep.mubr.msk.bf16.mxu0 %vm9541_vm0, %v9540_v1  ;;  %v9357_v5 = vld [vmem:[%s11137_s4 + $0x70] sm:$0xff]  }
0x1db2   : > { %8807 = vmatprep.subr.bf16.mxu0 %v9540_v1 }
0x1db5   : > { %v3268_v11 = vpop.f32.mrb[76].mxu1  ;;  %8808 = vmatpush3.bf16.msra.mxu0 %v9352_v10 }
0x1db6   : > { %v8803_v13 = vpop.f32.mrb[77].mxu1  ;;  %8821 = vmatprep.subr.bf16.mxu0 %v9540_v1 }
0x1db7   : > { %v3271_v14 = vpop.f32.mrb[78].mxu1  ;;  %v9360_v13 = vld [vmem:[%s11134_s1 + $0x78] sm:$0xff]  }
0x1db8   : > { %v8804_v15 = vpop.f32.mrb[79].mxu1  ;;  %8810 = vmatmul.mubr.msk.bf16.vlgmr.msra.gmra.mrb[76].mxu0 %vm820_vm1, %v10100_v30 }
0x1db9   : > { %8822 = vmatpush3.bf16.msra.mxu0 %v9353_v12  ;;  %8825 = vmatprep.mubr.msk.bf16.mxu0 %vm9541_vm0, %v9540_v1 }
0x1dba   : > { %8823 = vmatprep.subr.bf16.mxu0 %v9540_v1 }
0x1dbd   : > { %v3398_v18 = vpop.f32.mrb[80].mxu1  ;;  %8824 = vmatpush3.bf16.msra.mxu0 %v9354_v16 }
0x1dbe   : > { %v3399_v20 = vadd.f32 %v7843_v17, %v3398_v18  ;;  %v8819_v21 = vpop.f32.mrb[81].mxu1  ;;  %8835 = vmatprep.subr.bf16.mxu0 %v9540_v1  ;;  %v7883_v18 = vld [vmem:[%s11094_s14 + $0x7] ss:$0 sm:$0xff] }
0x1dbf   : > { %v3401_v22 = vpop.f32.mrb[82].mxu1 }
0x1dc0   : > { %v3470_v23 = vpack.c.bf16 %v3399_v20, %v3399_v20  ;;  %v8820_v24 = vpop.f32.mrb[83].mxu1  ;;  %8826 = vmatmul.mubr.msk.bf16.vlgmr.msra.gmra.mrb[80].mxu0 %vm820_vm1, %v10100_v30 }
0x1dc1   : > { %8837 = vmatprep.mubr.msk.bf16.mxu0 %vm9541_vm0, %v9540_v1 }
0x1dc2   : > { %v3475_v25 = vsel %vm1126_vm2, %v3470_v23, 0 }
0x1dc3   : > { %8830 = vmatpush3.bf16.xpose.msra.mxu1 %v3475_v25 }
0x1dc4   : > { %8841 = vmatprep.subr.bf16.mxu1 %v9540_v1 }
0x1e83   : > { %v3222_v26 = vpop.f32.mrb[72].mxu0 }
0x1e84   : > { %v10256_v27 = vadd.f32 %v3268_v11, %v3222_v26  ;;  %v8797_v29 = vpop.f32.mrb[73].mxu0 }
0x1e85   : > { %v3225_v31 = vpop.f32.mrb[74].mxu0 }
0x1e86   : > { %v8798_v32 = vpop.f32.mrb[75].mxu0 }
0x1e8b   : > { %v3333_v34 = vpop.f32.mrb[76].mxu0 }
0x1e8c   : > { %v3334_v35 = vadd.f32 %v7834_v33, %v3333_v34  ;;  %v8811_v36 = vpop.f32.mrb[77].mxu0  ;;  %v7874_v34 = vld [vmem:[%s11093_s13 + $0x7] ss:$0 sm:$0xff] }
0x1e8d   : > { %v3336_v37 = vpop.f32.mrb[78].mxu0 }
0x1e8e   : > { %v3469_v38 = vpack.c.bf16 %v3334_v35, %v3334_v35  ;;  %v8812_v39 = vpop.f32.mrb[79].mxu0 }
0x1e90   : > { %8832 = vmatmul.mubr.msk.bf16.vlgmr.msra.gmra.mrb[84].mxu1 %vm1126_vm2, %v3469_v38 }
0x1e91   : > { %8843 = vmatprep.mubr.msk.bf16.mxu1 %vm9541_vm0, %v9540_v1  ;;  %8842 = vmatpush3.bf16.msra.mxu1 %v3585_v62 }
0x1e92   : > { %8855 = vmatprep.subr.bf16.mxu1 %v9540_v1 }
0x1e93   : > { %v3463_v41 = vpop.f32.mrb[80].mxu0 }
0x1e94   : > { %v3464_v46 = vadd.f32 %v7852_v40, %v3463_v41  ;;  %v8827_v42 = vpop.f32.mrb[81].mxu0  ;;  %v7865_v41 = vld [vmem:[%s11092_s12 + $0x7] ss:$0 sm:$0xff] }
0x1e95   : > { %v3466_v43 = vpop.f32.mrb[82].mxu0 }
0x1e96   : > { %v3531_v44 = vpack.c.bf16 %v3464_v46, %v3464_v46  ;;  %v8828_v45 = vpop.f32.mrb[83].mxu0 }
0x1e98   : > { %v3536_v47 = vsel %vm1191_vm3, %v3531_v44, 0 }
0x1e99   : > { %8836 = vmatpush3.bf16.msra.mxu0 %v3536_v47 }
0x1e9a   : > { %8847 = vmatprep.subr.bf16.mxu0 %v9540_v1 }
0x1f63   : > { %v3511_v49 = vpop.f32.mrb[84].mxu1 }
0x1f64   : > { %v3517_v50 = vmul.f32 0.35355338, %v3511_v49  ;;  %v8833_v52 = vpop.f32.mrb[85].mxu1 }
0x1f65   : > { %v3514_v48 = vpop.f32.mrb[86].mxu1 }
0x1f66   : > { %v8834_v53 = vpop.f32.mrb[87].mxu1  ;;  %v3518_v54 = vadd.f32 %v3517_v50, %v9828_v19 }
0x1f68   : > { %v3519_v55 = vsel %vm1126_vm2, %v3518_v54, -inf }
0x1f69   : > { %3520 = vmax.xlane.f32.xlu0 %v3519_v55 }
0x1ff6   : > { %v3521_v56 = vpop.xlane.xlu0 %3520 }
0x1ff7   : > { %v3522_v57 = vsub.f32 %v3518_v54, %v3521_v56 }
0x1ff9   : > { %v3523_v58 = vmul.f32 1.442695, %v3522_v57  ;;  %v7889_v57 = vld [vmem:[%s11095_s15 + $0x1c] sm:$0xf] }
0x1ffb   : > { %9461 = vpow2.f32 %v3523_v58  ;;  %v3939_v58 = vsel %vm1191_vm3, %v7889_v57, 0  ;;  %v9367_v57 = vld [vmem:[%s11133_s20 + $0x80] sm:$0xff]  }
0x2005   : > { %v9462_v59 = vpop.eup %9461 }
0x2006   : > { %v3525_v60 = vsel %vm1126_vm2, %v9462_v59, 0.0 }
0x2007   : > { %3526 = vadd.xlane.f32.xlu1 %v3525_v60 }
0x2094   : > { %v3527_v63 = vpop.xlane.xlu1 %3526 }
0x2095   : > { %9463 = vrcp.f32 %v3527_v63 }
0x209f   : > { %v9464_v0 = vpop.eup %9463 }
0x20a0   : > { %v3529_v51 = vmul.f32 %v9464_v0, %v9462_v59 }
0x20a2   : > { %v3530_v3 = vpack.c.bf16 %v3529_v51, %v3529_v51 }
0x20a4   : > { %8838 = vmatmul.mubr.msk.bf16.vlgmr.msra.gmra.mrb[84].mxu0 %vm1126_vm2, %v3530_v3 }
0x20a5   : > { %8848 = vmatpush3.bf16.msra.mxu0 %v9355_v2  ;;  %8851 = vmatprep.mubr.msk.bf16.mxu0 %vm9541_vm0, %v9540_v1 }
0x20a6   : > { %8849 = vmatprep.subr.bf16.mxu0 %v9540_v1 }
0x20a9   : > { %8850 = vmatpush3.bf16.msra.mxu0 %v9356_v4 }
0x20aa   : > { %8863 = vmatprep.subr.bf16.mxu0 %v9540_v1 }
0x20ac   : > { %8852 = vmatmul.mubr.msk.bf16.vlgmr.msra.gmra.mrb[88].mxu0 %vm820_vm1, %v10100_v30 }
0x20ad   : > { %8864 = vmatpush3.bf16.msra.mxu0 %v9357_v5  ;;  %8867 = vmatprep.mubr.msk.bf16.mxu0 %vm9541_vm0, %v9540_v1  ;;  %v7892_v5 = vld [vmem:[%s11096_s16 + $0x1] ss:$0 sm:$0xff] }
0x20ae   : > { %8865 = vmatprep.subr.bf16.mxu0 %v9540_v1 }
0x20b1   : > { %8866 = vmatpush3.bf16.msra.mxu0 %v9358_v6 }
0x20b2   : > { %8877 = vmatprep.subr.bf16.mxu0 %v9540_v1 }
0x20b4   : > { %8868 = vmatmul.mubr.msk.bf16.vlgmr.msra.gmra.mrb[92].mxu0 %vm820_vm1, %v10100_v30 }
0x20b5   : > { %8879 = vmatprep.mubr.msk.bf16.mxu0 %vm9541_vm0, %v9540_v1 }
0x2177   : > { %v3572_v7 = vpop.f32.mrb[84].mxu0 }
0x2178   : > { %v3578_v9 = vpack.c.bf16 %v3572_v7, %v3572_v7  ;;  %v8839_v10 = vpop.f32.mrb[85].mxu0 }
0x2179   : > { %v3575_v11 = vpop.f32.mrb[86].mxu0 }
0x217a   : > { %v8840_v12 = vpop.f32.mrb[87].mxu0  ;;  %8844 = vmatmul.mubr.msk.bf16.vlgmr.msra.gmra.mrb[88].mxu1 %vm1126_vm2, %v3578_v9 }
0x217b   : > { %8856 = vmatpush3.bf16.msra.mxu1 %v9359_v8  ;;  %8859 = vmatprep.mubr.msk.bf16.mxu1 %vm9541_vm0, %v9540_v1 }
0x217c   : > { %8857 = vmatprep.subr.bf16.mxu1 %v9540_v1 }
0x217f   : > { %v3687_v14 = vpop.f32.mrb[88].mxu0  ;;  %8858 = vmatpush3.bf16.msra.mxu1 %v9360_v13 }
0x2180   : > { %v8853_v15 = vpop.f32.mrb[89].mxu0  ;;  %8871 = vmatprep.subr.bf16.mxu1 %v9540_v1 }
0x2181   : > { %v3690_v16 = vpop.f32.mrb[90].mxu0 }
0x2182   : > { %v8854_v17 = vpop.f32.mrb[91].mxu0  ;;  %8860 = vmatmul.mubr.msk.bf16.vlgmr.msra.gmra.mrb[92].mxu1 %vm820_vm1, %v10100_v30 }
0x2183   : > { %8873 = vmatprep.mubr.msk.bf16.mxu1 %vm9541_vm0, %v9540_v1 }
0x2187   : > { %v3817_v20 = vpop.f32.mrb[92].mxu0 }
0x2188   : > { %v3818_v21 = vadd.f32 %v7883_v18, %v3817_v20  ;;  %v8869_v22 = vpop.f32.mrb[93].mxu0  ;;  %v9361_v18 = vld [vmem:[%s11099_s19 + $0x10] sm:$0xff]   ;;  %v9363_v20 = vld [vmem:[%s11101_s21 + $0x20] sm:$0xff]  }
0x2189   : > { %v3820_v23 = vpop.f32.mrb[94].mxu0 }
0x218a   : > { %v3885_v24 = vpack.c.bf16 %v3818_v21, %v3818_v21  ;;  %v8870_v25 = vpop.f32.mrb[95].mxu0  ;;  %v9364_v21 = vld [vmem:[%s11101_s21 + $0x28] sm:$0xff]  }
0x218c   : > { %v3890_v26 = vsel %vm1191_vm3, %v3885_v24, 0 }
0x218d   : > { %8878 = vmatpush3.bf16.msra.mxu0 %v3890_v26  ;;  %v7895_v26 = vld [vmem:[%s11097_s17 + $0x1] ss:$0 sm:$0xff] }
0x218e   : > { %8889 = vmatprep.subr.bf16.mxu0 %v9540_v1 }
0x224d   : > { %v3621_v29 = vpop.f32.mrb[88].mxu1 }
0x224e   : > { %v3627_v30 = vadd.f32 %v3621_v29, %v10256_v27  ;;  %v8845_v31 = vpop.f32.mrb[89].mxu1  ;;  %v3688_v27 = vadd.f32 %v7865_v41, %v3687_v14 }
0x224f   : > { %v3624_v32 = vpop.f32.mrb[90].mxu1 }
0x2250   : > { %v8846_v33 = vpop.f32.mrb[91].mxu1  ;;  %v3823_v42 = vpack.c.bf16 %v3688_v27, %v3688_v27 }
0x2255   : > { %v3752_v35 = vpop.f32.mrb[92].mxu1 }
0x2256   : > { %v3753_v36 = vadd.f32 %v7874_v34, %v3752_v35  ;;  %v8861_v37 = vpop.f32.mrb[93].mxu1  ;;  %v9365_v34 = vld [vmem:[%s11101_s21 + $0x30] sm:$0xff]   ;;  %v9366_v35 = vld [vmem:[%s11101_s21 + $0x38] sm:$0xff]  }
0x2257   : > { %v3755_v38 = vpop.f32.mrb[94].mxu1 }
0x2258   : > { %v3824_v39 = vpack.c.bf16 %v3753_v36, %v3753_v36  ;;  %v8862_v40 = vpop.f32.mrb[95].mxu1  ;;  %v7902_v36 = vld [vmem:[%s11138_s9 + $0x1] ss:$0 sm:$0xff] }
0x225a   : > { %v3829_v46 = vsel %vm1126_vm2, %v3824_v39, 0 }
0x225b   : > { %8872 = vmatpush3.bf16.xpose.msra.mxu1 %v3829_v46 }
0x225c   : > { %8883 = vmatprep.subr.bf16.mxu1 %v9540_v1 }
0x2262   : > { %8874 = vmatmul.mubr.msk.bf16.vlgmr.msra.gmra.mrb[96].mxu1 %vm1126_vm2, %v3823_v42  ;;  %v7915_v42 = vld [vmem:[%s11102_s22 + $0x1] ss:$0 sm:$0xff] }
0x2263   : > { %8885 = vmatprep.mubr.msk.bf16.mxu1 %vm9541_vm0, %v9540_v1  ;;  %8884 = vmatpush3.bf16.msra.mxu1 %v3939_v58  ;;  %v9368_v58 = vld [vmem:[%s11137_s4 + $0x80] sm:$0xff]  }
0x2264   : > { %8897 = vmatprep.subr.bf16.mxu1 %v9540_v1 }
0x2335   : > { %v3865_v43 = vpop.f32.mrb[96].mxu1 }
0x2336   : > { %v3871_v44 = vmul.f32 0.35355338, %v3865_v43  ;;  %v8875_v45 = vpop.f32.mrb[97].mxu1 }
0x2337   : > { %v3868_v47 = vpop.f32.mrb[98].mxu1 }
0x2338   : > { %v8876_v49 = vpop.f32.mrb[99].mxu1  ;;  %v3872_v50 = vadd.f32 %v3871_v44, %v9828_v19 }
0x233a   : > { %v3873_v52 = vsel %vm1126_vm2, %v3872_v50, -inf }
0x233b   : > { %3874 = vmax.xlane.f32.xlu0 %v3873_v52 }
0x23c8   : > { %v3875_v48 = vpop.xlane.xlu0 %3874 }
0x23c9   : > { %v3876_v53 = vsub.f32 %v3872_v50, %v3875_v48 }
0x23cb   : > { %v3877_v54 = vmul.f32 1.442695, %v3876_v53 }
0x23cd   : > { %9465 = vpow2.f32 %v3877_v54 }
0x23d7   : > { %v9466_v55 = vpop.eup %9465 }
0x23d8   : > { %v3879_v56 = vsel %vm1126_vm2, %v9466_v55, 0.0 }
0x23d9   : > { %3880 = vadd.xlane.f32.xlu1 %v3879_v56 }
0x2466   : > { %v3881_v59 = vpop.xlane.xlu1 %3880 }
0x2467   : > { %9467 = vrcp.f32 %v3881_v59  ;;  %v9369_v59 = vld [vmem:[%s11133_s20 + $0x88] sm:$0xff]  }
0x2471   : > { %v9468_v60 = vpop.eup %9467 }
0x2472   : > { %v3883_v61 = vmul.f32 %v9468_v60, %v9466_v55  ;;  %v9370_v60 = vld [vmem:[%s11137_s4 + $0x88] sm:$0xff]  }
0x2474   : > { %v3884_v62 = vpack.c.bf16 %v3883_v61, %v3883_v61 }
0x2476   : > { %8880 = vmatmul.mubr.msk.bf16.vlgmr.msra.gmra.mrb[96].mxu0 %vm1126_vm2, %v3884_v62 }
0x2477   : > { %8893 = vmatprep.mubr.msk.bf16.mxu0 %vm9541_vm0, %v9540_v1  ;;  %8890 = vmatpush3.bf16.msra.mxu0 %v9361_v18 }
0x2478   : > { %8891 = vmatprep.subr.bf16.mxu0 %v9540_v1 }
0x2549   : > { %v3926_v63 = vpop.f32.mrb[96].mxu0 }
0x254a   : > { %v3932_v0 = vpack.c.bf16 %v3926_v63, %v3926_v63  ;;  %v8881_v51 = vpop.f32.mrb[97].mxu0 }
0x254b   : > { %v3929_v2 = vpop.f32.mrb[98].mxu0  ;;  %v7923_v51 = vld [vmem:[%s11103_s23 + $0x1] ss:$0 sm:$0xff] }
0x254c   : > { %v8882_v3 = vpop.f32.mrb[99].mxu0  ;;  %8886 = vmatmul.mubr.msk.bf16.vlgmr.msra.gmra.mrb[100].mxu1 %vm1126_vm2, %v3932_v0 }
0x254d   : > { %8905 = vmatprep.mubr.msk.bf16.mxu1 %vm9541_vm0, %v9540_v1  ;;  %8898 = vmatpush3.bf16.msra.mxu1 %v9363_v20  ;;  %v7924_v3 = vld [vmem:[%s11104_s24 + $0x1] ss:$0 sm:$0xff] }
0x254e   : > { %8899 = vmatprep.subr.bf16.mxu1 %v9540_v1 }
0x2551   : > { %8900 = vmatpush3.bf16.msra.mxu1 %v9364_v21  ;;  %v7939_v21 = vld [vmem:[%s11093_s13 + $0x8] ss:$0 sm:$0xff] }
0x2552   : > { %8901 = vmatprep.subr.bf16.mxu1 %v9540_v1 }
0x2555   : > { %8902 = vmatpush3.bf16.msra.mxu1 %v9365_v34 }
0x2556   : > { %8903 = vmatprep.subr.bf16.mxu1 %v9540_v1 }
0x2559   : > { %8904 = vmatpush3.bf16.msra.mxu1 %v9366_v35  ;;  %v9374_v35 = vld [vmem:[%s11133_s20 + $0x98] sm:$0xff]  }
0x255a   : > { %8925 = vmatprep.subr.bf16.mxu1 %v9540_v1 }
0x261f   : > { %v3975_v4 = vpop.f32.mrb[100].mxu1 }
0x2620   : > { %v3981_v6 = vadd.f32 %v3975_v4, %v3627_v30  ;;  %v8887_v7 = vpop.f32.mrb[101].mxu1  ;;  %v7896_v30 = vld [vmem:[%s11098_s18 + $0x1] ss:$0 sm:$0xff] }
0x2621   : > { %v3978_v8 = vpop.f32.mrb[102].mxu1 }
0x2622   : > { %v3990_v9 = vadd.f32 %v7892_v5, %v3981_v6  ;;  %v8888_v10 = vpop.f32.mrb[103].mxu1  ;;  %v9371_v6 = vld [vmem:[%s11134_s1 + $0x80] sm:$0xff]   ;;  %v9372_v8 = vld [vmem:[%s11134_s1 + $0x88] sm:$0xff]  }
0x2624   : > { %v3991_v11 = vadd.f32 %v3990_v9, %v10093_v28  ;;  %v9362_v28 = vld [vmem:[%s11099_s19 + $0x18] sm:$0xff]   ;;  %v7948_v9 = vld [vmem:[%s11094_s14 + $0x8] ss:$0 sm:$0xff] }
0x2625   : > { %8892 = vmatpush3.bf16.msra.mxu0 %v9362_v28 }
0x2626   : > { %v3996_v12 = vsel %vm820_vm1, %v3991_v11, 0.0  ;;  %8909 = vmatprep.subr.bf16.mxu0 %v9540_v1 }
0x2627   : > { %3997 = vadd.xlane.f32.xlu0 %v3996_v12 }
0x26b4   : > { %v3998_v13 = vpop.xlane.xlu0 %3997 }
0x26b5   : > { %v3999_v14 = vmul.f32 0.03125, %v3998_v13 }
0x26b7   : > { %v4000_v15 = vsub.f32 %v3991_v11, %v3999_v14 }
0x26b9   : > { %v4001_v16 = vmul.f32 %v4000_v15, %v4000_v15 }
0x26bb   : > { %v4002_v17 = vsel %vm820_vm1, %v4001_v16, 0.0 }
0x26bc   : > { %4003 = vadd.xlane.f32.xlu1 %v4002_v17 }
0x2749   : > { %v4004_v22 = vpop.xlane.xlu1 %4003 }
0x274a   : > { %v4005_v23 = vmul.f32 0.03125, %v4004_v22 }
0x274c   : > { %v4006_v24 = vadd.f32 1e-05, %v4005_v23 }
0x274e   : > { %9469 = vrsqrt.f32 %v4006_v24 }
0x2758   : > { %v9470_v25 = vpop.eup %9469 }
0x2759   : > { %v4008_v29 = vmul.f32 %v9470_v25, %v4000_v15 }
0x275b   : > { %v4015_v31 = vmul.f32 %v7895_v26, %v4008_v29 }
0x275d   : > { %v4022_v32 = vadd.f32 %v7896_v30, %v4015_v31  ;;  %v7930_v30 = vld [vmem:[%s11092_s12 + $0x8] ss:$0 sm:$0xff] }
0x275f   : > { %v4023_v33 = vpack.c.bf16 %v4022_v32, %v4022_v32 }
0x2761   : > { %8894 = vmatmul.mubr.msk.bf16.vlgmr.msra.gmra.mrb[100].mxu0 %vm820_vm1, %v4023_v33  ;;  %v9373_v33 = vld [vmem:[%s11133_s20 + $0x90] sm:$0xff]  }
0x2762   : > { %8913 = vmatprep.mubr.msk.bf16.mxu0 %vm9541_vm0, %v9540_v1  ;;  %8910 = vmatpush3.bf16.msra.mxu0 %v9367_v57 }
0x2763   : > { %8911 = vmatprep.subr.bf16.mxu0 %v9540_v1 }
0x2766   : > { %8912 = vmatpush3.bf16.msra.mxu0 %v9369_v59 }
0x2767   : > { %8917 = vmatprep.subr.bf16.mxu0 %v9540_v1 }
0x2834   : > { %v4086_v37 = vpop.f32.mrb[100].mxu0 }
0x2835   : > { %v4087_v38 = vadd.f32 %v7902_v36, %v4086_v37  ;;  %v8895_v39 = vpop.f32.mrb[101].mxu0  ;;  %v9375_v36 = vld [vmem:[%s11137_s4 + $0x90] sm:$0xff]   ;;  %v9376_v37 = vld [vmem:[%s11137_s4 + $0x98] sm:$0xff]  }
0x2836   : > { %v4089_v40 = vpop.f32.mrb[102].mxu0 }
0x2837   : > { %v4092_v41 = vmax.f32 %v4087_v38, 0.0  ;;  %v8896_v46 = vpop.f32.mrb[103].mxu0 }
0x2839   : > { %v4093_v27 = vpack.c.bf16 %v4092_v41, %v4092_v41 }
0x283b   : > { %8906 = vmatmul.mubr.msk.bf16.vlgmr.msra.gmra.mrb[104].mxu1 %vm2490_vm5, %v4093_v27 }
0x283c   : > { %8929 = vmatprep.mubr.msk.bf16.mxu1 %vm9541_vm0, %v9540_v1  ;;  %8926 = vmatpush3.bf16.msra.mxu1 %v9368_v58 }
0x283d   : > { %8927 = vmatprep.subr.bf16.mxu1 %v9540_v1 }
0x2840   : > { %8928 = vmatpush3.bf16.msra.mxu1 %v9370_v60 }
0x2841   : > { %8939 = vmatprep.subr.bf16.mxu1 %v9540_v1 }
0x290e   : > { %v4172_v43 = vpop.f32.mrb[104].mxu1 }
0x290f   : > { %v4173_v44 = vadd.f32 %v7915_v42, %v4172_v43  ;;  %v8907_v45 = vpop.f32.mrb[105].mxu1 }
0x2910   : > { %v4175_v47 = vpop.f32.mrb[106].mxu1 }
0x2911   : > { %v8908_v49 = vpop.f32.mrb[107].mxu1  ;;  %v4178_v50 = vadd.f32 %v4173_v44, %v4022_v32 }
0x2912   : > { %v7978_v49 = vld [vmem:[%s11094_s14 + $0x9] ss:$0 sm:$0xff] }
0x2913   : > { %v4183_v52 = vsel %vm820_vm1, %v4178_v50, 0.0 }
0x2914   : > { %4184 = vadd.xlane.f32.xlu0 %v4183_v52 }
0x29a1   : > { %v4185_v48 = vpop.xlane.xlu0 %4184 }
0x29a2   : > { %v4186_v53 = vmul.f32 0.03125, %v4185_v48 }
0x29a4   : > { %v4187_v54 = vsub.f32 %v4178_v50, %v4186_v53 }
0x29a6   : > { %v4188_v55 = vmul.f32 %v4187_v54, %v4187_v54 }
0x29a8   : > { %v4189_v56 = vsel %vm820_vm1, %v4188_v55, 0.0 }
0x29a9   : > { %4190 = vadd.xlane.f32.xlu1 %v4189_v56 }
0x2a36   : > { %v4191_v61 = vpop.xlane.xlu1 %4190 }
0x2a37   : > { %v4192_v62 = vmul.f32 0.03125, %v4191_v61 }
0x2a39   : > { %v4193_v63 = vadd.f32 1e-05, %v4192_v62 }
0x2a3b   : > { %9471 = vrsqrt.f32 %v4193_v63 }
0x2a45   : > { %v9472_v0 = vpop.eup %9471 }
0x2a46   : > { %v4195_v2 = vmul.f32 %v9472_v0, %v4187_v54 }
0x2a48   : > { %v4202_v4 = vmul.f32 %v7923_v51, %v4195_v2  ;;  %v9377_v51 = vld [vmem:[%s11134_s1 + $0x90] sm:$0xff]  }
0x2a4a   : > { %v10422_v5 = vadd.f32 %v7924_v3, %v4202_v4  ;;  %v9378_v3 = vld [vmem:[%s11134_s1 + $0x98] sm:$0xff]  }
0x2a4c   : > { %v10429_v7 = vpack.c.bf16 %v10422_v5, %v10422_v5 }
0x2a4e   : > { %8914 = vmatmul.mubr.msk.bf16.vlgmr.msra.gmra.mrb[104].mxu0 %vm820_vm1, %v10429_v7  ;;  %8930 = vmatmul.mubr.msk.bf16.vlgmr.msra.gmra.mrb[108].mxu1 %vm820_vm1, %v10429_v7 }
0x2a4f   : > { %8918 = vmatpush3.bf16.msra.mxu0 %v9371_v6  ;;  %8921 = vmatprep.mubr.msk.bf16.mxu0 %vm9541_vm0, %v9540_v1 }
0x2a50   : > { %8919 = vmatprep.subr.bf16.mxu0 %v9540_v1  ;;  %8941 = vmatprep.mubr.msk.bf16.mxu1 %vm9541_vm0, %v9540_v1 }
0x2a53   : > { %8920 = vmatpush3.bf16.msra.mxu0 %v9372_v8 }
0x2a54   : > { %8933 = vmatprep.subr.bf16.mxu0 %v9540_v1 }
0x2a56   : > { %8922 = vmatmul.mubr.msk.bf16.vlgmr.msra.gmra.mrb[108].mxu0 %vm820_vm1, %v10429_v7 }
0x2a57   : > { %8935 = vmatprep.mubr.msk.bf16.mxu0 %vm9541_vm0, %v9540_v1 }
0x2b21   : > { %v4273_v10 = vpop.f32.mrb[104].mxu0  ;;  %v4403_v11 = vpop.f32.mrb[108].mxu1 }
0x2b22   : > { %v4404_v12 = vadd.f32 %v7948_v9, %v4403_v11  ;;  %v8915_v13 = vpop.f32.mrb[105].mxu0  ;;  %v8931_v14 = vpop.f32.mrb[109].mxu1  ;;  %v4274_v32 = vadd.f32 %v7930_v30, %v4273_v10  ;;  %v7969_v10 = vld [vmem:[%s11093_s13 + $0x9] ss:$0 sm:$0xff] }
0x2b23   : > { %v4276_v15 = vpop.f32.mrb[106].mxu0  ;;  %v4406_v16 = vpop.f32.mrb[110].mxu1 }
0x2b24   : > { %v4471_v17 = vpack.c.bf16 %v4404_v12, %v4404_v12  ;;  %v8916_v18 = vpop.f32.mrb[107].mxu0  ;;  %v8932_v28 = vpop.f32.mrb[111].mxu1  ;;  %v4409_v34 = vpack.c.bf16 %v4274_v32, %v4274_v32 }
0x2b26   : > { %v4476_v20 = vsel %vm1191_vm3, %v4471_v17, 0  ;;  %v7960_v17 = vld [vmem:[%s11092_s12 + $0x9] ss:$0 sm:$0xff] }
0x2b27   : > { %8940 = vmatpush3.bf16.msra.mxu1 %v4476_v20 }
0x2b28   : > { %8953 = vmatprep.subr.bf16.mxu1 %v9540_v1 }
0x2b29   : > { %v4338_v22 = vpop.f32.mrb[108].mxu0 }
0x2b2a   : > { %v4339_v23 = vadd.f32 %v7939_v21, %v4338_v22  ;;  %v8923_v24 = vpop.f32.mrb[109].mxu0 }
0x2b2b   : > { %v4341_v25 = vpop.f32.mrb[110].mxu0 }
0x2b2c   : > { %v4410_v26 = vpack.c.bf16 %v4339_v23, %v4339_v23  ;;  %v8924_v29 = vpop.f32.mrb[111].mxu0 }
0x2b2e   : > { %v4415_v31 = vsel %vm1126_vm2, %v4410_v26, 0 }
0x2b2f   : > { %8934 = vmatpush3.bf16.xpose.msra.mxu0 %v4415_v31 }
0x2b30   : > { %8945 = vmatprep.subr.bf16.mxu0 %v9540_v1 }
0x2b36   : > { %8936 = vmatmul.mubr.msk.bf16.vlgmr.msra.gmra.mrb[112].mxu0 %vm1126_vm2, %v4409_v34 }
0x2b37   : > { %8946 = vmatpush3.bf16.msra.mxu0 %v9373_v33  ;;  %8949 = vmatprep.mubr.msk.bf16.mxu0 %vm9541_vm0, %v9540_v1 }
0x2b38   : > { %8947 = vmatprep.subr.bf16.mxu0 %v9540_v1 }
0x2b3b   : > { %8948 = vmatpush3.bf16.msra.mxu0 %v9374_v35  ;;  %v7984_v35 = vld [vmem:[%s11095_s15 + $0x24] sm:$0xf] }
0x2b3c   : > { %8961 = vmatprep.subr.bf16.mxu0 %v9540_v1 }
0x2b3e   : > { %8950 = vmatmul.mubr.msk.bf16.vlgmr.msra.gmra.mrb[116].mxu0 %vm820_vm1, %v10429_v7 }
0x2b3f   : > { %8962 = vmatpush3.bf16.msra.mxu0 %v9375_v36  ;;  %8965 = vmatprep.mubr.msk.bf16.mxu0 %vm9541_vm0, %v9540_v1  ;;  %v4832_v36 = vsel %vm1191_vm3, %v7984_v35, 0 }
0x2b40   : > { %8963 = vmatprep.subr.bf16.mxu0 %v9540_v1 }
0x2b43   : > { %8964 = vmatpush3.bf16.msra.mxu0 %v9376_v37 }
0x2b44   : > { %8975 = vmatprep.subr.bf16.mxu0 %v9540_v1 }
0x2b46   : > { %8966 = vmatmul.mubr.msk.bf16.vlgmr.msra.gmra.mrb[120].mxu0 %vm820_vm1, %v10429_v7 }
0x2b47   : > { %8977 = vmatprep.mubr.msk.bf16.mxu0 %vm9541_vm0, %v9540_v1 }
0x2c09   : > { %v4451_v38 = vpop.f32.mrb[112].mxu0 }
0x2c0a   : > { %v4457_v39 = vmul.f32 0.35355338, %v4451_v38  ;;  %v8937_v40 = vpop.f32.mrb[113].mxu0 }
0x2c0b   : > { %v4454_v41 = vpop.f32.mrb[114].mxu0 }
0x2c0c   : > { %v8938_v46 = vpop.f32.mrb[115].mxu0  ;;  %v4458_v27 = vadd.f32 %v4457_v39, %v9828_v19  ;;  %v7954_v39 = vld [vmem:[%s11095_s15 + $0x20] sm:$0xf] }
0x2c0d   : > { %v4878_v46 = vsel %vm1191_vm3, %v7954_v39, 0  ;;  %v8016_v39 = vld [vmem:[%s11095_s15 + $0x28] sm:$0xf] }
0x2c0e   : > { %v4459_v42 = vsel %vm1126_vm2, %v4458_v27, -inf }
0x2c0f   : > { %4460 = vmax.xlane.f32.xlu0 %v4459_v42 }
0x2c11   : > { %v4580_v43 = vpop.f32.mrb[116].mxu0 }
0x2c12   : > { %v8951_v44 = vpop.f32.mrb[117].mxu0  ;;  %v4581_v28 = vadd.f32 %v7960_v17, %v4580_v43  ;;  %v9380_v43 = vld [vmem:[%s11134_s1 + $0xa8] sm:$0xff]  }
0x2c13   : > { %v4583_v45 = vpop.f32.mrb[118].mxu0  ;;  %v8010_v17 = vld [vmem:[%s11094_s14 + $0xa] ss:$0 sm:$0xff] }
0x2c14   : > { %v8952_v47 = vpop.f32.mrb[119].mxu0  ;;  %v4716_v20 = vpack.c.bf16 %v4581_v28, %v4581_v28  ;;  %v9381_v45 = vld [vmem:[%s11133_s20 + $0xa0] sm:$0xff]  }
0x2c19   : > { %v4710_v50 = vpop.f32.mrb[120].mxu0 }
0x2c1a   : > { %v4711_v52 = vadd.f32 %v7978_v49, %v4710_v50  ;;  %v8967_v48 = vpop.f32.mrb[121].mxu0 }
0x2c1b   : > { %v4713_v53 = vpop.f32.mrb[122].mxu0  ;;  %v9382_v48 = vld [vmem:[%s11133_s20 + $0xa8] sm:$0xff]  }
0x2c1c   : > { %v4778_v54 = vpack.c.bf16 %v4711_v52, %v4711_v52  ;;  %v8968_v55 = vpop.f32.mrb[123].mxu0 }
0x2c1e   : > { %v4783_v56 = vsel %vm1191_vm3, %v4778_v54, 0  ;;  %v9383_v54 = vld [vmem:[%s11137_s4 + $0xa0] sm:$0xff]  }
0x2c1f   : > { %8976 = vmatpush3.bf16.msra.mxu0 %v4783_v56 }
0x2c20   : > { %8987 = vmatprep.subr.bf16.mxu0 %v9540_v1 }
0x2c9c   : > { %v4461_v57 = vpop.xlane.xlu0 %4460 }
0x2c9d   : > { %v4462_v58 = vsub.f32 %v4458_v27, %v4461_v57  ;;  %v9379_v27 = vld [vmem:[%s11134_s1 + $0xa0] sm:$0xff]  }
0x2c9f   : > { %v4463_v59 = vmul.f32 1.442695, %v4462_v58  ;;  %v9384_v58 = vld [vmem:[%s11137_s4 + $0xa8] sm:$0xff]  }
0x2ca1   : > { %9473 = vpow2.f32 %v4463_v59  ;;  %v8001_v59 = vld [vmem:[%s11093_s13 + $0xa] ss:$0 sm:$0xff] }
0x2cab   : > { %v9474_v60 = vpop.eup %9473 }
0x2cac   : > { %v4465_v61 = vsel %vm1126_vm2, %v9474_v60, 0.0 }
0x2cad   : > { %4466 = vadd.xlane.f32.xlu1 %v4465_v61 }
0x2d3a   : > { %v4467_v62 = vpop.xlane.xlu1 %4466 }
0x2d3b   : > { %9475 = vrcp.f32 %v4467_v62 }
0x2d45   : > { %v9476_v63 = vpop.eup %9475 }
0x2d46   : > { %v4469_v0 = vmul.f32 %v9476_v63, %v9474_v60 }
0x2d48   : > { %v4470_v2 = vpack.c.bf16 %v4469_v0, %v4469_v0 }
0x2d4a   : > { %8942 = vmatmul.mubr.msk.bf16.vlgmr.msra.gmra.mrb[112].mxu1 %vm1126_vm2, %v4470_v2 }
0x2d4b   : > { %8954 = vmatpush3.bf16.msra.mxu1 %v9377_v51  ;;  %8957 = vmatprep.mubr.msk.bf16.mxu1 %vm9541_vm0, %v9540_v1 }
0x2d4c   : > { %8955 = vmatprep.subr.bf16.mxu1 %v9540_v1 }
0x2d4f   : > { %8956 = vmatpush3.bf16.msra.mxu1 %v9378_v3 }
0x2d50   : > { %8969 = vmatprep.subr.bf16.mxu1 %v9540_v1 }
0x2d52   : > { %8958 = vmatmul.mubr.msk.bf16.vlgmr.msra.gmra.mrb[116].mxu1 %vm820_vm1, %v10429_v7 }
0x2d53   : > { %8971 = vmatprep.mubr.msk.bf16.mxu1 %vm9541_vm0, %v9540_v1 }
0x2e1d   : > { %v4512_v4 = vpop.f32.mrb[112].mxu1 }
0x2e1e   : > { %v8943_v6 = vpop.f32.mrb[113].mxu1  ;;  %v4518_v42 = vpack.c.bf16 %v4512_v4, %v4512_v4 }
0x2e1f   : > { %v4515_v8 = vpop.f32.mrb[114].mxu1 }
0x2e20   : > { %v8944_v9 = vpop.f32.mrb[115].mxu1 }
0x2e25   : > { %v4645_v11 = vpop.f32.mrb[116].mxu1 }
0x2e26   : > { %v4646_v12 = vadd.f32 %v7969_v10, %v4645_v11  ;;  %v8959_v13 = vpop.f32.mrb[117].mxu1  ;;  %v7992_v10 = vld [vmem:[%s11092_s12 + $0xa] ss:$0 sm:$0xff] }
0x2e27   : > { %v4648_v14 = vpop.f32.mrb[118].mxu1 }
0x2e28   : > { %v4717_v15 = vpack.c.bf16 %v4646_v12, %v4646_v12  ;;  %v8960_v16 = vpop.f32.mrb[119].mxu1 }
0x2e2a   : > { %v4722_v18 = vsel %vm1126_vm2, %v4717_v15, 0 }
0x2e2b   : > { %8970 = vmatpush3.bf16.xpose.msra.mxu1 %v4722_v18 }
0x2e2c   : > { %8981 = vmatprep.subr.bf16.mxu1 %v9540_v1 }
0x2e32   : > { %8972 = vmatmul.mubr.msk.bf16.vlgmr.msra.gmra.mrb[120].mxu1 %vm1126_vm2, %v4716_v20 }
0x2e33   : > { %8983 = vmatprep.mubr.msk.bf16.mxu1 %vm9541_vm0, %v9540_v1  ;;  %8982 = vmatpush3.bf16.msra.mxu1 %v4832_v36 }
0x2e34   : > { %8993 = vmatprep.subr.bf16.mxu1 %v9540_v1 }
0x2f05   : > { %v4758_v21 = vpop.f32.mrb[120].mxu1 }
0x2f06   : > { %v4764_v22 = vmul.f32 0.35355338, %v4758_v21  ;;  %v8973_v23 = vpop.f32.mrb[121].mxu1 }
0x2f07   : > { %v4761_v24 = vpop.f32.mrb[122].mxu1 }
0x2f08   : > { %v8974_v25 = vpop.f32.mrb[123].mxu1  ;;  %v4765_v26 = vadd.f32 %v4764_v22, %v9828_v19 }
0x2f0a   : > { %v4766_v29 = vsel %vm1126_vm2, %v4765_v26, -inf }
0x2f0b   : > { %4767 = vmax.xlane.f32.xlu0 %v4766_v29 }
0x2f98   : > { %v4768_v30 = vpop.xlane.xlu0 %4767 }
0x2f99   : > { %v4769_v31 = vsub.f32 %v4765_v26, %v4768_v30 }
0x2f9b   : > { %v4770_v32 = vmul.f32 1.442695, %v4769_v31 }
0x2f9d   : > { %9477 = vpow2.f32 %v4770_v32 }
0x2fa7   : > { %v9478_v33 = vpop.eup %9477 }
0x2fa8   : > { %v4772_v34 = vsel %vm1126_vm2, %v9478_v33, 0.0 }
0x2fa9   : > { %4773 = vadd.xlane.f32.xlu1 %v4772_v34 }
0x3036   : > { %v4774_v37 = vpop.xlane.xlu1 %4773 }
0x3037   : > { %9479 = vrcp.f32 %v4774_v37 }
0x3041   : > { %v9480_v38 = vpop.eup %9479 }
0x3042   : > { %v4776_v40 = vmul.f32 %v9480_v38, %v9478_v33 }
0x3044   : > { %v4777_v41 = vpack.c.bf16 %v4776_v40, %v4776_v40  ;;  %v5231_v40 = vsel %vm1191_vm3, %v8016_v39, 0 }
0x3046   : > { %8978 = vmatmul.mubr.msk.bf16.vlgmr.msra.gmra.mrb[124].mxu0 %vm1126_vm2, %v4777_v41 }
0x3047   : > { %8988 = vmatpush3.bf16.msra.mxu0 %v4878_v46  ;;  %8989 = vmatprep.mubr.msk.bf16.mxu0 %vm9541_vm0, %v9540_v1 }
0x3048   : > { %9001 = vmatprep.subr.bf16.mxu0 %v9540_v1 }
0x304e   : > { %8990 = vmatmul.mubr.msk.bf16.vlgmr.msra.gmra.mrb[128].mxu0 %vm1126_vm2, %v4518_v42  ;;  %v9385_v42 = vld [vmem:[%s11133_s20 + $0xb0] sm:$0xff]  }
0x304f   : > { %9002 = vmatpush3.bf16.msra.mxu0 %v9379_v27  ;;  %9005 = vmatprep.mubr.msk.bf16.mxu0 %vm9541_vm0, %v9540_v1 }
0x3050   : > { %9003 = vmatprep.subr.bf16.mxu0 %v9540_v1 }
0x3053   : > { %9004 = vmatpush3.bf16.msra.mxu0 %v9380_v43 }
0x3054   : > { %9017 = vmatprep.subr.bf16.mxu0 %v9540_v1 }
0x3056   : > { %9006 = vmatmul.mubr.msk.bf16.vlgmr.msra.gmra.mrb[132].mxu0 %vm820_vm1, %v10429_v7 }
0x3057   : > { %9019 = vmatprep.mubr.msk.bf16.mxu0 %vm9541_vm0, %v9540_v1 }
0x3119   : > { %v4819_v44 = vpop.f32.mrb[124].mxu0 }
0x311a   : > { %v4825_v47 = vpack.c.bf16 %v4819_v44, %v4819_v44  ;;  %v8979_v49 = vpop.f32.mrb[125].mxu0  ;;  %v9386_v44 = vld [vmem:[%s11133_s20 + $0xb8] sm:$0xff]  }
0x311b   : > { %v4822_v50 = vpop.f32.mrb[126].mxu0 }
0x311c   : > { %v8980_v52 = vpop.f32.mrb[127].mxu0  ;;  %8984 = vmatmul.mubr.msk.bf16.vlgmr.msra.gmra.mrb[124].mxu1 %vm1126_vm2, %v4825_v47  ;;  %v9388_v47 = vld [vmem:[%s11137_s4 + $0xb8] sm:$0xff]   ;;  %v9389_v50 = vld [vmem:[%s11134_s1 + $0xb0] sm:$0xff]  }
0x311d   : > { %8994 = vmatpush3.bf16.msra.mxu1 %v9381_v45  ;;  %8997 = vmatprep.mubr.msk.bf16.mxu1 %vm9541_vm0, %v9540_v1  ;;  %v9387_v45 = vld [vmem:[%s11137_s4 + $0xb0] sm:$0xff]  }
0x311e   : > { %8995 = vmatprep.subr.bf16.mxu1 %v9540_v1 }
0x3121   : > { %v4914_v53 = vpop.f32.mrb[128].mxu0  ;;  %8996 = vmatpush3.bf16.msra.mxu1 %v9382_v48 }
0x3122   : > { %v8991_v55 = vpop.f32.mrb[129].mxu0  ;;  %9009 = vmatprep.subr.bf16.mxu1 %v9540_v1 }
0x3123   : > { %v4917_v56 = vpop.f32.mrb[130].mxu0  ;;  %v9390_v55 = vld [vmem:[%s11134_s1 + $0xb8] sm:$0xff]  }
0x3124   : > { %v8992_v57 = vpop.f32.mrb[131].mxu0  ;;  %8998 = vmatmul.mubr.msk.bf16.vlgmr.msra.gmra.mrb[128].mxu1 %vm820_vm1, %v10429_v7 }
0x3125   : > { %9010 = vmatpush3.bf16.msra.mxu1 %v9383_v54  ;;  %9013 = vmatprep.mubr.msk.bf16.mxu1 %vm9541_vm0, %v9540_v1 }
0x3126   : > { %9011 = vmatprep.subr.bf16.mxu1 %v9540_v1 }
0x3129   : > { %v5044_v60 = vpop.f32.mrb[132].mxu0  ;;  %9012 = vmatpush3.bf16.msra.mxu1 %v9384_v58 }
0x312a   : > { %v5045_v61 = vadd.f32 %v8001_v59, %v5044_v60  ;;  %v9007_v62 = vpop.f32.mrb[133].mxu0  ;;  %9023 = vmatprep.subr.bf16.mxu1 %v9540_v1  ;;  %v8041_v60 = vld [vmem:[%s11094_s14 + $0xb] ss:$0 sm:$0xff] }
0x312b   : > { %v5047_v63 = vpop.f32.mrb[134].mxu0 }
0x312c   : > { %v5116_v0 = vpack.c.bf16 %v5045_v61, %v5045_v61  ;;  %v9008_v51 = vpop.f32.mrb[135].mxu0  ;;  %9014 = vmatmul.mubr.msk.bf16.vlgmr.msra.gmra.mrb[132].mxu1 %vm820_vm1, %v10429_v7 }
0x312d   : > { %9025 = vmatprep.mubr.msk.bf16.mxu1 %vm9541_vm0, %v9540_v1 }
0x312e   : > { %v5121_v2 = vsel %vm1126_vm2, %v5116_v0, 0 }
0x312f   : > { %9018 = vmatpush3.bf16.xpose.msra.mxu0 %v5121_v2 }
0x3130   : > { %9029 = vmatprep.subr.bf16.mxu0 %v9540_v1 }
0x31ef   : > { %v4868_v3 = vpop.f32.mrb[124].mxu1 }
0x31f0   : > { %v10585_v4 = vadd.f32 %v4914_v53, %v4868_v3  ;;  %v8985_v6 = vpop.f32.mrb[125].mxu1 }
0x31f1   : > { %v4871_v8 = vpop.f32.mrb[126].mxu1 }
0x31f2   : > { %v8986_v9 = vpop.f32.mrb[127].mxu1 }
0x31f7   : > { %v4979_v11 = vpop.f32.mrb[128].mxu1 }
0x31f8   : > { %v4980_v12 = vadd.f32 %v7992_v10, %v4979_v11  ;;  %v8999_v13 = vpop.f32.mrb[129].mxu1  ;;  %v8032_v11 = vld [vmem:[%s11093_s13 + $0xb] ss:$0 sm:$0xff] }
0x31f9   : > { %v4982_v14 = vpop.f32.mrb[130].mxu1 }
0x31fa   : > { %v5115_v15 = vpack.c.bf16 %v4980_v12, %v4980_v12  ;;  %v9000_v16 = vpop.f32.mrb[131].mxu1 }
0x31fc   : > { %9020 = vmatmul.mubr.msk.bf16.vlgmr.msra.gmra.mrb[136].mxu0 %vm1126_vm2, %v5115_v15 }
0x31fd   : > { %9031 = vmatprep.mubr.msk.bf16.mxu0 %vm9541_vm0, %v9540_v1  ;;  %9030 = vmatpush3.bf16.msra.mxu0 %v5231_v40 }
0x31fe   : > { %9043 = vmatprep.subr.bf16.mxu0 %v9540_v1 }
0x31ff   : > { %v5109_v18 = vpop.f32.mrb[132].mxu1 }
0x3200   : > { %v5110_v28 = vadd.f32 %v8010_v17, %v5109_v18  ;;  %v9015_v20 = vpop.f32.mrb[133].mxu1  ;;  %v8023_v18 = vld [vmem:[%s11092_s12 + $0xb] ss:$0 sm:$0xff] }
0x3201   : > { %v5112_v21 = vpop.f32.mrb[134].mxu1 }
0x3202   : > { %v5177_v22 = vpack.c.bf16 %v5110_v28, %v5110_v28  ;;  %v9016_v23 = vpop.f32.mrb[135].mxu1 }
0x3204   : > { %v5182_v24 = vsel %vm1191_vm3, %v5177_v22, 0 }
0x3205   : > { %9024 = vmatpush3.bf16.msra.mxu1 %v5182_v24 }
0x3206   : > { %9035 = vmatprep.subr.bf16.mxu1 %v9540_v1 }
0x32cf   : > { %v5157_v25 = vpop.f32.mrb[136].mxu0 }
0x32d0   : > { %v5163_v26 = vmul.f32 0.35355338, %v5157_v25  ;;  %v9021_v29 = vpop.f32.mrb[137].mxu0 }
0x32d1   : > { %v5160_v30 = vpop.f32.mrb[138].mxu0 }
0x32d2   : > { %v9022_v31 = vpop.f32.mrb[139].mxu0  ;;  %v5164_v32 = vadd.f32 %v5163_v26, %v9828_v19 }
0x32d4   : > { %v5165_v33 = vsel %vm1126_vm2, %v5164_v32, -inf }
0x32d5   : > { %5166 = vmax.xlane.f32.xlu0 %v5165_v33 }
0x3362   : > { %v5167_v34 = vpop.xlane.xlu0 %5166 }
0x3363   : > { %v5168_v35 = vsub.f32 %v5164_v32, %v5167_v34 }
0x3365   : > { %v5169_v36 = vmul.f32 1.442695, %v5168_v35  ;;  %v8047_v35 = vld [vmem:[%s11095_s15 + $0x2c] sm:$0xf] }
0x3367   : > { %9481 = vpow2.f32 %v5169_v36  ;;  %v5585_v36 = vsel %vm1191_vm3, %v8047_v35, 0  ;;  %v9397_v35 = vld [vmem:[%s11133_s20 + $0xc0] sm:$0xff]  }
0x3371   : > { %v9482_v37 = vpop.eup %9481 }
0x3372   : > { %v5171_v38 = vsel %vm1126_vm2, %v9482_v37, 0.0 }
0x3373   : > { %5172 = vadd.xlane.f32.xlu1 %v5171_v38 }
0x3400   : > { %v5173_v41 = vpop.xlane.xlu1 %5172 }
0x3401   : > { %9483 = vrcp.f32 %v5173_v41 }
0x340b   : > { %v9484_v46 = vpop.eup %9483 }
0x340c   : > { %v5175_v27 = vmul.f32 %v9484_v46, %v9482_v37 }
0x340e   : > { %v5176_v43 = vpack.c.bf16 %v5175_v27, %v5175_v27 }
0x3410   : > { %9026 = vmatmul.mubr.msk.bf16.vlgmr.msra.gmra.mrb[136].mxu1 %vm1126_vm2, %v5176_v43 }
0x3411   : > { %9036 = vmatpush3.bf16.msra.mxu1 %v9385_v42  ;;  %9039 = vmatprep.mubr.msk.bf16.mxu1 %vm9541_vm0, %v9540_v1 }
0x3412   : > { %9037 = vmatprep.subr.bf16.mxu1 %v9540_v1 }
0x3415   : > { %9038 = vmatpush3.bf16.msra.mxu1 %v9386_v44 }
0x3416   : > { %9051 = vmatprep.subr.bf16.mxu1 %v9540_v1 }
0x3418   : > { %9040 = vmatmul.mubr.msk.bf16.vlgmr.msra.gmra.mrb[140].mxu1 %vm820_vm1, %v10429_v7 }
0x3419   : > { %9052 = vmatpush3.bf16.msra.mxu1 %v9387_v45  ;;  %9055 = vmatprep.mubr.msk.bf16.mxu1 %vm9541_vm0, %v9540_v1  ;;  %v8050_v45 = vld [vmem:[%s11096_s16 + $0x2] ss:$0 sm:$0xff] }
0x341a   : > { %9053 = vmatprep.subr.bf16.mxu1 %v9540_v1 }
0x341d   : > { %9054 = vmatpush3.bf16.msra.mxu1 %v9388_v47 }
0x341e   : > { %9065 = vmatprep.subr.bf16.mxu1 %v9540_v1 }
0x3420   : > { %9056 = vmatmul.mubr.msk.bf16.vlgmr.msra.gmra.mrb[144].mxu1 %vm820_vm1, %v10429_v7 }
0x3421   : > { %9067 = vmatprep.mubr.msk.bf16.mxu1 %vm9541_vm0, %v9540_v1 }
0x34e3   : > { %v5218_v49 = vpop.f32.mrb[136].mxu1 }
0x34e4   : > { %v5224_v52 = vpack.c.bf16 %v5218_v49, %v5218_v49  ;;  %v9027_v48 = vpop.f32.mrb[137].mxu1 }
0x34e5   : > { %v5221_v53 = vpop.f32.mrb[138].mxu1 }
0x34e6   : > { %v9028_v54 = vpop.f32.mrb[139].mxu1  ;;  %9032 = vmatmul.mubr.msk.bf16.vlgmr.msra.gmra.mrb[140].mxu0 %vm1126_vm2, %v5224_v52 }
0x34e7   : > { %9044 = vmatpush3.bf16.msra.mxu0 %v9389_v50  ;;  %9047 = vmatprep.mubr.msk.bf16.mxu0 %vm9541_vm0, %v9540_v1 }
0x34e8   : > { %9045 = vmatprep.subr.bf16.mxu0 %v9540_v1 }
0x34eb   : > { %v5333_v56 = vpop.f32.mrb[140].mxu1  ;;  %9046 = vmatpush3.bf16.msra.mxu0 %v9390_v55 }
0x34ec   : > { %v9041_v57 = vpop.f32.mrb[141].mxu1  ;;  %9059 = vmatprep.subr.bf16.mxu0 %v9540_v1 }
0x34ed   : > { %v5336_v58 = vpop.f32.mrb[142].mxu1 }
0x34ee   : > { %v9042_v59 = vpop.f32.mrb[143].mxu1  ;;  %9048 = vmatmul.mubr.msk.bf16.vlgmr.msra.gmra.mrb[144].mxu0 %vm820_vm1, %v10429_v7 }
0x34ef   : > { %9061 = vmatprep.mubr.msk.bf16.mxu0 %vm9541_vm0, %v9540_v1 }
0x34f3   : > { %v5463_v61 = vpop.f32.mrb[144].mxu1 }
0x34f4   : > { %v5464_v62 = vadd.f32 %v8041_v60, %v5463_v61  ;;  %v9057_v63 = vpop.f32.mrb[145].mxu1  ;;  %v9391_v60 = vld [vmem:[%s11099_s19 + $0x20] sm:$0xff]  }
0x34f5   : > { %v5466_v0 = vpop.f32.mrb[146].mxu1  ;;  %v9393_v61 = vld [vmem:[%s11101_s21 + $0x40] sm:$0xff]  }
0x34f6   : > { %v5531_v51 = vpack.c.bf16 %v5464_v62, %v5464_v62  ;;  %v9058_v2 = vpop.f32.mrb[147].mxu1  ;;  %v9394_v62 = vld [vmem:[%s11101_s21 + $0x48] sm:$0xff]  }
0x34f8   : > { %v5536_v3 = vsel %vm1191_vm3, %v5531_v51, 0 }
0x34f9   : > { %9066 = vmatpush3.bf16.msra.mxu1 %v5536_v3  ;;  %v8053_v3 = vld [vmem:[%s11097_s17 + $0x2] ss:$0 sm:$0xff] }
0x34fa   : > { %9077 = vmatprep.subr.bf16.mxu1 %v9540_v1 }
0x35b9   : > { %v5267_v6 = vpop.f32.mrb[140].mxu0 }
0x35ba   : > { %v5273_v7 = vadd.f32 %v5267_v6, %v10585_v4  ;;  %v9033_v8 = vpop.f32.mrb[141].mxu0  ;;  %v5334_v4 = vadd.f32 %v8023_v18, %v5333_v56 }
0x35bb   : > { %v5270_v9 = vpop.f32.mrb[142].mxu0 }
0x35bc   : > { %v9034_v10 = vpop.f32.mrb[143].mxu0  ;;  %v5469_v20 = vpack.c.bf16 %v5334_v4, %v5334_v4 }
0x35c1   : > { %v5398_v12 = vpop.f32.mrb[144].mxu0 }
0x35c2   : > { %v5399_v13 = vadd.f32 %v8032_v11, %v5398_v12  ;;  %v9049_v14 = vpop.f32.mrb[145].mxu0  ;;  %v9395_v11 = vld [vmem:[%s11101_s21 + $0x50] sm:$0xff]   ;;  %v9396_v12 = vld [vmem:[%s11101_s21 + $0x58] sm:$0xff]  }
0x35c3   : > { %v5401_v15 = vpop.f32.mrb[146].mxu0 }
0x35c4   : > { %v5470_v16 = vpack.c.bf16 %v5399_v13, %v5399_v13  ;;  %v9050_v17 = vpop.f32.mrb[147].mxu0  ;;  %v8060_v13 = vld [vmem:[%s11138_s9 + $0x2] ss:$0 sm:$0xff] }
0x35c6   : > { %v5475_v28 = vsel %vm1126_vm2, %v5470_v16, 0 }
0x35c7   : > { %9060 = vmatpush3.bf16.xpose.msra.mxu0 %v5475_v28 }
0x35c8   : > { %9071 = vmatprep.subr.bf16.mxu0 %v9540_v1 }
0x35ce   : > { %9062 = vmatmul.mubr.msk.bf16.vlgmr.msra.gmra.mrb[148].mxu0 %vm1126_vm2, %v5469_v20  ;;  %v8073_v20 = vld [vmem:[%s11102_s22 + $0x2] ss:$0 sm:$0xff] }
0x35cf   : > { %9073 = vmatprep.mubr.msk.bf16.mxu0 %vm9541_vm0, %v9540_v1  ;;  %9072 = vmatpush3.bf16.msra.mxu0 %v5585_v36  ;;  %v9398_v36 = vld [vmem:[%s11137_s4 + $0xc0] sm:$0xff]  }
0x35d0   : > { %9085 = vmatprep.subr.bf16.mxu0 %v9540_v1 }
0x36a1   : > { %v5511_v21 = vpop.f32.mrb[148].mxu0 }
0x36a2   : > { %v5517_v22 = vmul.f32 0.35355338, %v5511_v21  ;;  %v9063_v23 = vpop.f32.mrb[149].mxu0 }
0x36a3   : > { %v5514_v24 = vpop.f32.mrb[150].mxu0 }
0x36a4   : > { %v9064_v25 = vpop.f32.mrb[151].mxu0  ;;  %v5518_v26 = vadd.f32 %v5517_v22, %v9828_v19 }
0x36a6   : > { %v5519_v29 = vsel %vm1126_vm2, %v5518_v26, -inf }
0x36a7   : > { %5520 = vmax.xlane.f32.xlu0 %v5519_v29 }
0x3734   : > { %v5521_v30 = vpop.xlane.xlu0 %5520 }
0x3735   : > { %v5522_v31 = vsub.f32 %v5518_v26, %v5521_v30 }
0x3737   : > { %v5523_v32 = vmul.f32 1.442695, %v5522_v31 }
0x3739   : > { %9485 = vpow2.f32 %v5523_v32 }
0x3743   : > { %v9486_v33 = vpop.eup %9485 }
0x3744   : > { %v5525_v34 = vsel %vm1126_vm2, %v9486_v33, 0.0 }
0x3745   : > { %5526 = vadd.xlane.f32.xlu1 %v5525_v34 }
0x37d2   : > { %v5527_v37 = vpop.xlane.xlu1 %5526 }
0x37d3   : > { %9487 = vrcp.f32 %v5527_v37  ;;  %v9399_v37 = vld [vmem:[%s11133_s20 + $0xc8] sm:$0xff]  }
0x37dd   : > { %v9488_v38 = vpop.eup %9487 }
0x37de   : > { %v5529_v39 = vmul.f32 %v9488_v38, %v9486_v33  ;;  %v9400_v38 = vld [vmem:[%s11137_s4 + $0xc8] sm:$0xff]  }
0x37e0   : > { %v5530_v40 = vpack.c.bf16 %v5529_v39, %v5529_v39 }
0x37e2   : > { %9068 = vmatmul.mubr.msk.bf16.vlgmr.msra.gmra.mrb[148].mxu1 %vm1126_vm2, %v5530_v40 }
0x37e3   : > { %9081 = vmatprep.mubr.msk.bf16.mxu1 %vm9541_vm0, %v9540_v1  ;;  %9078 = vmatpush3.bf16.msra.mxu1 %v9391_v60 }
0x37e4   : > { %9079 = vmatprep.subr.bf16.mxu1 %v9540_v1 }
0x38b5   : > { %v5572_v41 = vpop.f32.mrb[148].mxu1 }
0x38b6   : > { %v5578_v46 = vpack.c.bf16 %v5572_v41, %v5572_v41  ;;  %v9069_v27 = vpop.f32.mrb[149].mxu1 }
0x38b7   : > { %v5575_v42 = vpop.f32.mrb[150].mxu1  ;;  %v8081_v27 = vld [vmem:[%s11103_s23 + $0x2] ss:$0 sm:$0xff] }
0x38b8   : > { %v9070_v43 = vpop.f32.mrb[151].mxu1  ;;  %9074 = vmatmul.mubr.msk.bf16.vlgmr.msra.gmra.mrb[152].mxu0 %vm1126_vm2, %v5578_v46 }
0x38b9   : > { %9093 = vmatprep.mubr.msk.bf16.mxu0 %vm9541_vm0, %v9540_v1  ;;  %9086 = vmatpush3.bf16.msra.mxu0 %v9393_v61  ;;  %v8082_v43 = vld [vmem:[%s11104_s24 + $0x2] ss:$0 sm:$0xff] }
0x38ba   : > { %9087 = vmatprep.subr.bf16.mxu0 %v9540_v1 }
0x38bd   : > { %9088 = vmatpush3.bf16.msra.mxu0 %v9394_v62  ;;  %v8097_v62 = vld [vmem:[%s11093_s13 + $0xc] ss:$0 sm:$0xff] }
0x38be   : > { %9089 = vmatprep.subr.bf16.mxu0 %v9540_v1 }
0x38c1   : > { %9090 = vmatpush3.bf16.msra.mxu0 %v9395_v11 }
0x38c2   : > { %9091 = vmatprep.subr.bf16.mxu0 %v9540_v1 }
0x38c5   : > { %9092 = vmatpush3.bf16.msra.mxu0 %v9396_v12  ;;  %v9404_v12 = vld [vmem:[%s11133_s20 + $0xd8] sm:$0xff]  }
0x38c6   : > { %9113 = vmatprep.subr.bf16.mxu0 %v9540_v1 }
0x398b   : > { %v5621_v44 = vpop.f32.mrb[152].mxu0 }
0x398c   : > { %v5627_v47 = vadd.f32 %v5621_v44, %v5273_v7  ;;  %v9075_v49 = vpop.f32.mrb[153].mxu0  ;;  %v8054_v7 = vld [vmem:[%s11098_s18 + $0x2] ss:$0 sm:$0xff] }
0x398d   : > { %v5624_v50 = vpop.f32.mrb[154].mxu0 }
0x398e   : > { %v5636_v52 = vadd.f32 %v8050_v45, %v5627_v47  ;;  %v9076_v48 = vpop.f32.mrb[155].mxu0  ;;  %v9401_v47 = vld [vmem:[%s11134_s1 + $0xc0] sm:$0xff]   ;;  %v9402_v50 = vld [vmem:[%s11134_s1 + $0xc8] sm:$0xff]  }
0x3990   : > { %v5637_v53 = vadd.f32 %v5636_v52, %v10422_v5  ;;  %v9392_v5 = vld [vmem:[%s11099_s19 + $0x28] sm:$0xff]  }
0x3991   : > { %9080 = vmatpush3.bf16.msra.mxu1 %v9392_v5  ;;  %v8106_v52 = vld [vmem:[%s11094_s14 + $0xc] ss:$0 sm:$0xff] }
0x3992   : > { %v5642_v54 = vsel %vm820_vm1, %v5637_v53, 0.0  ;;  %9097 = vmatprep.subr.bf16.mxu1 %v9540_v1 }
0x3993   : > { %5643 = vadd.xlane.f32.xlu0 %v5642_v54 }
0x3a20   : > { %v5644_v55 = vpop.xlane.xlu0 %5643 }
0x3a21   : > { %v5645_v56 = vmul.f32 0.03125, %v5644_v55 }
0x3a23   : > { %v5646_v57 = vsub.f32 %v5637_v53, %v5645_v56 }
0x3a25   : > { %v5647_v58 = vmul.f32 %v5646_v57, %v5646_v57 }
0x3a27   : > { %v5648_v59 = vsel %vm820_vm1, %v5647_v58, 0.0 }
0x3a28   : > { %5649 = vadd.xlane.f32.xlu1 %v5648_v59 }
0x3ab5   : > { %v5650_v63 = vpop.xlane.xlu1 %5649 }
0x3ab6   : > { %v5651_v0 = vmul.f32 0.03125, %v5650_v63 }
0x3ab8   : > { %v5652_v51 = vadd.f32 1e-05, %v5651_v0 }
0x3aba   : > { %9489 = vrsqrt.f32 %v5652_v51 }
0x3ac4   : > { %v9490_v2 = vpop.eup %9489 }
0x3ac5   : > { %v5654_v6 = vmul.f32 %v9490_v2, %v5646_v57 }
0x3ac7   : > { %v5661_v8 = vmul.f32 %v8053_v3, %v5654_v6 }
0x3ac9   : > { %v5668_v9 = vadd.f32 %v8054_v7, %v5661_v8  ;;  %v8088_v7 = vld [vmem:[%s11092_s12 + $0xc] ss:$0 sm:$0xff] }
0x3acb   : > { %v5669_v10 = vpack.c.bf16 %v5668_v9, %v5668_v9 }
0x3acd   : > { %9082 = vmatmul.mubr.msk.bf16.vlgmr.msra.gmra.mrb[152].mxu1 %vm820_vm1, %v5669_v10  ;;  %v9403_v10 = vld [vmem:[%s11133_s20 + $0xd0] sm:$0xff]  }
0x3ace   : > { %9101 = vmatprep.mubr.msk.bf16.mxu1 %vm9541_vm0, %v9540_v1  ;;  %9098 = vmatpush3.bf16.msra.mxu1 %v9397_v35 }
0x3acf   : > { %9099 = vmatprep.subr.bf16.mxu1 %v9540_v1 }
0x3ad2   : > { %9100 = vmatpush3.bf16.msra.mxu1 %v9399_v37 }
0x3ad3   : > { %9105 = vmatprep.subr.bf16.mxu1 %v9540_v1 }
0x3ba0   : > { %v5732_v14 = vpop.f32.mrb[152].mxu1 }
0x3ba1   : > { %v5733_v15 = vadd.f32 %v8060_v13, %v5732_v14  ;;  %v9083_v16 = vpop.f32.mrb[153].mxu1  ;;  %v9405_v13 = vld [vmem:[%s11137_s4 + $0xd0] sm:$0xff]   ;;  %v9406_v14 = vld [vmem:[%s11137_s4 + $0xd8] sm:$0xff]  }
0x3ba2   : > { %v5735_v17 = vpop.f32.mrb[154].mxu1 }
0x3ba3   : > { %v5738_v18 = vmax.f32 %v5733_v15, 0.0  ;;  %v9084_v28 = vpop.f32.mrb[155].mxu1 }
0x3ba5   : > { %v5739_v4 = vpack.c.bf16 %v5738_v18, %v5738_v18 }
0x3ba7   : > { %9094 = vmatmul.mubr.msk.bf16.vlgmr.msra.gmra.mrb[156].mxu0 %vm2490_vm5, %v5739_v4 }
0x3ba8   : > { %9117 = vmatprep.mubr.msk.bf16.mxu0 %vm9541_vm0, %v9540_v1  ;;  %9114 = vmatpush3.bf16.msra.mxu0 %v9398_v36 }
0x3ba9   : > { %9115 = vmatprep.subr.bf16.mxu0 %v9540_v1 }
0x3bac   : > { %9116 = vmatpush3.bf16.msra.mxu0 %v9400_v38 }
0x3bad   : > { %9127 = vmatprep.subr.bf16.mxu0 %v9540_v1 }
0x3c7a   : > { %v5818_v21 = vpop.f32.mrb[156].mxu0 }
0x3c7b   : > { %v5819_v22 = vadd.f32 %v8073_v20, %v5818_v21  ;;  %v9095_v23 = vpop.f32.mrb[157].mxu0 }
0x3c7c   : > { %v5821_v24 = vpop.f32.mrb[158].mxu0 }
0x3c7d   : > { %v9096_v25 = vpop.f32.mrb[159].mxu0  ;;  %v5824_v26 = vadd.f32 %v5819_v22, %v5668_v9 }
0x3c7e   : > { %v8136_v25 = vld [vmem:[%s11094_s14 + $0xd] ss:$0 sm:$0xff] }
0x3c7f   : > { %v5829_v29 = vsel %vm820_vm1, %v5824_v26, 0.0 }
0x3c80   : > { %5830 = vadd.xlane.f32.xlu0 %v5829_v29 }
0x3d0d   : > { %v5831_v30 = vpop.xlane.xlu0 %5830 }
0x3d0e   : > { %v5832_v31 = vmul.f32 0.03125, %v5831_v30 }
0x3d10   : > { %v5833_v32 = vsub.f32 %v5824_v26, %v5832_v31 }
0x3d12   : > { %v5834_v33 = vmul.f32 %v5833_v32, %v5833_v32 }
0x3d14   : > { %v5835_v34 = vsel %vm820_vm1, %v5834_v33, 0.0 }
0x3d15   : > { %5836 = vadd.xlane.f32.xlu1 %v5835_v34 }
0x3da2   : > { %v5837_v39 = vpop.xlane.xlu1 %5836 }
0x3da3   : > { %v5838_v40 = vmul.f32 0.03125, %v5837_v39 }
0x3da5   : > { %v5839_v41 = vadd.f32 1e-05, %v5838_v40 }
0x3da7   : > { %9491 = vrsqrt.f32 %v5839_v41 }
0x3db1   : > { %v9492_v46 = vpop.eup %9491 }
0x3db2   : > { %v5841_v42 = vmul.f32 %v9492_v46, %v5833_v32 }
0x3db4   : > { %v5848_v44 = vmul.f32 %v8081_v27, %v5841_v42  ;;  %v9407_v27 = vld [vmem:[%s11134_s1 + $0xd0] sm:$0xff]  }
0x3db6   : > { %v10751_v45 = vadd.f32 %v8082_v43, %v5848_v44  ;;  %v9408_v43 = vld [vmem:[%s11134_s1 + $0xd8] sm:$0xff]  }
0x3db8   : > { %v10758_v49 = vpack.c.bf16 %v10751_v45, %v10751_v45 }
0x3dba   : > { %9102 = vmatmul.mubr.msk.bf16.vlgmr.msra.gmra.mrb[156].mxu1 %vm820_vm1, %v10758_v49  ;;  %9118 = vmatmul.mubr.msk.bf16.vlgmr.msra.gmra.mrb[160].mxu0 %vm820_vm1, %v10758_v49 }
0x3dbb   : > { %9106 = vmatpush3.bf16.msra.mxu1 %v9401_v47  ;;  %9109 = vmatprep.mubr.msk.bf16.mxu1 %vm9541_vm0, %v9540_v1 }
0x3dbc   : > { %9107 = vmatprep.subr.bf16.mxu1 %v9540_v1  ;;  %9129 = vmatprep.mubr.msk.bf16.mxu0 %vm9541_vm0, %v9540_v1 }
0x3dbf   : > { %9108 = vmatpush3.bf16.msra.mxu1 %v9402_v50 }
0x3dc0   : > { %9121 = vmatprep.subr.bf16.mxu1 %v9540_v1 }
0x3dc2   : > { %9110 = vmatmul.mubr.msk.bf16.vlgmr.msra.gmra.mrb[160].mxu1 %vm820_vm1, %v10758_v49 }
0x3dc3   : > { %9123 = vmatprep.mubr.msk.bf16.mxu1 %vm9541_vm0, %v9540_v1 }
0x3e8d   : > { %v5919_v48 = vpop.f32.mrb[156].mxu1  ;;  %v6049_v53 = vpop.f32.mrb[160].mxu0 }
0x3e8e   : > { %v6050_v54 = vadd.f32 %v8106_v52, %v6049_v53  ;;  %v9103_v55 = vpop.f32.mrb[157].mxu1  ;;  %v9119_v56 = vpop.f32.mrb[161].mxu0  ;;  %v5920_v9 = vadd.f32 %v8088_v7, %v5919_v48  ;;  %v8127_v48 = vld [vmem:[%s11093_s13 + $0xd] ss:$0 sm:$0xff] }
0x3e8f   : > { %v5922_v57 = vpop.f32.mrb[158].mxu1  ;;  %v6052_v58 = vpop.f32.mrb[162].mxu0 }
0x3e90   : > { %v6117_v59 = vpack.c.bf16 %v6050_v54, %v6050_v54  ;;  %v9104_v60 = vpop.f32.mrb[159].mxu1  ;;  %v9120_v5 = vpop.f32.mrb[163].mxu0  ;;  %v6055_v11 = vpack.c.bf16 %v5920_v9, %v5920_v9 }
0x3e92   : > { %v6122_v61 = vsel %vm1191_vm3, %v6117_v59, 0  ;;  %v8118_v59 = vld [vmem:[%s11092_s12 + $0xd] ss:$0 sm:$0xff] }
0x3e93   : > { %9128 = vmatpush3.bf16.msra.mxu0 %v6122_v61 }
0x3e94   : > { %9141 = vmatprep.subr.bf16.mxu0 %v9540_v1 }
0x3e95   : > { %v5984_v63 = vpop.f32.mrb[160].mxu1 }
0x3e96   : > { %v5985_v0 = vadd.f32 %v8097_v62, %v5984_v63  ;;  %v9111_v51 = vpop.f32.mrb[161].mxu1 }
0x3e97   : > { %v5987_v2 = vpop.f32.mrb[162].mxu1 }
0x3e98   : > { %v6056_v3 = vpack.c.bf16 %v5985_v0, %v5985_v0  ;;  %v9112_v6 = vpop.f32.mrb[163].mxu1 }
0x3e9a   : > { %v6061_v8 = vsel %vm1126_vm2, %v6056_v3, 0 }
0x3e9b   : > { %9122 = vmatpush3.bf16.xpose.msra.mxu1 %v6061_v8 }
0x3e9c   : > { %9133 = vmatprep.subr.bf16.mxu1 %v9540_v1 }
0x3ea2   : > { %9124 = vmatmul.mubr.msk.bf16.vlgmr.msra.gmra.mrb[164].mxu1 %vm1126_vm2, %v6055_v11 }
0x3ea3   : > { %9134 = vmatpush3.bf16.msra.mxu1 %v9403_v10  ;;  %9137 = vmatprep.mubr.msk.bf16.mxu1 %vm9541_vm0, %v9540_v1 }
0x3ea4   : > { %9135 = vmatprep.subr.bf16.mxu1 %v9540_v1 }
0x3ea7   : > { %9136 = vmatpush3.bf16.msra.mxu1 %v9404_v12  ;;  %v8142_v12 = vld [vmem:[%s11095_s15 + $0x34] sm:$0xf] }
0x3ea8   : > { %9149 = vmatprep.subr.bf16.mxu1 %v9540_v1 }
0x3eaa   : > { %9138 = vmatmul.mubr.msk.bf16.vlgmr.msra.gmra.mrb[168].mxu1 %vm820_vm1, %v10758_v49 }
0x3eab   : > { %9150 = vmatpush3.bf16.msra.mxu1 %v9405_v13  ;;  %9153 = vmatprep.mubr.msk.bf16.mxu1 %vm9541_vm0, %v9540_v1  ;;  %v6478_v13 = vsel %vm1191_vm3, %v8142_v12, 0 }
0x3eac   : > { %9151 = vmatprep.subr.bf16.mxu1 %v9540_v1 }
0x3eaf   : > { %9152 = vmatpush3.bf16.msra.mxu1 %v9406_v14 }
0x3eb0   : > { %9163 = vmatprep.subr.bf16.mxu1 %v9540_v1 }
0x3eb2   : > { %9154 = vmatmul.mubr.msk.bf16.vlgmr.msra.gmra.mrb[172].mxu1 %vm820_vm1, %v10758_v49 }
0x3eb3   : > { %9165 = vmatprep.mubr.msk.bf16.mxu1 %vm9541_vm0, %v9540_v1 }
0x3f75   : > { %v6097_v15 = vpop.f32.mrb[164].mxu1 }
0x3f76   : > { %v6103_v16 = vmul.f32 0.35355338, %v6097_v15  ;;  %v9125_v17 = vpop.f32.mrb[165].mxu1 }
0x3f77   : > { %v6100_v18 = vpop.f32.mrb[166].mxu1 }
0x3f78   : > { %v9126_v28 = vpop.f32.mrb[167].mxu1  ;;  %v6104_v4 = vadd.f32 %v6103_v16, %v9828_v19  ;;  %v8112_v16 = vld [vmem:[%s11095_s15 + $0x30] sm:$0xf] }
0x3f79   : > { %v6524_v28 = vsel %vm1191_vm3, %v8112_v16, 0  ;;  %v8174_v16 = vld [vmem:[%s11095_s15 + $0x38] sm:$0xf] }
0x3f7a   : > { %v6105_v20 = vsel %vm1126_vm2, %v6104_v4, -inf }
0x3f7b   : > { %6106 = vmax.xlane.f32.xlu0 %v6105_v20 }
0x3f7d   : > { %v6226_v21 = vpop.f32.mrb[168].mxu1 }
0x3f7e   : > { %v9139_v22 = vpop.f32.mrb[169].mxu1  ;;  %v6227_v5 = vadd.f32 %v8118_v59, %v6226_v21  ;;  %v9410_v21 = vld [vmem:[%s11134_s1 + $0xe8] sm:$0xff]  }
0x3f7f   : > { %v6229_v23 = vpop.f32.mrb[170].mxu1  ;;  %v8168_v59 = vld [vmem:[%s11094_s14 + $0xe] ss:$0 sm:$0xff] }
0x3f80   : > { %v9140_v24 = vpop.f32.mrb[171].mxu1  ;;  %v6362_v61 = vpack.c.bf16 %v6227_v5, %v6227_v5  ;;  %v9411_v23 = vld [vmem:[%s11133_s20 + $0xe0] sm:$0xff]  }
0x3f85   : > { %v6356_v26 = vpop.f32.mrb[172].mxu1 }
0x3f86   : > { %v6357_v29 = vadd.f32 %v8136_v25, %v6356_v26  ;;  %v9155_v30 = vpop.f32.mrb[173].mxu1 }
0x3f87   : > { %v6359_v31 = vpop.f32.mrb[174].mxu1  ;;  %v9412_v30 = vld [vmem:[%s11133_s20 + $0xe8] sm:$0xff]  }
0x3f88   : > { %v6424_v32 = vpack.c.bf16 %v6357_v29, %v6357_v29  ;;  %v9156_v33 = vpop.f32.mrb[175].mxu1 }
0x3f8a   : > { %v6429_v34 = vsel %vm1191_vm3, %v6424_v32, 0  ;;  %v9413_v32 = vld [vmem:[%s11137_s4 + $0xe0] sm:$0xff]  }
0x3f8b   : > { %9164 = vmatpush3.bf16.msra.mxu1 %v6429_v34 }
0x3f8c   : > { %9175 = vmatprep.subr.bf16.mxu1 %v9540_v1 }
0x4008   : > { %v6107_v35 = vpop.xlane.xlu0 %6106 }
0x4009   : > { %v6108_v36 = vsub.f32 %v6104_v4, %v6107_v35  ;;  %v9409_v4 = vld [vmem:[%s11134_s1 + $0xe0] sm:$0xff]  }
0x400b   : > { %v6109_v37 = vmul.f32 1.442695, %v6108_v36  ;;  %v9414_v36 = vld [vmem:[%s11137_s4 + $0xe8] sm:$0xff]  }
0x400d   : > { %9493 = vpow2.f32 %v6109_v37  ;;  %v8159_v37 = vld [vmem:[%s11093_s13 + $0xe] ss:$0 sm:$0xff] }
0x4017   : > { %v9494_v38 = vpop.eup %9493 }
0x4018   : > { %v6111_v39 = vsel %vm1126_vm2, %v9494_v38, 0.0 }
0x4019   : > { %6112 = vadd.xlane.f32.xlu1 %v6111_v39 }
0x40a6   : > { %v6113_v40 = vpop.xlane.xlu1 %6112 }
0x40a7   : > { %9495 = vrcp.f32 %v6113_v40 }
0x40b1   : > { %v9496_v41 = vpop.eup %9495 }
0x40b2   : > { %v6115_v46 = vmul.f32 %v9496_v41, %v9494_v38 }
0x40b4   : > { %v6116_v42 = vpack.c.bf16 %v6115_v46, %v6115_v46 }
0x40b6   : > { %9130 = vmatmul.mubr.msk.bf16.vlgmr.msra.gmra.mrb[164].mxu0 %vm1126_vm2, %v6116_v42 }
0x40b7   : > { %9142 = vmatpush3.bf16.msra.mxu0 %v9407_v27  ;;  %9145 = vmatprep.mubr.msk.bf16.mxu0 %vm9541_vm0, %v9540_v1 }
0x40b8   : > { %9143 = vmatprep.subr.bf16.mxu0 %v9540_v1 }
0x40bb   : > { %9144 = vmatpush3.bf16.msra.mxu0 %v9408_v43 }
0x40bc   : > { %9157 = vmatprep.subr.bf16.mxu0 %v9540_v1 }
0x40be   : > { %9146 = vmatmul.mubr.msk.bf16.vlgmr.msra.gmra.mrb[168].mxu0 %vm820_vm1, %v10758_v49 }
0x40bf   : > { %9159 = vmatprep.mubr.msk.bf16.mxu0 %vm9541_vm0, %v9540_v1 }
0x4189   : > { %v6158_v44 = vpop.f32.mrb[164].mxu0 }
0x418a   : > { %v9131_v47 = vpop.f32.mrb[165].mxu0  ;;  %v6164_v20 = vpack.c.bf16 %v6158_v44, %v6158_v44 }
0x418b   : > { %v6161_v50 = vpop.f32.mrb[166].mxu0 }
0x418c   : > { %v9132_v52 = vpop.f32.mrb[167].mxu0 }
0x4191   : > { %v6291_v53 = vpop.f32.mrb[168].mxu0 }
0x4192   : > { %v6292_v54 = vadd.f32 %v8127_v48, %v6291_v53  ;;  %v9147_v55 = vpop.f32.mrb[169].mxu0  ;;  %v8150_v48 = vld [vmem:[%s11092_s12 + $0xe] ss:$0 sm:$0xff] }
0x4193   : > { %v6294_v56 = vpop.f32.mrb[170].mxu0 }
0x4194   : > { %v6363_v57 = vpack.c.bf16 %v6292_v54, %v6292_v54  ;;  %v9148_v58 = vpop.f32.mrb[171].mxu0 }
0x4196   : > { %v6368_v60 = vsel %vm1126_vm2, %v6363_v57, 0 }
0x4197   : > { %9158 = vmatpush3.bf16.xpose.msra.mxu0 %v6368_v60 }
0x4198   : > { %9169 = vmatprep.subr.bf16.mxu0 %v9540_v1 }
0x419e   : > { %9160 = vmatmul.mubr.msk.bf16.vlgmr.msra.gmra.mrb[172].mxu0 %vm1126_vm2, %v6362_v61 }
0x419f   : > { %9171 = vmatprep.mubr.msk.bf16.mxu0 %vm9541_vm0, %v9540_v1  ;;  %9170 = vmatpush3.bf16.msra.mxu0 %v6478_v13 }
0x41a0   : > { %9181 = vmatprep.subr.bf16.mxu0 %v9540_v1 }
0x4271   : > { %v6404_v62 = vpop.f32.mrb[172].mxu0 }
0x4272   : > { %v6410_v63 = vmul.f32 0.35355338, %v6404_v62  ;;  %v9161_v0 = vpop.f32.mrb[173].mxu0 }
0x4273   : > { %v6407_v51 = vpop.f32.mrb[174].mxu0 }
0x4274   : > { %v9162_v2 = vpop.f32.mrb[175].mxu0  ;;  %v6411_v3 = vadd.f32 %v6410_v63, %v9828_v19 }
0x4276   : > { %v6412_v6 = vsel %vm1126_vm2, %v6411_v3, -inf }
0x4277   : > { %6413 = vmax.xlane.f32.xlu0 %v6412_v6 }
0x4304   : > { %v6414_v7 = vpop.xlane.xlu0 %6413 }
0x4305   : > { %v6415_v8 = vsub.f32 %v6411_v3, %v6414_v7 }
0x4307   : > { %v6416_v9 = vmul.f32 1.442695, %v6415_v8 }
0x4309   : > { %9497 = vpow2.f32 %v6416_v9 }
0x4313   : > { %v9498_v10 = vpop.eup %9497 }
0x4314   : > { %v6418_v11 = vsel %vm1126_vm2, %v9498_v10, 0.0 }
0x4315   : > { %6419 = vadd.xlane.f32.xlu1 %v6418_v11 }
0x43a2   : > { %v6420_v14 = vpop.xlane.xlu1 %6419 }
0x43a3   : > { %9499 = vrcp.f32 %v6420_v14 }
0x43ad   : > { %v9500_v15 = vpop.eup %9499 }
0x43ae   : > { %v6422_v17 = vmul.f32 %v9500_v15, %v9498_v10 }
0x43b0   : > { %v6423_v18 = vpack.c.bf16 %v6422_v17, %v6422_v17  ;;  %v6877_v17 = vsel %vm1191_vm3, %v8174_v16, 0 }
0x43b2   : > { %9166 = vmatmul.mubr.msk.bf16.vlgmr.msra.gmra.mrb[176].mxu1 %vm1126_vm2, %v6423_v18 }
0x43b3   : > { %9176 = vmatpush3.bf16.msra.mxu1 %v6524_v28  ;;  %9177 = vmatprep.mubr.msk.bf16.mxu1 %vm9541_vm0, %v9540_v1 }
0x43b4   : > { %9189 = vmatprep.subr.bf16.mxu1 %v9540_v1 }
0x43ba   : > { %9178 = vmatmul.mubr.msk.bf16.vlgmr.msra.gmra.mrb[180].mxu1 %vm1126_vm2, %v6164_v20  ;;  %v9415_v20 = vld [vmem:[%s11133_s20 + $0xf0] sm:$0xff]  }
0x43bb   : > { %9190 = vmatpush3.bf16.msra.mxu1 %v9409_v4  ;;  %9193 = vmatprep.mubr.msk.bf16.mxu1 %vm9541_vm0, %v9540_v1 }
0x43bc   : > { %9191 = vmatprep.subr.bf16.mxu1 %v9540_v1 }
0x43bf   : > { %9192 = vmatpush3.bf16.msra.mxu1 %v9410_v21 }
0x43c0   : > { %9205 = vmatprep.subr.bf16.mxu1 %v9540_v1 }
0x43c2   : > { %9194 = vmatmul.mubr.msk.bf16.vlgmr.msra.gmra.mrb[184].mxu1 %vm820_vm1, %v10758_v49 }
0x43c3   : > { %9207 = vmatprep.mubr.msk.bf16.mxu1 %vm9541_vm0, %v9540_v1 }
0x4485   : > { %v6465_v22 = vpop.f32.mrb[176].mxu1 }
0x4486   : > { %v6471_v24 = vpack.c.bf16 %v6465_v22, %v6465_v22  ;;  %v9167_v25 = vpop.f32.mrb[177].mxu1  ;;  %v9416_v22 = vld [vmem:[%s11133_s20 + $0xf8] sm:$0xff]  }
0x4487   : > { %v6468_v26 = vpop.f32.mrb[178].mxu1 }
0x4488   : > { %v9168_v29 = vpop.f32.mrb[179].mxu1  ;;  %9172 = vmatmul.mubr.msk.bf16.vlgmr.msra.gmra.mrb[176].mxu0 %vm1126_vm2, %v6471_v24  ;;  %v9418_v24 = vld [vmem:[%s11137_s4 + $0xf8] sm:$0xff]   ;;  %v9419_v26 = vld [vmem:[%s11134_s1 + $0xf0] sm:$0xff]  }
0x4489   : > { %9182 = vmatpush3.bf16.msra.mxu0 %v9411_v23  ;;  %9185 = vmatprep.mubr.msk.bf16.mxu0 %vm9541_vm0, %v9540_v1  ;;  %v9417_v23 = vld [vmem:[%s11137_s4 + $0xf0] sm:$0xff]  }
0x448a   : > { %9183 = vmatprep.subr.bf16.mxu0 %v9540_v1 }
0x448d   : > { %v6560_v31 = vpop.f32.mrb[180].mxu1  ;;  %9184 = vmatpush3.bf16.msra.mxu0 %v9412_v30 }
0x448e   : > { %v9179_v33 = vpop.f32.mrb[181].mxu1  ;;  %9197 = vmatprep.subr.bf16.mxu0 %v9540_v1 }
0x448f   : > { %v6563_v34 = vpop.f32.mrb[182].mxu1  ;;  %v9420_v33 = vld [vmem:[%s11134_s1 + $0xf8] sm:$0xff]  }
0x4490   : > { %v9180_v35 = vpop.f32.mrb[183].mxu1  ;;  %9186 = vmatmul.mubr.msk.bf16.vlgmr.msra.gmra.mrb[180].mxu0 %vm820_vm1, %v10758_v49 }
0x4491   : > { %9198 = vmatpush3.bf16.msra.mxu0 %v9413_v32  ;;  %9201 = vmatprep.mubr.msk.bf16.mxu0 %vm9541_vm0, %v9540_v1 }
0x4492   : > { %9199 = vmatprep.subr.bf16.mxu0 %v9540_v1 }
0x4495   : > { %v6690_v38 = vpop.f32.mrb[184].mxu1  ;;  %9200 = vmatpush3.bf16.msra.mxu0 %v9414_v36 }
0x4496   : > { %v6691_v39 = vadd.f32 %v8159_v37, %v6690_v38  ;;  %v9195_v40 = vpop.f32.mrb[185].mxu1  ;;  %9211 = vmatprep.subr.bf16.mxu0 %v9540_v1  ;;  %v8199_v38 = vld [vmem:[%s11094_s14 + $0xf] ss:$0 sm:$0xff] }
0x4497   : > { %v6693_v41 = vpop.f32.mrb[186].mxu1 }
0x4498   : > { %v6762_v46 = vpack.c.bf16 %v6691_v39, %v6691_v39  ;;  %v9196_v27 = vpop.f32.mrb[187].mxu1  ;;  %9202 = vmatmul.mubr.msk.bf16.vlgmr.msra.gmra.mrb[184].mxu0 %vm820_vm1, %v10758_v49 }
0x4499   : > { %9213 = vmatprep.mubr.msk.bf16.mxu0 %vm9541_vm0, %v9540_v1 }
0x449a   : > { %v6767_v42 = vsel %vm1126_vm2, %v6762_v46, 0 }
0x449b   : > { %9206 = vmatpush3.bf16.xpose.msra.mxu1 %v6767_v42 }
0x449c   : > { %9217 = vmatprep.subr.bf16.mxu1 %v9540_v1 }
0x455b   : > { %v6514_v43 = vpop.f32.mrb[176].mxu0 }
0x455c   : > { %v10914_v44 = vadd.f32 %v6560_v31, %v6514_v43  ;;  %v9173_v47 = vpop.f32.mrb[177].mxu0 }
0x455d   : > { %v6517_v50 = vpop.f32.mrb[178].mxu0 }
0x455e   : > { %v9174_v52 = vpop.f32.mrb[179].mxu0 }
0x4563   : > { %v6625_v53 = vpop.f32.mrb[180].mxu0 }
0x4564   : > { %v6626_v54 = vadd.f32 %v8150_v48, %v6625_v53  ;;  %v9187_v55 = vpop.f32.mrb[181].mxu0  ;;  %v8190_v53 = vld [vmem:[%s11093_s13 + $0xf] ss:$0 sm:$0xff] }
0x4565   : > { %v6628_v56 = vpop.f32.mrb[182].mxu0 }
0x4566   : > { %v6761_v57 = vpack.c.bf16 %v6626_v54, %v6626_v54  ;;  %v9188_v58 = vpop.f32.mrb[183].mxu0 }
0x4568   : > { %9208 = vmatmul.mubr.msk.bf16.vlgmr.msra.gmra.mrb[188].mxu1 %vm1126_vm2, %v6761_v57 }
0x4569   : > { %9219 = vmatprep.mubr.msk.bf16.mxu1 %vm9541_vm0, %v9540_v1  ;;  %9218 = vmatpush3.bf16.msra.mxu1 %v6877_v17 }
0x456a   : > { %9231 = vmatprep.subr.bf16.mxu1 %v9540_v1 }
0x456b   : > { %v6755_v60 = vpop.f32.mrb[184].mxu0 }
0x456c   : > { %v6756_v5 = vadd.f32 %v8168_v59, %v6755_v60  ;;  %v9203_v61 = vpop.f32.mrb[185].mxu0  ;;  %v8181_v60 = vld [vmem:[%s11092_s12 + $0xf] ss:$0 sm:$0xff] }
0x456d   : > { %v6758_v62 = vpop.f32.mrb[186].mxu0 }
0x456e   : > { %v6823_v63 = vpack.c.bf16 %v6756_v5, %v6756_v5  ;;  %v9204_v0 = vpop.f32.mrb[187].mxu0 }
0x4570   : > { %v6828_v51 = vsel %vm1191_vm3, %v6823_v63, 0 }
0x4571   : > { %9212 = vmatpush3.bf16.msra.mxu0 %v6828_v51 }
0x4572   : > { %9223 = vmatprep.subr.bf16.mxu0 %v9540_v1 }
0x463b   : > { %v6803_v2 = vpop.f32.mrb[188].mxu1 }
0x463c   : > { %v6809_v3 = vmul.f32 0.35355338, %v6803_v2  ;;  %v9209_v6 = vpop.f32.mrb[189].mxu1 }
0x463d   : > { %v6806_v7 = vpop.f32.mrb[190].mxu1 }
0x463e   : > { %v9210_v8 = vpop.f32.mrb[191].mxu1  ;;  %v6810_v9 = vadd.f32 %v6809_v3, %v9828_v19 }
0x4640   : > { %v6811_v10 = vsel %vm1126_vm2, %v6810_v9, -inf }
0x4641   : > { %6812 = vmax.xlane.f32.xlu0 %v6811_v10 }
0x46ce   : > { %v6813_v11 = vpop.xlane.xlu0 %6812 }
0x46cf   : > { %v6814_v12 = vsub.f32 %v6810_v9, %v6813_v11 }
0x46d1   : > { %v6815_v13 = vmul.f32 1.442695, %v6814_v12  ;;  %v8205_v12 = vld [vmem:[%s11095_s15 + $0x3c] sm:$0xf] }
0x46d3   : > { %9501 = vpow2.f32 %v6815_v13  ;;  %v7231_v13 = vsel %vm1191_vm3, %v8205_v12, 0  ;;  %v9428_v12 = vld [vmem:[%s11105_s25 + $0x8] sm:$0xff]  }
0x46dd   : > { %v9502_v14 = vpop.eup %9501 }
0x46de   : > { %v6817_v15 = vsel %vm1126_vm2, %v9502_v14, 0.0 }
0x46df   : > { %6818 = vadd.xlane.f32.xlu1 %v6817_v15 }
0x476c   : > { %v6819_v18 = vpop.xlane.xlu1 %6818 }
0x476d   : > { %9503 = vrcp.f32 %v6819_v18 }
0x4777   : > { %v9504_v28 = vpop.eup %9503 }
0x4778   : > { %v6821_v4 = vmul.f32 %v9504_v28, %v9502_v14 }
0x477a   : > { %v6822_v21 = vpack.c.bf16 %v6821_v4, %v6821_v4 }
0x477c   : > { %9214 = vmatmul.mubr.msk.bf16.vlgmr.msra.gmra.mrb[188].mxu0 %vm1126_vm2, %v6822_v21 }
0x477d   : > { %9224 = vmatpush3.bf16.msra.mxu0 %v9415_v20  ;;  %9227 = vmatprep.mubr.msk.bf16.mxu0 %vm9541_vm0, %v9540_v1 }
0x477e   : > { %9225 = vmatprep.subr.bf16.mxu0 %v9540_v1 }
0x4781   : > { %9226 = vmatpush3.bf16.msra.mxu0 %v9416_v22  ;;  %v8208_v22 = vld [vmem:[%s11096_s16 + $0x3] ss:$0 sm:$0xff] }
0x4782   : > { %9239 = vmatprep.subr.bf16.mxu0 %v9540_v1 }
0x4784   : > { %9228 = vmatmul.mubr.msk.bf16.vlgmr.msra.gmra.mrb[192].mxu0 %vm820_vm1, %v10758_v49 }
0x4785   : > { %9240 = vmatpush3.bf16.msra.mxu0 %v9417_v23  ;;  %9243 = vmatprep.mubr.msk.bf16.mxu0 %vm9541_vm0, %v9540_v1 }
0x4786   : > { %9241 = vmatprep.subr.bf16.mxu0 %v9540_v1 }
0x4789   : > { %9242 = vmatpush3.bf16.msra.mxu0 %v9418_v24 }
0x478a   : > { %9253 = vmatprep.subr.bf16.mxu0 %v9540_v1 }
0x478c   : > { %9244 = vmatmul.mubr.msk.bf16.vlgmr.msra.gmra.mrb[196].mxu0 %vm820_vm1, %v10758_v49 }
0x478d   : > { %9255 = vmatprep.mubr.msk.bf16.mxu0 %vm9541_vm0, %v9540_v1 }
0x484f   : > { %v6864_v25 = vpop.f32.mrb[188].mxu0 }
0x4850   : > { %v6870_v29 = vpack.c.bf16 %v6864_v25, %v6864_v25  ;;  %v9215_v30 = vpop.f32.mrb[189].mxu0 }
0x4851   : > { %v6867_v31 = vpop.f32.mrb[190].mxu0 }
0x4852   : > { %v9216_v32 = vpop.f32.mrb[191].mxu0  ;;  %9220 = vmatmul.mubr.msk.bf16.vlgmr.msra.gmra.mrb[192].mxu1 %vm1126_vm2, %v6870_v29 }
0x4853   : > { %9232 = vmatpush3.bf16.msra.mxu1 %v9419_v26  ;;  %9235 = vmatprep.mubr.msk.bf16.mxu1 %vm9541_vm0, %v9540_v1 }
0x4854   : > { %9233 = vmatprep.subr.bf16.mxu1 %v9540_v1 }
0x4857   : > { %v6979_v34 = vpop.f32.mrb[192].mxu0  ;;  %9234 = vmatpush3.bf16.msra.mxu1 %v9420_v33 }
0x4858   : > { %v9229_v35 = vpop.f32.mrb[193].mxu0  ;;  %9247 = vmatprep.subr.bf16.mxu1 %v9540_v1 }
0x4859   : > { %v6982_v36 = vpop.f32.mrb[194].mxu0 }
0x485a   : > { %v9230_v37 = vpop.f32.mrb[195].mxu0  ;;  %9236 = vmatmul.mubr.msk.bf16.vlgmr.msra.gmra.mrb[196].mxu1 %vm820_vm1, %v10758_v49 }
0x485b   : > { %9249 = vmatprep.mubr.msk.bf16.mxu1 %vm9541_vm0, %v9540_v1  ;;  %v9421_v37 = vld [vmem:[%s11099_s19 + $0x30] sm:$0xff]  }
0x485f   : > { %v7109_v39 = vpop.f32.mrb[196].mxu0 }
0x4860   : > { %v7110_v40 = vadd.f32 %v8199_v38, %v7109_v39  ;;  %v9245_v41 = vpop.f32.mrb[197].mxu0  ;;  %v9423_v38 = vld [vmem:[%s11101_s21 + $0x60] sm:$0xff]   ;;  %v9424_v39 = vld [vmem:[%s11101_s21 + $0x68] sm:$0xff]  }
0x4861   : > { %v7112_v46 = vpop.f32.mrb[198].mxu0 }
0x4862   : > { %v7177_v27 = vpack.c.bf16 %v7110_v40, %v7110_v40  ;;  %v9246_v42 = vpop.f32.mrb[199].mxu0 }
0x4863   : > { %v8211_v42 = vld [vmem:[%s11097_s17 + $0x3] ss:$0 sm:$0xff] }
0x4864   : > { %v7182_v43 = vsel %vm1191_vm3, %v7177_v27, 0 }
0x4865   : > { %9254 = vmatpush3.bf16.msra.mxu0 %v7182_v43 }
0x4866   : > { %9265 = vmatprep.subr.bf16.mxu0 %v9540_v1 }
0x4925   : > { %v6913_v47 = vpop.f32.mrb[192].mxu1 }
0x4926   : > { %v6919_v49 = vadd.f32 %v6913_v47, %v10914_v44  ;;  %v9221_v50 = vpop.f32.mrb[193].mxu1  ;;  %v6980_v44 = vadd.f32 %v8181_v60, %v6979_v34  ;;  %v8212_v47 = vld [vmem:[%s11098_s18 + $0x3] ss:$0 sm:$0xff] }
0x4927   : > { %v6916_v52 = vpop.f32.mrb[194].mxu1 }
0x4928   : > { %v9222_v48 = vpop.f32.mrb[195].mxu1  ;;  %v7115_v61 = vpack.c.bf16 %v6980_v44, %v6980_v44  ;;  %v8231_v44 = vld [vmem:[%s11102_s22 + $0x3] ss:$0 sm:$0xff] }
0x4929   : > { %v9425_v48 = vld [vmem:[%s11101_s21 + $0x70] sm:$0xff]  }
0x492d   : > { %v7044_v54 = vpop.f32.mrb[196].mxu1 }
0x492e   : > { %v7045_v55 = vadd.f32 %v8190_v53, %v7044_v54  ;;  %v9237_v56 = vpop.f32.mrb[197].mxu1  ;;  %v9426_v53 = vld [vmem:[%s11101_s21 + $0x78] sm:$0xff]   ;;  %v8218_v54 = vld [vmem:[%s11138_s9 + $0x3] ss:$0 sm:$0xff] }
0x492f   : > { %v7047_v57 = vpop.f32.mrb[198].mxu1 }
0x4930   : > { %v7116_v58 = vpack.c.bf16 %v7045_v55, %v7045_v55  ;;  %v9238_v59 = vpop.f32.mrb[199].mxu1 }
0x4932   : > { %v7121_v5 = vsel %vm1126_vm2, %v7116_v58, 0 }
0x4933   : > { %9248 = vmatpush3.bf16.xpose.msra.mxu1 %v7121_v5 }
0x4934   : > { %9259 = vmatprep.subr.bf16.mxu1 %v9540_v1 }
0x493a   : > { %9250 = vmatmul.mubr.msk.bf16.vlgmr.msra.gmra.mrb[200].mxu1 %vm1126_vm2, %v7115_v61 }
0x493b   : > { %9261 = vmatprep.mubr.msk.bf16.mxu1 %vm9541_vm0, %v9540_v1  ;;  %9260 = vmatpush3.bf16.msra.mxu1 %v7231_v13 }
0x493c   : > { %9273 = vmatprep.subr.bf16.mxu1 %v9540_v1 }
0x4a0d   : > { %v7157_v62 = vpop.f32.mrb[200].mxu1 }
0x4a0e   : > { %v7163_v63 = vmul.f32 0.35355338, %v7157_v62  ;;  %v9251_v0 = vpop.f32.mrb[201].mxu1 }
0x4a0f   : > { %v7160_v51 = vpop.f32.mrb[202].mxu1 }
0x4a10   : > { %v9252_v2 = vpop.f32.mrb[203].mxu1  ;;  %v7164_v3 = vadd.f32 %v7163_v63, %v9828_v19 }
0x4a12   : > { %v7165_v6 = vsel %vm1126_vm2, %v7164_v3, -inf }
0x4a13   : > { %7166 = vmax.xlane.f32.xlu0 %v7165_v6 }
0x4aa0   : > { %v7167_v7 = vpop.xlane.xlu0 %7166 }
0x4aa1   : > { %v7168_v8 = vsub.f32 %v7164_v3, %v7167_v7 }
0x4aa3   : > { %v7169_v9 = vmul.f32 1.442695, %v7168_v8 }
0x4aa5   : > { %9505 = vpow2.f32 %v7169_v9 }
0x4aaf   : > { %v9506_v10 = vpop.eup %9505 }
0x4ab0   : > { %v7171_v11 = vsel %vm1126_vm2, %v9506_v10, 0.0 }
0x4ab1   : > { %7172 = vadd.xlane.f32.xlu1 %v7171_v11  ;;  %v9427_v11 = vld [vmem:[%s11105_s25] sm:$0xff]  }
0x4b3e   : > { %v7173_v19 = vpop.xlane.xlu1 %7172 }
0x4b3f   : > { %9507 = vrcp.f32 %v7173_v19 }
0x4b49   : > { %v9508_v14 = vpop.eup %9507 }
0x4b4a   : > { %v7175_v15 = vmul.f32 %v9508_v14, %v9506_v10 }
0x4b4c   : > { %v7176_v16 = vpack.c.bf16 %v7175_v15, %v7175_v15 }
0x4b4e   : > { %9256 = vmatmul.mubr.msk.bf16.vlgmr.msra.gmra.mrb[200].mxu0 %vm1126_vm2, %v7176_v16  ;;  %v8239_v16 = vld [vmem:[%s11103_s23 + $0x3] ss:$0 sm:$0xff] }
0x4b4f   : > { %9269 = vmatprep.mubr.msk.bf16.mxu0 %vm9541_vm0, %v9540_v1  ;;  %9266 = vmatpush3.bf16.msra.mxu0 %v9421_v37 }
0x4b50   : > { %9267 = vmatprep.subr.bf16.mxu0 %v9540_v1 }
0x4c21   : > { %v7218_v17 = vpop.f32.mrb[200].mxu0 }
0x4c22   : > { %v7224_v18 = vpack.c.bf16 %v7218_v17, %v7218_v17  ;;  %v9257_v28 = vpop.f32.mrb[201].mxu0 }
0x4c23   : > { %v7221_v4 = vpop.f32.mrb[202].mxu0 }
0x4c24   : > { %v9258_v20 = vpop.f32.mrb[203].mxu0  ;;  %9262 = vmatmul.mubr.msk.bf16.vlgmr.msra.gmra.mrb[204].mxu1 %vm1126_vm2, %v7224_v18  ;;  %v8240_v18 = vld [vmem:[%s11104_s24 + $0x3] ss:$0 sm:$0xff] }
0x4c25   : > { %9281 = vmatprep.mubr.msk.bf16.mxu1 %vm9541_vm0, %v9540_v1  ;;  %9274 = vmatpush3.bf16.msra.mxu1 %v9423_v38  ;;  %v8241_v20 = vld [vmem:[%s11106_s26] ss:$0 sm:$0xff] }
0x4c26   : > { %9275 = vmatprep.subr.bf16.mxu1 %v9540_v1 }
0x4c29   : > { %9276 = vmatpush3.bf16.msra.mxu1 %v9424_v39 }
0x4c2a   : > { %9277 = vmatprep.subr.bf16.mxu1 %v9540_v1 }
0x4c2d   : > { %9278 = vmatpush3.bf16.msra.mxu1 %v9425_v48 }
0x4c2e   : > { %9279 = vmatprep.subr.bf16.mxu1 %v9540_v1 }
0x4c31   : > { %9280 = vmatpush3.bf16.msra.mxu1 %v9426_v53 }
0x4cf7   : > { %v7267_v21 = vpop.f32.mrb[204].mxu1 }
0x4cf8   : > { %v7273_v23 = vadd.f32 %v7267_v21, %v6919_v49  ;;  %v9263_v24 = vpop.f32.mrb[205].mxu1 }
0x4cf9   : > { %v7270_v25 = vpop.f32.mrb[206].mxu1 }
0x4cfa   : > { %v7282_v26 = vadd.f32 %v8208_v22, %v7273_v23  ;;  %v9264_v29 = vpop.f32.mrb[207].mxu1 }
0x4cfc   : > { %v7283_v30 = vadd.f32 %v7282_v26, %v10751_v45  ;;  %v9422_v45 = vld [vmem:[%s11099_s19 + $0x38] sm:$0xff]  }
0x4cfd   : > { %9268 = vmatpush3.bf16.msra.mxu0 %v9422_v45 }
0x4cfe   : > { %v7288_v31 = vsel %vm820_vm1, %v7283_v30, 0.0  ;;  %9285 = vmatprep.subr.bf16.mxu0 %v9540_v1 }
0x4cff   : > { %7289 = vadd.xlane.f32.xlu0 %v7288_v31 }
0x4d8c   : > { %v7290_v32 = vpop.xlane.xlu0 %7289 }
0x4d8d   : > { %v7291_v33 = vmul.f32 0.03125, %v7290_v32 }
0x4d8f   : > { %v7292_v34 = vsub.f32 %v7283_v30, %v7291_v33 }
0x4d91   : > { %v7293_v35 = vmul.f32 %v7292_v34, %v7292_v34 }
0x4d93   : > { %v7294_v36 = vsel %vm820_vm1, %v7293_v35, 0.0 }
0x4d94   : > { %7295 = vadd.xlane.f32.xlu1 %v7294_v36 }
0x4e21   : > { %v7296_v40 = vpop.xlane.xlu1 %7295 }
0x4e22   : > { %v7297_v41 = vmul.f32 0.03125, %v7296_v40 }
0x4e24   : > { %v7298_v46 = vadd.f32 1e-05, %v7297_v41 }
0x4e26   : > { %9509 = vrsqrt.f32 %v7298_v46 }
0x4e30   : > { %v9510_v27 = vpop.eup %9509 }
0x4e31   : > { %v7300_v43 = vmul.f32 %v9510_v27, %v7292_v34 }
0x4e33   : > { %v7307_v49 = vmul.f32 %v8211_v42, %v7300_v43 }
0x4e35   : > { %v7314_v50 = vadd.f32 %v8212_v47, %v7307_v49 }
0x4e37   : > { %v7315_v52 = vpack.c.bf16 %v7314_v50, %v7314_v50 }
0x4e39   : > { %9270 = vmatmul.mubr.msk.bf16.vlgmr.msra.gmra.mrb[204].mxu0 %vm820_vm1, %v7315_v52 }
0x4e3a   : > { %9289 = vmatprep.mubr.msk.bf16.mxu0 %vm9541_vm0, %v9540_v1  ;;  %9286 = vmatpush3.bf16.msra.mxu0 %v9427_v11 }
0x4e3b   : > { %9287 = vmatprep.subr.bf16.mxu0 %v9540_v1 }
0x4e3e   : > { %9288 = vmatpush3.bf16.msra.mxu0 %v9428_v12 }
0x4f0c   : > { %v7378_v55 = vpop.f32.mrb[204].mxu0 }
0x4f0d   : > { %v7379_v56 = vadd.f32 %v8218_v54, %v7378_v55  ;;  %v9271_v57 = vpop.f32.mrb[205].mxu0 }
0x4f0e   : > { %v7381_v58 = vpop.f32.mrb[206].mxu0 }
0x4f0f   : > { %v7384_v59 = vmax.f32 %v7379_v56, 0.0  ;;  %v9272_v60 = vpop.f32.mrb[207].mxu0 }
0x4f11   : > { %v7385_v5 = vpack.c.bf16 %v7384_v59, %v7384_v59 }
0x4f13   : > { %9282 = vmatmul.mubr.msk.bf16.vlgmr.msra.gmra.mrb[208].mxu1 %vm2490_vm5, %v7385_v5 }
0x4fe6   : > { %v7464_v61 = vpop.f32.mrb[208].mxu1 }
0x4fe7   : > { %v7465_v62 = vadd.f32 %v8231_v44, %v7464_v61  ;;  %v9283_v63 = vpop.f32.mrb[209].mxu1 }
0x4fe8   : > { %v7467_v0 = vpop.f32.mrb[210].mxu1 }
0x4fe9   : > { %v9284_v51 = vpop.f32.mrb[211].mxu1  ;;  %v7470_v2 = vadd.f32 %v7465_v62, %v7314_v50 }
0x4feb   : > { %v7475_v3 = vsel %vm820_vm1, %v7470_v2, 0.0 }
0x4fec   : > { %7476 = vadd.xlane.f32.xlu0 %v7475_v3 }
0x5079   : > { %v7477_v6 = vpop.xlane.xlu0 %7476 }
0x507a   : > { %v7478_v7 = vmul.f32 0.03125, %v7477_v6 }
0x507c   : > { %v7479_v8 = vsub.f32 %v7470_v2, %v7478_v7 }
0x507e   : > { %v7480_v9 = vmul.f32 %v7479_v8, %v7479_v8 }
0x5080   : > { %v7481_v10 = vsel %vm820_vm1, %v7480_v9, 0.0 }
0x5081   : > { %7482 = vadd.xlane.f32.xlu1 %v7481_v10 }
0x510e   : > { %v7483_v13 = vpop.xlane.xlu1 %7482 }
0x510f   : > { %v7484_v19 = vmul.f32 0.03125, %v7483_v13 }
0x5111   : > { %v7485_v14 = vadd.f32 1e-05, %v7484_v19 }
0x5113   : > { %9511 = vrsqrt.f32 %v7485_v14 }
0x511d   : > { %v9512_v15 = vpop.eup %9511 }
0x511e   : > { %v7487_v17 = vmul.f32 %v9512_v15, %v7479_v8 }
0x5120   : > { %v7494_v1 = vmul.f32 %v8239_v16, %v7487_v17 }
0x5122   : > { %v7501_v28 = vadd.f32 %v8240_v18, %v7494_v1 }
0x5124   : > { %v7502_v4 = vpack.c.bf16 %v7501_v28, %v7501_v28 }
0x5126   : > { %9290 = vmatmul.mubr.msk.bf16.vlgmr.msra.gmra.mrb[208].mxu0 %vm820_vm1, %v7502_v4 }
0x51f9   : > { %v7563_v21 = vpop.f32.mrb[208].mxu0 }
0x51fa   : > { %v7564_v22 = vadd.f32 %v8241_v20, %v7563_v21  ;;  %v9291_v23 = vpop.f32.mrb[209].mxu0 }
0x51fb   : > { %v7566_v24 = vpop.f32.mrb[210].mxu0 }
0x51fc   : > { %v7569_v25 = vsub.f32 0.0, %v7564_v22  ;;  %v9292_v26 = vpop.f32.mrb[211].mxu0 }
0x51fe   : > { %v7570_v29 = vmul.f32 1.442695, %v7569_v25 }
0x5200   : > { %9513 = vpow2.f32 %v7570_v29 }
0x520a   : > { %v9514_v30 = vpop.eup %9513 }
0x520b   : > { %v7572_v31 = vadd.f32 1.0, %v9514_v30 }
0x520d   : > { %9515 = vrcp.f32 %v7572_v31 }
0x5217   : > { %v9516_v32 = vpop.eup %9515 }
0x5218   : > { %7575 = vst [vmem:[%s793_s7] sm:$0xff] %v9516_v32 }
0x5219 PF: > { %s43_s5 = sadd.s32 1, %s9537_s5  }
0x521a   : > { %p40_p9 = scmp.ge.s32.totalorder %s43_s5, 4  }
0x521c   :  { %42 = sbr.rel (!%p40_p9) target bundleno = 31 (0x1f), region = 286 }

</bundles_post_ra>
